<compile_context>
chip_gen: v7x
topology: tpu7x:2x2x1
jax: 0.10.0
libtpu: 0.0.40
codegen_flags: <defaults>
</compile_context>

<pallas_src>
import jax
import jax.numpy as jnp
from jax import lax
from jax.experimental import pallas as pl
from jax.experimental.pallas import tpu as pltpu

_EPS = 1e-5


def _layernorm(x, gamma, beta):
    x = x.astype(jnp.float32)
    mean = jnp.mean(x, axis=-1, keepdims=True)
    var = jnp.mean(jnp.square(x - mean), axis=-1, keepdims=True)
    return (x - mean) * lax.rsqrt(var + _EPS) * gamma + beta


# ----------------------- Kernel A: pair -> attention map ---------------------
def _attn_map_kernel(row_ref, col_ref, ln_g_ref, ln_b_ref, wT_ref, bp_ref, attn_ref):
    # row_ref : (TILE_I, L, d_in)      pair[b, i0+t, :, :]
    # col_ref : (L, TILE_I*d_in)       pair[b, :, i0:i0+TILE_I, :]  (i_local, c) flat on lanes
    # wT_ref  : (H, d_in)              proj_pair weight, pre-transposed in the wrapper
    # bp_ref  : (H, 1)                 proj_pair bias as a column
    # attn_ref: (H, TILE_I, L)         softmax over the last (lane) axis j; written in the
    #                                  (B, H, L_i, L_j) output layout Kernel B consumes.
    tile_i, L, d_in = row_ref.shape
    g = ln_g_ref[...]
    be = ln_b_ref[...]
    wT = wT_ref[...]
    bp = bp_ref[...]
    for t in range(tile_i):                                   # static unroll over the i-tile
        row_t = row_ref[t]                                    # (L, d_in)  = pair[b, i, :, :]
        col_t = col_ref[:, pl.ds(t * d_in, d_in)]             # (L, d_in)  = pair[b, :, i, :]
        sym = 0.5 * (row_t + col_t)                           # 0.5*(pair + pair^T) for row i
        sym = _layernorm(sym, g, be)
        # logits[h, j] = sum_c wT[h, c] * sym[j, c]  -> key axis j lands on lanes.
        logits = lax.dot_general(wT, sym, (((1,), (1,)), ((), ())),
                                 preferred_element_type=jnp.float32) + bp     # (H, L)
        m = jnp.max(logits, axis=-1, keepdims=True)
        e = jnp.exp(logits - m)
        s = jnp.sum(e, axis=-1, keepdims=True)
        attn_ref[:, t, :] = (e * pl.reciprocal(s, approx=True)).astype(attn_ref.dtype)


# ------------------- Kernel B: attention + FFN over the MSA ------------------
def _msa_update_kernel(attn_ref, msa_ref,
                       ln1_g_ref, ln1_b_ref, w_msa_ref, b_msa_ref,
                       w_out_ref, b_out_ref, ln2_g_ref, ln2_b_ref,
                       w_ff1_ref, b_ff1_ref, w_ff2_ref, b_ff2_ref,
                       out_ref):
    # attn_ref: (H, L, L)   msa_ref/out_ref: (TILE_N, L, d_out)
    tile_n, L, d_out = msa_ref.shape
    H = attn_ref.shape[0]
    dk = d_out // H

    x = msa_ref[...].astype(jnp.float32).reshape(tile_n * L, d_out)   # big MXU M dim
    v = _layernorm(x, ln1_g_ref[...], ln1_b_ref[...])
    v = jnp.dot(v, w_msa_ref[...], preferred_element_type=jnp.float32) + b_msa_ref[...]
    v3 = v.reshape(tile_n, L, d_out)

    # Per-head attention, batched across the TILE_N MSA rows; the output projection
    # is applied per head and accumulated, so upd never needs a lane re-assembly.
    acc = None
    for h in range(H):                                        # static unroll, H small
        a_h = jnp.broadcast_to(attn_ref[h], (tile_n, L, L))   # (TILE_N, L, L)
        v_h = v3[:, :, h * dk:(h + 1) * dk]                   # (TILE_N, L, dk)
        u_h = jnp.einsum('nij,njk->nik', a_h, v_h,
                         preferred_element_type=jnp.float32)  # (TILE_N, L, dk)
        p_h = jnp.dot(u_h.reshape(tile_n * L, dk),
                      w_out_ref[pl.ds(h * dk, dk), :],
                      preferred_element_type=jnp.float32)     # (TILE_N*L, d_out)
        acc = p_h if acc is None else acc + p_h

    x = x + acc + b_out_ref[...]                              # residual (dropout = id)

    # pre-norm feed-forward + residual
    y = _layernorm(x, ln2_g_ref[...], ln2_b_ref[...])
    y = jnp.dot(y, w_ff1_ref[...], preferred_element_type=jnp.float32) + b_ff1_ref[...]
    y = jnp.maximum(y, 0.0)
    y = jnp.dot(y, w_ff2_ref[...], preferred_element_type=jnp.float32) + b_ff2_ref[...]
    x = x + y

    out_ref[...] = x.reshape(tile_n, L, d_out).astype(out_ref.dtype)


# --------------------------------- wrapper -----------------------------------
def pair2msa_forward(pair, msa, params, *, tile_i=8, tile_n=4):
    B, L, L2, d_in = pair.shape
    _, N, _, d_out = msa.shape
    H = params["w_pair"].shape[1]
    d_ff = params["w_ff1"].shape[1]
    assert L == L2 and L % tile_i == 0 and N % tile_n == 0 and d_out % H == 0

    # Free / tiny glue: lane-flattened view of pair for the transposed ("column")
    # reads (no HBM transpose!), pre-transposed proj_pair weight, column bias.
    pair_cols = pair.reshape(B, L, L * d_in)
    w_pair_t = jnp.transpose(params["w_pair"])                # (H, d_in)
    b_pair_c = params["b_pair"].reshape(H, 1)

    # attn is produced directly in (B, H, L_i, L_j) layout -> no XLA transpose glue.
    attn = pl.pallas_call(
        _attn_map_kernel,
        out_shape=jax.ShapeDtypeStruct((B, H, L, L), jnp.float32),
        grid_spec=pltpu.PrefetchScalarGridSpec(
            num_scalar_prefetch=0,
            grid=(B, L // tile_i),
            in_specs=[
                pl.BlockSpec((None, tile_i, L, d_in), lambda b, i: (b, i, 0, 0)),
                pl.BlockSpec((None, L, tile_i * d_in), lambda b, i: (b, 0, i)),
                pl.BlockSpec((1, d_in), lambda b, i: (0, 0)),
                pl.BlockSpec((1, d_in), lambda b, i: (0, 0)),
                pl.BlockSpec((H, d_in), lambda b, i: (0, 0)),
                pl.BlockSpec((H, 1), lambda b, i: (0, 0)),
            ],
            out_specs=pl.BlockSpec((None, H, tile_i, L), lambda b, i: (b, 0, i, 0)),
        ),
        compiler_params=pltpu.CompilerParams(
            dimension_semantics=("parallel", "parallel"),
            vmem_limit_bytes=32 * 1024 * 1024),
    )(pair, pair_cols, params["ln_pair_g"], params["ln_pair_b"], w_pair_t, b_pair_c)

    zmap = lambda b, n: (0, 0)
    out = pl.pallas_call(
        _msa_update_kernel,
        out_shape=jax.ShapeDtypeStruct((B, N, L, d_out), msa.dtype),
        grid_spec=pltpu.PrefetchScalarGridSpec(
            num_scalar_prefetch=0,
            grid=(B, N // tile_n),
            in_specs=[
                pl.BlockSpec((None, H, L, L), lambda b, n: (b, 0, 0, 0)),
                pl.BlockSpec((None, tile_n, L, d_out), lambda b, n: (b, n, 0, 0)),
                pl.BlockSpec((1, d_out), zmap),
                pl.BlockSpec((1, d_out), zmap),
                pl.BlockSpec((d_out, d_out), zmap),
                pl.BlockSpec((1, d_out), zmap),
                pl.BlockSpec((d_out, d_out), zmap),
                pl.BlockSpec((1, d_out), zmap),
                pl.BlockSpec((1, d_out), zmap),
                pl.BlockSpec((1, d_out), zmap),
                pl.BlockSpec((d_out, d_ff), zmap),
                pl.BlockSpec((1, d_ff), zmap),
                pl.BlockSpec((d_ff, d_out), zmap),
                pl.BlockSpec((1, d_out), zmap),
            ],
            out_specs=pl.BlockSpec((None, tile_n, L, d_out), lambda b, n: (b, n, 0, 0)),
        ),
        compiler_params=pltpu.CompilerParams(
            dimension_semantics=("parallel", "parallel"),
            vmem_limit_bytes=48 * 1024 * 1024),   # stays under v7x 64 MiB physical VMEM
    )(attn, msa,
      params["ln1_g"], params["ln1_b"], params["w_msa"], params["b_msa"],
      params["w_out"], params["b_out"],
      params["ln2_g"], params["ln2_b"],
      params["w_ff1"], params["b_ff1"], params["w_ff2"], params["b_ff2"])
    return out


# ------------------------------ reference (JAX) -------------------------------
def pair2msa_reference(pair, msa, p):
    src = 0.5 * (pair + jnp.swapaxes(pair, 1, 2))
    src = _layernorm(src, p["ln_pair_g"][0], p["ln_pair_b"][0])
    attn = jax.nn.softmax(src @ p["w_pair"] + p["b_pair"][0], axis=2)  # (B,L,L,H)
    B, N, L, d_out = msa.shape
    H = attn.shape[-1]
    dk = d_out // H
    v = _layernorm(msa, p["ln1_g"][0], p["ln1_b"][0]) @ p["w_msa"] + p["b_msa"][0]
    v = v.reshape(B, N, L, H, dk)
    tgt2 = jnp.einsum("bijh,bnjhk->bnihk", attn, v).reshape(B, N, L, d_out)
    tgt2 = tgt2 @ p["w_out"] + p["b_out"][0]
    x = msa + tgt2
    y = _layernorm(x, p["ln2_g"][0], p["ln2_b"][0])
    y = jnp.maximum(y @ p["w_ff1"] + p["b_ff1"][0], 0.0)
    y = y @ p["w_ff2"] + p["b_ff2"][0]
    return x + y


# ------------------------------ parameter init --------------------------------
def init_params(key, d_in, d_out, heads, d_ff):
    ks = jax.random.split(key, 5)

    def lin(k, fan_in, fan_out):
        kw, kb = jax.random.split(k)
        w = jax.random.normal(kw, (fan_in, fan_out), jnp.float32) / jnp.sqrt(fan_in)
        b = 0.01 * jax.random.normal(kb, (1, fan_out), jnp.float32)
        return w, b

    w_pair, b_pair = lin(ks[0], d_in, heads)
    w_msa, b_msa = lin(ks[1], d_out, d_out)
    w_out, b_out = lin(ks[2], d_out, d_out)
    w_ff1, b_ff1 = lin(ks[3], d_out, d_ff)
    w_ff2, b_ff2 = lin(ks[4], d_ff, d_out)
    return dict(
        ln_pair_g=jnp.ones((1, d_in), jnp.float32),
        ln_pair_b=jnp.zeros((1, d_in), jnp.float32),
        w_pair=w_pair, b_pair=b_pair,
        ln1_g=jnp.ones((1, d_out), jnp.float32),
        ln1_b=jnp.zeros((1, d_out), jnp.float32),
        w_msa=w_msa, b_msa=b_msa,
        w_out=w_out, b_out=b_out,
        ln2_g=jnp.ones((1, d_out), jnp.float32),
        ln2_b=jnp.zeros((1, d_out), jnp.float32),
        w_ff1=w_ff1, b_ff1=b_ff1,
        w_ff2=w_ff2, b_ff2=b_ff2,
    )


if __name__ == "__main__":
    # module-default feature dims (n_feat_in=128, n_feat_out=256, heads=4, r_ff=4),
    # small batch / sequence / length so the test stays tiny.
    B, N, L = 2, 8, 16
    D_IN, HEADS, D_OUT, R_FF = 128, 4, 256, 4
    assert D_OUT % HEADS == 0

    key = jax.random.PRNGKey(0)
    k_pair, k_msa, k_par = jax.random.split(key, 3)
    pair = jax.random.normal(k_pair, (B, L, L, D_IN), jnp.float32)
    msa = jax.random.normal(k_msa, (B, N, L, D_OUT), jnp.float32)
    params = init_params(k_par, D_IN, D_OUT, HEADS, D_OUT * R_FF)

    out = jax.block_until_ready(jax.jit(pair2msa_forward)(pair, msa, params))
    ref = pair2msa_reference(pair, msa, params)

    assert out.shape == (B, N, L, D_OUT) and out.dtype == jnp.float32
    err = float(jnp.max(jnp.abs(out - ref)))
    # tolerance covers MXU f32 matmul precision + approx-reciprocal softmax norm
    if err > 5e-3:
        raise SystemExit(f"kernel/reference mismatch, max abs err = {err}")
    print("KERNEL_OK")
</pallas_src>

<mosaic_0001>
module attributes {stable_mosaic.version = 11 : i64} {
  func.func @_msa_update_kernel(%arg0: i32, %arg1: i32, %arg2: memref<1x4x16x16xf32, #tpu.memory_space<vmem>>, %arg3: memref<1x4x16x256xf32, #tpu.memory_space<vmem>>, %arg4: memref<1x256xf32, #tpu.memory_space<vmem>>, %arg5: memref<1x256xf32, #tpu.memory_space<vmem>>, %arg6: memref<256x256xf32, #tpu.memory_space<vmem>>, %arg7: memref<1x256xf32, #tpu.memory_space<vmem>>, %arg8: memref<256x256xf32, #tpu.memory_space<vmem>>, %arg9: memref<1x256xf32, #tpu.memory_space<vmem>>, %arg10: memref<1x256xf32, #tpu.memory_space<vmem>>, %arg11: memref<1x256xf32, #tpu.memory_space<vmem>>, %arg12: memref<256x1024xf32, #tpu.memory_space<vmem>>, %arg13: memref<1x1024xf32, #tpu.memory_space<vmem>>, %arg14: memref<1024x256xf32, #tpu.memory_space<vmem>>, %arg15: memref<1x256xf32, #tpu.memory_space<vmem>>, %arg16: memref<1x4x16x256xf32, #tpu.memory_space<vmem>>) attributes {dimension_semantics = [#tpu.dimension_semantics<parallel>, #tpu.dimension_semantics<parallel>], iteration_bounds = array<i64: 2, 2>, scalar_prefetch = 0 : i64, scratch_operands = 0 : i64, tpu.core_type = #tpu.core_type<tc>, window_params = [{transform_indices = @transform_0, window_bounds = array<i64: 1, 4, 16, 16>}, {transform_indices = @transform_1, window_bounds = array<i64: 1, 4, 16, 256>}, {pipeline_mode = #tpu.pipeline_mode<synchronous>, transform_indices = @transform_2, window_bounds = array<i64: 1, 256>}, {pipeline_mode = #tpu.pipeline_mode<synchronous>, transform_indices = @transform_3, window_bounds = array<i64: 1, 256>}, {pipeline_mode = #tpu.pipeline_mode<synchronous>, transform_indices = @transform_4, window_bounds = array<i64: 256, 256>}, {pipeline_mode = #tpu.pipeline_mode<synchronous>, transform_indices = @transform_5, window_bounds = array<i64: 1, 256>}, {pipeline_mode = #tpu.pipeline_mode<synchronous>, transform_indices = @transform_6, window_bounds = array<i64: 256, 256>}, {pipeline_mode = #tpu.pipeline_mode<synchronous>, transform_indices = @transform_7, window_bounds = array<i64: 1, 256>}, {pipeline_mode = #tpu.pipeline_mode<synchronous>, transform_indices = @transform_8, window_bounds = array<i64: 1, 256>}, {pipeline_mode = #tpu.pipeline_mode<synchronous>, transform_indices = @transform_9, window_bounds = array<i64: 1, 256>}, {pipeline_mode = #tpu.pipeline_mode<synchronous>, transform_indices = @transform_10, window_bounds = array<i64: 256, 1024>}, {pipeline_mode = #tpu.pipeline_mode<synchronous>, transform_indices = @transform_11, window_bounds = array<i64: 1, 1024>}, {pipeline_mode = #tpu.pipeline_mode<synchronous>, transform_indices = @transform_12, window_bounds = array<i64: 1024, 256>}, {pipeline_mode = #tpu.pipeline_mode<synchronous>, transform_indices = @transform_13, window_bounds = array<i64: 1, 256>}, {transform_indices = @transform_14, window_bounds = array<i64: 1, 4, 16, 256>}]} {
    %c0 = arith.constant 0 : index
    %c0_0 = arith.constant 0 : index
    %c0_1 = arith.constant 0 : index
    %c0_2 = arith.constant 0 : index
    %0 = vector.load %arg3[%c0, %c0_0, %c0_1, %c0_2] : memref<1x4x16x256xf32, #tpu.memory_space<vmem>>, vector<1x4x16x256xf32>
    %1 = vector.shape_cast %0 : vector<1x4x16x256xf32> to vector<4x16x256xf32>
    %2 = vector.shape_cast %1 : vector<4x16x256xf32> to vector<64x256xf32>
    %c0_3 = arith.constant 0 : index
    %c0_4 = arith.constant 0 : index
    %3 = vector.load %arg4[%c0_3, %c0_4] : memref<1x256xf32, #tpu.memory_space<vmem>>, vector<1x256xf32>
    %c0_5 = arith.constant 0 : index
    %c0_6 = arith.constant 0 : index
    %4 = vector.load %arg5[%c0_5, %c0_6] : memref<1x256xf32, #tpu.memory_space<vmem>>, vector<1x256xf32>
    %cst = arith.constant dense<0.000000e+00> : vector<64xf32>
    %5 = vector.multi_reduction <add>, %2, %cst [1] : vector<64x256xf32> to vector<64xf32>
    %6 = vector.shape_cast %5 : vector<64xf32> to vector<64x1xf32>
    %cst_7 = arith.constant 2.560000e+02 : f32
    %7 = vector.broadcast %cst_7 : f32 to vector<64x1xf32>
    %8 = arith.divf %6, %7 : vector<64x1xf32>
    %9 = vector.broadcast %8 : vector<64x1xf32> to vector<64x256xf32>
    %10 = arith.subf %2, %9 : vector<64x256xf32>
    %11 = arith.mulf %10, %10 : vector<64x256xf32>
    %cst_8 = arith.constant dense<0.000000e+00> : vector<64xf32>
    %12 = vector.multi_reduction <add>, %11, %cst_8 [1] : vector<64x256xf32> to vector<64xf32>
    %13 = vector.shape_cast %12 : vector<64xf32> to vector<64x1xf32>
    %cst_9 = arith.constant 2.560000e+02 : f32
    %14 = vector.broadcast %cst_9 : f32 to vector<64x1xf32>
    %15 = arith.divf %13, %14 : vector<64x1xf32>
    %16 = vector.broadcast %8 : vector<64x1xf32> to vector<64x256xf32>
    %17 = arith.subf %2, %16 : vector<64x256xf32>
    %cst_10 = arith.constant 9.99999974E-6 : f32
    %18 = vector.broadcast %cst_10 : f32 to vector<64x1xf32>
    %19 = arith.addf %15, %18 : vector<64x1xf32>
    %20 = math.rsqrt %19 : vector<64x1xf32>
    %21 = vector.broadcast %20 : vector<64x1xf32> to vector<64x256xf32>
    %22 = arith.mulf %17, %21 : vector<64x256xf32>
    %23 = vector.broadcast %3 : vector<1x256xf32> to vector<64x256xf32>
    %24 = arith.mulf %22, %23 : vector<64x256xf32>
    %25 = vector.broadcast %4 : vector<1x256xf32> to vector<64x256xf32>
    %26 = arith.addf %24, %25 : vector<64x256xf32>
    %c0_11 = arith.constant 0 : index
    %c0_12 = arith.constant 0 : index
    %27 = vector.load %arg6[%c0_11, %c0_12] : memref<256x256xf32, #tpu.memory_space<vmem>>, vector<256x256xf32>
    %cst_13 = arith.constant dense<0.000000e+00> : vector<64x256xf32>
    %28 = tpu.matmul %26, %27, %cst_13 {dimension_numbers = #tpu.dot_dimension_numbers<[1], [0], [0], [1], [0, 0, 1, 1], [], []>} : vector<64x256xf32>, vector<256x256xf32>, vector<64x256xf32> -> vector<64x256xf32>
    %c0_14 = arith.constant 0 : index
    %c0_15 = arith.constant 0 : index
    %29 = vector.load %arg7[%c0_14, %c0_15] : memref<1x256xf32, #tpu.memory_space<vmem>>, vector<1x256xf32>
    %30 = vector.broadcast %29 : vector<1x256xf32> to vector<64x256xf32>
    %31 = arith.addf %28, %30 : vector<64x256xf32>
    %32 = vector.shape_cast %31 : vector<64x256xf32> to vector<4x16x256xf32>
    %c0_16 = arith.constant 0 : index
    %c0_17 = arith.constant 0 : index
    %c0_18 = arith.constant 0 : index
    %c0_19 = arith.constant 0 : index
    %33 = vector.load %arg2[%c0_16, %c0_17, %c0_18, %c0_19] : memref<1x4x16x16xf32, #tpu.memory_space<vmem>>, vector<1x1x16x16xf32>
    %34 = vector.shape_cast %33 : vector<1x1x16x16xf32> to vector<16x16xf32>
    %35 = vector.shape_cast %34 : vector<16x16xf32> to vector<1x16x16xf32>
    %36 = vector.broadcast %35 : vector<1x16x16xf32> to vector<4x16x16xf32>
    %37 = vector.extract_strided_slice %32 {offsets = [0, 0, 0], sizes = [4, 16, 64], strides = [1, 1, 1]} : vector<4x16x256xf32> to vector<4x16x64xf32>
    "tpu.trace_start"() <{level = 10 : i32, message = "nij,njk->nik"}> : () -> ()
    %cst_20 = arith.constant dense<0.000000e+00> : vector<4x16x64xf32>
    %38 = tpu.matmul %36, %37, %cst_20 {dimension_numbers = #tpu.dot_dimension_numbers<[2], [1], [1], [2], [0, 0, 0, 1, 1, 2], [0], [0]>} : vector<4x16x16xf32>, vector<4x16x64xf32>, vector<4x16x64xf32> -> vector<4x16x64xf32>
    "tpu.trace_stop"() : () -> ()
    %39 = vector.shape_cast %38 : vector<4x16x64xf32> to vector<64x64xf32>
    %c0_21 = arith.constant 0 : index
    %c0_22 = arith.constant 0 : index
    %40 = vector.load %arg8[%c0_21, %c0_22] : memref<256x256xf32, #tpu.memory_space<vmem>>, vector<64x256xf32>
    %cst_23 = arith.constant dense<0.000000e+00> : vector<64x256xf32>
    %41 = tpu.matmul %39, %40, %cst_23 {dimension_numbers = #tpu.dot_dimension_numbers<[1], [0], [0], [1], [0, 0, 1, 1], [], []>} : vector<64x64xf32>, vector<64x256xf32>, vector<64x256xf32> -> vector<64x256xf32>
    %c0_24 = arith.constant 0 : index
    %c1 = arith.constant 1 : index
    %c0_25 = arith.constant 0 : index
    %c0_26 = arith.constant 0 : index
    %42 = vector.load %arg2[%c0_24, %c1, %c0_25, %c0_26] : memref<1x4x16x16xf32, #tpu.memory_space<vmem>>, vector<1x1x16x16xf32>
    %43 = vector.shape_cast %42 : vector<1x1x16x16xf32> to vector<16x16xf32>
    %44 = vector.shape_cast %43 : vector<16x16xf32> to vector<1x16x16xf32>
    %45 = vector.broadcast %44 : vector<1x16x16xf32> to vector<4x16x16xf32>
    %46 = vector.extract_strided_slice %32 {offsets = [0, 0, 64], sizes = [4, 16, 64], strides = [1, 1, 1]} : vector<4x16x256xf32> to vector<4x16x64xf32>
    "tpu.trace_start"() <{level = 10 : i32, message = "nij,njk->nik"}> : () -> ()
    %cst_27 = arith.constant dense<0.000000e+00> : vector<4x16x64xf32>
    %47 = tpu.matmul %45, %46, %cst_27 {dimension_numbers = #tpu.dot_dimension_numbers<[2], [1], [1], [2], [0, 0, 0, 1, 1, 2], [0], [0]>} : vector<4x16x16xf32>, vector<4x16x64xf32>, vector<4x16x64xf32> -> vector<4x16x64xf32>
    "tpu.trace_stop"() : () -> ()
    %48 = vector.shape_cast %47 : vector<4x16x64xf32> to vector<64x64xf32>
    %c64 = arith.constant 64 : index
    %c0_28 = arith.constant 0 : index
    %49 = vector.load %arg8[%c64, %c0_28] : memref<256x256xf32, #tpu.memory_space<vmem>>, vector<64x256xf32>
    %cst_29 = arith.constant dense<0.000000e+00> : vector<64x256xf32>
    %50 = tpu.matmul %48, %49, %cst_29 {dimension_numbers = #tpu.dot_dimension_numbers<[1], [0], [0], [1], [0, 0, 1, 1], [], []>} : vector<64x64xf32>, vector<64x256xf32>, vector<64x256xf32> -> vector<64x256xf32>
    %51 = arith.addf %41, %50 : vector<64x256xf32>
    %c0_30 = arith.constant 0 : index
    %c2 = arith.constant 2 : index
    %c0_31 = arith.constant 0 : index
    %c0_32 = arith.constant 0 : index
    %52 = vector.load %arg2[%c0_30, %c2, %c0_31, %c0_32] : memref<1x4x16x16xf32, #tpu.memory_space<vmem>>, vector<1x1x16x16xf32>
    %53 = vector.shape_cast %52 : vector<1x1x16x16xf32> to vector<16x16xf32>
    %54 = vector.shape_cast %53 : vector<16x16xf32> to vector<1x16x16xf32>
    %55 = vector.broadcast %54 : vector<1x16x16xf32> to vector<4x16x16xf32>
    %56 = vector.extract_strided_slice %32 {offsets = [0, 0, 128], sizes = [4, 16, 64], strides = [1, 1, 1]} : vector<4x16x256xf32> to vector<4x16x64xf32>
    "tpu.trace_start"() <{level = 10 : i32, message = "nij,njk->nik"}> : () -> ()
    %cst_33 = arith.constant dense<0.000000e+00> : vector<4x16x64xf32>
    %57 = tpu.matmul %55, %56, %cst_33 {dimension_numbers = #tpu.dot_dimension_numbers<[2], [1], [1], [2], [0, 0, 0, 1, 1, 2], [0], [0]>} : vector<4x16x16xf32>, vector<4x16x64xf32>, vector<4x16x64xf32> -> vector<4x16x64xf32>
    "tpu.trace_stop"() : () -> ()
    %58 = vector.shape_cast %57 : vector<4x16x64xf32> to vector<64x64xf32>
    %c128 = arith.constant 128 : index
    %c0_34 = arith.constant 0 : index
    %59 = vector.load %arg8[%c128, %c0_34] : memref<256x256xf32, #tpu.memory_space<vmem>>, vector<64x256xf32>
    %cst_35 = arith.constant dense<0.000000e+00> : vector<64x256xf32>
    %60 = tpu.matmul %58, %59, %cst_35 {dimension_numbers = #tpu.dot_dimension_numbers<[1], [0], [0], [1], [0, 0, 1, 1], [], []>} : vector<64x64xf32>, vector<64x256xf32>, vector<64x256xf32> -> vector<64x256xf32>
    %61 = arith.addf %51, %60 : vector<64x256xf32>
    %c0_36 = arith.constant 0 : index
    %c3 = arith.constant 3 : index
    %c0_37 = arith.constant 0 : index
    %c0_38 = arith.constant 0 : index
    %62 = vector.load %arg2[%c0_36, %c3, %c0_37, %c0_38] : memref<1x4x16x16xf32, #tpu.memory_space<vmem>>, vector<1x1x16x16xf32>
    %63 = vector.shape_cast %62 : vector<1x1x16x16xf32> to vector<16x16xf32>
    %64 = vector.shape_cast %63 : vector<16x16xf32> to vector<1x16x16xf32>
    %65 = vector.broadcast %64 : vector<1x16x16xf32> to vector<4x16x16xf32>
    %66 = vector.extract_strided_slice %32 {offsets = [0, 0, 192], sizes = [4, 16, 64], strides = [1, 1, 1]} : vector<4x16x256xf32> to vector<4x16x64xf32>
    "tpu.trace_start"() <{level = 10 : i32, message = "nij,njk->nik"}> : () -> ()
    %cst_39 = arith.constant dense<0.000000e+00> : vector<4x16x64xf32>
    %67 = tpu.matmul %65, %66, %cst_39 {dimension_numbers = #tpu.dot_dimension_numbers<[2], [1], [1], [2], [0, 0, 0, 1, 1, 2], [0], [0]>} : vector<4x16x16xf32>, vector<4x16x64xf32>, vector<4x16x64xf32> -> vector<4x16x64xf32>
    "tpu.trace_stop"() : () -> ()
    %68 = vector.shape_cast %67 : vector<4x16x64xf32> to vector<64x64xf32>
    %c192 = arith.constant 192 : index
    %c0_40 = arith.constant 0 : index
    %69 = vector.load %arg8[%c192, %c0_40] : memref<256x256xf32, #tpu.memory_space<vmem>>, vector<64x256xf32>
    %cst_41 = arith.constant dense<0.000000e+00> : vector<64x256xf32>
    %70 = tpu.matmul %68, %69, %cst_41 {dimension_numbers = #tpu.dot_dimension_numbers<[1], [0], [0], [1], [0, 0, 1, 1], [], []>} : vector<64x64xf32>, vector<64x256xf32>, vector<64x256xf32> -> vector<64x256xf32>
    %71 = arith.addf %61, %70 : vector<64x256xf32>
    %72 = arith.addf %2, %71 : vector<64x256xf32>
    %c0_42 = arith.constant 0 : index
    %c0_43 = arith.constant 0 : index
    %73 = vector.load %arg9[%c0_42, %c0_43] : memref<1x256xf32, #tpu.memory_space<vmem>>, vector<1x256xf32>
    %74 = vector.broadcast %73 : vector<1x256xf32> to vector<64x256xf32>
    %75 = arith.addf %72, %74 : vector<64x256xf32>
    %c0_44 = arith.constant 0 : index
    %c0_45 = arith.constant 0 : index
    %76 = vector.load %arg10[%c0_44, %c0_45] : memref<1x256xf32, #tpu.memory_space<vmem>>, vector<1x256xf32>
    %c0_46 = arith.constant 0 : index
    %c0_47 = arith.constant 0 : index
    %77 = vector.load %arg11[%c0_46, %c0_47] : memref<1x256xf32, #tpu.memory_space<vmem>>, vector<1x256xf32>
    %cst_48 = arith.constant dense<0.000000e+00> : vector<64xf32>
    %78 = vector.multi_reduction <add>, %75, %cst_48 [1] : vector<64x256xf32> to vector<64xf32>
    %79 = vector.shape_cast %78 : vector<64xf32> to vector<64x1xf32>
    %cst_49 = arith.constant 2.560000e+02 : f32
    %80 = vector.broadcast %cst_49 : f32 to vector<64x1xf32>
    %81 = arith.divf %79, %80 : vector<64x1xf32>
    %82 = vector.broadcast %81 : vector<64x1xf32> to vector<64x256xf32>
    %83 = arith.subf %75, %82 : vector<64x256xf32>
    %84 = arith.mulf %83, %83 : vector<64x256xf32>
    %cst_50 = arith.constant dense<0.000000e+00> : vector<64xf32>
    %85 = vector.multi_reduction <add>, %84, %cst_50 [1] : vector<64x256xf32> to vector<64xf32>
    %86 = vector.shape_cast %85 : vector<64xf32> to vector<64x1xf32>
    %cst_51 = arith.constant 2.560000e+02 : f32
    %87 = vector.broadcast %cst_51 : f32 to vector<64x1xf32>
    %88 = arith.divf %86, %87 : vector<64x1xf32>
    %89 = vector.broadcast %81 : vector<64x1xf32> to vector<64x256xf32>
    %90 = arith.subf %75, %89 : vector<64x256xf32>
    %cst_52 = arith.constant 9.99999974E-6 : f32
    %91 = vector.broadcast %cst_52 : f32 to vector<64x1xf32>
    %92 = arith.addf %88, %91 : vector<64x1xf32>
    %93 = math.rsqrt %92 : vector<64x1xf32>
    %94 = vector.broadcast %93 : vector<64x1xf32> to vector<64x256xf32>
    %95 = arith.mulf %90, %94 : vector<64x256xf32>
    %96 = vector.broadcast %76 : vector<1x256xf32> to vector<64x256xf32>
    %97 = arith.mulf %95, %96 : vector<64x256xf32>
    %98 = vector.broadcast %77 : vector<1x256xf32> to vector<64x256xf32>
    %99 = arith.addf %97, %98 : vector<64x256xf32>
    %c0_53 = arith.constant 0 : index
    %c0_54 = arith.constant 0 : index
    %100 = vector.load %arg12[%c0_53, %c0_54] : memref<256x1024xf32, #tpu.memory_space<vmem>>, vector<256x1024xf32>
    %cst_55 = arith.constant dense<0.000000e+00> : vector<64x1024xf32>
    %101 = tpu.matmul %99, %100, %cst_55 {dimension_numbers = #tpu.dot_dimension_numbers<[1], [0], [0], [1], [0, 0, 1, 1], [], []>} : vector<64x256xf32>, vector<256x1024xf32>, vector<64x1024xf32> -> vector<64x1024xf32>
    %c0_56 = arith.constant 0 : index
    %c0_57 = arith.constant 0 : index
    %102 = vector.load %arg13[%c0_56, %c0_57] : memref<1x1024xf32, #tpu.memory_space<vmem>>, vector<1x1024xf32>
    %103 = vector.broadcast %102 : vector<1x1024xf32> to vector<64x1024xf32>
    %104 = arith.addf %101, %103 : vector<64x1024xf32>
    %cst_58 = arith.constant 0.000000e+00 : f32
    %105 = vector.broadcast %cst_58 : f32 to vector<64x1024xf32>
    %106 = arith.maximumf %104, %105 : vector<64x1024xf32>
    %c0_59 = arith.constant 0 : index
    %c0_60 = arith.constant 0 : index
    %107 = vector.load %arg14[%c0_59, %c0_60] : memref<1024x256xf32, #tpu.memory_space<vmem>>, vector<1024x256xf32>
    %cst_61 = arith.constant dense<0.000000e+00> : vector<64x256xf32>
    %108 = tpu.matmul %106, %107, %cst_61 {dimension_numbers = #tpu.dot_dimension_numbers<[1], [0], [0], [1], [0, 0, 1, 1], [], []>} : vector<64x1024xf32>, vector<1024x256xf32>, vector<64x256xf32> -> vector<64x256xf32>
    %c0_62 = arith.constant 0 : index
    %c0_63 = arith.constant 0 : index
    %109 = vector.load %arg15[%c0_62, %c0_63] : memref<1x256xf32, #tpu.memory_space<vmem>>, vector<1x256xf32>
    %110 = vector.broadcast %109 : vector<1x256xf32> to vector<64x256xf32>
    %111 = arith.addf %108, %110 : vector<64x256xf32>
    %112 = arith.addf %75, %111 : vector<64x256xf32>
    %113 = vector.shape_cast %112 : vector<64x256xf32> to vector<4x16x256xf32>
    %c0_64 = arith.constant 0 : index
    %c0_65 = arith.constant 0 : index
    %c0_66 = arith.constant 0 : index
    %c0_67 = arith.constant 0 : index
    %114 = vector.load %arg16[%c0_64, %c0_65, %c0_66, %c0_67] : memref<1x4x16x256xf32, #tpu.memory_space<vmem>>, vector<1x4x16x256xf32>
    %115 = vector.shape_cast %114 : vector<1x4x16x256xf32> to vector<4x16x256xf32>
    %116 = vector.shape_cast %113 : vector<4x16x256xf32> to vector<1x4x16x256xf32>
    tpu.vector_store %arg16[%c0_64, %c0_65, %c0_66, %c0_67], %116 {strides = array<i32>} : memref<1x4x16x256xf32, #tpu.memory_space<vmem>>, vector<1x4x16x256xf32>,
    return
  }
  func.func @transform_0(%arg0: i32, %arg1: i32) -> (i32, i32, i32, i32) {
    %c0_i32 = arith.constant 0 : i32
    %c0_i32_0 = arith.constant 0 : i32
    %c0_i32_1 = arith.constant 0 : i32
    %c0_i32_2 = arith.constant 0 : i32
    return %arg0, %c0_i32, %c0_i32_0, %c0_i32_1 : i32, i32, i32, i32
  }
  func.func @transform_1(%arg0: i32, %arg1: i32) -> (i32, i32, i32, i32) {
    %c0_i32 = arith.constant 0 : i32
    %c0_i32_0 = arith.constant 0 : i32
    %c0_i32_1 = arith.constant 0 : i32
    return %arg0, %arg1, %c0_i32, %c0_i32_0 : i32, i32, i32, i32
  }
  func.func @transform_2(%arg0: i32, %arg1: i32) -> (i32, i32) {
    %c0_i32 = arith.constant 0 : i32
    %c0_i32_0 = arith.constant 0 : i32
    %c0_i32_1 = arith.constant 0 : i32
    return %c0_i32, %c0_i32_0 : i32, i32
  }
  func.func @transform_3(%arg0: i32, %arg1: i32) -> (i32, i32) {
    %c0_i32 = arith.constant 0 : i32
    %c0_i32_0 = arith.constant 0 : i32
    %c0_i32_1 = arith.constant 0 : i32
    return %c0_i32, %c0_i32_0 : i32, i32
  }
  func.func @transform_4(%arg0: i32, %arg1: i32) -> (i32, i32) {
    %c0_i32 = arith.constant 0 : i32
    %c0_i32_0 = arith.constant 0 : i32
    %c0_i32_1 = arith.constant 0 : i32
    return %c0_i32, %c0_i32_0 : i32, i32
  }
  func.func @transform_5(%arg0: i32, %arg1: i32) -> (i32, i32) {
    %c0_i32 = arith.constant 0 : i32
    %c0_i32_0 = arith.constant 0 : i32
    %c0_i32_1 = arith.constant 0 : i32
    return %c0_i32, %c0_i32_0 : i32, i32
  }
  func.func @transform_6(%arg0: i32, %arg1: i32) -> (i32, i32) {
    %c0_i32 = arith.constant 0 : i32
    %c0_i32_0 = arith.constant 0 : i32
    %c0_i32_1 = arith.constant 0 : i32
    return %c0_i32, %c0_i32_0 : i32, i32
  }
  func.func @transform_7(%arg0: i32, %arg1: i32) -> (i32, i32) {
    %c0_i32 = arith.constant 0 : i32
    %c0_i32_0 = arith.constant 0 : i32
    %c0_i32_1 = arith.constant 0 : i32
    return %c0_i32, %c0_i32_0 : i32, i32
  }
  func.func @transform_8(%arg0: i32, %arg1: i32) -> (i32, i32) {
    %c0_i32 = arith.constant 0 : i32
    %c0_i32_0 = arith.constant 0 : i32
    %c0_i32_1 = arith.constant 0 : i32
    return %c0_i32, %c0_i32_0 : i32, i32
  }
  func.func @transform_9(%arg0: i32, %arg1: i32) -> (i32, i32) {
    %c0_i32 = arith.constant 0 : i32
    %c0_i32_0 = arith.constant 0 : i32
    %c0_i32_1 = arith.constant 0 : i32
    return %c0_i32, %c0_i32_0 : i32, i32
  }
  func.func @transform_10(%arg0: i32, %arg1: i32) -> (i32, i32) {
    %c0_i32 = arith.constant 0 : i32
    %c0_i32_0 = arith.constant 0 : i32
    %c0_i32_1 = arith.constant 0 : i32
    return %c0_i32, %c0_i32_0 : i32, i32
  }
  func.func @transform_11(%arg0: i32, %arg1: i32) -> (i32, i32) {
    %c0_i32 = arith.constant 0 : i32
    %c0_i32_0 = arith.constant 0 : i32
    %c0_i32_1 = arith.constant 0 : i32
    return %c0_i32, %c0_i32_0 : i32, i32
  }
  func.func @transform_12(%arg0: i32, %arg1: i32) -> (i32, i32) {
    %c0_i32 = arith.constant 0 : i32
    %c0_i32_0 = arith.constant 0 : i32
    %c0_i32_1 = arith.constant 0 : i32
    return %c0_i32, %c0_i32_0 : i32, i32
  }
  func.func @transform_13(%arg0: i32, %arg1: i32) -> (i32, i32) {
    %c0_i32 = arith.constant 0 : i32
    %c0_i32_0 = arith.constant 0 : i32
    %c0_i32_1 = arith.constant 0 : i32
    return %c0_i32, %c0_i32_0 : i32, i32
  }
  func.func @transform_14(%arg0: i32, %arg1: i32) -> (i32, i32, i32, i32) {
    %c0_i32 = arith.constant 0 : i32
    %c0_i32_0 = arith.constant 0 : i32
    %c0_i32_1 = arith.constant 0 : i32
    return %arg0, %arg1, %c0_i32, %c0_i32_0 : i32, i32, i32, i32
  }
}

module attributes {stable_mosaic.version = 11 : i64} {
  func.func @_attn_map_kernel(%arg0: i32, %arg1: i32, %arg2: memref<1x8x16x128xf32, #tpu.memory_space<vmem>>, %arg3: memref<1x16x1024xf32, #tpu.memory_space<vmem>>, %arg4: memref<1x128xf32, #tpu.memory_space<vmem>>, %arg5: memref<1x128xf32, #tpu.memory_space<vmem>>, %arg6: memref<4x128xf32, #tpu.memory_space<vmem>>, %arg7: memref<4x1xf32, #tpu.memory_space<vmem>>, %arg8: memref<1x4x8x16xf32, #tpu.memory_space<vmem>>) attributes {dimension_semantics = [#tpu.dimension_semantics<parallel>, #tpu.dimension_semantics<parallel>], iteration_bounds = array<i64: 2, 2>, scalar_prefetch = 0 : i64, scratch_operands = 0 : i64, tpu.core_type = #tpu.core_type<tc>, window_params = [{transform_indices = @transform_0, window_bounds = array<i64: 1, 8, 16, 128>}, {transform_indices = @transform_1, window_bounds = array<i64: 1, 16, 1024>}, {pipeline_mode = #tpu.pipeline_mode<synchronous>, transform_indices = @transform_2, window_bounds = array<i64: 1, 128>}, {pipeline_mode = #tpu.pipeline_mode<synchronous>, transform_indices = @transform_3, window_bounds = array<i64: 1, 128>}, {pipeline_mode = #tpu.pipeline_mode<synchronous>, transform_indices = @transform_4, window_bounds = array<i64: 4, 128>}, {pipeline_mode = #tpu.pipeline_mode<synchronous>, transform_indices = @transform_5, window_bounds = array<i64: 4, 1>}, {transform_indices = @transform_6, window_bounds = array<i64: 1, 4, 8, 16>}]} {
    %c0 = arith.constant 0 : index
    %c0_0 = arith.constant 0 : index
    %0 = vector.load %arg4[%c0, %c0_0] : memref<1x128xf32, #tpu.memory_space<vmem>>, vector<1x128xf32>
    %c0_1 = arith.constant 0 : index
    %c0_2 = arith.constant 0 : index
    %1 = vector.load %arg5[%c0_1, %c0_2] : memref<1x128xf32, #tpu.memory_space<vmem>>, vector<1x128xf32>
    %c0_3 = arith.constant 0 : index
    %c0_4 = arith.constant 0 : index
    %2 = vector.load %arg6[%c0_3, %c0_4] : memref<4x128xf32, #tpu.memory_space<vmem>>, vector<4x128xf32>
    %c0_5 = arith.constant 0 : index
    %c0_6 = arith.constant 0 : index
    %3 = vector.load %arg7[%c0_5, %c0_6] : memref<4x1xf32, #tpu.memory_space<vmem>>, vector<4x1xf32>
    %c0_7 = arith.constant 0 : index
    %c0_8 = arith.constant 0 : index
    %c0_9 = arith.constant 0 : index
    %c0_10 = arith.constant 0 : index
    %4 = vector.load %arg2[%c0_7, %c0_8, %c0_9, %c0_10] : memref<1x8x16x128xf32, #tpu.memory_space<vmem>>, vector<1x1x16x128xf32>
    %5 = vector.shape_cast %4 : vector<1x1x16x128xf32> to vector<16x128xf32>
    %c0_11 = arith.constant 0 : index
    %c0_12 = arith.constant 0 : index
    %c0_13 = arith.constant 0 : index
    %6 = vector.load %arg3[%c0_11, %c0_12, %c0_13] : memref<1x16x1024xf32, #tpu.memory_space<vmem>>, vector<1x16x128xf32>
    %7 = vector.shape_cast %6 : vector<1x16x128xf32> to vector<16x128xf32>
    %8 = arith.addf %5, %7 : vector<16x128xf32>
    %cst = arith.constant 5.000000e-01 : f32
    %9 = vector.broadcast %cst : f32 to vector<16x128xf32>
    %10 = arith.mulf %9, %8 : vector<16x128xf32>
    %cst_14 = arith.constant dense<0.000000e+00> : vector<16xf32>
    %11 = vector.multi_reduction <add>, %10, %cst_14 [1] : vector<16x128xf32> to vector<16xf32>
    %12 = vector.shape_cast %11 : vector<16xf32> to vector<16x1xf32>
    %cst_15 = arith.constant 1.280000e+02 : f32
    %13 = vector.broadcast %cst_15 : f32 to vector<16x1xf32>
    %14 = arith.divf %12, %13 : vector<16x1xf32>
    %15 = vector.broadcast %14 : vector<16x1xf32> to vector<16x128xf32>
    %16 = arith.subf %10, %15 : vector<16x128xf32>
    %17 = arith.mulf %16, %16 : vector<16x128xf32>
    %cst_16 = arith.constant dense<0.000000e+00> : vector<16xf32>
    %18 = vector.multi_reduction <add>, %17, %cst_16 [1] : vector<16x128xf32> to vector<16xf32>
    %19 = vector.shape_cast %18 : vector<16xf32> to vector<16x1xf32>
    %cst_17 = arith.constant 1.280000e+02 : f32
    %20 = vector.broadcast %cst_17 : f32 to vector<16x1xf32>
    %21 = arith.divf %19, %20 : vector<16x1xf32>
    %22 = vector.broadcast %14 : vector<16x1xf32> to vector<16x128xf32>
    %23 = arith.subf %10, %22 : vector<16x128xf32>
    %cst_18 = arith.constant 9.99999974E-6 : f32
    %24 = vector.broadcast %cst_18 : f32 to vector<16x1xf32>
    %25 = arith.addf %21, %24 : vector<16x1xf32>
    %26 = math.rsqrt %25 : vector<16x1xf32>
    %27 = vector.broadcast %26 : vector<16x1xf32> to vector<16x128xf32>
    %28 = arith.mulf %23, %27 : vector<16x128xf32>
    %29 = vector.broadcast %0 : vector<1x128xf32> to vector<16x128xf32>
    %30 = arith.mulf %28, %29 : vector<16x128xf32>
    %31 = vector.broadcast %1 : vector<1x128xf32> to vector<16x128xf32>
    %32 = arith.addf %30, %31 : vector<16x128xf32>
    %cst_19 = arith.constant dense<0.000000e+00> : vector<4x16xf32>
    %33 = tpu.matmul %2, %32, %cst_19 {dimension_numbers = #tpu.dot_dimension_numbers<[1], [1], [0], [0], [0, 0, 1, 0], [], []>} : vector<4x128xf32>, vector<16x128xf32>, vector<4x16xf32> -> vector<4x16xf32>
    %34 = vector.broadcast %3 : vector<4x1xf32> to vector<4x16xf32>
    %35 = arith.addf %33, %34 : vector<4x16xf32>
    %cst_20 = arith.constant dense<0xFF800000> : vector<4xf32>
    %36 = vector.multi_reduction <maximumf>, %35, %cst_20 [1] : vector<4x16xf32> to vector<4xf32>
    %37 = vector.shape_cast %36 : vector<4xf32> to vector<4x1xf32>
    %38 = vector.broadcast %37 : vector<4x1xf32> to vector<4x16xf32>
    %39 = arith.subf %35, %38 : vector<4x16xf32>
    %40 = math.exp %39 : vector<4x16xf32>
    %cst_21 = arith.constant dense<0.000000e+00> : vector<4xf32>
    %41 = vector.multi_reduction <add>, %40, %cst_21 [1] : vector<4x16xf32> to vector<4xf32>
    %42 = vector.shape_cast %41 : vector<4xf32> to vector<4x1xf32>
    %43 = tpu.reciprocal %42 {approx = true} : vector<4x1xf32> -> vector<4x1xf32>
    %44 = vector.broadcast %43 : vector<4x1xf32> to vector<4x16xf32>
    %45 = arith.mulf %40, %44 : vector<4x16xf32>
    %c0_22 = arith.constant 0 : index
    %c0_23 = arith.constant 0 : index
    %c0_24 = arith.constant 0 : index
    %c0_25 = arith.constant 0 : index
    %46 = vector.load %arg8[%c0_22, %c0_23, %c0_24, %c0_25] : memref<1x4x8x16xf32, #tpu.memory_space<vmem>>, vector<1x4x1x16xf32>
    %47 = vector.shape_cast %46 : vector<1x4x1x16xf32> to vector<4x16xf32>
    %48 = vector.shape_cast %45 : vector<4x16xf32> to vector<1x4x1x16xf32>
    tpu.vector_store %arg8[%c0_22, %c0_23, %c0_24, %c0_25], %48 {strides = array<i32>} : memref<1x4x8x16xf32, #tpu.memory_space<vmem>>, vector<1x4x1x16xf32>,
    %c0_26 = arith.constant 0 : index
    %c1 = arith.constant 1 : index
    %c0_27 = arith.constant 0 : index
    %c0_28 = arith.constant 0 : index
    %49 = vector.load %arg2[%c0_26, %c1, %c0_27, %c0_28] : memref<1x8x16x128xf32, #tpu.memory_space<vmem>>, vector<1x1x16x128xf32>
    %50 = vector.shape_cast %49 : vector<1x1x16x128xf32> to vector<16x128xf32>
    %c0_29 = arith.constant 0 : index
    %c0_30 = arith.constant 0 : index
    %c128 = arith.constant 128 : index
    %51 = vector.load %arg3[%c0_29, %c0_30, %c128] : memref<1x16x1024xf32, #tpu.memory_space<vmem>>, vector<1x16x128xf32>
    %52 = vector.shape_cast %51 : vector<1x16x128xf32> to vector<16x128xf32>
    %53 = arith.addf %50, %52 : vector<16x128xf32>
    %cst_31 = arith.constant 5.000000e-01 : f32
    %54 = vector.broadcast %cst_31 : f32 to vector<16x128xf32>
    %55 = arith.mulf %54, %53 : vector<16x128xf32>
    %cst_32 = arith.constant dense<0.000000e+00> : vector<16xf32>
    %56 = vector.multi_reduction <add>, %55, %cst_32 [1] : vector<16x128xf32> to vector<16xf32>
    %57 = vector.shape_cast %56 : vector<16xf32> to vector<16x1xf32>
    %cst_33 = arith.constant 1.280000e+02 : f32
    %58 = vector.broadcast %cst_33 : f32 to vector<16x1xf32>
    %59 = arith.divf %57, %58 : vector<16x1xf32>
    %60 = vector.broadcast %59 : vector<16x1xf32> to vector<16x128xf32>
    %61 = arith.subf %55, %60 : vector<16x128xf32>
    %62 = arith.mulf %61, %61 : vector<16x128xf32>
    %cst_34 = arith.constant dense<0.000000e+00> : vector<16xf32>
    %63 = vector.multi_reduction <add>, %62, %cst_34 [1] : vector<16x128xf32> to vector<16xf32>
    %64 = vector.shape_cast %63 : vector<16xf32> to vector<16x1xf32>
    %cst_35 = arith.constant 1.280000e+02 : f32
    %65 = vector.broadcast %cst_35 : f32 to vector<16x1xf32>
    %66 = arith.divf %64, %65 : vector<16x1xf32>
    %67 = vector.broadcast %59 : vector<16x1xf32> to vector<16x128xf32>
    %68 = arith.subf %55, %67 : vector<16x128xf32>
    %cst_36 = arith.constant 9.99999974E-6 : f32
    %69 = vector.broadcast %cst_36 : f32 to vector<16x1xf32>
    %70 = arith.addf %66, %69 : vector<16x1xf32>
    %71 = math.rsqrt %70 : vector<16x1xf32>
    %72 = vector.broadcast %71 : vector<16x1xf32> to vector<16x128xf32>
    %73 = arith.mulf %68, %72 : vector<16x128xf32>
    %74 = vector.broadcast %0 : vector<1x128xf32> to vector<16x128xf32>
    %75 = arith.mulf %73, %74 : vector<16x128xf32>
    %76 = vector.broadcast %1 : vector<1x128xf32> to vector<16x128xf32>
    %77 = arith.addf %75, %76 : vector<16x128xf32>
    %cst_37 = arith.constant dense<0.000000e+00> : vector<4x16xf32>
    %78 = tpu.matmul %2, %77, %cst_37 {dimension_numbers = #tpu.dot_dimension_numbers<[1], [1], [0], [0], [0, 0, 1, 0], [], []>} : vector<4x128xf32>, vector<16x128xf32>, vector<4x16xf32> -> vector<4x16xf32>
    %79 = vector.broadcast %3 : vector<4x1xf32> to vector<4x16xf32>
    %80 = arith.addf %78, %79 : vector<4x16xf32>
    %cst_38 = arith.constant dense<0xFF800000> : vector<4xf32>
    %81 = vector.multi_reduction <maximumf>, %80, %cst_38 [1] : vector<4x16xf32> to vector<4xf32>
    %82 = vector.shape_cast %81 : vector<4xf32> to vector<4x1xf32>
    %83 = vector.broadcast %82 : vector<4x1xf32> to vector<4x16xf32>
    %84 = arith.subf %80, %83 : vector<4x16xf32>
    %85 = math.exp %84 : vector<4x16xf32>
    %cst_39 = arith.constant dense<0.000000e+00> : vector<4xf32>
    %86 = vector.multi_reduction <add>, %85, %cst_39 [1] : vector<4x16xf32> to vector<4xf32>
    %87 = vector.shape_cast %86 : vector<4xf32> to vector<4x1xf32>
    %88 = tpu.reciprocal %87 {approx = true} : vector<4x1xf32> -> vector<4x1xf32>
    %89 = vector.broadcast %88 : vector<4x1xf32> to vector<4x16xf32>
    %90 = arith.mulf %85, %89 : vector<4x16xf32>
    %c0_40 = arith.constant 0 : index
    %c0_41 = arith.constant 0 : index
    %c1_42 = arith.constant 1 : index
    %c0_43 = arith.constant 0 : index
    %91 = vector.load %arg8[%c0_40, %c0_41, %c1_42, %c0_43] : memref<1x4x8x16xf32, #tpu.memory_space<vmem>>, vector<1x4x1x16xf32>
    %92 = vector.shape_cast %91 : vector<1x4x1x16xf32> to vector<4x16xf32>
    %93 = vector.shape_cast %90 : vector<4x16xf32> to vector<1x4x1x16xf32>
    tpu.vector_store %arg8[%c0_40, %c0_41, %c1_42, %c0_43], %93 {strides = array<i32>} : memref<1x4x8x16xf32, #tpu.memory_space<vmem>>, vector<1x4x1x16xf32>,
    %c0_44 = arith.constant 0 : index
    %c2 = arith.constant 2 : index
    %c0_45 = arith.constant 0 : index
    %c0_46 = arith.constant 0 : index
    %94 = vector.load %arg2[%c0_44, %c2, %c0_45, %c0_46] : memref<1x8x16x128xf32, #tpu.memory_space<vmem>>, vector<1x1x16x128xf32>
    %95 = vector.shape_cast %94 : vector<1x1x16x128xf32> to vector<16x128xf32>
    %c0_47 = arith.constant 0 : index
    %c0_48 = arith.constant 0 : index
    %c256 = arith.constant 256 : index
    %96 = vector.load %arg3[%c0_47, %c0_48, %c256] : memref<1x16x1024xf32, #tpu.memory_space<vmem>>, vector<1x16x128xf32>
    %97 = vector.shape_cast %96 : vector<1x16x128xf32> to vector<16x128xf32>
    %98 = arith.addf %95, %97 : vector<16x128xf32>
    %cst_49 = arith.constant 5.000000e-01 : f32
    %99 = vector.broadcast %cst_49 : f32 to vector<16x128xf32>
    %100 = arith.mulf %99, %98 : vector<16x128xf32>
    %cst_50 = arith.constant dense<0.000000e+00> : vector<16xf32>
    %101 = vector.multi_reduction <add>, %100, %cst_50 [1] : vector<16x128xf32> to vector<16xf32>
    %102 = vector.shape_cast %101 : vector<16xf32> to vector<16x1xf32>
    %cst_51 = arith.constant 1.280000e+02 : f32
    %103 = vector.broadcast %cst_51 : f32 to vector<16x1xf32>
    %104 = arith.divf %102, %103 : vector<16x1xf32>
    %105 = vector.broadcast %104 : vector<16x1xf32> to vector<16x128xf32>
    %106 = arith.subf %100, %105 : vector<16x128xf32>
    %107 = arith.mulf %106, %106 : vector<16x128xf32>
    %cst_52 = arith.constant dense<0.000000e+00> : vector<16xf32>
    %108 = vector.multi_reduction <add>, %107, %cst_52 [1] : vector<16x128xf32> to vector<16xf32>
    %109 = vector.shape_cast %108 : vector<16xf32> to vector<16x1xf32>
    %cst_53 = arith.constant 1.280000e+02 : f32
    %110 = vector.broadcast %cst_53 : f32 to vector<16x1xf32>
    %111 = arith.divf %109, %110 : vector<16x1xf32>
    %112 = vector.broadcast %104 : vector<16x1xf32> to vector<16x128xf32>
    %113 = arith.subf %100, %112 : vector<16x128xf32>
    %cst_54 = arith.constant 9.99999974E-6 : f32
    %114 = vector.broadcast %cst_54 : f32 to vector<16x1xf32>
    %115 = arith.addf %111, %114 : vector<16x1xf32>
    %116 = math.rsqrt %115 : vector<16x1xf32>
    %117 = vector.broadcast %116 : vector<16x1xf32> to vector<16x128xf32>
    %118 = arith.mulf %113, %117 : vector<16x128xf32>
    %119 = vector.broadcast %0 : vector<1x128xf32> to vector<16x128xf32>
    %120 = arith.mulf %118, %119 : vector<16x128xf32>
    %121 = vector.broadcast %1 : vector<1x128xf32> to vector<16x128xf32>
    %122 = arith.addf %120, %121 : vector<16x128xf32>
    %cst_55 = arith.constant dense<0.000000e+00> : vector<4x16xf32>
    %123 = tpu.matmul %2, %122, %cst_55 {dimension_numbers = #tpu.dot_dimension_numbers<[1], [1], [0], [0], [0, 0, 1, 0], [], []>} : vector<4x128xf32>, vector<16x128xf32>, vector<4x16xf32> -> vector<4x16xf32>
    %124 = vector.broadcast %3 : vector<4x1xf32> to vector<4x16xf32>
    %125 = arith.addf %123, %124 : vector<4x16xf32>
    %cst_56 = arith.constant dense<0xFF800000> : vector<4xf32>
    %126 = vector.multi_reduction <maximumf>, %125, %cst_56 [1] : vector<4x16xf32> to vector<4xf32>
    %127 = vector.shape_cast %126 : vector<4xf32> to vector<4x1xf32>
    %128 = vector.broadcast %127 : vector<4x1xf32> to vector<4x16xf32>
    %129 = arith.subf %125, %128 : vector<4x16xf32>
    %130 = math.exp %129 : vector<4x16xf32>
    %cst_57 = arith.constant dense<0.000000e+00> : vector<4xf32>
    %131 = vector.multi_reduction <add>, %130, %cst_57 [1] : vector<4x16xf32> to vector<4xf32>
    %132 = vector.shape_cast %131 : vector<4xf32> to vector<4x1xf32>
    %133 = tpu.reciprocal %132 {approx = true} : vector<4x1xf32> -> vector<4x1xf32>
    %134 = vector.broadcast %133 : vector<4x1xf32> to vector<4x16xf32>
    %135 = arith.mulf %130, %134 : vector<4x16xf32>
    %c0_58 = arith.constant 0 : index
    %c0_59 = arith.constant 0 : index
    %c2_60 = arith.constant 2 : index
    %c0_61 = arith.constant 0 : index
    %136 = vector.load %arg8[%c0_58, %c0_59, %c2_60, %c0_61] : memref<1x4x8x16xf32, #tpu.memory_space<vmem>>, vector<1x4x1x16xf32>
    %137 = vector.shape_cast %136 : vector<1x4x1x16xf32> to vector<4x16xf32>
    %138 = vector.shape_cast %135 : vector<4x16xf32> to vector<1x4x1x16xf32>
    tpu.vector_store %arg8[%c0_58, %c0_59, %c2_60, %c0_61], %138 {strides = array<i32>} : memref<1x4x8x16xf32, #tpu.memory_space<vmem>>, vector<1x4x1x16xf32>,
    %c0_62 = arith.constant 0 : index
    %c3 = arith.constant 3 : index
    %c0_63 = arith.constant 0 : index
    %c0_64 = arith.constant 0 : index
    %139 = vector.load %arg2[%c0_62, %c3, %c0_63, %c0_64] : memref<1x8x16x128xf32, #tpu.memory_space<vmem>>, vector<1x1x16x128xf32>
    %140 = vector.shape_cast %139 : vector<1x1x16x128xf32> to vector<16x128xf32>
    %c0_65 = arith.constant 0 : index
    %c0_66 = arith.constant 0 : index
    %c384 = arith.constant 384 : index
    %141 = vector.load %arg3[%c0_65, %c0_66, %c384] : memref<1x16x1024xf32, #tpu.memory_space<vmem>>, vector<1x16x128xf32>
    %142 = vector.shape_cast %141 : vector<1x16x128xf32> to vector<16x128xf32>
    %143 = arith.addf %140, %142 : vector<16x128xf32>
    %cst_67 = arith.constant 5.000000e-01 : f32
    %144 = vector.broadcast %cst_67 : f32 to vector<16x128xf32>
    %145 = arith.mulf %144, %143 : vector<16x128xf32>
    %cst_68 = arith.constant dense<0.000000e+00> : vector<16xf32>
    %146 = vector.multi_reduction <add>, %145, %cst_68 [1] : vector<16x128xf32> to vector<16xf32>
    %147 = vector.shape_cast %146 : vector<16xf32> to vector<16x1xf32>
    %cst_69 = arith.constant 1.280000e+02 : f32
    %148 = vector.broadcast %cst_69 : f32 to vector<16x1xf32>
    %149 = arith.divf %147, %148 : vector<16x1xf32>
    %150 = vector.broadcast %149 : vector<16x1xf32> to vector<16x128xf32>
    %151 = arith.subf %145, %150 : vector<16x128xf32>
    %152 = arith.mulf %151, %151 : vector<16x128xf32>
    %cst_70 = arith.constant dense<0.000000e+00> : vector<16xf32>
    %153 = vector.multi_reduction <add>, %152, %cst_70 [1] : vector<16x128xf32> to vector<16xf32>
    %154 = vector.shape_cast %153 : vector<16xf32> to vector<16x1xf32>
    %cst_71 = arith.constant 1.280000e+02 : f32
    %155 = vector.broadcast %cst_71 : f32 to vector<16x1xf32>
    %156 = arith.divf %154, %155 : vector<16x1xf32>
    %157 = vector.broadcast %149 : vector<16x1xf32> to vector<16x128xf32>
    %158 = arith.subf %145, %157 : vector<16x128xf32>
    %cst_72 = arith.constant 9.99999974E-6 : f32
    %159 = vector.broadcast %cst_72 : f32 to vector<16x1xf32>
    %160 = arith.addf %156, %159 : vector<16x1xf32>
    %161 = math.rsqrt %160 : vector<16x1xf32>
    %162 = vector.broadcast %161 : vector<16x1xf32> to vector<16x128xf32>
    %163 = arith.mulf %158, %162 : vector<16x128xf32>
    %164 = vector.broadcast %0 : vector<1x128xf32> to vector<16x128xf32>
    %165 = arith.mulf %163, %164 : vector<16x128xf32>
    %166 = vector.broadcast %1 : vector<1x128xf32> to vector<16x128xf32>
    %167 = arith.addf %165, %166 : vector<16x128xf32>
    %cst_73 = arith.constant dense<0.000000e+00> : vector<4x16xf32>
    %168 = tpu.matmul %2, %167, %cst_73 {dimension_numbers = #tpu.dot_dimension_numbers<[1], [1], [0], [0], [0, 0, 1, 0], [], []>} : vector<4x128xf32>, vector<16x128xf32>, vector<4x16xf32> -> vector<4x16xf32>
    %169 = vector.broadcast %3 : vector<4x1xf32> to vector<4x16xf32>
    %170 = arith.addf %168, %169 : vector<4x16xf32>
    %cst_74 = arith.constant dense<0xFF800000> : vector<4xf32>
    %171 = vector.multi_reduction <maximumf>, %170, %cst_74 [1] : vector<4x16xf32> to vector<4xf32>
    %172 = vector.shape_cast %171 : vector<4xf32> to vector<4x1xf32>
    %173 = vector.broadcast %172 : vector<4x1xf32> to vector<4x16xf32>
    %174 = arith.subf %170, %173 : vector<4x16xf32>
    %175 = math.exp %174 : vector<4x16xf32>
    %cst_75 = arith.constant dense<0.000000e+00> : vector<4xf32>
    %176 = vector.multi_reduction <add>, %175, %cst_75 [1] : vector<4x16xf32> to vector<4xf32>
    %177 = vector.shape_cast %176 : vector<4xf32> to vector<4x1xf32>
    %178 = tpu.reciprocal %177 {approx = true} : vector<4x1xf32> -> vector<4x1xf32>
    %179 = vector.broadcast %178 : vector<4x1xf32> to vector<4x16xf32>
    %180 = arith.mulf %175, %179 : vector<4x16xf32>
    %c0_76 = arith.constant 0 : index
    %c0_77 = arith.constant 0 : index
    %c3_78 = arith.constant 3 : index
    %c0_79 = arith.constant 0 : index
    %181 = vector.load %arg8[%c0_76, %c0_77, %c3_78, %c0_79] : memref<1x4x8x16xf32, #tpu.memory_space<vmem>>, vector<1x4x1x16xf32>
    %182 = vector.shape_cast %181 : vector<1x4x1x16xf32> to vector<4x16xf32>
    %183 = vector.shape_cast %180 : vector<4x16xf32> to vector<1x4x1x16xf32>
    tpu.vector_store %arg8[%c0_76, %c0_77, %c3_78, %c0_79], %183 {strides = array<i32>} : memref<1x4x8x16xf32, #tpu.memory_space<vmem>>, vector<1x4x1x16xf32>,
    %c0_80 = arith.constant 0 : index
    %c4 = arith.constant 4 : index
    %c0_81 = arith.constant 0 : index
    %c0_82 = arith.constant 0 : index
    %184 = vector.load %arg2[%c0_80, %c4, %c0_81, %c0_82] : memref<1x8x16x128xf32, #tpu.memory_space<vmem>>, vector<1x1x16x128xf32>
    %185 = vector.shape_cast %184 : vector<1x1x16x128xf32> to vector<16x128xf32>
    %c0_83 = arith.constant 0 : index
    %c0_84 = arith.constant 0 : index
    %c512 = arith.constant 512 : index
    %186 = vector.load %arg3[%c0_83, %c0_84, %c512] : memref<1x16x1024xf32, #tpu.memory_space<vmem>>, vector<1x16x128xf32>
    %187 = vector.shape_cast %186 : vector<1x16x128xf32> to vector<16x128xf32>
    %188 = arith.addf %185, %187 : vector<16x128xf32>
    %cst_85 = arith.constant 5.000000e-01 : f32
    %189 = vector.broadcast %cst_85 : f32 to vector<16x128xf32>
    %190 = arith.mulf %189, %188 : vector<16x128xf32>
    %cst_86 = arith.constant dense<0.000000e+00> : vector<16xf32>
    %191 = vector.multi_reduction <add>, %190, %cst_86 [1] : vector<16x128xf32> to vector<16xf32>
    %192 = vector.shape_cast %191 : vector<16xf32> to vector<16x1xf32>
    %cst_87 = arith.constant 1.280000e+02 : f32
    %193 = vector.broadcast %cst_87 : f32 to vector<16x1xf32>
    %194 = arith.divf %192, %193 : vector<16x1xf32>
    %195 = vector.broadcast %194 : vector<16x1xf32> to vector<16x128xf32>
    %196 = arith.subf %190, %195 : vector<16x128xf32>
    %197 = arith.mulf %196, %196 : vector<16x128xf32>
    %cst_88 = arith.constant dense<0.000000e+00> : vector<16xf32>
    %198 = vector.multi_reduction <add>, %197, %cst_88 [1] : vector<16x128xf32> to vector<16xf32>
    %199 = vector.shape_cast %198 : vector<16xf32> to vector<16x1xf32>
    %cst_89 = arith.constant 1.280000e+02 : f32
    %200 = vector.broadcast %cst_89 : f32 to vector<16x1xf32>
    %201 = arith.divf %199, %200 : vector<16x1xf32>
    %202 = vector.broadcast %194 : vector<16x1xf32> to vector<16x128xf32>
    %203 = arith.subf %190, %202 : vector<16x128xf32>
    %cst_90 = arith.constant 9.99999974E-6 : f32
    %204 = vector.broadcast %cst_90 : f32 to vector<16x1xf32>
    %205 = arith.addf %201, %204 : vector<16x1xf32>
    %206 = math.rsqrt %205 : vector<16x1xf32>
    %207 = vector.broadcast %206 : vector<16x1xf32> to vector<16x128xf32>
    %208 = arith.mulf %203, %207 : vector<16x128xf32>
    %209 = vector.broadcast %0 : vector<1x128xf32> to vector<16x128xf32>
    %210 = arith.mulf %208, %209 : vector<16x128xf32>
    %211 = vector.broadcast %1 : vector<1x128xf32> to vector<16x128xf32>
    %212 = arith.addf %210, %211 : vector<16x128xf32>
    %cst_91 = arith.constant dense<0.000000e+00> : vector<4x16xf32>
    %213 = tpu.matmul %2, %212, %cst_91 {dimension_numbers = #tpu.dot_dimension_numbers<[1], [1], [0], [0], [0, 0, 1, 0], [], []>} : vector<4x128xf32>, vector<16x128xf32>, vector<4x16xf32> -> vector<4x16xf32>
    %214 = vector.broadcast %3 : vector<4x1xf32> to vector<4x16xf32>
    %215 = arith.addf %213, %214 : vector<4x16xf32>
    %cst_92 = arith.constant dense<0xFF800000> : vector<4xf32>
    %216 = vector.multi_reduction <maximumf>, %215, %cst_92 [1] : vector<4x16xf32> to vector<4xf32>
    %217 = vector.shape_cast %216 : vector<4xf32> to vector<4x1xf32>
    %218 = vector.broadcast %217 : vector<4x1xf32> to vector<4x16xf32>
    %219 = arith.subf %215, %218 : vector<4x16xf32>
    %220 = math.exp %219 : vector<4x16xf32>
    %cst_93 = arith.constant dense<0.000000e+00> : vector<4xf32>
    %221 = vector.multi_reduction <add>, %220, %cst_93 [1] : vector<4x16xf32> to vector<4xf32>
    %222 = vector.shape_cast %221 : vector<4xf32> to vector<4x1xf32>
    %223 = tpu.reciprocal %222 {approx = true} : vector<4x1xf32> -> vector<4x1xf32>
    %224 = vector.broadcast %223 : vector<4x1xf32> to vector<4x16xf32>
    %225 = arith.mulf %220, %224 : vector<4x16xf32>
    %c0_94 = arith.constant 0 : index
    %c0_95 = arith.constant 0 : index
    %c4_96 = arith.constant 4 : index
    %c0_97 = arith.constant 0 : index
    %226 = vector.load %arg8[%c0_94, %c0_95, %c4_96, %c0_97] : memref<1x4x8x16xf32, #tpu.memory_space<vmem>>, vector<1x4x1x16xf32>
    %227 = vector.shape_cast %226 : vector<1x4x1x16xf32> to vector<4x16xf32>
    %228 = vector.shape_cast %225 : vector<4x16xf32> to vector<1x4x1x16xf32>
    tpu.vector_store %arg8[%c0_94, %c0_95, %c4_96, %c0_97], %228 {strides = array<i32>} : memref<1x4x8x16xf32, #tpu.memory_space<vmem>>, vector<1x4x1x16xf32>,
    %c0_98 = arith.constant 0 : index
    %c5 = arith.constant 5 : index
    %c0_99 = arith.constant 0 : index
    %c0_100 = arith.constant 0 : index
    %229 = vector.load %arg2[%c0_98, %c5, %c0_99, %c0_100] : memref<1x8x16x128xf32, #tpu.memory_space<vmem>>, vector<1x1x16x128xf32>
    %230 = vector.shape_cast %229 : vector<1x1x16x128xf32> to vector<16x128xf32>
    %c0_101 = arith.constant 0 : index
    %c0_102 = arith.constant 0 : index
    %c640 = arith.constant 640 : index
    %231 = vector.load %arg3[%c0_101, %c0_102, %c640] : memref<1x16x1024xf32, #tpu.memory_space<vmem>>, vector<1x16x128xf32>
    %232 = vector.shape_cast %231 : vector<1x16x128xf32> to vector<16x128xf32>
    %233 = arith.addf %230, %232 : vector<16x128xf32>
    %cst_103 = arith.constant 5.000000e-01 : f32
    %234 = vector.broadcast %cst_103 : f32 to vector<16x128xf32>
    %235 = arith.mulf %234, %233 : vector<16x128xf32>
    %cst_104 = arith.constant dense<0.000000e+00> : vector<16xf32>
    %236 = vector.multi_reduction <add>, %235, %cst_104 [1] : vector<16x128xf32> to vector<16xf32>
    %237 = vector.shape_cast %236 : vector<16xf32> to vector<16x1xf32>
    %cst_105 = arith.constant 1.280000e+02 : f32
    %238 = vector.broadcast %cst_105 : f32 to vector<16x1xf32>
    %239 = arith.divf %237, %238 : vector<16x1xf32>
    %240 = vector.broadcast %239 : vector<16x1xf32> to vector<16x128xf32>
    %241 = arith.subf %235, %240 : vector<16x128xf32>
    %242 = arith.mulf %241, %241 : vector<16x128xf32>
    %cst_106 = arith.constant dense<0.000000e+00> : vector<16xf32>
    %243 = vector.multi_reduction <add>, %242, %cst_106 [1] : vector<16x128xf32> to vector<16xf32>
    %244 = vector.shape_cast %243 : vector<16xf32> to vector<16x1xf32>
    %cst_107 = arith.constant 1.280000e+02 : f32
    %245 = vector.broadcast %cst_107 : f32 to vector<16x1xf32>
    %246 = arith.divf %244, %245 : vector<16x1xf32>
    %247 = vector.broadcast %239 : vector<16x1xf32> to vector<16x128xf32>
    %248 = arith.subf %235, %247 : vector<16x128xf32>
    %cst_108 = arith.constant 9.99999974E-6 : f32
    %249 = vector.broadcast %cst_108 : f32 to vector<16x1xf32>
    %250 = arith.addf %246, %249 : vector<16x1xf32>
    %251 = math.rsqrt %250 : vector<16x1xf32>
    %252 = vector.broadcast %251 : vector<16x1xf32> to vector<16x128xf32>
    %253 = arith.mulf %248, %252 : vector<16x128xf32>
    %254 = vector.broadcast %0 : vector<1x128xf32> to vector<16x128xf32>
    %255 = arith.mulf %253, %254 : vector<16x128xf32>
    %256 = vector.broadcast %1 : vector<1x128xf32> to vector<16x128xf32>
    %257 = arith.addf %255, %256 : vector<16x128xf32>
    %cst_109 = arith.constant dense<0.000000e+00> : vector<4x16xf32>
    %258 = tpu.matmul %2, %257, %cst_109 {dimension_numbers = #tpu.dot_dimension_numbers<[1], [1], [0], [0], [0, 0, 1, 0], [], []>} : vector<4x128xf32>, vector<16x128xf32>, vector<4x16xf32> -> vector<4x16xf32>
    %259 = vector.broadcast %3 : vector<4x1xf32> to vector<4x16xf32>
    %260 = arith.addf %258, %259 : vector<4x16xf32>
    %cst_110 = arith.constant dense<0xFF800000> : vector<4xf32>
    %261 = vector.multi_reduction <maximumf>, %260, %cst_110 [1] : vector<4x16xf32> to vector<4xf32>
    %262 = vector.shape_cast %261 : vector<4xf32> to vector<4x1xf32>
    %263 = vector.broadcast %262 : vector<4x1xf32> to vector<4x16xf32>
    %264 = arith.subf %260, %263 : vector<4x16xf32>
    %265 = math.exp %264 : vector<4x16xf32>
    %cst_111 = arith.constant dense<0.000000e+00> : vector<4xf32>
    %266 = vector.multi_reduction <add>, %265, %cst_111 [1] : vector<4x16xf32> to vector<4xf32>
    %267 = vector.shape_cast %266 : vector<4xf32> to vector<4x1xf32>
    %268 = tpu.reciprocal %267 {approx = true} : vector<4x1xf32> -> vector<4x1xf32>
    %269 = vector.broadcast %268 : vector<4x1xf32> to vector<4x16xf32>
    %270 = arith.mulf %265, %269 : vector<4x16xf32>
    %c0_112 = arith.constant 0 : index
    %c0_113 = arith.constant 0 : index
    %c5_114 = arith.constant 5 : index
    %c0_115 = arith.constant 0 : index
    %271 = vector.load %arg8[%c0_112, %c0_113, %c5_114, %c0_115] : memref<1x4x8x16xf32, #tpu.memory_space<vmem>>, vector<1x4x1x16xf32>
    %272 = vector.shape_cast %271 : vector<1x4x1x16xf32> to vector<4x16xf32>
    %273 = vector.shape_cast %270 : vector<4x16xf32> to vector<1x4x1x16xf32>
    tpu.vector_store %arg8[%c0_112, %c0_113, %c5_114, %c0_115], %273 {strides = array<i32>} : memref<1x4x8x16xf32, #tpu.memory_space<vmem>>, vector<1x4x1x16xf32>,
    %c0_116 = arith.constant 0 : index
    %c6 = arith.constant 6 : index
    %c0_117 = arith.constant 0 : index
    %c0_118 = arith.constant 0 : index
    %274 = vector.load %arg2[%c0_116, %c6, %c0_117, %c0_118] : memref<1x8x16x128xf32, #tpu.memory_space<vmem>>, vector<1x1x16x128xf32>
    %275 = vector.shape_cast %274 : vector<1x1x16x128xf32> to vector<16x128xf32>
    %c0_119 = arith.constant 0 : index
    %c0_120 = arith.constant 0 : index
    %c768 = arith.constant 768 : index
    %276 = vector.load %arg3[%c0_119, %c0_120, %c768] : memref<1x16x1024xf32, #tpu.memory_space<vmem>>, vector<1x16x128xf32>
    %277 = vector.shape_cast %276 : vector<1x16x128xf32> to vector<16x128xf32>
    %278 = arith.addf %275, %277 : vector<16x128xf32>
    %cst_121 = arith.constant 5.000000e-01 : f32
    %279 = vector.broadcast %cst_121 : f32 to vector<16x128xf32>
    %280 = arith.mulf %279, %278 : vector<16x128xf32>
    %cst_122 = arith.constant dense<0.000000e+00> : vector<16xf32>
    %281 = vector.multi_reduction <add>, %280, %cst_122 [1] : vector<16x128xf32> to vector<16xf32>
    %282 = vector.shape_cast %281 : vector<16xf32> to vector<16x1xf32>
    %cst_123 = arith.constant 1.280000e+02 : f32
    %283 = vector.broadcast %cst_123 : f32 to vector<16x1xf32>
    %284 = arith.divf %282, %283 : vector<16x1xf32>
    %285 = vector.broadcast %284 : vector<16x1xf32> to vector<16x128xf32>
    %286 = arith.subf %280, %285 : vector<16x128xf32>
    %287 = arith.mulf %286, %286 : vector<16x128xf32>
    %cst_124 = arith.constant dense<0.000000e+00> : vector<16xf32>
    %288 = vector.multi_reduction <add>, %287, %cst_124 [1] : vector<16x128xf32> to vector<16xf32>
    %289 = vector.shape_cast %288 : vector<16xf32> to vector<16x1xf32>
    %cst_125 = arith.constant 1.280000e+02 : f32
    %290 = vector.broadcast %cst_125 : f32 to vector<16x1xf32>
    %291 = arith.divf %289, %290 : vector<16x1xf32>
    %292 = vector.broadcast %284 : vector<16x1xf32> to vector<16x128xf32>
    %293 = arith.subf %280, %292 : vector<16x128xf32>
    %cst_126 = arith.constant 9.99999974E-6 : f32
    %294 = vector.broadcast %cst_126 : f32 to vector<16x1xf32>
    %295 = arith.addf %291, %294 : vector<16x1xf32>
    %296 = math.rsqrt %295 : vector<16x1xf32>
    %297 = vector.broadcast %296 : vector<16x1xf32> to vector<16x128xf32>
    %298 = arith.mulf %293, %297 : vector<16x128xf32>
    %299 = vector.broadcast %0 : vector<1x128xf32> to vector<16x128xf32>
    %300 = arith.mulf %298, %299 : vector<16x128xf32>
    %301 = vector.broadcast %1 : vector<1x128xf32> to vector<16x128xf32>
    %302 = arith.addf %300, %301 : vector<16x128xf32>
    %cst_127 = arith.constant dense<0.000000e+00> : vector<4x16xf32>
    %303 = tpu.matmul %2, %302, %cst_127 {dimension_numbers = #tpu.dot_dimension_numbers<[1], [1], [0], [0], [0, 0, 1, 0], [], []>} : vector<4x128xf32>, vector<16x128xf32>, vector<4x16xf32> -> vector<4x16xf32>
    %304 = vector.broadcast %3 : vector<4x1xf32> to vector<4x16xf32>
    %305 = arith.addf %303, %304 : vector<4x16xf32>
    %cst_128 = arith.constant dense<0xFF800000> : vector<4xf32>
    %306 = vector.multi_reduction <maximumf>, %305, %cst_128 [1] : vector<4x16xf32> to vector<4xf32>
    %307 = vector.shape_cast %306 : vector<4xf32> to vector<4x1xf32>
    %308 = vector.broadcast %307 : vector<4x1xf32> to vector<4x16xf32>
    %309 = arith.subf %305, %308 : vector<4x16xf32>
    %310 = math.exp %309 : vector<4x16xf32>
    %cst_129 = arith.constant dense<0.000000e+00> : vector<4xf32>
    %311 = vector.multi_reduction <add>, %310, %cst_129 [1] : vector<4x16xf32> to vector<4xf32>
    %312 = vector.shape_cast %311 : vector<4xf32> to vector<4x1xf32>
    %313 = tpu.reciprocal %312 {approx = true} : vector<4x1xf32> -> vector<4x1xf32>
    %314 = vector.broadcast %313 : vector<4x1xf32> to vector<4x16xf32>
    %315 = arith.mulf %310, %314 : vector<4x16xf32>
    %c0_130 = arith.constant 0 : index
    %c0_131 = arith.constant 0 : index
    %c6_132 = arith.constant 6 : index
    %c0_133 = arith.constant 0 : index
    %316 = vector.load %arg8[%c0_130, %c0_131, %c6_132, %c0_133] : memref<1x4x8x16xf32, #tpu.memory_space<vmem>>, vector<1x4x1x16xf32>
    %317 = vector.shape_cast %316 : vector<1x4x1x16xf32> to vector<4x16xf32>
    %318 = vector.shape_cast %315 : vector<4x16xf32> to vector<1x4x1x16xf32>
    tpu.vector_store %arg8[%c0_130, %c0_131, %c6_132, %c0_133], %318 {strides = array<i32>} : memref<1x4x8x16xf32, #tpu.memory_space<vmem>>, vector<1x4x1x16xf32>,
    %c0_134 = arith.constant 0 : index
    %c7 = arith.constant 7 : index
    %c0_135 = arith.constant 0 : index
    %c0_136 = arith.constant 0 : index
    %319 = vector.load %arg2[%c0_134, %c7, %c0_135, %c0_136] : memref<1x8x16x128xf32, #tpu.memory_space<vmem>>, vector<1x1x16x128xf32>
    %320 = vector.shape_cast %319 : vector<1x1x16x128xf32> to vector<16x128xf32>
    %c0_137 = arith.constant 0 : index
    %c0_138 = arith.constant 0 : index
    %c896 = arith.constant 896 : index
    %321 = vector.load %arg3[%c0_137, %c0_138, %c896] : memref<1x16x1024xf32, #tpu.memory_space<vmem>>, vector<1x16x128xf32>
    %322 = vector.shape_cast %321 : vector<1x16x128xf32> to vector<16x128xf32>
    %323 = arith.addf %320, %322 : vector<16x128xf32>
    %cst_139 = arith.constant 5.000000e-01 : f32
    %324 = vector.broadcast %cst_139 : f32 to vector<16x128xf32>
    %325 = arith.mulf %324, %323 : vector<16x128xf32>
    %cst_140 = arith.constant dense<0.000000e+00> : vector<16xf32>
    %326 = vector.multi_reduction <add>, %325, %cst_140 [1] : vector<16x128xf32> to vector<16xf32>
    %327 = vector.shape_cast %326 : vector<16xf32> to vector<16x1xf32>
    %cst_141 = arith.constant 1.280000e+02 : f32
    %328 = vector.broadcast %cst_141 : f32 to vector<16x1xf32>
    %329 = arith.divf %327, %328 : vector<16x1xf32>
    %330 = vector.broadcast %329 : vector<16x1xf32> to vector<16x128xf32>
    %331 = arith.subf %325, %330 : vector<16x128xf32>
    %332 = arith.mulf %331, %331 : vector<16x128xf32>
    %cst_142 = arith.constant dense<0.000000e+00> : vector<16xf32>
    %333 = vector.multi_reduction <add>, %332, %cst_142 [1] : vector<16x128xf32> to vector<16xf32>
    %334 = vector.shape_cast %333 : vector<16xf32> to vector<16x1xf32>
    %cst_143 = arith.constant 1.280000e+02 : f32
    %335 = vector.broadcast %cst_143 : f32 to vector<16x1xf32>
    %336 = arith.divf %334, %335 : vector<16x1xf32>
    %337 = vector.broadcast %329 : vector<16x1xf32> to vector<16x128xf32>
    %338 = arith.subf %325, %337 : vector<16x128xf32>
    %cst_144 = arith.constant 9.99999974E-6 : f32
    %339 = vector.broadcast %cst_144 : f32 to vector<16x1xf32>
    %340 = arith.addf %336, %339 : vector<16x1xf32>
    %341 = math.rsqrt %340 : vector<16x1xf32>
    %342 = vector.broadcast %341 : vector<16x1xf32> to vector<16x128xf32>
    %343 = arith.mulf %338, %342 : vector<16x128xf32>
    %344 = vector.broadcast %0 : vector<1x128xf32> to vector<16x128xf32>
    %345 = arith.mulf %343, %344 : vector<16x128xf32>
    %346 = vector.broadcast %1 : vector<1x128xf32> to vector<16x128xf32>
    %347 = arith.addf %345, %346 : vector<16x128xf32>
    %cst_145 = arith.constant dense<0.000000e+00> : vector<4x16xf32>
    %348 = tpu.matmul %2, %347, %cst_145 {dimension_numbers = #tpu.dot_dimension_numbers<[1], [1], [0], [0], [0, 0, 1, 0], [], []>} : vector<4x128xf32>, vector<16x128xf32>, vector<4x16xf32> -> vector<4x16xf32>
    %349 = vector.broadcast %3 : vector<4x1xf32> to vector<4x16xf32>
    %350 = arith.addf %348, %349 : vector<4x16xf32>
    %cst_146 = arith.constant dense<0xFF800000> : vector<4xf32>
    %351 = vector.multi_reduction <maximumf>, %350, %cst_146 [1] : vector<4x16xf32> to vector<4xf32>
    %352 = vector.shape_cast %351 : vector<4xf32> to vector<4x1xf32>
    %353 = vector.broadcast %352 : vector<4x1xf32> to vector<4x16xf32>
    %354 = arith.subf %350, %353 : vector<4x16xf32>
    %355 = math.exp %354 : vector<4x16xf32>
    %cst_147 = arith.constant dense<0.000000e+00> : vector<4xf32>
    %356 = vector.multi_reduction <add>, %355, %cst_147 [1] : vector<4x16xf32> to vector<4xf32>
    %357 = vector.shape_cast %356 : vector<4xf32> to vector<4x1xf32>
    %358 = tpu.reciprocal %357 {approx = true} : vector<4x1xf32> -> vector<4x1xf32>
    %359 = vector.broadcast %358 : vector<4x1xf32> to vector<4x16xf32>
    %360 = arith.mulf %355, %359 : vector<4x16xf32>
    %c0_148 = arith.constant 0 : index
    %c0_149 = arith.constant 0 : index
    %c7_150 = arith.constant 7 : index
    %c0_151 = arith.constant 0 : index
    %361 = vector.load %arg8[%c0_148, %c0_149, %c7_150, %c0_151] : memref<1x4x8x16xf32, #tpu.memory_space<vmem>>, vector<1x4x1x16xf32>
    %362 = vector.shape_cast %361 : vector<1x4x1x16xf32> to vector<4x16xf32>
    %363 = vector.shape_cast %360 : vector<4x16xf32> to vector<1x4x1x16xf32>
    tpu.vector_store %arg8[%c0_148, %c0_149, %c7_150, %c0_151], %363 {strides = array<i32>} : memref<1x4x8x16xf32, #tpu.memory_space<vmem>>, vector<1x4x1x16xf32>,
    return
  }
  func.func @transform_0(%arg0: i32, %arg1: i32) -> (i32, i32, i32, i32) {
    %c0_i32 = arith.constant 0 : i32
    %c0_i32_0 = arith.constant 0 : i32
    %c0_i32_1 = arith.constant 0 : i32
    return %arg0, %arg1, %c0_i32, %c0_i32_0 : i32, i32, i32, i32
  }
  func.func @transform_1(%arg0: i32, %arg1: i32) -> (i32, i32, i32) {
    %c0_i32 = arith.constant 0 : i32
    %c0_i32_0 = arith.constant 0 : i32
    return %arg0, %c0_i32, %arg1 : i32, i32, i32
  }
  func.func @transform_2(%arg0: i32, %arg1: i32) -> (i32, i32) {
    %c0_i32 = arith.constant 0 : i32
    %c0_i32_0 = arith.constant 0 : i32
    %c0_i32_1 = arith.constant 0 : i32
    return %c0_i32, %c0_i32_0 : i32, i32
  }
  func.func @transform_3(%arg0: i32, %arg1: i32) -> (i32, i32) {
    %c0_i32 = arith.constant 0 : i32
    %c0_i32_0 = arith.constant 0 : i32
    %c0_i32_1 = arith.constant 0 : i32
    return %c0_i32, %c0_i32_0 : i32, i32
  }
  func.func @transform_4(%arg0: i32, %arg1: i32) -> (i32, i32) {
    %c0_i32 = arith.constant 0 : i32
    %c0_i32_0 = arith.constant 0 : i32
    %c0_i32_1 = arith.constant 0 : i32
    return %c0_i32, %c0_i32_0 : i32, i32
  }
  func.func @transform_5(%arg0: i32, %arg1: i32) -> (i32, i32) {
    %c0_i32 = arith.constant 0 : i32
    %c0_i32_0 = arith.constant 0 : i32
    %c0_i32_1 = arith.constant 0 : i32
    return %c0_i32, %c0_i32_0 : i32, i32
  }
  func.func @transform_6(%arg0: i32, %arg1: i32) -> (i32, i32, i32, i32) {
    %c0_i32 = arith.constant 0 : i32
    %c0_i32_0 = arith.constant 0 : i32
    %c0_i32_1 = arith.constant 0 : i32
    return %arg0, %c0_i32, %arg1, %c0_i32_0 : i32, i32, i32, i32
  }
}

</mosaic_0001>

<bundles_post_ra>
// kernel: pair2msa_forward.2
= control target key start
LH: loop header
LB: loop body
LE: loop exit
PB: predicated region body
PF: predicated region fallthrough
CT: control target
= control target key end

     0   :  { %s2080_s21 = smov 0   ;;  %s2082_s22 = smov 0   ;;  %s2602_s0 = inlined_call_operand.vmem [shape: f32[2,16,16,128], index: 0, kind: input, shape index: {}]   ;;  %s2603_s1 = inlined_call_operand.vmem [shape: f32[2,16,2048], index: 1, kind: input, shape index: {}]   ;;  %s2604_s2 = inlined_call_operand.vmem [shape: f32[1,128], index: 2, kind: input, shape index: {}]   ;;  %s2605_s3 = inlined_call_operand.vmem [shape: f32[1,128], index: 3, kind: input, shape index: {}]   ;;  %s2606_s4 = inlined_call_operand.vmem [shape: f32[4,128], index: 4, kind: input, shape index: {}]   ;;  %s2607_s5 = inlined_call_operand.vmem [shape: f32[4,1], index: 5, kind: input, shape index: {}]   ;;  %s2608_s6 = inlined_call_operand.vmem [shape: f32[2,4,16,16], index: 6, kind: output, shape index: {}]  }
   0x1   :  { %s2084_s23 = smov 0   ;;  %s2086_s24 = smov 0  }
   0x2   :  { %s2088_s25 = smov 0   ;;  %s2090_s26 = smov 0  }
   0x3   :  { %s2092_s27 = smov 0  }
   0x4 LB: > { %s25_s28 = sadd.s32 1, %s2030_s25  ;;  %s28_s29 = sadd.s32 1, %s2034_s26  ;;  %s2038_s27 = sphi %s2092_s27, %s16_s27   ;;  %s2034_s26 = sphi %s2090_s26, %s2615_s26   ;;  %s2030_s25 = sphi %s2088_s25, %s2614_s25   ;;  %s2026_s24 = sphi %s2086_s24, %s2613_s24   ;;  %s2022_s23 = sphi %s2084_s23, %s2612_s23   ;;  %s2018_s22 = sphi %s2082_s22, %s2611_s22   ;;  %s2014_s21 = sphi %s2080_s21, %s2610_s21  }
   0x5   : > { %p26_p0 = scmp.ge.s32.totalorder %s25_s28, 2  ;;  %s1718_s30 = sadd.s32 4294967295, %s2038_s27  }
   0x6   : > { %p72_p1 = scmp.ne.s32.totalorder %s2018_s22, %s2014_s21  ;;  %p73_p2 = scmp.eq.s32.totalorder %s2038_s27, 0 }
   0x7   : > { %s2617_s28 = smov (%p26_p0, %s25_s28), 0  ;;  %s2619_s29 = smov (!%p26_p0, %s28_s29), %s2034_s26 }
   0x8   : > { %p30_p3 = scmp.ge.s32.totalorder %s2619_s29, 2  ;;  %p188_p4 = scmp.eq.s32.totalorder %s1718_s30, 3 }
   0x9   : > { %s61_s7 = ssub.s32 %s2030_s25, %s2617_s28  ;;  %p74_p5 = por %p73_p2, %p72_p1 }
   0xa   : > { %s2621_s29 = smov (%p30_p3, %s2619_s29), 0  ;;  %p2128_p6 = por %p188_p4, %p72_p1 }
   0xb   : > { %s60_s9 = ssub.s32 %s2034_s26, %s2621_s29  ;;  %s65_s11 = sadd.s32 1, %s2018_s22 }
   0xc   : > { %s62_s10 = sor.u32 %s61_s7, %s60_s9  ;;  %p1721_p8 = scmp.ge.s32.totalorder %s2038_s27, 4 }
   0xd   : > { %p63_p7 = scmp.eq.s32.totalorder %s62_s10, 0 }
   0xe   : > { %222 = sbr.rel (%p1721_p8) target bundleno = 36 (0x24), region = 32 }
   0xf   : > { %s2136_s12 = scalar_select %p63_p7, %s2018_s22, %s65_s11  }
  0x15   : > { %239 = sbr.rel (!%p74_p5) target bundleno = 36 (0x24), region = 40  ;;  %s241_s13 = sand.u32 (%p74_p5), 1, %s2018_s22  }
  0x16   : > { %s1723_s14 = sshll.u32 (%p74_p5), %s2030_s25, 3  ;;  %s1722_s15 = sshll.u32 (%p74_p5), %s241_s13, 7 }
  0x17   : > { %s1724_s16 = sshll.u32 (%p74_p5), %s2034_s26, 5  ;;  %s243_s7 = scalar_lea.vmem (%p74_p5), [#allocation2], %s1722_s15 }
  0x18   : > { %s246_s17 = sadd.s32 (%p74_p5), %s1724_s16, %s1723_s14 }
  0x19   : > { %s1725_s18 = sshll.u32 (%p74_p5), %s246_s17, 3 }
  0x1a   : > { %s2145_s30 = scalar_lea.vmem (%p74_p5), %s2603_s1, %s1725_s18 }
  0x1b   : > { %v261_v0 = vld [vmem:[%s2145_s30] sm:$0xff] (%p74_p5)  ;;  %v263_v1 = vld [vmem:[%s2145_s30 + $0x8] sm:$0xff] (%p74_p5)  ;;  %v265_v2 = vld [vmem:[%s2145_s30 + $0x10] sm:$0xff] (%p74_p5) }
  0x1c   : > { %262 = vst [vmem:[%s243_s7] sm:$0xff] %v261_v0  ;;  %264 = vst [vmem:[%s243_s7 + $0x8] sm:$0xff] %v263_v1  ;;  %v267_v3 = vld [vmem:[%s2145_s30 + $0x18] sm:$0xff]  ;;  %v269_v4 = vld [vmem:[%s2145_s30 + $0x20] sm:$0xff] }
  0x1d   : > { %266 = vst [vmem:[%s243_s7 + $0x10] sm:$0xff] %v265_v2  ;;  %v271_v5 = vld [vmem:[%s2145_s30 + $0x28] sm:$0xff]  ;;  %268 = vst [vmem:[%s243_s7 + $0x18] sm:$0xff] %v267_v3  ;;  %v273_v6 = vld [vmem:[%s2145_s30 + $0x30] sm:$0xff] }
  0x1e   : > { %270 = vst [vmem:[%s243_s7 + $0x20] sm:$0xff] %v269_v4  ;;  %272 = vst [vmem:[%s243_s7 + $0x28] sm:$0xff] %v271_v5  ;;  %v275_v7 = vld [vmem:[%s2145_s30 + $0x38] sm:$0xff]  ;;  %v277_v8 = vld [vmem:[%s2145_s30 + $0x80] sm:$0xff] }
  0x1f   : > { %274 = vst [vmem:[%s243_s7 + $0x30] sm:$0xff] %v273_v6  ;;  %276 = vst [vmem:[%s243_s7 + $0x38] sm:$0xff] %v275_v7  ;;  %v279_v9 = vld [vmem:[%s2145_s30 + $0x88] sm:$0xff]  ;;  %v281_v10 = vld [vmem:[%s2145_s30 + $0x90] sm:$0xff] }
  0x20   : > { %278 = vst [vmem:[%s243_s7 + $0x40] sm:$0xff] %v277_v8  ;;  %v283_v11 = vld [vmem:[%s2145_s30 + $0x98] sm:$0xff]  ;;  %280 = vst [vmem:[%s243_s7 + $0x48] sm:$0xff] %v279_v9  ;;  %v285_v12 = vld [vmem:[%s2145_s30 + $0xa0] sm:$0xff] }
  0x21   : > { %282 = vst [vmem:[%s243_s7 + $0x50] sm:$0xff] %v281_v10  ;;  %284 = vst [vmem:[%s243_s7 + $0x58] sm:$0xff] %v283_v11  ;;  %v287_v13 = vld [vmem:[%s2145_s30 + $0xa8] sm:$0xff]  ;;  %v289_v14 = vld [vmem:[%s2145_s30 + $0xb0] sm:$0xff] }
  0x22   : > { %286 = vst [vmem:[%s243_s7 + $0x60] sm:$0xff] %v285_v12  ;;  %288 = vst [vmem:[%s243_s7 + $0x68] sm:$0xff] %v287_v13  ;;  %v291_v15 = vld [vmem:[%s2145_s30 + $0xb8] sm:$0xff] }
  0x23   : > { %290 = vst [vmem:[%s243_s7 + $0x70] sm:$0xff] %v289_v14  ;;  %292 = vst [vmem:[%s243_s7 + $0x78] sm:$0xff] %v291_v15 }
  0x24 PF: > { %p1726_p9 = scmp.ge.s32.totalorder %s2038_s27, 1  ;;  %p297_p10 = scmp.lt.s32.totalorder %s2038_s27, 5 }
  0x26   : > { %p298_p11 = pnand %p1726_p9, %p297_p10 }
  0x27   : > { %s1729_s9 = sshll.u32 (!%p298_p11), %s2022_s23, 3  ;;  %s304_s10 = sand.u32 (!%p298_p11), 1, %s2014_s21   ;;  %vm2041_vm0 = vmmov (!%p298_p11), 0   ;;  %vm480_vm1 = vcmask (!%p298_p11), 125952   ;;  %vm521_vm2 = vcmask (!%p298_p11), 122880  }
  0x28   : > { %301 = sbr.rel (%p298_p11) target bundleno = 955 (0x3bb), region = 63  ;;  %p343_p12 = scmp.lt.s32.totalorder (!%p298_p11), %s2026_s24, 1 }
  0x29   : > { %p345_p13 = scmp.lt.s32.totalorder (!%p298_p11), %s1729_s9, 15  ;;  %s1727_s11 = sshll.u32 (!%p298_p11), %s304_s10, 7 }
  0x2a   : > { %s2171_s18 = scalar_lea.vmem (!%p298_p11), [#allocation2], %s1727_s11 }
  0x2b   : > { %v360_v16 = vld [vmem:[%s2171_s18] sm:$0xff] (!%p298_p11)  ;;  %v529_v17 = vld [vmem:[%s2171_s18 + $0x8] sm:$0xff] (!%p298_p11)  ;;  %v678_v27 = vld [vmem:[%s2171_s18 + $0x10] sm:$0xff] (!%p298_p11) }
  0x2c   : > { %v361_v18 = vld [vmem:[%s2171_s18 + $0x40] sm:$0xff] (!%p298_p11)  ;;  %v530_v19 = vld [vmem:[%s2171_s18 + $0x48] sm:$0xff] (!%p298_p11)  ;;  %v679_v31 = vld [vmem:[%s2171_s18 + $0x50] sm:$0xff] (!%p298_p11) }
  0x2d   : > { %v827_v38 = vld [vmem:[%s2171_s18 + $0x18] sm:$0xff] (!%p298_p11)  ;;  %v976_v46 = vld [vmem:[%s2171_s18 + $0x20] sm:$0xff] (!%p298_p11)  ;;  %v1125_v54 = vld [vmem:[%s2171_s18 + $0x28] sm:$0xff] (!%p298_p11) }
  0x2e   : > { %v828_v41 = vld [vmem:[%s2171_s18 + $0x58] sm:$0xff] (!%p298_p11)  ;;  %v977_v49 = vld [vmem:[%s2171_s18 + $0x60] sm:$0xff] (!%p298_p11)  ;;  %v1126_v57 = vld [vmem:[%s2171_s18 + $0x68] sm:$0xff] (!%p298_p11) }
  0x2f   : > { %s344_s13 = scalar_select %p343_p12, %s2026_s24, 1  ;;  %v1274_v62 = vld [vmem:[%s2171_s18 + $0x30] sm:$0xff]  ;;  %v1423_v6 = vld [vmem:[%s2171_s18 + $0x38] sm:$0xff] }
  0x30   : > { %s2623_s9 = smov (!%p345_p13, %s1729_s9), 15  ;;  %v1275_v1 = vld [vmem:[%s2171_s18 + $0x70] sm:$0xff]  ;;  %v1424_v9 = vld [vmem:[%s2171_s18 + $0x78] sm:$0xff]  ;;  %s1728_s18 = sshll.u32 %s304_s10, 5 }
  0x31   : > { %s1731_s14 = sshll.u32 %s344_s13, 5  ;;  %s1730_s15 = sshll.u32 %s2623_s9, 1 }
  0x32   : > { %s349_s16 = sadd.s32 %s1731_s14, %s1730_s15  ;;  %s2477_s19 = scalar_lea.vmem [#allocation3], %s1728_s18 }
  0x33   : > { %s1732_s17 = sshll.u32 %s349_s16, 3  ;;  %s1750_s21 = sshll.u32 (%p2128_p6), %s2026_s24, 3 }
  0x34   : > { %s2179_s30 = scalar_lea.vmem %s2602_s0, %s1732_s17  ;;  %s1577_s10 = sadd.s32 (%p2128_p6), %s2022_s23, %s1750_s21 }
  0x35   : > { %v358_v20 = vld [vmem:[%s2179_s30] sm:$0xff]  ;;  %v1735_v21 = vld [vmem:[%s2179_s30 + $0x10] sm:$0xff]  ;;  %v359_v22 = vld [vmem:[%s2179_s30 + $0x8] sm:$0xff]  ;;  %s1751_s20 = sshll.u32 (%p2128_p6), %s1577_s10, 3 }
  0x36   : > { %v362_v23 = vadd.f32 %v360_v16, %v358_v20  ;;  %v531_v24 = vadd.f32 %v1735_v21, %v529_v17  ;;  %v363_v25 = vadd.f32 %v361_v18, %v359_v22  ;;  %v1736_v26 = vld [vmem:[%s2179_s30 + $0x18] sm:$0xff]  ;;  %v1737_v29 = vld [vmem:[%s2179_s30 + $0x20] sm:$0xff]  ;;  %v1738_v30 = vld [vmem:[%s2179_s30 + $0x28] sm:$0xff]  ;;  %s1579_s9 = scalar_lea.vmem (%p2128_p6), %s2608_s6, %s1751_s20 }
  0x37   : > { %v532_v28 = vadd.f32 %v1736_v26, %v530_v19  ;;  %v680_v36 = vadd.f32 %v1737_v29, %v678_v27  ;;  %v681_v37 = vadd.f32 %v1738_v30, %v679_v31  ;;  %v1739_v39 = vld [vmem:[%s2179_s30 + $0x30] sm:$0xff]  ;;  %v1740_v40 = vld [vmem:[%s2179_s30 + $0x38] sm:$0xff]  ;;  %v1741_v47 = vld [vmem:[%s2179_s30 + $0x40] sm:$0xff] }
  0x38   : > { %v2190_v32 = vmul.f32 0.5, %v362_v23  ;;  %v2192_v33 = vmul.f32 0.5, %v531_v24  ;;  %v2196_v34 = vmul.f32 0.5, %v363_v25  ;;  %v829_v44 = vadd.f32 %v1739_v39, %v827_v38  ;;  %v1742_v48 = vld [vmem:[%s2179_s30 + $0x48] sm:$0xff]  ;;  %v1743_v55 = vld [vmem:[%s2179_s30 + $0x50] sm:$0xff]  ;;  %v1744_v56 = vld [vmem:[%s2179_s30 + $0x58] sm:$0xff] }
  0x39   : > { %v2198_v35 = vmul.f32 0.5, %v532_v28  ;;  %v2206_v42 = vmul.f32 0.5, %v680_v36  ;;  %v2208_v43 = vmul.f32 0.5, %v681_v37  ;;  %v830_v45 = vadd.f32 %v1740_v40, %v828_v41  ;;  %v1745_v63 = vld [vmem:[%s2179_s30 + $0x60] sm:$0xff]  ;;  %v1746_v0 = vld [vmem:[%s2179_s30 + $0x68] sm:$0xff]  ;;  %v1747_v7 = vld [vmem:[%s2179_s30 + $0x70] sm:$0xff] }
  0x3a   : > { %366 = vadd.xlane.f32.xlu0 %v2190_v32  ;;  %535 = vadd.xlane.f32.xlu1 %v2192_v33  ;;  %v2216_v50 = vmul.f32 0.5, %v829_v44  ;;  %v978_v52 = vadd.f32 %v1741_v47, %v976_v46  ;;  %v979_v53 = vadd.f32 %v1742_v48, %v977_v49  ;;  %v1127_v60 = vadd.f32 %v1743_v55, %v1125_v54  ;;  %v1748_v8 = vld [vmem:[%s2179_s30 + $0x78] sm:$0xff] }
  0x3b   : > { %v2218_v51 = vmul.f32 0.5, %v830_v45  ;;  %v1128_v61 = vadd.f32 %v1744_v56, %v1126_v57  ;;  %v1276_v4 = vadd.f32 %v1745_v63, %v1274_v62  ;;  %v1277_v5 = vadd.f32 %v1746_v0, %v1275_v1 }
  0x3c   : > { %v2226_v58 = vmul.f32 0.5, %v978_v52  ;;  %v2228_v59 = vmul.f32 0.5, %v979_v53  ;;  %v2236_v2 = vmul.f32 0.5, %v1127_v60  ;;  %v1425_v12 = vadd.f32 %v1747_v7, %v1423_v6 }
  0x3d   : > { %v2238_v3 = vmul.f32 0.5, %v1128_v61  ;;  %v2246_v10 = vmul.f32 0.5, %v1276_v4  ;;  %v2248_v11 = vmul.f32 0.5, %v1277_v5  ;;  %v1426_v13 = vadd.f32 %v1748_v8, %v1424_v9 }
  0x3e   : > { %368 = vadd.xlane.f32.xlu0 %v2196_v34  ;;  %537 = vadd.xlane.f32.xlu1 %v2198_v35  ;;  %v2252_v14 = vmul.f32 0.5, %v1425_v12 }
  0x3f   : > { %v2254_v15 = vmul.f32 0.5, %v1426_v13 }
  0x42   : > { %684 = vadd.xlane.f32.xlu0 %v2206_v42  ;;  %686 = vadd.xlane.f32.xlu1 %v2208_v43 }
  0x46   : > { %833 = vadd.xlane.f32.xlu0 %v2216_v50  ;;  %835 = vadd.xlane.f32.xlu1 %v2218_v51 }
  0x4a   : > { %982 = vadd.xlane.f32.xlu0 %v2226_v58  ;;  %984 = vadd.xlane.f32.xlu1 %v2228_v59 }
  0x4e   : > { %1131 = vadd.xlane.f32.xlu0 %v2236_v2  ;;  %1133 = vadd.xlane.f32.xlu1 %v2238_v3 }
  0x52   : > { %1280 = vadd.xlane.f32.xlu0 %v2246_v10  ;;  %1282 = vadd.xlane.f32.xlu1 %v2248_v11 }
  0x56   : > { %1429 = vadd.xlane.f32.xlu0 %v2252_v14  ;;  %1431 = vadd.xlane.f32.xlu1 %v2254_v15 }
  0xc7   : > { %v367_v16 = vpop.xlane.xlu0 %366  ;;  %v536_v17 = vpop.xlane.xlu1 %535 }
  0xc8   : > { %v371_v18 = vmul.f32 0.0078125, %v367_v16  ;;  %v539_v19 = vmul.f32 0.0078125, %v536_v17 }
  0xca   : > { %v2259_v20 = vsub.f32 %v2190_v32, %v371_v18  ;;  %v2262_v21 = vsub.f32 %v2192_v33, %v539_v19  ;;  %v2040_v18 = vmov 0.0|0.0   ;;  %v2043_v19 = vmov 0  }
  0xcb   : > { %v369_v22 = vpop.xlane.xlu0 %368  ;;  %v538_v23 = vpop.xlane.xlu1 %537  ;;  %1834 = vmatprep.subr.bf16.mxu0 %v2040_v18  ;;  %1837 = vmatprep.subr.bf16.mxu1 %v2040_v18 }
  0xcc   : > { %v372_v24 = vmul.f32 0.0078125, %v369_v22  ;;  %v375_v25 = vmul.f32 %v2259_v20, %v2259_v20  ;;  %v540_v26 = vmul.f32 0.0078125, %v538_v23  ;;  %v543_v29 = vmul.f32 %v2262_v21, %v2262_v21  ;;  %1919 = vset.pattern.permute.xlu0 %v2043_v19 }
  0xce   : > { %v2267_v27 = vsub.f32 %v2196_v34, %v372_v24  ;;  %377 = vadd.xlane.f32.xlu0 %v375_v25  ;;  %v2270_v28 = vsub.f32 %v2198_v35, %v540_v26 }
  0xcf   : > { %v685_v30 = vpop.xlane.xlu0 %684  ;;  %v687_v31 = vpop.xlane.xlu1 %686 }
  0xd0   : > { %v688_v32 = vmul.f32 0.0078125, %v685_v30  ;;  %v376_v33 = vmul.f32 %v2267_v27, %v2267_v27  ;;  %v689_v36 = vmul.f32 0.0078125, %v687_v31  ;;  %v544_v35 = vmul.f32 %v2270_v28, %v2270_v28 }
  0xd2   : > { %v2277_v37 = vsub.f32 %v2206_v42, %v688_v32  ;;  %545 = vadd.xlane.f32.xlu0 %v543_v29  ;;  %379 = vadd.xlane.f32.xlu1 %v376_v33  ;;  %v2280_v34 = vsub.f32 %v2208_v43, %v689_v36 }
  0xd3   : > { %v834_v38 = vpop.xlane.xlu0 %833  ;;  %v836_v39 = vpop.xlane.xlu1 %835 }
  0xd4   : > { %v837_v40 = vmul.f32 0.0078125, %v834_v38  ;;  %v692_v41 = vmul.f32 %v2277_v37, %v2277_v37  ;;  %v838_v44 = vmul.f32 0.0078125, %v836_v39  ;;  %v693_v43 = vmul.f32 %v2280_v34, %v2280_v34 }
  0xd6   : > { %v2287_v45 = vsub.f32 %v2216_v50, %v837_v40  ;;  %547 = vadd.xlane.f32.xlu1 %v544_v35  ;;  %694 = vadd.xlane.f32.xlu0 %v692_v41  ;;  %v2290_v42 = vsub.f32 %v2218_v51, %v838_v44 }
  0xd7   : > { %v983_v46 = vpop.xlane.xlu0 %982  ;;  %v985_v47 = vpop.xlane.xlu1 %984 }
  0xd8   : > { %v986_v48 = vmul.f32 0.0078125, %v983_v46  ;;  %v841_v49 = vmul.f32 %v2287_v45, %v2287_v45  ;;  %v987_v52 = vmul.f32 0.0078125, %v985_v47  ;;  %v842_v51 = vmul.f32 %v2290_v42, %v2290_v42 }
  0xda   : > { %v2297_v53 = vsub.f32 %v2226_v58, %v986_v48  ;;  %696 = vadd.xlane.f32.xlu1 %v693_v43  ;;  %843 = vadd.xlane.f32.xlu0 %v841_v49  ;;  %v2300_v50 = vsub.f32 %v2228_v59, %v987_v52 }
  0xdb   : > { %v1132_v54 = vpop.xlane.xlu0 %1131  ;;  %v1134_v55 = vpop.xlane.xlu1 %1133 }
  0xdc   : > { %v1135_v56 = vmul.f32 0.0078125, %v1132_v54  ;;  %v990_v57 = vmul.f32 %v2297_v53, %v2297_v53  ;;  %v1136_v60 = vmul.f32 0.0078125, %v1134_v55  ;;  %v991_v59 = vmul.f32 %v2300_v50, %v2300_v50 }
  0xde   : > { %v2307_v61 = vsub.f32 %v2236_v2, %v1135_v56  ;;  %845 = vadd.xlane.f32.xlu1 %v842_v51  ;;  %992 = vadd.xlane.f32.xlu0 %v990_v57  ;;  %v2310_v58 = vsub.f32 %v2238_v3, %v1136_v60  ;;  %v2351_v57 = vld [vmem:[%s2604_s2] ss:$0 sm:$0xff] }
  0xdf   : > { %v1281_v62 = vpop.xlane.xlu0 %1280  ;;  %v1283_v63 = vpop.xlane.xlu1 %1282 }
  0xe0   : > { %v1284_v0 = vmul.f32 0.0078125, %v1281_v62  ;;  %v1139_v1 = vmul.f32 %v2307_v61, %v2307_v61  ;;  %v1285_v4 = vmul.f32 0.0078125, %v1283_v63  ;;  %v1140_v3 = vmul.f32 %v2310_v58, %v2310_v58 }
  0xe2   : > { %v2317_v5 = vsub.f32 %v2246_v10, %v1284_v0  ;;  %994 = vadd.xlane.f32.xlu1 %v991_v59  ;;  %1141 = vadd.xlane.f32.xlu0 %v1139_v1  ;;  %v2320_v2 = vsub.f32 %v2248_v11, %v1285_v4 }
  0xe3   : > { %v1430_v6 = vpop.xlane.xlu0 %1429  ;;  %v1432_v7 = vpop.xlane.xlu1 %1431 }
  0xe4   : > { %v1433_v8 = vmul.f32 0.0078125, %v1430_v6  ;;  %v1288_v9 = vmul.f32 %v2317_v5, %v2317_v5  ;;  %v1434_v12 = vmul.f32 0.0078125, %v1432_v7  ;;  %v1289_v11 = vmul.f32 %v2320_v2, %v2320_v2  ;;  %v2358_v7 = vld [vmem:[%s2605_s3] ss:$0 sm:$0xff] }
  0xe6   : > { %v2327_v13 = vsub.f32 %v2252_v14, %v1433_v8  ;;  %1143 = vadd.xlane.f32.xlu1 %v1140_v3  ;;  %1290 = vadd.xlane.f32.xlu0 %v1288_v9  ;;  %v2330_v10 = vsub.f32 %v2254_v15, %v1434_v12  ;;  %v2042_v14 = vmov 0.0   ;;  %v357_v15 = vld [vmem:[%s2607_s5] sm:$0xf] }
  0xe7   : > { %1782 = vmatprep.mubr.msk.f32.mxu0 %vm2041_vm0, %v2042_v14  ;;  %1789 = vmatprep.mubr.msk.f32.mxu1 %vm2041_vm0, %v2042_v14 }
  0xe8   : > { %v1437_v16 = vmul.f32 %v2327_v13, %v2327_v13  ;;  %v1438_v17 = vmul.f32 %v2330_v10, %v2330_v10 }
  0xea   : > { %1292 = vadd.xlane.f32.xlu1 %v1289_v11  ;;  %1439 = vadd.xlane.f32.xlu0 %v1437_v16 }
  0xee   : > { %1441 = vadd.xlane.f32.xlu1 %v1438_v17 }
 0x100   : > { %407 = vperm.xlu0 %1919, %v357_v15  }
 0x15b   : > { %v378_v22 = vpop.xlane.xlu0 %377 }
 0x15c   : > { %v381_v23 = vmul.f32 0.0078125, %v378_v22 }
 0x15e   : > { %v383_v24 = vadd.f32 1e-05, %v381_v23 }
 0x15f   : > { %v380_v25 = vpop.xlane.xlu1 %379  ;;  %v546_v26 = vpop.xlane.xlu0 %545 }
 0x160   : > { %1920 = vrsqrt.f32 %v383_v24  ;;  %v382_v29 = vmul.f32 0.0078125, %v380_v25  ;;  %v549_v30 = vmul.f32 0.0078125, %v546_v26 }
 0x162   : > { %v384_v31 = vadd.f32 1e-05, %v382_v29  ;;  %v551_v32 = vadd.f32 1e-05, %v549_v30 }
 0x163   : > { %v548_v33 = vpop.xlane.xlu1 %547  ;;  %v695_v36 = vpop.xlane.xlu0 %694 }
 0x164   : > { %1922 = vrsqrt.f32 %v384_v31  ;;  %v550_v35 = vmul.f32 0.0078125, %v548_v33  ;;  %v698_v38 = vmul.f32 0.0078125, %v695_v36 }
 0x165   : > { %1924 = vrsqrt.f32 %v551_v32 }
 0x166   : > { %v552_v39 = vadd.f32 1e-05, %v550_v35  ;;  %v700_v40 = vadd.f32 1e-05, %v698_v38 }
 0x167   : > { %v697_v41 = vpop.xlane.xlu1 %696  ;;  %v844_v44 = vpop.xlane.xlu0 %843 }
 0x168   : > { %1926 = vrsqrt.f32 %v552_v39  ;;  %v699_v43 = vmul.f32 0.0078125, %v697_v41  ;;  %v847_v46 = vmul.f32 0.0078125, %v844_v44 }
 0x169   : > { %1928 = vrsqrt.f32 %v700_v40 }
 0x16a   : > { %v1921_v47 = vpop.eup %1920  ;;  %v701_v48 = vadd.f32 1e-05, %v699_v43  ;;  %v849_v49 = vadd.f32 1e-05, %v847_v46 }
 0x16b   : > { %v846_v52 = vpop.xlane.xlu1 %845  ;;  %v993_v51 = vpop.xlane.xlu0 %992  ;;  %v387_v54 = vmul.f32 %v1921_v47, %v2259_v20 }
 0x16c   : > { %1930 = vrsqrt.f32 %v701_v48  ;;  %v848_v55 = vmul.f32 0.0078125, %v846_v52  ;;  %v996_v56 = vmul.f32 0.0078125, %v993_v51 }
 0x16d   : > { %1932 = vrsqrt.f32 %v849_v49  ;;  %v395_v3 = vmul.f32 %v2351_v57, %v387_v54 }
 0x16e   : > { %v1923_v60 = vpop.eup %1922  ;;  %v850_v59 = vadd.f32 1e-05, %v848_v55  ;;  %v998_v62 = vadd.f32 1e-05, %v996_v56 }
 0x16f   : > { %v1925_v63 = vpop.eup %1924  ;;  %v995_v0 = vpop.xlane.xlu1 %994  ;;  %v388_v4 = vmul.f32 %v1923_v60, %v2267_v27  ;;  %v403_v19 = vadd.f32 %v2358_v7, %v395_v3 }
 0x170   : > { %v1142_v1 = vpop.xlane.xlu0 %1141  ;;  %1934 = vrsqrt.f32 %v850_v59  ;;  %v997_v20 = vmul.f32 0.0078125, %v995_v0  ;;  %v555_v8 = vmul.f32 %v1925_v63, %v2262_v21 }
 0x171   : > { %v1145_v6 = vmul.f32 0.0078125, %v1142_v1  ;;  %1936 = vrsqrt.f32 %v998_v62  ;;  %v396_v9 = vmul.f32 %v2351_v57, %v388_v4 }
 0x172   : > { %v1927_v12 = vpop.eup %1926  ;;  %v999_v11 = vadd.f32 1e-05, %v997_v20  ;;  %v557_v24 = vmul.f32 %v2351_v57, %v555_v8 }
 0x173   : > { %v1147_v16 = vadd.f32 1e-05, %v1145_v6  ;;  %v1929_v17 = vpop.eup %1928  ;;  %v1144_v27 = vpop.xlane.xlu1 %1143  ;;  %v404_v22 = vadd.f32 %v2358_v7, %v396_v9  ;;  %v556_v23 = vmul.f32 %v1927_v12, %v2270_v28 }
 0x174   : > { %v1291_v15 = vpop.xlane.xlu0 %1290  ;;  %v704_v25 = vmul.f32 %v1929_v17, %v2277_v37  ;;  %1938 = vrsqrt.f32 %v999_v11  ;;  %v1146_v21 = vmul.f32 0.0078125, %v1144_v27  ;;  %v559_v39 = vadd.f32 %v2358_v7, %v557_v24 }
 0x175   : > { %v1294_v26 = vmul.f32 0.0078125, %v1291_v15  ;;  %1940 = vrsqrt.f32 %v1147_v16  ;;  %v1835_v29 = vpack.c.bf16 %v404_v22, %v403_v19  ;;  %v558_v30 = vmul.f32 %v2351_v57, %v556_v23 }
 0x176   : > { %v1931_v31 = vpop.eup %1930  ;;  %v1148_v32 = vadd.f32 1e-05, %v1146_v21  ;;  %v706_v40 = vmul.f32 %v2351_v57, %v704_v25 }
 0x177   : > { %v1296_v33 = vadd.f32 1e-05, %v1294_v26  ;;  %v1933_v36 = vpop.eup %1932  ;;  %v705_v35 = vmul.f32 %v1931_v31, %v2280_v34  ;;  %v1293_v38 = vpop.xlane.xlu1 %1292  ;;  %1836 = vmatpush3.bf16.xpose.msra.mxu0 %v1835_v29  ;;  %v560_v37 = vadd.f32 %v2358_v7, %v558_v30 }
 0x178   : > { %v1440_v28 = vpop.xlane.xlu0 %1439  ;;  %v853_v41 = vmul.f32 %v1933_v36, %v2287_v45  ;;  %1942 = vrsqrt.f32 %v1148_v32  ;;  %v1295_v44 = vmul.f32 0.0078125, %v1293_v38  ;;  %1840 = vmatprep.subr.bf16.mxu0 %v2040_v18  ;;  %v2379_v45 = vld [vmem:[%s2606_s4] sm:$0xf]  ;;  %v708_v55 = vadd.f32 %v2358_v7, %v706_v40 }
 0x179   : > { %v1443_v43 = vmul.f32 0.0078125, %v1440_v28  ;;  %1944 = vrsqrt.f32 %v1296_v33  ;;  %v1838_v46 = vpack.c.bf16 %v560_v37, %v559_v39  ;;  %v707_v34 = vmul.f32 %v2351_v57, %v705_v35 }
 0x17a   : > { %v1935_v47 = vpop.eup %1934  ;;  %v1297_v48 = vadd.f32 1e-05, %v1295_v44  ;;  %v855_v60 = vmul.f32 %v2351_v57, %v853_v41 }
 0x17b   : > { %v1445_v49 = vadd.f32 1e-05, %v1443_v43  ;;  %v1937_v52 = vpop.eup %1936  ;;  %v854_v51 = vmul.f32 %v1935_v47, %v2290_v42  ;;  %v1442_v54 = vpop.xlane.xlu1 %1441  ;;  %1839 = vmatpush3.bf16.xpose.msra.mxu1 %v1838_v46  ;;  %v709_v56 = vadd.f32 %v2358_v7, %v707_v34 }
 0x17c   : > { %v1002_v59 = vmul.f32 %v1937_v52, %v2297_v53  ;;  %1946 = vrsqrt.f32 %v1297_v48  ;;  %v1444_v62 = vmul.f32 0.0078125, %v1442_v54  ;;  %1843 = vmatprep.subr.bf16.mxu1 %v2040_v18  ;;  %v857_v53 = vadd.f32 %v2358_v7, %v855_v60 }
 0x17d   : > { %1948 = vrsqrt.f32 %v1445_v49  ;;  %v1841_v42 = vpack.c.bf16 %v709_v56, %v708_v55  ;;  %v856_v63 = vmul.f32 %v2351_v57, %v854_v51 }
 0x17e   : > { %v1939_v0 = vpop.eup %1938  ;;  %v1446_v1 = vadd.f32 1e-05, %v1444_v62  ;;  %1783 = vmatmul.mubr.f32.vlgmr.msra.gmra.mrb[0].mxu0 %v2379_v45  ;;  %v1004_v4 = vmul.f32 %v2351_v57, %v1002_v59 }
 0x17f   : > { %v1941_v3 = vpop.eup %1940  ;;  %v1003_v20 = vmul.f32 %v1939_v0, %v2300_v50  ;;  %1842 = vmatpush3.bf16.xpose.msra.mxu0 %v1841_v42  ;;  %v858_v6 = vadd.f32 %v2358_v7, %v856_v63  ;;  %1796 = vmatprep.mubr.msk.f32.mxu0 %vm2041_vm0, %v2042_v14 }
 0x180   : > { %v1151_v8 = vmul.f32 %v1941_v3, %v2307_v61  ;;  %1950 = vrsqrt.f32 %v1446_v1  ;;  %1846 = vmatprep.subr.bf16.mxu0 %v2040_v18  ;;  %v1006_v50 = vadd.f32 %v2358_v7, %v1004_v4 }
 0x181   : > { %v1844_v9 = vpack.c.bf16 %v858_v6, %v857_v53  ;;  %v1005_v12 = vmul.f32 %v2351_v57, %v1003_v20 }
 0x182   : > { %v1943_v11 = vpop.eup %1942  ;;  %1790 = vmatmul.mubr.f32.vlgmr.msra.gmra.mrb[0].mxu1 %v2379_v45  ;;  %v1153_v61 = vmul.f32 %v2351_v57, %v1151_v8 }
 0x183   : > { %v1945_v16 = vpop.eup %1944  ;;  %v1152_v17 = vmul.f32 %v1943_v11, %v2310_v58  ;;  %1845 = vmatpush3.bf16.xpose.msra.mxu1 %v1844_v9  ;;  %v1007_v27 = vadd.f32 %v2358_v7, %v1005_v12  ;;  %1803 = vmatprep.mubr.msk.f32.mxu1 %vm2041_vm0, %v2042_v14 }
 0x184   : > { %v1300_v15 = vmul.f32 %v1945_v16, %v2317_v5  ;;  %1849 = vmatprep.subr.bf16.mxu1 %v2040_v18  ;;  %v1155_v21 = vadd.f32 %v2358_v7, %v1153_v61 }
 0x185   : > { %v1847_v19 = vpack.c.bf16 %v1007_v27, %v1006_v50  ;;  %v1154_v22 = vmul.f32 %v2351_v57, %v1152_v17 }
 0x186   : > { %v1947_v23 = vpop.eup %1946  ;;  %1797 = vmatmul.mubr.f32.vlgmr.msra.gmra.mrb[2].mxu0 %v2379_v45  ;;  %v1302_v58 = vmul.f32 %v2351_v57, %v1300_v15 }
 0x187   : > { %v1949_v24 = vpop.eup %1948  ;;  %v1301_v25 = vmul.f32 %v1947_v23, %v2320_v2  ;;  %1848 = vmatpush3.bf16.xpose.msra.mxu0 %v1847_v19  ;;  %v1156_v26 = vadd.f32 %v2358_v7, %v1154_v22  ;;  %1810 = vmatprep.mubr.msk.f32.mxu0 %vm2041_vm0, %v2042_v14 }
 0x188   : > { %v1449_v5 = vmul.f32 %v1949_v24, %v2327_v13  ;;  %1852 = vmatprep.subr.bf16.mxu0 %v2040_v18  ;;  %v1304_v2 = vadd.f32 %v2358_v7, %v1302_v58 }
 0x189   : > { %v1850_v29 = vpack.c.bf16 %v1156_v26, %v1155_v21  ;;  %v1303_v30 = vmul.f32 %v2351_v57, %v1301_v25 }
 0x18a   : > { %v1951_v31 = vpop.eup %1950  ;;  %1804 = vmatmul.mubr.f32.vlgmr.msra.gmra.mrb[2].mxu1 %v2379_v45  ;;  %v1451_v13 = vmul.f32 %v2351_v57, %v1449_v5 }
 0x18b   : > { %v1450_v32 = vmul.f32 %v1951_v31, %v2330_v10  ;;  %1851 = vmatpush3.bf16.xpose.msra.mxu1 %v1850_v29  ;;  %v1305_v33 = vadd.f32 %v2358_v7, %v1303_v30  ;;  %1817 = vmatprep.mubr.msk.f32.mxu1 %vm2041_vm0, %v2042_v14 }
 0x18c   : > { %1855 = vmatprep.subr.bf16.mxu1 %v2040_v18  ;;  %v1453_v38 = vadd.f32 %v2358_v7, %v1451_v13  ;;  %v408_v18 = vpop.permute.xlu0 %407 }
 0x18d   : > { %v1853_v36 = vpack.c.bf16 %v1305_v33, %v1304_v2  ;;  %v1452_v35 = vmul.f32 %v2351_v57, %v1450_v32 }
 0x18e   : > { %1811 = vmatmul.mubr.f32.vlgmr.msra.gmra.mrb[4].mxu0 %v2379_v45 }
 0x18f   : > { %1854 = vmatpush3.bf16.xpose.msra.mxu0 %v1853_v36  ;;  %v1454_v10 = vadd.f32 %v2358_v7, %v1452_v35  ;;  %1824 = vmatprep.mubr.msk.f32.mxu0 %vm2041_vm0, %v2042_v14 }
 0x191   : > { %v1856_v28 = vpack.c.bf16 %v1454_v10, %v1453_v38 }
 0x192   : > { %1818 = vmatmul.mubr.f32.vlgmr.msra.gmra.mrb[4].mxu1 %v2379_v45 }
 0x193   : > { %1857 = vmatpush3.bf16.xpose.msra.mxu1 %v1856_v28  ;;  %1831 = vmatprep.mubr.msk.f32.mxu1 %vm2041_vm0, %v2042_v14 }
 0x196   : > { %1825 = vmatmul.mubr.f32.vlgmr.msra.gmra.mrb[6].mxu0 %v2379_v45 }
 0x19a   : > { %1832 = vmatmul.mubr.f32.vlgmr.msra.gmra.mrb[6].mxu1 %v2379_v45 }
 0x251   : > { %v476_v57 = vpop.f32.mrb[0].mxu0 }
 0x252   : > { %v1784_v39 = vpop.f32.mrb[1].mxu0  ;;  %v477_v37 = vadd.f32 %v476_v57, %v408_v18 }
 0x254   : > { %v481_v7 = vsel %vm480_vm1, %v477_v37, -inf }
 0x255   : > { %v627_v40 = vpop.f32.mrb[0].mxu1  ;;  %482 = vmax.xlane.f32.xlu1 %v481_v7 }
 0x256   : > { %v628_v41 = vadd.f32 %v627_v40, %v408_v18  ;;  %v1791_v44 = vpop.f32.mrb[1].mxu1 }
 0x258   : > { %v631_v43 = vsel %vm480_vm1, %v628_v41, -inf }
 0x259   : > { %v776_v46 = vpop.f32.mrb[2].mxu0  ;;  %632 = vmax.xlane.f32.xlu1 %v631_v43 }
 0x25a   : > { %v777_v14 = vadd.f32 %v776_v46, %v408_v18  ;;  %v1798_v34 = vpop.f32.mrb[3].mxu0 }
 0x25c   : > { %v780_v47 = vsel %vm480_vm1, %v777_v14, -inf }
 0x25d   : > { %v925_v48 = vpop.f32.mrb[2].mxu1  ;;  %781 = vmax.xlane.f32.xlu1 %v780_v47  ;;  %v496_v47 = vlaneseq }
 0x25e   : > { %v926_v49 = vadd.f32 %v925_v48, %v408_v18  ;;  %v1805_v52 = vpop.f32.mrb[3].mxu1 }
 0x25f   : > { %v497_v52 = vshrl.u32 %v496_v47, 7 }
 0x260   : > { %v929_v51 = vsel %vm480_vm1, %v926_v49, -inf }
 0x261   : > { %v1074_v54 = vpop.f32.mrb[4].mxu0  ;;  %930 = vmax.xlane.f32.xlu1 %v929_v51 }
 0x262   : > { %v1075_v45 = vadd.f32 %v1074_v54, %v408_v18  ;;  %v1812_v55 = vpop.f32.mrb[5].mxu0 }
 0x264   : > { %v1078_v56 = vsel %vm480_vm1, %v1075_v45, -inf }
 0x265   : > { %v1223_v60 = vpop.f32.mrb[4].mxu1  ;;  %1079 = vmax.xlane.f32.xlu1 %v1078_v56 }
 0x266   : > { %v1224_v59 = vadd.f32 %v1223_v60, %v408_v18  ;;  %v1819_v62 = vpop.f32.mrb[5].mxu1 }
 0x268   : > { %v1227_v42 = vsel %vm480_vm1, %v1224_v59, -inf }
 0x269   : > { %v1372_v63 = vpop.f32.mrb[6].mxu0  ;;  %1228 = vmax.xlane.f32.xlu1 %v1227_v42 }
 0x26a   : > { %v1373_v0 = vadd.f32 %v1372_v63, %v408_v18  ;;  %v1826_v1 = vpop.f32.mrb[7].mxu0 }
 0x26c   : > { %v1376_v4 = vsel %vm480_vm1, %v1373_v0, -inf }
 0x26d   : > { %v1521_v3 = vpop.f32.mrb[6].mxu1  ;;  %1377 = vmax.xlane.f32.xlu1 %v1376_v4 }
 0x26e   : > { %v1522_v20 = vadd.f32 %v1521_v3, %v408_v18  ;;  %v1833_v53 = vpop.f32.mrb[7].mxu1 }
 0x270   : > { %v1525_v6 = vsel %vm480_vm1, %v1522_v20, -inf }
 0x271   : > { %1526 = vmax.xlane.f32.xlu1 %v1525_v6 }
 0x2e2   : > { %v483_v8 = vpop.xlane.xlu1 %482 }
 0x2e3   : > { %v484_v9 = vsub.f32 %v477_v37, %v483_v8 }
 0x2e5   : > { %v485_v12 = vmul.f32 1.442695, %v484_v9 }
 0x2e6   : > { %v633_v11 = vpop.xlane.xlu1 %632 }
 0x2e7   : > { %1952 = vpow2.f32 %v485_v12  ;;  %v634_v50 = vsub.f32 %v628_v41, %v633_v11 }
 0x2e9   : > { %v635_v16 = vmul.f32 1.442695, %v634_v50 }
 0x2ea   : > { %v782_v17 = vpop.xlane.xlu1 %781 }
 0x2eb   : > { %1954 = vpow2.f32 %v635_v16  ;;  %v783_v27 = vsub.f32 %v777_v14, %v782_v17  ;;  %v2044_v14 = vmov 1966171168  }
 0x2ec   : > { %v494_v34 = vunpack.c.l.s4 %v2044_v14 }
 0x2ed   : > { %v784_v61 = vmul.f32 1.442695, %v783_v27 }
 0x2ee   : > { %v931_v15 = vpop.xlane.xlu1 %930 }
 0x2ef   : > { %1956 = vpow2.f32 %v784_v61  ;;  %v932_v19 = vsub.f32 %v926_v49, %v931_v15  ;;  %v495_v49 = vunpack.c.0.s8 %v494_v34 }
 0x2f1   : > { %v1953_v22 = vpop.eup %1952  ;;  %v933_v23 = vmul.f32 1.442695, %v932_v19  ;;  %v2470_v54 = vsub.s32 %v495_v49, %v497_v52 }
 0x2f2   : > { %v1080_v58 = vpop.xlane.xlu1 %1079  ;;  %v487_v24 = vsel %vm480_vm1, %v1953_v22, 0.0 }
 0x2f3   : > { %1958 = vpow2.f32 %v933_v23  ;;  %v1081_v25 = vsub.f32 %v1075_v45, %v1080_v58  ;;  %488 = vadd.xlane.f32.xlu1 %v487_v24 }
 0x2f5   : > { %v1955_v21 = vpop.eup %1954  ;;  %v1082_v26 = vmul.f32 1.442695, %v1081_v25 }
 0x2f6   : > { %v1229_v5 = vpop.xlane.xlu1 %1228  ;;  %v637_v29 = vsel %vm480_vm1, %v1955_v21, 0.0 }
 0x2f7   : > { %1960 = vpow2.f32 %v1082_v26  ;;  %v1230_v30 = vsub.f32 %v1224_v59, %v1229_v5  ;;  %638 = vadd.xlane.f32.xlu1 %v637_v29 }
 0x2f9   : > { %v2446_v31 = vpop.eup %1956  ;;  %v1231_v2 = vmul.f32 1.442695, %v1230_v30 }
 0x2fa   : > { %v1378_v32 = vpop.xlane.xlu1 %1377  ;;  %v786_v33 = vsel %vm480_vm1, %v2446_v31, 0.0 }
 0x2fb   : > { %1962 = vpow2.f32 %v1231_v2  ;;  %v1379_v13 = vsub.f32 %v1373_v0, %v1378_v32  ;;  %787 = vadd.xlane.f32.xlu1 %v786_v33 }
 0x2fd   : > { %v2450_v36 = vpop.eup %1958  ;;  %v1380_v35 = vmul.f32 1.442695, %v1379_v13 }
 0x2fe   : > { %v1527_v38 = vpop.xlane.xlu1 %1526  ;;  %v935_v10 = vsel %vm480_vm1, %v2450_v36, 0.0 }
 0x2ff   : > { %1964 = vpow2.f32 %v1380_v35  ;;  %v1528_v28 = vsub.f32 %v1522_v20, %v1527_v38  ;;  %936 = vadd.xlane.f32.xlu0 %v935_v10 }
 0x301   : > { %v2454_v18 = vpop.eup %1960  ;;  %v1529_v57 = vmul.f32 1.442695, %v1528_v28 }
 0x302   : > { %v1084_v39 = vsel %vm480_vm1, %v2454_v18, 0.0 }
 0x303   : > { %1966 = vpow2.f32 %v1529_v57  ;;  %1085 = vadd.xlane.f32.xlu1 %v1084_v39 }
 0x305   : > { %v2458_v37 = vpop.eup %1962 }
 0x306   : > { %v1233_v7 = vsel %vm480_vm1, %v2458_v37, 0.0 }
 0x307   : > { %1234 = vadd.xlane.f32.xlu1 %v1233_v7 }
 0x309   : > { %v2462_v40 = vpop.eup %1964 }
 0x30a   : > { %v1382_v41 = vsel %vm480_vm1, %v2462_v40, 0.0 }
 0x30b   : > { %1383 = vadd.xlane.f32.xlu1 %v1382_v41 }
 0x30d   : > { %v2466_v44 = vpop.eup %1966 }
 0x30e   : > { %v1531_v43 = vsel %vm480_vm1, %v2466_v44, 0.0 }
 0x30f   : > { %1532 = vadd.xlane.f32.xlu1 %v1531_v43 }
 0x380   : > { %v489_v46 = vpop.xlane.xlu1 %488 }
 0x381   : > { %1968 = vrcp.f32 %v489_v46 }
 0x384   : > { %v639_v48 = vpop.xlane.xlu1 %638 }
 0x385   : > { %1970 = vrcp.f32 %v639_v48 }
 0x388   : > { %v788_v51 = vpop.xlane.xlu1 %787 }
 0x389   : > { %1972 = vrcp.f32 %v788_v51 }
 0x38b   : > { %v1969_v45 = vpop.eup %1968 }
 0x38c   : > { %v491_v55 = vmul.f32 %v1969_v45, %v1953_v22  ;;  %v937_v56 = vpop.xlane.xlu0 %936 }
 0x38d   : > { %1974 = vrcp.f32 %v937_v56 }
 0x38e   : > { %v499_v60 = vrot.slane %v491_v55, %v2470_v54 }
 0x38f   : > { %v1971_v59 = vpop.eup %1970 }
 0x390   : > { %v500_v62 = vcombine.high %v499_v60, %v499_v60  ;;  %v507_v42 = vrot.slane %v499_v60, %v2470_v54  ;;  %v641_v63 = vmul.f32 %v1971_v59, %v1955_v21  ;;  %v1086_v0 = vpop.xlane.xlu1 %1085 }
 0x391   : > { %1976 = vrcp.f32 %v1086_v0 }
 0x392   : > { %v514_v1 = vrot.slane %v500_v62, %v2470_v54  ;;  %v515_v4 = vcombine.high %v507_v42, %v507_v42  ;;  %522 = vst.msk [vmem:[%s2477_s19] sm:$0x1] %vm521_vm2, %v507_v42  ;;  %v649_v3 = vrot.slane %v641_v63, %v2470_v54 }
 0x393   : > { %v1973_v20 = vpop.eup %1972 }
 0x394   : > { %v516_v53 = vcombine.high %v514_v1, %v514_v1  ;;  %523 = vst.msk [vmem:[%s2477_s19 + $0x8] sm:$0x1] %vm521_vm2, %v514_v1  ;;  %524 = vst.msk [vmem:[%s2477_s19 + $0x10] sm:$0x1] %vm521_vm2, %v515_v4  ;;  %v650_v6 = vcombine.high %v649_v3, %v649_v3  ;;  %v657_v8 = vrot.slane %v649_v3, %v2470_v54  ;;  %v1235_v12 = vpop.xlane.xlu1 %1234 }
 0x395   : > { %v790_v9 = vmul.f32 %v1973_v20, %v2446_v31  ;;  %1978 = vrcp.f32 %v1235_v12 }
 0x396   : > { %525 = vst.msk [vmem:[%s2477_s19 + $0x18] sm:$0x1] %vm521_vm2, %v516_v53  ;;  %v664_v11 = vrot.slane %v650_v6, %v2470_v54  ;;  %v665_v50 = vcombine.high %v657_v8, %v657_v8  ;;  %671 = vst.msk [vmem:[%s2477_s19 + $0x1] sm:$0x1] %vm521_vm2, %v657_v8 }
 0x397   : > { %v798_v16 = vrot.slane %v790_v9, %v2470_v54  ;;  %v1975_v17 = vpop.eup %1974 }
 0x398   : > { %v666_v27 = vcombine.high %v664_v11, %v664_v11  ;;  %672 = vst.msk [vmem:[%s2477_s19 + $0x9] sm:$0x1] %vm521_vm2, %v664_v11  ;;  %673 = vst.msk [vmem:[%s2477_s19 + $0x11] sm:$0x1] %vm521_vm2, %v665_v50  ;;  %v939_v19 = vmul.f32 %v1975_v17, %v2450_v36  ;;  %v1384_v22 = vpop.xlane.xlu1 %1383 }
 0x399   : > { %v799_v61 = vcombine.high %v798_v16, %v798_v16  ;;  %v806_v15 = vrot.slane %v798_v16, %v2470_v54  ;;  %1980 = vrcp.f32 %v1384_v22 }
 0x39a   : > { %674 = vst.msk [vmem:[%s2477_s19 + $0x19] sm:$0x1] %vm521_vm2, %v666_v27  ;;  %v947_v24 = vrot.slane %v939_v19, %v2470_v54 }
 0x39b   : > { %v813_v23 = vrot.slane %v799_v61, %v2470_v54  ;;  %v814_v58 = vcombine.high %v806_v15, %v806_v15  ;;  %820 = vst.msk [vmem:[%s2477_s19 + $0x2] sm:$0x1] %vm521_vm2, %v806_v15  ;;  %v1977_v25 = vpop.eup %1976 }
 0x39c   : > { %v948_v26 = vcombine.high %v947_v24, %v947_v24  ;;  %v955_v5 = vrot.slane %v947_v24, %v2470_v54  ;;  %v1088_v29 = vmul.f32 %v1977_v25, %v2454_v18  ;;  %v1533_v30 = vpop.xlane.xlu1 %1532 }
 0x39d   : > { %v815_v21 = vcombine.high %v813_v23, %v813_v23  ;;  %821 = vst.msk [vmem:[%s2477_s19 + $0xa] sm:$0x1] %vm521_vm2, %v813_v23  ;;  %822 = vst.msk [vmem:[%s2477_s19 + $0x12] sm:$0x1] %vm521_vm2, %v814_v58  ;;  %1982 = vrcp.f32 %v1533_v30 }
 0x39e   : > { %v962_v31 = vrot.slane %v948_v26, %v2470_v54  ;;  %v963_v2 = vcombine.high %v955_v5, %v955_v5  ;;  %969 = vst.msk [vmem:[%s2477_s19 + $0x3] sm:$0x1] %vm521_vm2, %v955_v5  ;;  %v1096_v32 = vrot.slane %v1088_v29, %v2470_v54 }
 0x39f   : > { %823 = vst.msk [vmem:[%s2477_s19 + $0x1a] sm:$0x1] %vm521_vm2, %v815_v21  ;;  %v1979_v33 = vpop.eup %1978 }
 0x3a0   : > { %v964_v13 = vcombine.high %v962_v31, %v962_v31  ;;  %970 = vst.msk [vmem:[%s2477_s19 + $0xb] sm:$0x1] %vm521_vm2, %v962_v31  ;;  %971 = vst.msk [vmem:[%s2477_s19 + $0x13] sm:$0x1] %vm521_vm2, %v963_v2  ;;  %v1097_v36 = vcombine.high %v1096_v32, %v1096_v32  ;;  %v1104_v35 = vrot.slane %v1096_v32, %v2470_v54 }
 0x3a1   : > { %v1237_v38 = vmul.f32 %v1979_v33, %v2458_v37 }
 0x3a2   : > { %972 = vst.msk [vmem:[%s2477_s19 + $0x1b] sm:$0x1] %vm521_vm2, %v964_v13  ;;  %v1111_v10 = vrot.slane %v1097_v36, %v2470_v54  ;;  %v1112_v28 = vcombine.high %v1104_v35, %v1104_v35  ;;  %1118 = vst.msk [vmem:[%s2477_s19 + $0x4] sm:$0x1] %vm521_vm2, %v1104_v35 }
 0x3a3   : > { %v1245_v18 = vrot.slane %v1237_v38, %v2470_v54  ;;  %v1981_v57 = vpop.eup %1980 }
 0x3a4   : > { %v1113_v39 = vcombine.high %v1111_v10, %v1111_v10  ;;  %1119 = vst.msk [vmem:[%s2477_s19 + $0xc] sm:$0x1] %vm521_vm2, %v1111_v10  ;;  %1120 = vst.msk [vmem:[%s2477_s19 + $0x14] sm:$0x1] %vm521_vm2, %v1112_v28  ;;  %v1386_v41 = vmul.f32 %v1981_v57, %v2462_v40 }
 0x3a5   : > { %v1246_v37 = vcombine.high %v1245_v18, %v1245_v18  ;;  %v1253_v7 = vrot.slane %v1245_v18, %v2470_v54 }
 0x3a6   : > { %1121 = vst.msk [vmem:[%s2477_s19 + $0x1c] sm:$0x1] %vm521_vm2, %v1113_v39  ;;  %v1394_v14 = vrot.slane %v1386_v41, %v2470_v54 }
 0x3a7   : > { %v1260_v43 = vrot.slane %v1246_v37, %v2470_v54  ;;  %v1261_v46 = vcombine.high %v1253_v7, %v1253_v7  ;;  %1267 = vst.msk [vmem:[%s2477_s19 + $0x5] sm:$0x1] %vm521_vm2, %v1253_v7  ;;  %v1983_v34 = vpop.eup %1982 }
 0x3a8   : > { %v1395_v40 = vcombine.high %v1394_v14, %v1394_v14  ;;  %v1402_v48 = vrot.slane %v1394_v14, %v2470_v54  ;;  %v1535_v49 = vmul.f32 %v1983_v34, %v2466_v44 }
 0x3a9   : > { %v1262_v47 = vcombine.high %v1260_v43, %v1260_v43  ;;  %1268 = vst.msk [vmem:[%s2477_s19 + $0xd] sm:$0x1] %vm521_vm2, %v1260_v43  ;;  %1269 = vst.msk [vmem:[%s2477_s19 + $0x15] sm:$0x1] %vm521_vm2, %v1261_v46 }
 0x3aa   : > { %v1409_v52 = vrot.slane %v1395_v40, %v2470_v54  ;;  %v1410_v51 = vcombine.high %v1402_v48, %v1402_v48  ;;  %1416 = vst.msk [vmem:[%s2477_s19 + $0x6] sm:$0x1] %vm521_vm2, %v1402_v48  ;;  %v1543_v45 = vrot.slane %v1535_v49, %v2470_v54 }
 0x3ab   : > { %1270 = vst.msk [vmem:[%s2477_s19 + $0x1d] sm:$0x1] %vm521_vm2, %v1262_v47 }
 0x3ac   : > { %v1411_v55 = vcombine.high %v1409_v52, %v1409_v52  ;;  %1417 = vst.msk [vmem:[%s2477_s19 + $0xe] sm:$0x1] %vm521_vm2, %v1409_v52  ;;  %1418 = vst.msk [vmem:[%s2477_s19 + $0x16] sm:$0x1] %vm521_vm2, %v1410_v51  ;;  %v1544_v56 = vcombine.high %v1543_v45, %v1543_v45  ;;  %v1551_v44 = vrot.slane %v1543_v45, %v2470_v54  ;;  %1575 = sbr.rel (!%p2128_p6) target bundleno = 955 (0x3bb), region = 71 }
 0x3ae   : > { %1419 = vst.msk [vmem:[%s2477_s19 + $0x1e] sm:$0x1] %vm521_vm2, %v1411_v55  ;;  %v1558_v60 = vrot.slane %v1544_v56, %v2470_v54  ;;  %v1559_v59 = vcombine.high %v1551_v44, %v1551_v44  ;;  %1565 = vst.msk [vmem:[%s2477_s19 + $0x7] sm:$0x1] %vm521_vm2, %v1551_v44 }
 0x3b0   : > { %v1560_v62 = vcombine.high %v1558_v60, %v1558_v60  ;;  %1566 = vst.msk [vmem:[%s2477_s19 + $0xf] sm:$0x1] %vm521_vm2, %v1558_v60  ;;  %1567 = vst.msk [vmem:[%s2477_s19 + $0x17] sm:$0x1] %vm521_vm2, %v1559_v59 }
 0x3b2   : > { %1568 = vst.msk [vmem:[%s2477_s19 + $0x1f] sm:$0x1] %vm521_vm2, %v1560_v62 }
 0x3b5   : > { %v1613_v54 = vld [vmem:[%s2477_s19] sm:$0xff] }
 0x3b6   : > { %1614 = vst [vmem:[%s1579_s9] sm:$0xff] %v1613_v54 }
 0x3b7   : > { %v1615_v42 = vld [vmem:[%s2477_s19 + $0x8] sm:$0xff]  ;;  %v1617_v63 = vld [vmem:[%s2477_s19 + $0x10] sm:$0xff] }
 0x3b8   : > { %1616 = vst [vmem:[%s1579_s9 + $0x10] sm:$0xff] %v1615_v42  ;;  %1618 = vst [vmem:[%s1579_s9 + $0x20] sm:$0xff] %v1617_v63 }
 0x3b9   : > { %v1619_v0 = vld [vmem:[%s2477_s19 + $0x18] sm:$0xff] }
 0x3ba   : > { %1620 = vst [vmem:[%s1579_s9 + $0x30] sm:$0xff] %v1619_v0 }
 0x3bb PF: > { %s16_s27 = sadd.s32 1, %s2038_s27   ;;  %s2610_s21 = smov %s2018_s22 }
 0x3bc   : > { %p13_p0 = scmp.ge.s32.totalorder %s16_s27, 6   ;;  %s2611_s22 = smov %s2136_s12 }
 0x3bd   : > { %s2612_s23 = smov %s2030_s25  ;;  %s2613_s24 = smov %s2034_s26 }
 0x3be   : > { %s2614_s25 = smov %s2617_s28  ;;  %s2615_s26 = smov %s2621_s29 }
 0x3bf   :  { %15 = sbr.rel (!%p13_p0) target bundleno = 4 (0x4), region = 150 }

// kernel: pair2msa_forward.3
= control target key start
LH: loop header
LB: loop body
LE: loop exit
PB: predicated region body
PF: predicated region fallthrough
CT: control target
= control target key end

     0   :  { %s8179_s0 = inlined_call_operand.vmem [shape: f32[2,4,16,16], index: 0, kind: input, shape index: {}]   ;;  %s8180_s1 = inlined_call_operand.vmem [shape: f32[2,8,16,256], index: 1, kind: input, shape index: {}]   ;;  %s8181_s2 = inlined_call_operand.vmem [shape: f32[1,256], index: 2, kind: input, shape index: {}]   ;;  %s8182_s3 = inlined_call_operand.vmem [shape: f32[1,256], index: 3, kind: input, shape index: {}]   ;;  %s8183_s4 = inlined_call_operand.vmem [shape: f32[256,256], index: 4, kind: input, shape index: {}]   ;;  %s8184_s5 = inlined_call_operand.vmem [shape: f32[1,256], index: 5, kind: input, shape index: {}]   ;;  %s8185_s6 = inlined_call_operand.vmem [shape: f32[256,256], index: 6, kind: input, shape index: {}]   ;;  %s8186_s7 = inlined_call_operand.vmem [shape: f32[1,256], index: 7, kind: input, shape index: {}]   ;;  %s8187_s8 = inlined_call_operand.vmem [shape: f32[1,256], index: 8, kind: input, shape index: {}]   ;;  %s8188_s9 = inlined_call_operand.vmem [shape: f32[1,256], index: 9, kind: input, shape index: {}]   ;;  %s8189_s10 = inlined_call_operand.hbm [shape: f32[256,1024], index: 10, kind: input, shape index: {}]   ;;  %s8190_s11 = inlined_call_operand.vmem [shape: f32[1,1024], index: 11, kind: input, shape index: {}]   ;;  %s8191_s12 = inlined_call_operand.hbm [shape: f32[1024,256], index: 12, kind: input, shape index: {}]   ;;  %s8192_s13 = inlined_call_operand.vmem [shape: f32[1,256], index: 13, kind: input, shape index: {}]   ;;  %s8193_s14 = inlined_call_operand.hbm [shape: f32[2,8,16,256], index: 14, kind: output, shape index: {}]  }
   0x1   :  { %8244 = sst [smem:[#allocation65_spill]] %s8190_s11 }
   0x2   :  { %8245 = sst [smem:[#allocation66_spill]] %s8192_s13 }
   0x3   :  { %8246 = sst [smem:[#allocation67_spill]] %s8193_s14 }
   0x4   :  { %19 = vsyncpa [#allocation3], 0 }
   0x5   :  { %20 = vsyncpa [#allocation6], 0 }
   0x6   :  { %21 = vsyncpa [#allocation4], 0 }
   0x7   :  { %23 = vsyncpa [#allocation4 + $0x1], 0  ;;  %s6368_s29 = smov 0   ;;  %s6370_s30 = smov 0  }
   0x8   :  { %s6372_s15 = smov 0   ;;  %s6374_s16 = smov 0  }
   0x9   :  { %s6376_s17 = smov 0   ;;  %s6378_s18 = smov 0  }
   0xa   :  { %s6380_s19 = smov 0   ;;  %s6382_s20 = smov 0  }
   0xb LB: > { %8247 = sst [smem:[#allocation11_spill]] %s6252_s29  ;;  %s4815_s21 = sadd.s32 4294967295, %s6280_s20   ;;  %s6280_s20 = sphi %s6382_s20, %s29_s20   ;;  %s6276_s19 = sphi %s6380_s19, %s8368_s19   ;;  %s6272_s18 = sphi %s6378_s18, %s8367_s18   ;;  %s6268_s17 = sphi %s6376_s17, %s8366_s17   ;;  %s6264_s16 = sphi %s6374_s16, %s8365_s16   ;;  %s6260_s15 = sphi %s6372_s15, %s8364_s15   ;;  %s6256_s30 = sphi %s6370_s30, %s8363_s30   ;;  %s6252_s29 = sphi %s6368_s29, %s8362_s29  }
   0xc   : > { %8248 = sst [smem:[#allocation12_spill]] %s6256_s30  ;;  %s4816_s22 = sadd.s32 4294967294, %s6280_s20  }
   0xd   : > { %8249 = sst [smem:[#allocation13_spill]] %s6260_s15  ;;  %s38_s23 = sadd.s32 1, %s6272_s18 }
   0xe   : > { %8250 = sst [smem:[#allocation14_spill]] %s6272_s18  ;;  %s41_s24 = sadd.s32 1, %s6276_s19 }
   0xf   : > { %8251 = sst [smem:[#allocation15_spill]] %s6276_s19  ;;  %p39_p0 = scmp.ge.s32.totalorder %s38_s23, 2 }
  0x10   : > { %8252 = sst [smem:[#allocation16_spill]] %s6280_s20  ;;  %s356_s25 = sadd.s32 1, %s6260_s15 }
  0x11   : > { %p366_p1 = scmp.ne.s32.totalorder %s6260_s15, %s6256_s30  ;;  %p367_p2 = scmp.eq.s32.totalorder %s4815_s21, 3 }
  0x12   : > { %s8370_s23 = smov (%p39_p0, %s38_s23), 0  ;;  %s8372_s24 = smov (!%p39_p0, %s41_s24), %s6276_s19 }
  0x13   : > { %8253 = sst [smem:[#allocation17_spill]] %s8370_s23  ;;  %s352_s26 = ssub.s32 %s6272_s18, %s8370_s23 }
  0x14   : > { %p6420_p3 = por %p367_p2, %p366_p1  ;;  %p43_p4 = scmp.ge.s32.totalorder %s8372_s24, 2 }
  0x15   : > { %p372_p5 = scmp.ne.s32.totalorder %s6256_s30, %s6252_s29  ;;  %p373_p6 = scmp.eq.s32.totalorder %s4816_s22, 3 }
  0x16   : > { %s8254_s27 = scalar_select %p6420_p3, 1, 0 }
  0x17   : > { %p4817_p7 = scmp.ge.s32.totalorder %s6280_s20, 1  ;;  %s8374_s24 = smov (%p43_p4, %s8372_s24), 0 }
  0x18   : > { %8255 = sst [smem:[#allocation18_spill]] %s8254_s27  ;;  %p6429_p8 = por %p373_p6, %p372_p5 }
  0x19   : > { %8256 = sst [smem:[#allocation19_spill]] %s8374_s24  ;;  %p380_p9 = scmp.lt.s32.totalorder %s6280_s20, 5 }
  0x1a   : > { %s8257_s28 = scalar_select %p6429_p8, 1, 0 }
  0x1b   : > { %s351_s14 = ssub.s32 %s6276_s19, %s8374_s24  ;;  %p6436_p10 = pnand %p4817_p7, %p380_p9 }
  0x1c   : > { %8258 = sst [smem:[#allocation20_spill]] %s8257_s28  ;;  %s353_s13 = sor.u32 %s352_s26, %s351_s14 }
  0x1d   : > { %s8259_s23 = scalar_select %p6436_p10, 1, 0 }
  0x1e   : > { %p354_p11 = scmp.eq.s32.totalorder %s353_s13, 0  ;;  %p6440_p12 = scmp.eq.s32.totalorder %s4815_s21, 0 }
  0x1f   : > { %p5944_p13 = pneg %p6436_p10  ;;  %s6282_s29 = smov [#allocation2]  }
  0x20   : > { %s8260_s18 = scalar_select %p6440_p12, 1, 0 }
  0x21   : > { %s6447_s22 = scalar_select %p354_p11, %s6260_s15, %s356_s25  }
  0x22   : > { %s416_s28 = sshll.u32 %s6282_s29, 4  ;;  %p6451_p0 = pnand %p6440_p12, %p5944_p13  ;;  %s417_s28 = int_to_ptr.vmem [resolvable:$true] %s416_s28 }
  0x23   : > { %8261 = sst [smem:[#allocation21_spill]] %s6447_s22  ;;  %s6122_s26 = scalar_lea.hbm %s8189_s10, 32768 }
  0x24   : > { %p6123_p1 = scmp.ne.s32.totalorder %s8189_s10, %s6122_s26  ;;  %p6124_p2 = pneg %p6451_p0 }
  0x25   : > { %p6129_p6 = scmp.lt.u32.totalorder %s6122_s26, %s8189_s10 }
  0x26   : > { %p6125_p4 = pnand %p6124_p2, %p6123_p1 }
  0x28   : > { %p6126_p5 = pneg %p6125_p4 }
  0x2a   : > { %p6131_p7 = pnand %p6129_p6, %p6126_p5 }
  0x2c   : > { %6134 = shalt.err (!%p6131_p7)
}
  0x2d   : > { %s6135_s22 = scalar_lea.vmem %s417_s28, 32768  ;;  %p6143_p8 = scmp.lt.s32.totalorder %s417_s28, %s417_s28 }
  0x2e   : > { %p6136_p9 = scmp.ne.s32.totalorder %s417_s28, %s6135_s22  ;;  %p6144_p3 = scmp.lt.s32.totalorder %s6135_s22, %s6135_s22 }
  0x30   : > { %p6138_p11 = pnand %p6136_p9, %p6124_p2  ;;  %p6145_p12 = por %p6144_p3, %p6143_p8 }
  0x32   : > { %p6139_p13 = pneg %p6138_p11 }
  0x34   : > { %p6146_p10 = pnand %p6145_p12, %p6139_p13 }
  0x36   : > { %6149 = shalt.err (!%p6146_p10)
}
  0x37   : > { %s6283_s19 = smov 1024   ;;  %s6284_s24 = smov 64  }
  0x38   : > { %5947 = dma.hbm_to_vmem [thread:$0]  (!%p6451_p0), %s8189_s10, 32768, %s417_s28, [#allocation3], %s6283_s19, %s6283_s19, %s6284_s24  }
  0x39   : > { %s6285_s26 = smov [#allocation5]   ;;  %s6150_s20 = scalar_lea.hbm %s8191_s12, 32768 }
  0x3a   : > { %s432_s29 = sshll.u32 %s6285_s26, 4  ;;  %p6151_p3 = scmp.ne.s32.totalorder %s8191_s12, %s6150_s20  ;;  %s433_s29 = int_to_ptr.vmem [resolvable:$true] %s432_s29 }
  0x3b   : > { %p6157_p12 = scmp.lt.u32.totalorder %s6150_s20, %s8191_s12 }
  0x3c   : > { %p6153_p8 = pnand %p6151_p3, %p6124_p2 }
  0x3e   : > { %p6154_p10 = pneg %p6153_p8 }
  0x40   : > { %p6159_p1 = pnand %p6157_p12, %p6154_p10 }
  0x42   : > { %6162 = shalt.err (!%p6159_p1)
}
  0x43   : > { %s6163_s28 = scalar_lea.vmem %s433_s29, 32768  ;;  %p6171_p7 = scmp.lt.s32.totalorder %s433_s29, %s433_s29 }
  0x44   : > { %p6164_p4 = scmp.ne.s32.totalorder %s433_s29, %s6163_s28  ;;  %p6172_p9 = scmp.lt.s32.totalorder %s6163_s28, %s6163_s28 }
  0x46   : > { %p6166_p5 = pnand %p6164_p4, %p6124_p2  ;;  %p6173_p11 = por %p6172_p9, %p6171_p7 }
  0x48   : > { %p6167_p6 = pneg %p6166_p5 }
  0x4a   : > { %p6174_p13 = pnand %p6173_p11, %p6167_p6 }
  0x4c   : > { %6177 = shalt.err (!%p6174_p13)
}
  0x4d   : > { %s6286_s15 = smov 256   ;;  %s6287_s27 = smov 16  }
  0x4e   : > { %5950 = dma.hbm_to_vmem [thread:$0]  (!%p6451_p0), %s8191_s12, 32768, %s433_s29, [#allocation6], %s6286_s15, %s6286_s15, %s6287_s27  }
  0x4f   : > { %p8263_p3 = scmp.ne.s32.totalorder %s8259_s23, 0 }
  0x51   : > { %473 = sbr.rel (%p8263_p3) target bundleno = 2265 (0x8d9), region = 76 }
  0x58   : > { %p8264_p8 = scmp.ne.s32.totalorder %s8260_s18, 0 }
  0x5a   : > { %6239 = dma.done.wait (%p8264_p8), [#allocation3], 32768  }
  0x5b   : > { %6241 = vsyncadd (%p8264_p8), [#allocation3], 4294934528 }
  0x5c   : > { %6243 = dma.done.wait (%p8264_p8), [#allocation6], 32768  }
  0x5d   : > { %6245 = vsyncadd (%p8264_p8), [#allocation6], 4294934528  ;;  %p533_p2 = scmp.lt.s32.totalorder %s6268_s17, 1  ;;  %s4827_s20 = sshll.u32 %s6264_s16, 2  ;;  %v752_v24 = vld [vmem:[%s8183_s4 + $0x8] sm:$0xff]  ;;  %v754_v25 = vld [vmem:[%s8183_s4 + $0x18] sm:$0xff] }
  0x5e   : > { %p541_p0 = scmp.lt.s32.totalorder %s4827_s20, 7  ;;  %v751_v26 = vld [vmem:[%s8183_s4] sm:$0xff]  ;;  %v5086_v27 = vpack.c.bf16 %v754_v25, %v752_v24  ;;  %v753_v28 = vld [vmem:[%s8183_s4 + $0x10] sm:$0xff]  ;;  %v756_v29 = vld [vmem:[%s8183_s4 + $0x28] sm:$0xff]  ;;  %vm942_vm0 = vcmask 130048   ;;  %s6288_s22 = smov 64  }
  0x5f   : > { %s6510_s23 = scalar_select %p533_p2, %s6268_s17, 1  ;;  %v758_v30 = vld [vmem:[%s8183_s4 + $0x38] sm:$0xff]  ;;  %v5088_v31 = vpack.c.bf16 %v753_v28, %v751_v26  ;;  %v755_v33 = vld [vmem:[%s8183_s4 + $0x20] sm:$0xff]  ;;  %v757_v34 = vld [vmem:[%s8183_s4 + $0x30] sm:$0xff]  ;;  %vm1622_vm1 = vcmask 523264  }
  0x60   : > { %s8376_s20 = smov (!%p541_p0, %s4827_s20), 7  ;;  %v5090_v32 = vpack.c.bf16 %v758_v30, %v756_v29  ;;  %v760_v35 = vld [vmem:[%s8183_s4 + $0x48] sm:$0xff]  ;;  %5087 = vmatprep.subr.bf16.mxu1 %v5086_v27  ;;  %v762_v36 = vld [vmem:[%s8183_s4 + $0x58] sm:$0xff]  ;;  %v5092_v37 = vpack.c.bf16 %v757_v34, %v755_v33  ;;  %v759_v39 = vld [vmem:[%s8183_s4 + $0x40] sm:$0xff]  ;;  %s8335_s26 = sld [smem:[#allocation66_spill]] }
  0x61   : > { %s4829_s14 = sshll.u32 %s6510_s23, 5  ;;  %s4828_s19 = sshll.u32 %s8376_s20, 2  ;;  %5089 = vmatpush1.bf16.msra.mxu1 %v5088_v31  ;;  %v5094_v38 = vpack.c.bf16 %v762_v36, %v760_v35  ;;  %v761_v40 = vld [vmem:[%s8183_s4 + $0x50] sm:$0xff]  ;;  %v764_v41 = vld [vmem:[%s8183_s4 + $0x68] sm:$0xff]  ;;  %v766_v42 = vld [vmem:[%s8183_s4 + $0x78] sm:$0xff] }
  0x62   : > { %s545_s24 = sadd.s32 %s4829_s14, %s4828_s19  ;;  %5091 = vmatprep.subr.bf16.mxu1 %v5090_v32  ;;  %v5096_v43 = vpack.c.bf16 %v761_v40, %v759_v39  ;;  %v5098_v44 = vpack.c.bf16 %v766_v42, %v764_v41  ;;  %v763_v45 = vld [vmem:[%s8183_s4 + $0x60] sm:$0xff]  ;;  %v765_v46 = vld [vmem:[%s8183_s4 + $0x70] sm:$0xff]  ;;  %v768_v47 = vld [vmem:[%s8183_s4 + $0x88] sm:$0xff]  ;;  %s8297_s19 = sld [smem:[#allocation65_spill]] }
  0x63   : > { %s4830_s13 = sshll.u32 %s545_s24, 3  ;;  %v770_v48 = vld [vmem:[%s8183_s4 + $0x98] sm:$0xff]  ;;  %v5100_v49 = vpack.c.bf16 %v765_v46, %v763_v45  ;;  %v767_v51 = vld [vmem:[%s8183_s4 + $0x80] sm:$0xff]  ;;  %v769_v52 = vld [vmem:[%s8183_s4 + $0x90] sm:$0xff]  ;;  %s8331_s24 = sld [smem:[#allocation12_spill]] }
  0x64   : > { %s6516_s29 = scalar_lea.vmem %s8180_s1, %s4830_s13  ;;  %v5102_v50 = vpack.c.bf16 %v770_v48, %v768_v47  ;;  %v772_v53 = vld [vmem:[%s8183_s4 + $0xa8] sm:$0xff]  ;;  %v774_v54 = vld [vmem:[%s8183_s4 + $0xb8] sm:$0xff]  ;;  %v5104_v55 = vpack.c.bf16 %v769_v52, %v767_v51  ;;  %v771_v57 = vld [vmem:[%s8183_s4 + $0xa0] sm:$0xff]  ;;  %s4908_s13 = sshll.u32 %s6510_s23, 6 }
  0x65   : > { %v6519_v0 = vld [vmem:[%s6516_s29] sm:$0xff]  ;;  %v6522_v1 = vld [vmem:[%s6516_s29 + $0x8] sm:$0xff]  ;;  %v6533_v5 = vld [vmem:[%s6516_s29 + $0x10] sm:$0xff]  ;;  %5093 = vmatpush1.bf16.msra.mxu1 %v5092_v37  ;;  %v5106_v56 = vpack.c.bf16 %v774_v54, %v772_v53  ;;  %s6932_s18 = scalar_lea.vmem %s8179_s0, %s4908_s13  ;;  %s4904_s28 = sshll.u32 %s6268_s17, 5 }
  0x66   : > { %v6525_v2 = vld [vmem:[%s6516_s29 + $0x20] sm:$0xff]  ;;  %v568_v3 = vadd.f32 %v6522_v1, %v6519_v0  ;;  %v6530_v4 = vld [vmem:[%s6516_s29 + $0x28] sm:$0xff]  ;;  %v6536_v6 = vld [vmem:[%s6516_s29 + $0x18] sm:$0xff]  ;;  %5095 = vmatprep.subr.bf16.mxu1 %v5094_v38  ;;  %s8352_s17 = sld [smem:[#allocation18_spill]]  ;;  %s8354_s30 = sld [smem:[#allocation67_spill]] }
  0x67   : > { %v574_v7 = vadd.f32 %v6530_v4, %v6525_v2  ;;  %v6541_v8 = vld [vmem:[%s6516_s29 + $0x30] sm:$0xff]  ;;  %v6544_v9 = vld [vmem:[%s6516_s29 + $0x38] sm:$0xff]  ;;  %v571_v10 = vadd.f32 %v6536_v6, %v6533_v5  ;;  %v6551_v12 = vld [vmem:[%s6516_s29 + $0x40] sm:$0xff]  ;;  %s6290_s21 = smov [#allocation7]  }
  0x68   : > { %569 = vadd.xlane.f32.xlu0 %v568_v3  ;;  %v577_v11 = vadd.f32 %v6544_v9, %v6541_v8  ;;  %v6554_v13 = vld [vmem:[%s6516_s29 + $0x48] sm:$0xff]  ;;  %v6557_v14 = vld [vmem:[%s6516_s29 + $0x50] sm:$0xff]  ;;  %v6560_v15 = vld [vmem:[%s6516_s29 + $0x58] sm:$0xff] }
  0x69   : > { %575 = vadd.xlane.f32.xlu1 %v574_v7  ;;  %v580_v16 = vadd.f32 %v6554_v13, %v6551_v12  ;;  %v583_v17 = vadd.f32 %v6560_v15, %v6557_v14  ;;  %v6567_v18 = vld [vmem:[%s6516_s29 + $0x60] sm:$0xff]  ;;  %v6570_v19 = vld [vmem:[%s6516_s29 + $0x68] sm:$0xff]  ;;  %v6573_v20 = vld [vmem:[%s6516_s29 + $0x70] sm:$0xff]  ;;  %5097 = vmatpush1.bf16.msra.mxu1 %v5096_v43 }
  0x6a   : > { %v6576_v21 = vld [vmem:[%s6516_s29 + $0x78] sm:$0xff]  ;;  %v586_v22 = vadd.f32 %v6570_v19, %v6567_v18  ;;  %5099 = vmatprep.subr.bf16.mxu1 %v5098_v44  ;;  %v773_v58 = vld [vmem:[%s8183_s4 + $0xb0] sm:$0xff]  ;;  %v776_v59 = vld [vmem:[%s8183_s4 + $0xc8] sm:$0xff] }
  0x6b   : > { %v589_v23 = vadd.f32 %v6576_v21, %v6573_v20  ;;  %v778_v60 = vld [vmem:[%s8183_s4 + $0xd8] sm:$0xff]  ;;  %v5108_v61 = vpack.c.bf16 %v773_v58, %v771_v57  ;;  %v775_v63 = vld [vmem:[%s8183_s4 + $0xc0] sm:$0xff]  ;;  %v777_v3 = vld [vmem:[%s8183_s4 + $0xd0] sm:$0xff] }
  0x6c   : > { %572 = vadd.xlane.f32.xlu0 %v571_v10  ;;  %v5110_v62 = vpack.c.bf16 %v778_v60, %v776_v59  ;;  %v780_v7 = vld [vmem:[%s8183_s4 + $0xe8] sm:$0xff]  ;;  %v782_v10 = vld [vmem:[%s8183_s4 + $0xf8] sm:$0xff]  ;;  %v783_v27 = vld [vmem:[%s8183_s4 + $0x100] sm:$0xff]  ;;  %s8355_s14 = smov %s8354_s30  ;;  %p8357_p12 = scmp.ne.s32.totalorder %s8352_s17, 0 }
  0x6d   : > { %578 = vadd.xlane.f32.xlu1 %v577_v11  ;;  %5101 = vmatpush1.bf16.msra.mxu1 %v5100_v49  ;;  %v5112_v11 = vpack.c.bf16 %v777_v3, %v775_v63  ;;  %v786_v24 = vld [vmem:[%s8183_s4 + $0x118] sm:$0xff]  ;;  %v785_v28 = vld [vmem:[%s8183_s4 + $0x110] sm:$0xff]  ;;  %v788_v29 = vld [vmem:[%s8183_s4 + $0x128] sm:$0xff] }
  0x6e   : > { %5103 = vmatprep.subr.bf16.mxu1 %v5102_v50  ;;  %v790_v30 = vld [vmem:[%s8183_s4 + $0x138] sm:$0xff]  ;;  %v5120_v31 = vpack.c.bf16 %v785_v28, %v783_v27  ;;  %v787_v33 = vld [vmem:[%s8183_s4 + $0x120] sm:$0xff]  ;;  %v789_v34 = vld [vmem:[%s8183_s4 + $0x130] sm:$0xff] }
  0x6f   : > { %v5122_v32 = vpack.c.bf16 %v790_v30, %v788_v29  ;;  %v792_v35 = vld [vmem:[%s8183_s4 + $0x148] sm:$0xff]  ;;  %v794_v36 = vld [vmem:[%s8183_s4 + $0x158] sm:$0xff]  ;;  %v5124_v37 = vpack.c.bf16 %v789_v34, %v787_v33  ;;  %v791_v39 = vld [vmem:[%s8183_s4 + $0x140] sm:$0xff] }
  0x70   : > { %581 = vadd.xlane.f32.xlu0 %v580_v16  ;;  %v5114_v16 = vpack.c.bf16 %v782_v10, %v780_v7  ;;  %v5126_v38 = vpack.c.bf16 %v794_v36, %v792_v35  ;;  %v793_v40 = vld [vmem:[%s8183_s4 + $0x150] sm:$0xff]  ;;  %v796_v34 = vld [vmem:[%s8183_s4 + $0x168] sm:$0xff]  ;;  %v798_v35 = vld [vmem:[%s8183_s4 + $0x178] sm:$0xff] }
  0x71   : > { %584 = vadd.xlane.f32.xlu1 %v583_v17  ;;  %5105 = vmatpush1.bf16.msra.mxu1 %v5104_v55  ;;  %v779_v17 = vld [vmem:[%s8183_s4 + $0xe0] sm:$0xff]  ;;  %v5128_v41 = vpack.c.bf16 %v793_v40, %v791_v39  ;;  %v5130_v36 = vpack.c.bf16 %v798_v35, %v796_v34  ;;  %v800_v40 = vld [vmem:[%s8183_s4 + $0x188] sm:$0xff] }
  0x72   : > { %5107 = vmatprep.subr.bf16.mxu1 %v5106_v56  ;;  %v566_v35 = vld [vmem:[%s8181_s2] sm:$0x3] }
  0x74   : > { %587 = vadd.xlane.f32.xlu0 %v586_v22  ;;  %v781_v22 = vld [vmem:[%s8183_s4 + $0xf0] sm:$0xff] }
  0x75   : > { %590 = vadd.xlane.f32.xlu1 %v589_v23  ;;  %5109 = vmatpush1.bf16.msra.mxu1 %v5108_v61  ;;  %v784_v23 = vld [vmem:[%s8183_s4 + $0x108] sm:$0xff]  ;;  %v5116_v25 = vpack.c.bf16 %v781_v22, %v779_v17 }
  0x76   : > { %5111 = vmatprep.subr.bf16.mxu1 %v5110_v62  ;;  %v5118_v26 = vpack.c.bf16 %v786_v24, %v784_v23 }
  0x79   : > { %5113 = vmatpush1.bf16.msra.mxu1 %v5112_v11 }
  0x7a   : > { %5115 = vmatprep.subr.bf16.mxu1 %v5114_v16 }
  0x7d   : > { %5117 = vmatpush1.bf16.msra.mxu1 %v5116_v25 }
  0x7e   : > { %5119 = vmatprep.subr.bf16.mxu1 %v5118_v26 }
  0x81   : > { %5121 = vmatpush1.bf16.msra.mxu1 %v5120_v31 }
  0x82   : > { %5123 = vmatprep.subr.bf16.mxu1 %v5122_v32 }
  0x85   : > { %5125 = vmatpush1.bf16.msra.mxu1 %v5124_v37  ;;  %v795_v37 = vld [vmem:[%s8183_s4 + $0x160] sm:$0xff] }
  0x86   : > { %5127 = vmatprep.subr.bf16.mxu1 %v5126_v38  ;;  %v797_v38 = vld [vmem:[%s8183_s4 + $0x170] sm:$0xff] }
  0x87   : > { %v5132_v39 = vpack.c.bf16 %v797_v38, %v795_v37 }
  0x89   : > { %5129 = vmatpush1.bf16.msra.mxu1 %v5128_v41  ;;  %v802_v41 = vld [vmem:[%s8183_s4 + $0x198] sm:$0xff] }
  0x8a   : > { %5131 = vmatprep.subr.bf16.mxu1 %v5130_v36 }
  0x8d   : > { %5133 = vmatpush1.bf16.msra.mxu1 %v5132_v39 }
  0xf5   : > { %v570_v42 = vpop.xlane.xlu0 %569 }
  0xf6   : > { %v593_v43 = vmul.f32 0.00390625, %v570_v42  ;;  %v576_v44 = vpop.xlane.xlu1 %575  ;;  %v5134_v42 = vpack.c.bf16 %v802_v41, %v800_v40  ;;  %v567_v40 = vld [vmem:[%s8182_s3] sm:$0x3] }
  0xf7   : > { %v595_v45 = vmul.f32 0.00390625, %v576_v44  ;;  %v801_v44 = vld [vmem:[%s8183_s4 + $0x190] sm:$0xff] }
  0xf8   : > { %v6715_v46 = vsub.f32 %v6519_v0, %v593_v43  ;;  %v6718_v47 = vsub.f32 %v6522_v1, %v593_v43  ;;  %v799_v43 = vld [vmem:[%s8183_s4 + $0x180] sm:$0xff]  ;;  %5135 = vmatprep.subr.bf16.mxu1 %v5134_v42 }
  0xf9   : > { %v6721_v48 = vsub.f32 %v6525_v2, %v595_v45  ;;  %v6724_v49 = vsub.f32 %v6530_v4, %v595_v45  ;;  %v573_v50 = vpop.xlane.xlu0 %572  ;;  %v5136_v45 = vpack.c.bf16 %v801_v44, %v799_v43 }
  0xfa   : > { %v594_v51 = vmul.f32 0.00390625, %v573_v50  ;;  %v579_v52 = vpop.xlane.xlu1 %578  ;;  %v617_v53 = vmul.f32 %v6715_v46, %v6715_v46  ;;  %v618_v54 = vmul.f32 %v6718_v47, %v6718_v47  ;;  %v804_v50 = vld [vmem:[%s8183_s4 + $0x1a8] sm:$0xff] }
  0xfb   : > { %v596_v0 = vmul.f32 0.00390625, %v579_v52  ;;  %v621_v1 = vmul.f32 %v6721_v48, %v6721_v48  ;;  %v622_v2 = vmul.f32 %v6724_v49, %v6724_v49  ;;  %5137 = vmatpush1.bf16.msra.mxu1 %v5136_v45 }
  0xfc   : > { %v6735_v55 = vsub.f32 %v6533_v5, %v594_v51  ;;  %v6738_v4 = vsub.f32 %v6536_v6, %v594_v51  ;;  %v633_v56 = vadd.f32 %v618_v54, %v617_v53  ;;  %v806_v51 = vld [vmem:[%s8183_s4 + $0x1b8] sm:$0xff]  ;;  %v803_v53 = vld [vmem:[%s8183_s4 + $0x1a0] sm:$0xff]  ;;  %v805_v54 = vld [vmem:[%s8183_s4 + $0x1b0] sm:$0xff] }
  0xfd   : > { %v6741_v57 = vsub.f32 %v6541_v8, %v596_v0  ;;  %v6744_v58 = vsub.f32 %v6544_v9, %v596_v0  ;;  %v582_v59 = vpop.xlane.xlu0 %581  ;;  %v639_v62 = vadd.f32 %v622_v2, %v621_v1  ;;  %v5138_v52 = vpack.c.bf16 %v806_v51, %v804_v50  ;;  %v808_v1 = vld [vmem:[%s8183_s4 + $0x1c8] sm:$0xff]  ;;  %v810_v2 = vld [vmem:[%s8183_s4 + $0x1d8] sm:$0xff] }
  0xfe   : > { %v597_v60 = vmul.f32 0.00390625, %v582_v59  ;;  %634 = vadd.xlane.f32.xlu0 %v633_v56  ;;  %v585_v61 = vpop.xlane.xlu1 %584  ;;  %v619_v63 = vmul.f32 %v6735_v55, %v6735_v55  ;;  %v620_v5 = vmul.f32 %v6738_v4, %v6738_v4  ;;  %v5140_v0 = vpack.c.bf16 %v805_v54, %v803_v53  ;;  %v807_v59 = vld [vmem:[%s8183_s4 + $0x1c0] sm:$0xff] }
  0xff   : > { %v598_v6 = vmul.f32 0.00390625, %v585_v61  ;;  %v623_v3 = vmul.f32 %v6741_v57, %v6741_v57  ;;  %v624_v8 = vmul.f32 %v6744_v58, %v6744_v58  ;;  %5139 = vmatprep.subr.bf16.mxu1 %v5138_v52  ;;  %v5142_v56 = vpack.c.bf16 %v810_v2, %v808_v1 }
 0x100   : > { %v6755_v9 = vsub.f32 %v6551_v12, %v597_v60  ;;  %v6758_v7 = vsub.f32 %v6554_v13, %v597_v60  ;;  %v636_v10 = vadd.f32 %v620_v5, %v619_v63  ;;  %5141 = vmatpush1.bf16.msra.mxu1 %v5140_v0  ;;  %v809_v60 = vld [vmem:[%s8183_s4 + $0x1d0] sm:$0xff]  ;;  %v814_v63 = vld [vmem:[%s8183_s4 + $0x1f8] sm:$0xff] }
 0x101   : > { %v6761_v11 = vsub.f32 %v6557_v14, %v598_v6  ;;  %v6764_v16 = vsub.f32 %v6560_v15, %v598_v6  ;;  %v588_v17 = vpop.xlane.xlu0 %587  ;;  %v642_v24 = vadd.f32 %v624_v8, %v623_v3  ;;  %v5144_v61 = vpack.c.bf16 %v809_v60, %v807_v59  ;;  %5143 = vmatprep.subr.bf16.mxu1 %v5142_v56  ;;  %v811_v6 = vld [vmem:[%s8183_s4 + $0x1e0] sm:$0xff]  ;;  %v813_v3 = vld [vmem:[%s8183_s4 + $0x1f0] sm:$0xff] }
 0x102   : > { %v599_v22 = vmul.f32 0.00390625, %v588_v17  ;;  %640 = vadd.xlane.f32.xlu0 %v639_v62  ;;  %637 = vadd.xlane.f32.xlu1 %v636_v10  ;;  %v591_v23 = vpop.xlane.xlu1 %590  ;;  %v625_v12 = vmul.f32 %v6755_v9, %v6755_v9  ;;  %v626_v13 = vmul.f32 %v6758_v7, %v6758_v7  ;;  %v812_v62 = vld [vmem:[%s8183_s4 + $0x1e8] sm:$0xff]  ;;  %v5148_v8 = vpack.c.bf16 %v813_v3, %v811_v6 }
 0x103   : > { %v600_v25 = vmul.f32 0.00390625, %v591_v23  ;;  %v627_v14 = vmul.f32 %v6761_v11, %v6761_v11  ;;  %v628_v15 = vmul.f32 %v6764_v16, %v6764_v16  ;;  %v5146_v5 = vpack.c.bf16 %v814_v63, %v812_v62 }
 0x104   : > { %v6775_v26 = vsub.f32 %v6567_v18, %v599_v22  ;;  %v6778_v27 = vsub.f32 %v6570_v19, %v599_v22  ;;  %v645_v28 = vadd.f32 %v626_v13, %v625_v12  ;;  %5145 = vmatpush1.bf16.msra.mxu1 %v5144_v61  ;;  %v698_v22 = vlaneseq }
 0x105   : > { %v6781_v29 = vsub.f32 %v6573_v20, %v600_v25  ;;  %v6784_v30 = vsub.f32 %v6576_v21, %v600_v25  ;;  %v648_v31 = vadd.f32 %v628_v15, %v627_v14  ;;  %5147 = vmatprep.subr.bf16.mxu1 %v5146_v5 }
 0x106   : > { %643 = vadd.xlane.f32.xlu1 %v642_v24  ;;  %646 = vadd.xlane.f32.xlu0 %v645_v28  ;;  %v629_v32 = vmul.f32 %v6775_v26, %v6775_v26  ;;  %v630_v18 = vmul.f32 %v6778_v27, %v6778_v27  ;;  %v6854_v14 = vshrl.u32 %v698_v22, 7 }
 0x107   : > { %v631_v19 = vmul.f32 %v6781_v29, %v6781_v29  ;;  %v632_v33 = vmul.f32 %v6784_v30, %v6784_v30 }
 0x108   : > { %v651_v20 = vadd.f32 %v630_v18, %v629_v32  ;;  %5149 = vmatpush1.bf16.msra.mxu1 %v5148_v8 }
 0x109   : > { %v654_v21 = vadd.f32 %v632_v33, %v631_v19  ;;  %v6857_v33 = vsub.s32 0, %v6854_v14 }
 0x10a   : > { %649 = vadd.xlane.f32.xlu1 %v648_v31  ;;  %652 = vadd.xlane.f32.xlu0 %v651_v20  ;;  %v6860_v20 = vsub.s32 1, %v6854_v14 }
 0x10b   : > { %8265 = vst [vmem:[#allocation22_spill] sm:$0xff] %v6857_v33  ;;  %v6869_v41 = vrot.slane %v566_v35, %v6857_v33  ;;  %v6876_v51 = vrot.slane %v567_v40, %v6857_v33 }
 0x10c   : > { %8266 = vst [vmem:[#allocation23_spill] sm:$0xff] %v6860_v20  ;;  %v6872_v42 = vrot.slane %v566_v35, %v6860_v20  ;;  %v6879_v52 = vrot.slane %v567_v40, %v6860_v20 }
 0x10e   : > { %655 = vadd.xlane.f32.xlu1 %v654_v21 }
 0x18b   : > { %v635_v10 = vpop.xlane.xlu0 %634 }
 0x18c   : > { %v657_v17 = vmul.f32 0.00390625, %v635_v10 }
 0x18e   : > { %v665_v23 = vadd.f32 1e-05, %v657_v17 }
 0x18f   : > { %v638_v24 = vpop.xlane.xlu1 %637  ;;  %v641_v12 = vpop.xlane.xlu0 %640 }
 0x190   : > { %6074 = vrsqrt.f32 %v665_v23  ;;  %v658_v13 = vmul.f32 0.00390625, %v638_v24  ;;  %v659_v25 = vmul.f32 0.00390625, %v641_v12 }
 0x192   : > { %v666_v15 = vadd.f32 1e-05, %v658_v13  ;;  %v667_v28 = vadd.f32 1e-05, %v659_v25 }
 0x193   : > { %v644_v31 = vpop.xlane.xlu1 %643  ;;  %v647_v32 = vpop.xlane.xlu0 %646 }
 0x194   : > { %6076 = vrsqrt.f32 %v666_v15  ;;  %v660_v18 = vmul.f32 0.00390625, %v644_v31  ;;  %v661_v19 = vmul.f32 0.00390625, %v647_v32 }
 0x195   : > { %6078 = vrsqrt.f32 %v667_v28 }
 0x196   : > { %v668_v21 = vadd.f32 1e-05, %v660_v18  ;;  %v669_v34 = vadd.f32 1e-05, %v661_v19 }
 0x197   : > { %v650_v36 = vpop.xlane.xlu1 %649  ;;  %v653_v37 = vpop.xlane.xlu0 %652 }
 0x198   : > { %6080 = vrsqrt.f32 %v668_v21  ;;  %v662_v38 = vmul.f32 0.00390625, %v650_v36  ;;  %v663_v39 = vmul.f32 0.00390625, %v653_v37 }
 0x199   : > { %6082 = vrsqrt.f32 %v669_v34 }
 0x19a   : > { %v6075_v43 = vpop.eup %6074  ;;  %v670_v44 = vadd.f32 1e-05, %v662_v38  ;;  %v671_v54 = vadd.f32 1e-05, %v663_v39 }
 0x19b   : > { %v656_v45 = vpop.xlane.xlu1 %655  ;;  %v682_v50 = vmul.f32 %v6075_v43, %v6718_v47  ;;  %v681_v53 = vmul.f32 %v6075_v43, %v6715_v46 }
 0x19c   : > { %6084 = vrsqrt.f32 %v670_v44  ;;  %v664_v0 = vmul.f32 0.00390625, %v656_v45 }
 0x19d   : > { %v709_v1 = vmul.f32 %v6872_v42, %v682_v50  ;;  %v708_v2 = vmul.f32 %v6869_v41, %v681_v53  ;;  %6086 = vrsqrt.f32 %v671_v54 }
 0x19e   : > { %v6077_v56 = vpop.eup %6076  ;;  %v672_v63 = vadd.f32 1e-05, %v664_v0 }
 0x19f   : > { %v6079_v59 = vpop.eup %6078  ;;  %v736_v60 = vadd.f32 %v6879_v52, %v709_v1  ;;  %v735_v47 = vadd.f32 %v6876_v51, %v708_v2  ;;  %v684_v61 = vmul.f32 %v6077_v56, %v6738_v4  ;;  %v683_v62 = vmul.f32 %v6077_v56, %v6735_v55 }
 0x1a0   : > { %v686_v46 = vmul.f32 %v6079_v59, %v6724_v49  ;;  %v685_v5 = vmul.f32 %v6079_v59, %v6721_v48  ;;  %6088 = vrsqrt.f32 %v672_v63 }
 0x1a1   : > { %891 = vmatprep.mubr.f32.mxu1 %v736_v60  ;;  %v711_v6 = vmul.f32 %v6872_v42, %v684_v61  ;;  %v710_v3 = vmul.f32 %v6869_v41, %v683_v62 }
 0x1a2   : > { %v6081_v8 = vpop.eup %6080  ;;  %892 = vmatmul.mubr.f32.vlgmr.msra.gmra.mrb[0].mxu1 %v735_v47  ;;  %v713_v10 = vmul.f32 %v6872_v42, %v686_v46  ;;  %v712_v49 = vmul.f32 %v6869_v41, %v685_v5 }
 0x1a3   : > { %v6083_v17 = vpop.eup %6082  ;;  %v738_v4 = vadd.f32 %v6879_v52, %v711_v6  ;;  %v737_v55 = vadd.f32 %v6876_v51, %v710_v3  ;;  %v688_v22 = vmul.f32 %v6081_v8, %v6744_v58  ;;  %v687_v48 = vmul.f32 %v6081_v8, %v6741_v57  ;;  %v6959_v3 = vld [vmem:[%s6932_s18 + $0x8] sm:$0xff] }
 0x1a4   : > { %v740_v23 = vadd.f32 %v6879_v52, %v713_v10  ;;  %v690_v12 = vmul.f32 %v6083_v17, %v6758_v7  ;;  %v739_v25 = vadd.f32 %v6876_v51, %v712_v49  ;;  %v689_v58 = vmul.f32 %v6083_v17, %v6755_v9  ;;  %v6962_v8 = vld [vmem:[%s6932_s18 + $0x28] sm:$0xff] }
 0x1a5   : > { %897 = vmatprep.mubr.f32.mxu1 %v738_v4  ;;  %v715_v24 = vmul.f32 %v6872_v42, %v688_v22  ;;  %v714_v15 = vmul.f32 %v6869_v41, %v687_v48 }
 0x1a6   : > { %v6085_v13 = vpop.eup %6084  ;;  %898 = vmatmul.mubr.f32.gmra.mrb[2].mxu1 %v737_v55  ;;  %v717_v57 = vmul.f32 %v6872_v42, %v690_v12  ;;  %v716_v18 = vmul.f32 %v6869_v41, %v689_v58 }
 0x1a7   : > { %903 = vmatprep.mubr.f32.mxu1 %v740_v23  ;;  %v742_v28 = vadd.f32 %v6879_v52, %v715_v24  ;;  %v692_v31 = vmul.f32 %v6085_v13, %v6764_v16  ;;  %v6087_v32 = vpop.eup %6086  ;;  %v741_v7 = vadd.f32 %v6876_v51, %v714_v15  ;;  %v691_v19 = vmul.f32 %v6085_v13, %v6761_v11 }
 0x1a8   : > { %v744_v21 = vadd.f32 %v6879_v52, %v717_v57  ;;  %v694_v9 = vmul.f32 %v6087_v32, %v6778_v27  ;;  %v743_v16 = vadd.f32 %v6876_v51, %v716_v18  ;;  %v693_v37 = vmul.f32 %v6087_v32, %v6775_v26 }
 0x1a9   : > { %v719_v34 = vmul.f32 %v6872_v42, %v692_v31  ;;  %v718_v36 = vmul.f32 %v6869_v41, %v691_v19 }
 0x1aa   : > { %904 = vmatmul.mubr.f32.gmra.mrb[4].mxu1 %v739_v25  ;;  %v6089_v35 = vpop.eup %6088  ;;  %v721_v39 = vmul.f32 %v6872_v42, %v694_v9  ;;  %v720_v40 = vmul.f32 %v6869_v41, %v693_v37 }
 0x1ab   : > { %909 = vmatprep.mubr.f32.mxu1 %v742_v28  ;;  %v746_v38 = vadd.f32 %v6879_v52, %v719_v34  ;;  %v696_v11 = vmul.f32 %v6089_v35, %v6784_v30  ;;  %v745_v27 = vadd.f32 %v6876_v51, %v718_v36  ;;  %v695_v43 = vmul.f32 %v6089_v35, %v6781_v29  ;;  %v6935_v29 = vld [vmem:[%s6932_s18] sm:$0xff] }
 0x1ac   : > { %v748_v44 = vadd.f32 %v6879_v52, %v721_v39  ;;  %v747_v26 = vadd.f32 %v6876_v51, %v720_v40 }
 0x1ad   : > { %v723_v45 = vmul.f32 %v6872_v42, %v696_v11  ;;  %v722_v50 = vmul.f32 %v6869_v41, %v695_v43  ;;  %v6940_v41 = vld [vmem:[%s6932_s18 + $0x20] sm:$0xff] }
 0x1ae   : > { %910 = vmatmul.mubr.f32.gmra.mrb[6].mxu1 %v741_v7  ;;  %5034 = vmatprep.mubr.msk.f32.mxu0 %vm942_vm0, %v6940_v41  ;;  %v815_v42 = vld [vmem:[%s8184_s5] sm:$0x3] }
 0x1af   : > { %915 = vmatprep.mubr.f32.mxu1 %v744_v21  ;;  %v750_v30 = vadd.f32 %v6879_v52, %v723_v45  ;;  %v749_v53 = vadd.f32 %v6876_v51, %v722_v50  ;;  %v6948_v52 = vrot.slane %v815_v42, %v6857_v33  ;;  %v6951_v0 = vrot.slane %v815_v42, %v6860_v20  ;;  %v7007_v45 = vld [vmem:[%s6932_s18 + $0x30] sm:$0xff] }
 0x1b2   : > { %916 = vmatmul.mubr.f32.gmra.mrb[8].mxu1 %v743_v16 }
 0x1b3   : > { %921 = vmatprep.mubr.f32.mxu1 %v746_v38 }
 0x1b6   : > { %922 = vmatmul.mubr.f32.gmra.mrb[10].mxu1 %v745_v27 }
 0x1b7   : > { %927 = vmatprep.mubr.f32.mxu1 %v748_v44  ;;  %v4839_v44 = vld [vmem:[%s6932_s18 + $0x10] sm:$0xff] }
 0x1ba   : > { %928 = vmatmul.mubr.f32.gmra.mrb[12].mxu1 %v747_v26 }
 0x1bb   : > { %933 = vmatprep.mubr.f32.mxu1 %v750_v30 }
 0x1be   : > { %934 = vmatmul.mubr.f32.gmra.mrb[14].mxu1 %v749_v53 }
 0x1bf   : > { %4978 = vmatprep.mubr.msk.f32.mxu1 %vm942_vm0, %v6935_v29 }
 0x275   : > { %v893_v51 = vpop.f32.mrb[0].mxu1 }
 0x276   : > { %v895_v54 = vpop.f32.mrb[1].mxu1  ;;  %v894_v2 = vadd.f32 %v893_v51, %v6948_v52  ;;  %v4840_v51 = vld [vmem:[%s6932_s18 + $0x18] sm:$0xff] }
 0x277   : > { %v896_v60 = vadd.f32 %v895_v54, %v6951_v0 }
 0x279   : > { %v899_v1 = vpop.f32.mrb[2].mxu1 }
 0x27a   : > { %v900_v56 = vadd.f32 %v899_v1, %v6948_v52  ;;  %v901_v59 = vpop.f32.mrb[3].mxu1 }
 0x27b   : > { %v902_v47 = vadd.f32 %v901_v59, %v6951_v0 }
 0x27c   : > { %v6034_v61 = vpack.i.bf16 %v900_v56, %v894_v2  ;;  %v5150_v62 = vpack.c.bf16 %v900_v56, %v894_v2  ;;  %v7022_v2 = vld [vmem:[%s6932_s18 + $0x38] sm:$0xff]  ;;  %s530_s18 = sand.u32 1, %s8331_s24  }
 0x27d   : > { %v6054_v63 = vpack.i.bf16 %v902_v47, %v896_v60  ;;  %v905_v46 = vpop.f32.mrb[4].mxu1  ;;  %v5214_v5 = vpack.c.bf16 %v902_v47, %v896_v60  ;;  %s4824_s25 = sshll.u32 %s530_s18, 7 }
 0x27e   : > { %6035 = vrot.lane.b32.xlu0 %v6034_v61, %s6288_s22  ;;  %v907_v6 = vpop.f32.mrb[5].mxu1  ;;  %5151 = vmatprep.subr.bf16.mxu1 %v5150_v62  ;;  %v906_v17 = vadd.f32 %v905_v46, %v6948_v52  ;;  %v1609_v46 = vld [vmem:[%s8185_s6 + $0x98] sm:$0xff]  ;;  %s8071_s23 = scalar_lea.vmem [#allocation7], %s4824_s25 }
 0x27f   : > { %5153 = vmatpush3.bf16.msra.mxu1 %v5150_v62  ;;  %5215 = vmatprep.subr.bf16.mxu0 %v5214_v5  ;;  %v908_v22 = vadd.f32 %v907_v6, %v6951_v0 }
 0x280   : > { %5217 = vmatpush3.bf16.msra.mxu0 %v5214_v5 }
 0x281   : > { %v911_v10 = vpop.f32.mrb[6].mxu1 }
 0x282   : > { %v912_v4 = vadd.f32 %v911_v10, %v6948_v52  ;;  %6055 = vrot.lane.b32.xlu0 %v6054_v63, %s6288_s22  ;;  %v913_v55 = vpop.f32.mrb[7].mxu1  ;;  %4979 = vmatmul.mubr.msk.f32.vlgmr.msra.gmra.mrb[16].mxu1 %vm942_vm0, %v6959_v3  ;;  %v1607_v63 = vld [vmem:[%s8185_s6 + $0x88] sm:$0xff] }
 0x283   : > { %v914_v49 = vadd.f32 %v913_v55, %v6951_v0  ;;  %5035 = vmatmul.mubr.msk.f32.vlgmr.msra.gmra.mrb[0].mxu0 %vm942_vm0, %v6962_v8  ;;  %4985 = vmatprep.mubr.msk.f32.mxu1 %vm942_vm0, %v6935_v29  ;;  %v5182_v10 = vpack.c.bf16 %v1609_v46, %v1607_v63  ;;  %v1254_v63 = vld [vmem:[%s8185_s6 + $0x28] sm:$0xff]  ;;  %v1256_v46 = vld [vmem:[%s8185_s6 + $0x38] sm:$0xff] }
 0x284   : > { %v6039_v48 = vpack.i.bf16 %v912_v4, %v906_v17  ;;  %v5154_v23 = vpack.c.bf16 %v912_v4, %v906_v17  ;;  %5041 = vmatprep.mubr.msk.f32.mxu0 %vm942_vm0, %v6940_v41  ;;  %v1606_v17 = vld [vmem:[%s8185_s6 + $0x80] sm:$0xff]  ;;  %v1608_v4 = vld [vmem:[%s8185_s6 + $0x90] sm:$0xff] }
 0x285   : > { %v6059_v24 = vpack.i.bf16 %v914_v49, %v908_v22  ;;  %v5218_v12 = vpack.c.bf16 %v914_v49, %v908_v22  ;;  %v917_v13 = vpop.f32.mrb[8].mxu1  ;;  %v1611_v22 = vld [vmem:[%s8185_s6 + $0xa8] sm:$0xff]  ;;  %v1613_v49 = vld [vmem:[%s8185_s6 + $0xb8] sm:$0xff] }
 0x286   : > { %6040 = vrot.lane.b32.xlu1 %v6039_v48, %s6288_s22  ;;  %v919_v25 = vpop.f32.mrb[9].mxu1  ;;  %5155 = vmatprep.subr.bf16.mxu1 %v5154_v23  ;;  %v918_v58 = vadd.f32 %v917_v13, %v6948_v52  ;;  %v5184_v13 = vpack.c.bf16 %v1608_v4, %v1606_v17  ;;  %v1258_v4 = vld [vmem:[%s8185_s6 + $0x48] sm:$0xff] }
 0x287   : > { %5157 = vmatpush3.bf16.msra.mxu1 %v5154_v23  ;;  %5219 = vmatprep.subr.bf16.mxu0 %v5218_v12  ;;  %v920_v31 = vadd.f32 %v919_v25, %v6951_v0 }
 0x288   : > { %5221 = vmatpush3.bf16.msra.mxu0 %v5218_v12 }
 0x289   : > { %v923_v15 = vpop.f32.mrb[10].mxu1 }
 0x28a   : > { %v924_v28 = vadd.f32 %v923_v15, %v6948_v52  ;;  %v925_v57 = vpop.f32.mrb[11].mxu1  ;;  %4986 = vmatmul.mubr.msk.f32.vlgmr.msra.gmra.mrb[18].mxu1 %vm942_vm0, %v6959_v3  ;;  %v5186_v15 = vpack.c.bf16 %v1613_v49, %v1611_v22 }
 0x28b   : > { %v926_v32 = vadd.f32 %v925_v57, %v6951_v0  ;;  %5042 = vmatmul.mubr.msk.f32.vlgmr.msra.gmra.mrb[2].mxu0 %vm942_vm0, %v6962_v8  ;;  %4992 = vmatprep.mubr.msk.f32.mxu1 %vm942_vm0, %v6935_v29  ;;  %v1612_v57 = vld [vmem:[%s8185_s6 + $0xb0] sm:$0xff] }
 0x28c   : > { %v6044_v7 = vpack.i.bf16 %v924_v28, %v918_v58  ;;  %v5158_v18 = vpack.c.bf16 %v924_v28, %v918_v58  ;;  %5048 = vmatprep.mubr.msk.f32.mxu0 %vm942_vm0, %v6940_v41  ;;  %v1610_v28 = vld [vmem:[%s8185_s6 + $0xa0] sm:$0xff] }
 0x28d   : > { %v6064_v19 = vpack.i.bf16 %v926_v32, %v920_v31  ;;  %v5222_v21 = vpack.c.bf16 %v926_v32, %v920_v31  ;;  %v929_v34 = vpop.f32.mrb[12].mxu1 }
 0x28e   : > { %6045 = vrot.lane.b32.xlu1 %v6044_v7, %s6288_s22  ;;  %v931_v9 = vpop.f32.mrb[13].mxu1  ;;  %5159 = vmatprep.subr.bf16.mxu1 %v5158_v18  ;;  %v930_v16 = vadd.f32 %v929_v34, %v6948_v52 }
 0x28f   : > { %6065 = vrot.lane.b32.xlu0 %v6064_v19, %s6288_s22  ;;  %5161 = vmatpush3.bf16.msra.mxu1 %v5158_v18  ;;  %v932_v38 = vadd.f32 %v931_v9, %v6951_v0  ;;  %v1615_v18 = vld [vmem:[%s8185_s6 + $0xc8] sm:$0xff]  ;;  %v1617_v19 = vld [vmem:[%s8185_s6 + $0xd8] sm:$0xff]  ;;  %v1614_v9 = vld [vmem:[%s8185_s6 + $0xc0] sm:$0xff] }
 0x290   : > { %5223 = vmatprep.subr.bf16.mxu0 %v5222_v21  ;;  %v5190_v34 = vpack.c.bf16 %v1617_v19, %v1615_v18  ;;  %v2209_v18 = vld [vmem:[%s8185_s6 + $0x118] sm:$0xff] }
 0x291   : > { %5225 = vmatpush3.bf16.msra.mxu0 %v5222_v21  ;;  %v935_v35 = vpop.f32.mrb[14].mxu1  ;;  %v5188_v21 = vpack.c.bf16 %v1612_v57, %v1610_v28  ;;  %v1261_v57 = vld [vmem:[%s8185_s6 + $0x60] sm:$0xff] }
 0x292   : > { %v936_v36 = vadd.f32 %v935_v35, %v6948_v52  ;;  %v937_v37 = vpop.f32.mrb[15].mxu1  ;;  %4993 = vmatmul.mubr.msk.f32.vlgmr.msra.gmra.mrb[20].mxu1 %vm942_vm0, %v6959_v3  ;;  %v1616_v35 = vld [vmem:[%s8185_s6 + $0xd0] sm:$0xff] }
 0x293   : > { %v938_v39 = vadd.f32 %v937_v37, %v6951_v0  ;;  %4999 = vmatprep.mubr.msk.f32.mxu1 %vm942_vm0, %v6935_v29  ;;  %v1621_v37 = vld [vmem:[%s8185_s6 + $0xf8] sm:$0xff] }
 0x294   : > { %v6049_v11 = vpack.i.bf16 %v936_v36, %v930_v16  ;;  %v5162_v27 = vpack.c.bf16 %v936_v36, %v930_v16  ;;  %5049 = vmatmul.mubr.msk.f32.vlgmr.msra.gmra.mrb[4].mxu0 %vm942_vm0, %v6962_v8  ;;  %v1619_v36 = vld [vmem:[%s8185_s6 + $0xe8] sm:$0xff] }
 0x295   : > { %v6069_v40 = vpack.i.bf16 %v938_v39, %v932_v38  ;;  %v5226_v43 = vpack.c.bf16 %v938_v39, %v932_v38  ;;  %5055 = vmatprep.mubr.msk.f32.mxu0 %vm942_vm0, %v6940_v41  ;;  %v5192_v38 = vpack.c.bf16 %v1616_v35, %v1614_v9  ;;  %v5194_v39 = vpack.c.bf16 %v1621_v37, %v1619_v36  ;;  %v2206_v36 = vld [vmem:[%s8185_s6 + $0x100] sm:$0xff]  ;;  %v2208_v37 = vld [vmem:[%s8185_s6 + $0x110] sm:$0xff] }
 0x296   : > { %6050 = vrot.lane.b32.xlu1 %v6049_v11, %s6288_s22  ;;  %5163 = vmatprep.subr.bf16.mxu1 %v5162_v27  ;;  %v1618_v11 = vld [vmem:[%s8185_s6 + $0xe0] sm:$0xff] }
 0x297   : > { %5165 = vmatpush3.bf16.msra.mxu1 %v5162_v27  ;;  %5227 = vmatprep.subr.bf16.mxu0 %v5226_v43  ;;  %v1620_v27 = vld [vmem:[%s8185_s6 + $0xf0] sm:$0xff] }
 0x298   : > { %5229 = vmatpush3.bf16.msra.mxu0 %v5226_v43  ;;  %v6289_v43 = vmov 0.0  }
 0x29a   : > { %6060 = vrot.lane.b32.xlu1 %v6059_v24, %s6288_s22  ;;  %5000 = vmatmul.mubr.msk.f32.vlgmr.msra.gmra.mrb[22].mxu1 %vm942_vm0, %v6959_v3 }
 0x29b   : > { %5006 = vmatprep.mubr.msk.f32.mxu1 %vm942_vm0, %v4839_v44  ;;  %5056 = vmatmul.mubr.msk.f32.vlgmr.msra.gmra.mrb[6].mxu0 %vm942_vm0, %v6962_v8 }
 0x29c   : > { %5062 = vmatprep.mubr.msk.f32.mxu0 %vm942_vm0, %v7007_v45 }
 0x29e   : > { %6070 = vrot.lane.b32.xlu1 %v6069_v40, %s6288_s22  ;;  %v5196_v40 = vpack.c.bf16 %v1620_v27, %v1618_v11  ;;  %v2213_v11 = vld [vmem:[%s8185_s6 + $0x138] sm:$0xff]  ;;  %s4909_s22 = sshll.u32 %s6264_s16, 4 }
 0x29f   : > { %s4693_s15 = sadd.s32 %s4909_s22, %s4904_s28 }
 0x2a0   : > { %s4905_s16 = sshll.u32 %s4693_s15, 7 }
 0x2a1   : > { %s8118_s20 = scalar_lea.hbm %s8354_s30, %s4905_s16 }
 0x2f0   : > { %v6036_v26 = vpop.permute.xlu0 %6035 }
 0x2f1   : > { %v6038_v50 = vunpack.i.h.bf16 %v6036_v26  ;;  %v6037_v30 = vunpack.i.l.bf16 %v6036_v26  ;;  %v1252_v26 = vld [vmem:[%s8185_s6 + $0x18] sm:$0xff] }
 0x2f3   : > { %v5166_v53 = vpack.c.bf16 %v6038_v50, %v6037_v30 }
 0x2f4   : > { %v6056_v29 = vpop.permute.xlu0 %6055 }
 0x2f5   : > { %v6058_v41 = vunpack.i.h.bf16 %v6056_v29  ;;  %v6057_v42 = vunpack.i.l.bf16 %v6056_v29  ;;  %5167 = vmatprep.subr.bf16.mxu1 %v5166_v53 }
 0x2f6   : > { %5169 = vmatpush3.bf16.msra.mxu1 %v5166_v53 }
 0x2f7   : > { %v5246_v52 = vpack.c.bf16 %v6058_v41, %v6057_v42 }
 0x2f8   : > { %v6041_v54 = vpop.permute.xlu1 %6040 }
 0x2f9   : > { %v6043_v0 = vunpack.i.h.bf16 %v6041_v54  ;;  %v6042_v1 = vunpack.i.l.bf16 %v6041_v54  ;;  %5007 = vmatmul.mubr.msk.f32.vlgmr.msra.gmra.mrb[24].mxu1 %vm942_vm0, %v4840_v51  ;;  %5247 = vmatprep.subr.bf16.mxu0 %v5246_v52 }
 0x2fa   : > { %5249 = vmatpush3.bf16.msra.mxu0 %v5246_v52  ;;  %5013 = vmatprep.mubr.msk.f32.mxu1 %vm942_vm0, %v4839_v44 }
 0x2fb   : > { %v5170_v56 = vpack.c.bf16 %v6043_v0, %v6042_v1 }
 0x2fd   : > { %5171 = vmatprep.subr.bf16.mxu1 %v5170_v56  ;;  %5063 = vmatmul.mubr.msk.f32.vlgmr.msra.gmra.mrb[8].mxu0 %vm942_vm0, %v7022_v2 }
 0x2fe   : > { %5173 = vmatpush3.bf16.msra.mxu1 %v5170_v56  ;;  %5069 = vmatprep.mubr.msk.f32.mxu0 %vm942_vm0, %v7007_v45 }
 0x300   : > { %v6046_v59 = vpop.permute.xlu1 %6045 }
 0x301   : > { %v6048_v60 = vunpack.i.h.bf16 %v6046_v59  ;;  %v6047_v47 = vunpack.i.l.bf16 %v6046_v59  ;;  %5014 = vmatmul.mubr.msk.f32.vlgmr.msra.gmra.mrb[26].mxu1 %vm942_vm0, %v4840_v51  ;;  %v6066_v3 = vpop.permute.xlu0 %6065 }
 0x302   : > { %5020 = vmatprep.mubr.msk.f32.mxu1 %vm942_vm0, %v4839_v44  ;;  %v6068_v48 = vunpack.i.h.bf16 %v6066_v3  ;;  %v6067_v23 = vunpack.i.l.bf16 %v6066_v3  ;;  %v5202_v3 = vpack.c.bf16 %v1256_v46, %v1254_v63  ;;  %v2217_v63 = vld [vmem:[%s8185_s6 + $0x158] sm:$0xff] }
 0x303   : > { %v5174_v61 = vpack.c.bf16 %v6048_v60, %v6047_v47 }
 0x304   : > { %v5254_v31 = vpack.c.bf16 %v6068_v48, %v6067_v23  ;;  %v1257_v48 = vld [vmem:[%s8185_s6 + $0x40] sm:$0xff]  ;;  %v1259_v23 = vld [vmem:[%s8185_s6 + $0x50] sm:$0xff] }
 0x305   : > { %5175 = vmatprep.subr.bf16.mxu1 %v5174_v61 }
 0x306   : > { %5177 = vmatpush3.bf16.msra.mxu1 %v5174_v61  ;;  %v1249_v61 = vld [vmem:[%s8185_s6] sm:$0xff] }
 0x308   : > { %v6051_v62 = vpop.permute.xlu1 %6050 }
 0x309   : > { %v6053_v5 = vunpack.i.h.bf16 %v6051_v62  ;;  %v6052_v6 = vunpack.i.l.bf16 %v6051_v62  ;;  %5021 = vmatmul.mubr.msk.f32.vlgmr.msra.gmra.mrb[28].mxu1 %vm942_vm0, %v4840_v51  ;;  %v1251_v62 = vld [vmem:[%s8185_s6 + $0x10] sm:$0xff] }
 0x30a   : > { %5027 = vmatprep.mubr.msk.f32.mxu1 %vm942_vm0, %v4839_v44  ;;  %v1250_v44 = vld [vmem:[%s8185_s6 + $0x8] sm:$0xff] }
 0x30b   : > { %v5178_v8 = vpack.c.bf16 %v6053_v5, %v6052_v6  ;;  %v5198_v50 = vpack.c.bf16 %v1252_v26, %v1250_v44  ;;  %v5200_v5 = vpack.c.bf16 %v1251_v62, %v1249_v61  ;;  %v2210_v26 = vld [vmem:[%s8185_s6 + $0x120] sm:$0xff]  ;;  %v2215_v62 = vld [vmem:[%s8185_s6 + $0x148] sm:$0xff] }
 0x30c   : > { %v6061_v55 = vpop.permute.xlu1 %6060 }
 0x30d   : > { %v6063_v24 = vunpack.i.h.bf16 %v6061_v55  ;;  %v6062_v12 = vunpack.i.l.bf16 %v6061_v55  ;;  %5179 = vmatprep.subr.bf16.mxu1 %v5178_v8  ;;  %v1260_v55 = vld [vmem:[%s8185_s6 + $0x58] sm:$0xff] }
 0x30e   : > { %5181 = vmatpush3.bf16.msra.mxu1 %v5178_v8  ;;  %v1253_v8 = vld [vmem:[%s8185_s6 + $0x20] sm:$0xff]  ;;  %v5206_v49 = vpack.c.bf16 %v1260_v55, %v1258_v4 }
 0x30f   : > { %v5250_v25 = vpack.c.bf16 %v6063_v24, %v6062_v12  ;;  %5183 = vmatprep.subr.bf16.mxu1 %v5182_v10  ;;  %v1255_v10 = vld [vmem:[%s8185_s6 + $0x30] sm:$0xff]  ;;  %v1262_v12 = vld [vmem:[%s8185_s6 + $0x68] sm:$0xff] }
 0x310   : > { %v6071_v58 = vpop.permute.xlu1 %6070  ;;  %v5204_v22 = vpack.c.bf16 %v1255_v10, %v1253_v8  ;;  %v2216_v8 = vld [vmem:[%s8185_s6 + $0x150] sm:$0xff] }
 0x311   : > { %v6073_v32 = vunpack.i.h.bf16 %v6071_v58  ;;  %v6072_v7 = vunpack.i.l.bf16 %v6071_v58  ;;  %5028 = vmatmul.mubr.msk.f32.vlgmr.msra.gmra.mrb[30].mxu1 %vm942_vm0, %v4840_v51  ;;  %5251 = vmatprep.subr.bf16.mxu0 %v5250_v25 }
 0x312   : > { %5253 = vmatpush3.bf16.msra.mxu0 %v5250_v25  ;;  %5185 = vmatpush1.bf16.msra.mxu1 %v5184_v13  ;;  %v1264_v13 = vld [vmem:[%s8185_s6 + $0x78] sm:$0xff] }
 0x313   : > { %5255 = vmatprep.subr.bf16.mxu0 %v5254_v31  ;;  %5187 = vmatprep.subr.bf16.mxu1 %v5186_v15  ;;  %v5258_v16 = vpack.c.bf16 %v6073_v32, %v6072_v7  ;;  %v5208_v15 = vpack.c.bf16 %v1259_v23, %v1257_v48  ;;  %v5210_v28 = vpack.c.bf16 %v1264_v13, %v1262_v12  ;;  %v2207_v7 = vld [vmem:[%s8185_s6 + $0x108] sm:$0xff]  ;;  %v2220_v48 = vld [vmem:[%s8185_s6 + $0x170] sm:$0xff] }
 0x314   : > { %1711 = vmatprep.mubr.f32.mxu1 %v6289_v43  ;;  %v2717_v23 = vld [vmem:[%s8185_s6 + $0x188] sm:$0xff] }
 0x315   : > { %5070 = vmatmul.mubr.msk.f32.vlgmr.msra.gmra.mrb[10].mxu0 %vm942_vm0, %v7022_v2 }
 0x316   : > { %5257 = vmatpush3.bf16.msra.mxu0 %v5254_v31  ;;  %5076 = vmatprep.mubr.msk.f32.mxu0 %vm942_vm0, %v7007_v45  ;;  %v1263_v31 = vld [vmem:[%s8185_s6 + $0x70] sm:$0xff] }
 0x317   : > { %5259 = vmatprep.subr.bf16.mxu0 %v5258_v16  ;;  %5189 = vmatpush1.bf16.msra.mxu1 %v5188_v21  ;;  %v5212_v19 = vpack.c.bf16 %v1263_v31, %v1261_v57  ;;  %v5230_v21 = vpack.c.bf16 %v2209_v18, %v2207_v7  ;;  %v2725_v57 = vld [vmem:[%s8185_s6 + $0x1c8] sm:$0xff]  ;;  %v2724_v7 = vld [vmem:[%s8185_s6 + $0x1c0] sm:$0xff]  ;;  %v2726_v18 = vld [vmem:[%s8185_s6 + $0x1d0] sm:$0xff] }
 0x318   : > { %5191 = vmatprep.subr.bf16.mxu1 %v5190_v34 }
 0x319   : > { %5077 = vmatmul.mubr.msk.f32.vlgmr.msra.gmra.mrb[12].mxu0 %vm942_vm0, %v7022_v2 }
 0x31a   : > { %5261 = vmatpush3.bf16.msra.mxu0 %v5258_v16  ;;  %5083 = vmatprep.mubr.msk.f32.mxu0 %vm942_vm0, %v7007_v45 }
 0x31b   : > { %5193 = vmatpush1.bf16.msra.mxu1 %v5192_v38 }
 0x31c   : > { %5195 = vmatprep.subr.bf16.mxu1 %v5194_v39  ;;  %v2211_v39 = vld [vmem:[%s8185_s6 + $0x128] sm:$0xff] }
 0x31d   : > { %5084 = vmatmul.mubr.msk.f32.vlgmr.msra.gmra.mrb[14].mxu0 %vm942_vm0, %v7022_v2  ;;  %v5234_v44 = vpack.c.bf16 %v2213_v11, %v2211_v39 }
 0x31f   : > { %5197 = vmatpush1.bf16.msra.mxu1 %v5196_v40  ;;  %v5232_v40 = vpack.c.bf16 %v2208_v37, %v2206_v36 }
 0x320   : > { %5199 = vmatprep.subr.bf16.mxu1 %v5198_v50  ;;  %v2212_v50 = vld [vmem:[%s8185_s6 + $0x130] sm:$0xff] }
 0x355   : > { %v7098_v45 = vpop.f32.mrb[16].mxu1 }
 0x356   : > { %v7100_v30 = vpop.f32.mrb[17].mxu1  ;;  %v7114_v54 = vpop.f32.mrb[0].mxu0 }
 0x357   : > { %v7116_v0 = vpop.f32.mrb[1].mxu0 }
 0x35d   : > { %v7102_v53 = vpop.f32.mrb[18].mxu1 }
 0x35e   : > { %v7104_v29 = vpop.f32.mrb[19].mxu1  ;;  %v7118_v1 = vpop.f32.mrb[2].mxu0 }
 0x35f   : > { %v7120_v2 = vpop.f32.mrb[3].mxu0 }
 0x365   : > { %v7106_v41 = vpop.f32.mrb[20].mxu1 }
 0x366   : > { %v7108_v42 = vpop.f32.mrb[21].mxu1 }
 0x367   : > { %v7122_v56 = vpop.f32.mrb[4].mxu0 }
 0x368   : > { %v7124_v59 = vpop.f32.mrb[5].mxu0 }
 0x36d   : > { %v7110_v51 = vpop.f32.mrb[22].mxu1 }
 0x36e   : > { %v7112_v52 = vpop.f32.mrb[23].mxu1  ;;  %v7126_v60 = vpop.f32.mrb[6].mxu0 }
 0x36f   : > { %v7128_v47 = vpop.f32.mrb[7].mxu0 }
 0x3cc   : > { %v5008_v6 = vpop.f32.mrb[24].mxu1 }
 0x3cd   : > { %v1348_v17 = vpop.f32.mrb[25].mxu1 }
 0x3ce   : > { %4849 = vmatmul.mubr.msk.f32.vlgmr.msra.gmra.mrb[32].mxu1 %vm1622_vm1, %v1348_v17  ;;  %v2221_v17 = vld [vmem:[%s8185_s6 + $0x178] sm:$0xff] }
 0x3cf   : > { %5201 = vmatpush1.bf16.msra.mxu1 %v5200_v5  ;;  %1717 = vmatprep.mubr.f32.mxu1 %v6289_v43  ;;  %v5236_v5 = vpack.c.bf16 %v2212_v50, %v2210_v26 }
 0x3d0   : > { %5203 = vmatprep.subr.bf16.mxu1 %v5202_v3  ;;  %v7162_v24 = vpop.f32.mrb[8].mxu0  ;;  %v2214_v3 = vld [vmem:[%s8185_s6 + $0x140] sm:$0xff] }
 0x3d1   : > { %v7170_v25 = vpop.f32.mrb[9].mxu0  ;;  %v5240_v55 = vpack.c.bf16 %v2216_v8, %v2214_v3 }
 0x3d2   : > { %4850 = vmatmul.mubr.msk.f32.gmra.mrb[34].mxu1 %vm1622_vm1, %v5008_v6  ;;  %v5238_v6 = vpack.c.bf16 %v2217_v63, %v2215_v62  ;;  %v6110_v62 = vld [vmem:[%s6516_s29 + $0x20] sm:$0xff] }
 0x3d3   : > { %1723 = vmatprep.mubr.f32.mxu1 %v6289_v43  ;;  %5205 = vmatpush1.bf16.msra.mxu1 %v5204_v22 }
 0x3d4   : > { %v5015_v58 = vpop.f32.mrb[26].mxu1  ;;  %5207 = vmatprep.subr.bf16.mxu1 %v5206_v49  ;;  %v2218_v49 = vld [vmem:[%s8185_s6 + $0x160] sm:$0xff] }
 0x3d5   : > { %v1431_v32 = vpop.f32.mrb[27].mxu1  ;;  %v5244_v12 = vpack.c.bf16 %v2220_v48, %v2218_v49 }
 0x3d6   : > { %4851 = vmatmul.mubr.msk.f32.gmra.mrb[36].mxu1 %vm1622_vm1, %v1431_v32 }
 0x3d7   : > { %1729 = vmatprep.mubr.f32.mxu1 %v6289_v43  ;;  %5209 = vmatpush1.bf16.msra.mxu1 %v5208_v15 }
 0x3d8   : > { %5211 = vmatprep.subr.bf16.mxu1 %v5210_v28  ;;  %v2722_v28 = vld [vmem:[%s8185_s6 + $0x1b0] sm:$0xff] }
 0x3da   : > { %4852 = vmatmul.mubr.msk.f32.gmra.mrb[38].mxu1 %vm1622_vm1, %v5015_v58  ;;  %v2720_v58 = vld [vmem:[%s8185_s6 + $0x1a0] sm:$0xff] }
 0x3db   : > { %1735 = vmatprep.mubr.f32.mxu1 %v6289_v43  ;;  %5213 = vmatpush1.bf16.msra.mxu1 %v5212_v19  ;;  %v5268_v31 = vpack.c.bf16 %v2722_v28, %v2720_v58  ;;  %v2729_v19 = vld [vmem:[%s8185_s6 + $0x1e8] sm:$0xff] }
 0x3dc   : > { %v5022_v34 = vpop.f32.mrb[28].mxu1  ;;  %5231 = vmatprep.subr.bf16.mxu1 %v5230_v21  ;;  %v5272_v21 = vpack.c.bf16 %v2726_v18, %v2724_v7 }
 0x3dd   : > { %v1514_v9 = vpop.f32.mrb[29].mxu1 }
 0x3de   : > { %4853 = vmatmul.mubr.msk.f32.gmra.mrb[40].mxu1 %vm1622_vm1, %v1514_v9  ;;  %v2728_v9 = vld [vmem:[%s8185_s6 + $0x1e0] sm:$0xff] }
 0x3df   : > { %1741 = vmatprep.mubr.f32.mxu1 %v6289_v43 }
 0x3e2   : > { %4854 = vmatmul.mubr.msk.f32.gmra.mrb[42].mxu1 %vm1622_vm1, %v5022_v34 }
 0x3e3   : > { %1747 = vmatprep.mubr.f32.mxu1 %v6289_v43 }
 0x3e4   : > { %v5029_v35 = vpop.f32.mrb[30].mxu1 }
 0x3e5   : > { %v1597_v16 = vpop.f32.mrb[31].mxu1 }
 0x3e6   : > { %4855 = vmatmul.mubr.msk.f32.gmra.mrb[44].mxu1 %vm1622_vm1, %v1597_v16 }
 0x3e7   : > { %1753 = vmatprep.mubr.f32.mxu1 %v6289_v43 }
 0x3e8   : > { %v7202_v38 = vpop.f32.mrb[10].mxu0 }
 0x3e9   : > { %v7210_v27 = vpop.f32.mrb[11].mxu0 }
 0x3ea   : > { %4856 = vmatmul.mubr.msk.f32.gmra.mrb[46].mxu1 %vm1622_vm1, %v5029_v35  ;;  %v2730_v35 = vld [vmem:[%s8185_s6 + $0x1f0] sm:$0xff] }
 0x3eb   : > { %1848 = vmatprep.mubr.f32.mxu1 %v6289_v43 }
 0x3ec   : > { %v7220_v61 = vpop.f32.mrb[12].mxu0 }
 0x3ed   : > { %v7228_v46 = vpop.f32.mrb[13].mxu0 }
 0x3ee   : > { %4857 = vmatmul.mubr.msk.f32.vlgmr.msra.gmra.mrb[32].mxu1 %vm1622_vm1, %v7100_v30  ;;  %v2219_v30 = vld [vmem:[%s8185_s6 + $0x168] sm:$0xff] }
 0x3ef   : > { %5233 = vmatpush1.bf16.msra.mxu1 %v5232_v40  ;;  %1854 = vmatprep.mubr.f32.mxu1 %v6289_v43  ;;  %v5242_v22 = vpack.c.bf16 %v2221_v17, %v2219_v30  ;;  %v6112_v17 = vld [vmem:[%s6516_s29 + $0x30] sm:$0xff] }
 0x3f0   : > { %5235 = vmatprep.subr.bf16.mxu1 %v5234_v44  ;;  %v7239_v10 = vpop.f32.mrb[14].mxu0 }
 0x3f1   : > { %v7247_v4 = vpop.f32.mrb[15].mxu0 }
 0x3f2   : > { %4858 = vmatmul.mubr.msk.f32.gmra.mrb[34].mxu1 %vm1622_vm1, %v7098_v45  ;;  %v2719_v45 = vld [vmem:[%s8185_s6 + $0x198] sm:$0xff] }
 0x3f3   : > { %1860 = vmatprep.mubr.f32.mxu1 %v6289_v43  ;;  %5237 = vmatpush1.bf16.msra.mxu1 %v5236_v5  ;;  %v5262_v13 = vpack.c.bf16 %v2719_v45, %v2717_v23  ;;  %v6111_v5 = vld [vmem:[%s6516_s29 + $0x28] sm:$0xff] }
 0x3f4   : > { %5239 = vmatprep.subr.bf16.mxu1 %v5238_v6 }
 0x3f6   : > { %4859 = vmatmul.mubr.msk.f32.gmra.mrb[36].mxu1 %vm1622_vm1, %v7104_v29  ;;  %v2718_v29 = vld [vmem:[%s8185_s6 + $0x190] sm:$0xff] }
 0x3f7   : > { %1866 = vmatprep.mubr.f32.mxu1 %v6289_v43  ;;  %5241 = vmatpush1.bf16.msra.mxu1 %v5240_v55 }
 0x3f8   : > { %5243 = vmatprep.subr.bf16.mxu1 %v5242_v22  ;;  %v6113_v22 = vld [vmem:[%s6516_s29 + $0x38] sm:$0xff] }
 0x3fa   : > { %4860 = vmatmul.mubr.msk.f32.gmra.mrb[38].mxu1 %vm1622_vm1, %v7102_v53  ;;  %v2716_v53 = vld [vmem:[%s8185_s6 + $0x180] sm:$0xff] }
 0x3fb   : > { %1872 = vmatprep.mubr.f32.mxu1 %v6289_v43  ;;  %5245 = vmatpush1.bf16.msra.mxu1 %v5244_v12 }
 0x3fc   : > { %5263 = vmatprep.subr.bf16.mxu1 %v5262_v13  ;;  %v6114_v13 = vld [vmem:[%s6516_s29 + $0x40] sm:$0xff] }
 0x3fe   : > { %4861 = vmatmul.mubr.msk.f32.gmra.mrb[40].mxu1 %vm1622_vm1, %v7108_v42  ;;  %v2721_v42 = vld [vmem:[%s8185_s6 + $0x1a8] sm:$0xff] }
 0x3ff   : > { %1878 = vmatprep.mubr.f32.mxu1 %v6289_v43 }
 0x402   : > { %4862 = vmatmul.mubr.msk.f32.gmra.mrb[42].mxu1 %vm1622_vm1, %v7106_v41  ;;  %v2723_v41 = vld [vmem:[%s8185_s6 + $0x1b8] sm:$0xff] }
 0x403   : > { %1884 = vmatprep.mubr.f32.mxu1 %v6289_v43  ;;  %v5266_v15 = vpack.c.bf16 %v2723_v41, %v2721_v42  ;;  %v6115_v42 = vld [vmem:[%s6516_s29 + $0x48] sm:$0xff] }
 0x406   : > { %4863 = vmatmul.mubr.msk.f32.gmra.mrb[44].mxu1 %vm1622_vm1, %v7112_v52  ;;  %v5264_v52 = vpack.c.bf16 %v2718_v29, %v2716_v53 }
 0x407   : > { %1890 = vmatprep.mubr.f32.mxu1 %v6289_v43 }
 0x40a   : > { %4864 = vmatmul.mubr.msk.f32.gmra.mrb[46].mxu1 %vm1622_vm1, %v7110_v51  ;;  %v2727_v51 = vld [vmem:[%s8185_s6 + $0x1d8] sm:$0xff] }
 0x40b   : > { %2310 = vmatprep.mubr.f32.mxu1 %v6289_v43  ;;  %v5270_v32 = vpack.c.bf16 %v2727_v51, %v2725_v57  ;;  %v6116_v57 = vld [vmem:[%s6516_s29 + $0x50] sm:$0xff] }
 0x40e   : > { %4875 = vmatmul.mubr.msk.f32.vlgmr.msra.gmra.mrb[32].mxu1 %vm1622_vm1, %v7116_v0  ;;  %v2731_v0 = vld [vmem:[%s8185_s6 + $0x1f8] sm:$0xff] }
 0x40f   : > { %5265 = vmatpush1.bf16.msra.mxu1 %v5264_v52  ;;  %2316 = vmatprep.mubr.f32.mxu1 %v6289_v43  ;;  %v5274_v34 = vpack.c.bf16 %v2731_v0, %v2729_v19 }
 0x410   : > { %5267 = vmatprep.subr.bf16.mxu1 %v5266_v15 }
 0x412   : > { %4876 = vmatmul.mubr.msk.f32.gmra.mrb[34].mxu1 %vm1622_vm1, %v7114_v54  ;;  %v5276_v54 = vpack.c.bf16 %v2730_v35, %v2728_v9 }
 0x413   : > { %2322 = vmatprep.mubr.f32.mxu1 %v6289_v43  ;;  %5269 = vmatpush1.bf16.msra.mxu1 %v5268_v31 }
 0x414   : > { %5271 = vmatprep.subr.bf16.mxu1 %v5270_v32  ;;  %v6117_v32 = vld [vmem:[%s6516_s29 + $0x58] sm:$0xff] }
 0x416   : > { %4877 = vmatmul.mubr.msk.f32.gmra.mrb[36].mxu1 %vm1622_vm1, %v7120_v2 }
 0x417   : > { %2328 = vmatprep.mubr.f32.mxu1 %v6289_v43  ;;  %5273 = vmatpush1.bf16.msra.mxu1 %v5272_v21 }
 0x418   : > { %5275 = vmatprep.subr.bf16.mxu1 %v5274_v34  ;;  %v6118_v34 = vld [vmem:[%s6516_s29 + $0x60] sm:$0xff] }
 0x41a   : > { %4878 = vmatmul.mubr.msk.f32.gmra.mrb[38].mxu1 %vm1622_vm1, %v7118_v1  ;;  %v2901_v1 = vld [vmem:[%s8186_s7] sm:$0x3] }
 0x41b   : > { %2334 = vmatprep.mubr.f32.mxu1 %v6289_v43  ;;  %5277 = vmatpush1.bf16.msra.mxu1 %v5276_v54  ;;  %v7375_v2 = vrot.slane %v2901_v1, %v6857_v33  ;;  %v6119_v54 = vld [vmem:[%s6516_s29 + $0x68] sm:$0xff] }
 0x41e   : > { %4879 = vmatmul.mubr.msk.f32.gmra.mrb[40].mxu1 %vm1622_vm1, %v7124_v59  ;;  %v7378_v59 = vrot.slane %v2901_v1, %v6860_v20 }
 0x41f   : > { %2340 = vmatprep.mubr.f32.mxu1 %v6289_v43 }
 0x422   : > { %4880 = vmatmul.mubr.msk.f32.gmra.mrb[42].mxu1 %vm1622_vm1, %v7122_v56 }
 0x423   : > { %2346 = vmatprep.mubr.f32.mxu1 %v6289_v43 }
 0x426   : > { %4881 = vmatmul.mubr.msk.f32.gmra.mrb[44].mxu1 %vm1622_vm1, %v7128_v47 }
 0x427   : > { %2352 = vmatprep.mubr.f32.mxu1 %v6289_v43 }
 0x42a   : > { %4882 = vmatmul.mubr.msk.f32.gmra.mrb[46].mxu1 %vm1622_vm1, %v7126_v60  ;;  %v6106_v60 = vld [vmem:[%s6516_s29] sm:$0xff] }
 0x42b   : > { %2820 = vmatprep.mubr.f32.mxu1 %v6289_v43 }
 0x42e   : > { %4893 = vmatmul.mubr.msk.f32.vlgmr.msra.gmra.mrb[32].mxu1 %vm1622_vm1, %v7170_v25 }
 0x42f   : > { %2826 = vmatprep.mubr.f32.mxu1 %v6289_v43 }
 0x432   : > { %4894 = vmatmul.mubr.msk.f32.gmra.mrb[34].mxu1 %vm1622_vm1, %v7162_v24 }
 0x433   : > { %2832 = vmatprep.mubr.f32.mxu1 %v6289_v43 }
 0x436   : > { %4895 = vmatmul.mubr.msk.f32.gmra.mrb[36].mxu1 %vm1622_vm1, %v7210_v27  ;;  %v6109_v27 = vld [vmem:[%s6516_s29 + $0x18] sm:$0xff] }
 0x437   : > { %2838 = vmatprep.mubr.f32.mxu1 %v6289_v43 }
 0x43a   : > { %4896 = vmatmul.mubr.msk.f32.gmra.mrb[38].mxu1 %vm1622_vm1, %v7202_v38  ;;  %v6108_v38 = vld [vmem:[%s6516_s29 + $0x10] sm:$0xff] }
 0x43b   : > { %2844 = vmatprep.mubr.f32.mxu1 %v6289_v43 }
 0x43e   : > { %4897 = vmatmul.mubr.msk.f32.gmra.mrb[40].mxu1 %vm1622_vm1, %v7228_v46 }
 0x43f   : > { %2850 = vmatprep.mubr.f32.mxu1 %v6289_v43 }
 0x442   : > { %4898 = vmatmul.mubr.msk.f32.gmra.mrb[42].mxu1 %vm1622_vm1, %v7220_v61 }
 0x443   : > { %2856 = vmatprep.mubr.f32.mxu1 %v6289_v43 }
 0x446   : > { %4899 = vmatmul.mubr.msk.f32.gmra.mrb[44].mxu1 %vm1622_vm1, %v7247_v4 }
 0x447   : > { %2862 = vmatprep.mubr.f32.mxu1 %v6289_v43  ;;  %v6107_v43 = vld [vmem:[%s6516_s29 + $0x8] sm:$0xff] }
 0x44a   : > { %4900 = vmatmul.mubr.msk.f32.gmra.mrb[46].mxu1 %vm1622_vm1, %v7239_v10 }
 0x501   : > { %v2822_v56 = vpop.f32.mrb[32].mxu1 }
 0x502   : > { %v2885_v47 = vadd.f32 %v6106_v60, %v2822_v56  ;;  %v2824_v24 = vpop.f32.mrb[33].mxu1 }
 0x503   : > { %v2886_v25 = vadd.f32 %v6107_v43, %v2824_v24  ;;  %v6120_v43 = vld [vmem:[%s6516_s29 + $0x70] sm:$0xff] }
 0x504   : > { %v7383_v16 = vadd.f32 %v7375_v2, %v2885_v47 }
 0x505   : > { %v7386_v36 = vadd.f32 %v7378_v59, %v2886_v25  ;;  %v2828_v37 = vpop.f32.mrb[34].mxu1 }
 0x506   : > { %8267 = vst [vmem:[#allocation24_spill] sm:$0xff] %v7383_v16  ;;  %v2887_v39 = vadd.f32 %v6108_v38, %v2828_v37  ;;  %v2830_v11 = vpop.f32.mrb[35].mxu1  ;;  %v6121_v38 = vld [vmem:[%s6516_s29 + $0x78] sm:$0xff]  ;;  %s4696_s29 = sshll.u32 %s8071_s23, 4  ;;  %s8120_s29 = int_to_ptr.vmem [resolvable:$true] %s4696_s29 }
 0x507   : > { %8268 = vst [vmem:[#allocation25_spill] sm:$0xff] %v7386_v36  ;;  %v2888_v40 = vadd.f32 %v6109_v27, %v2830_v11  ;;  %v2931_v44 = vadd.f32 %v7386_v36, %v7383_v16  ;;  %s6178_s13 = scalar_lea.vmem %s8120_s29, 2048 }
 0x508   : > { %v7393_v26 = vadd.f32 %v7375_v2, %v2887_v39  ;;  %p6179_p10 = scmp.ne.s32.totalorder %s8120_s29, %s6178_s13 }
 0x509   : > { %v7396_v50 = vadd.f32 %v7378_v59, %v2888_v40  ;;  %2932 = vadd.xlane.f32.xlu0 %v2931_v44  ;;  %v2834_v61 = vpop.f32.mrb[36].mxu1 }
 0x50a   : > { %8269 = vst [vmem:[#allocation26_spill] sm:$0xff] %v7393_v26  ;;  %v2889_v63 = vadd.f32 %v6110_v62, %v2834_v61  ;;  %v2836_v46 = vpop.f32.mrb[37].mxu1  ;;  %v3114_v61 = vld [vmem:[#allocation2 + $0x8] sm:$0xff]  ;;  %p6180_p1 = pnand %p6179_p10, %p8357_p12 }
 0x50b   : > { %8270 = vst [vmem:[#allocation27_spill] sm:$0xff] %v7396_v50  ;;  %v2890_v6 = vadd.f32 %v6111_v5, %v2836_v46  ;;  %v2934_v3 = vadd.f32 %v7396_v50, %v7393_v26  ;;  %v3122_v62 = vld [vmem:[#allocation2 + $0x48] sm:$0xff]  ;;  %v3124_v5 = vld [vmem:[#allocation2 + $0x58] sm:$0xff] }
 0x50c   : > { %v7403_v8 = vadd.f32 %v7375_v2, %v2889_v63  ;;  %v3116_v63 = vld [vmem:[#allocation2 + $0x18] sm:$0xff]  ;;  %v5278_v46 = vpack.c.bf16 %v3122_v62, %v3114_v61  ;;  %v3171_v61 = vld [vmem:[#allocation2 + $0x1d0] sm:$0xff]  ;;  %v3178_v62 = vld [vmem:[#allocation2 + $0x208] sm:$0xff]  ;;  %p6181_p4 = pneg %p6180_p1 }
 0x50d   : > { %v7406_v10 = vadd.f32 %v7378_v59, %v2890_v6  ;;  %2935 = vadd.xlane.f32.xlu1 %v2934_v3  ;;  %v2840_v30 = vpop.f32.mrb[38].mxu1  ;;  %v3113_v6 = vld [vmem:[#allocation2] sm:$0xff] }
 0x50e   : > { %8271 = vst [vmem:[#allocation28_spill] sm:$0xff] %v7403_v8  ;;  %v2891_v4 = vadd.f32 %v6112_v17, %v2840_v30  ;;  %v2842_v55 = vpop.f32.mrb[39].mxu1  ;;  %v3121_v3 = vld [vmem:[#allocation2 + $0x40] sm:$0xff]  ;;  %v5342_v30 = vpack.c.bf16 %v3124_v5, %v3116_v63  ;;  %5279 = vmatprep.subr.bf16.mxu0 %v5278_v46  ;;  %v3186_v63 = vld [vmem:[#allocation2 + $0x248] sm:$0xff]  ;;  %v3180_v46 = vld [vmem:[#allocation2 + $0x218] sm:$0xff] }
 0x50f   : > { %8272 = vst [vmem:[#allocation29_spill] sm:$0xff] %v7406_v10  ;;  %v2892_v49 = vadd.f32 %v6113_v22, %v2842_v55  ;;  %v2937_v48 = vadd.f32 %v7406_v10, %v7403_v8  ;;  %v5280_v17 = vpack.c.bf16 %v3121_v3, %v3113_v6  ;;  %v3130_v55 = vld [vmem:[#allocation2 + $0x88] sm:$0xff]  ;;  %v3188_v5 = vld [vmem:[#allocation2 + $0x258] sm:$0xff] }
 0x510   : > { %v7413_v23 = vadd.f32 %v7375_v2, %v2891_v4  ;;  %v3115_v4 = vld [vmem:[#allocation2 + $0x10] sm:$0xff]  ;;  %v3138_v22 = vld [vmem:[#allocation2 + $0xc8] sm:$0xff]  ;;  %5343 = vmatprep.subr.bf16.mxu1 %v5342_v30  ;;  %v5294_v30 = vpack.c.bf16 %v3186_v63, %v3178_v62 }
 0x511   : > { %v7416_v45 = vadd.f32 %v7378_v59, %v2892_v49  ;;  %2938 = vadd.xlane.f32.xlu0 %v2937_v48  ;;  %v2846_v12 = vpop.f32.mrb[40].mxu1  ;;  %v3132_v49 = vld [vmem:[#allocation2 + $0x98] sm:$0xff]  ;;  %5281 = vmatpush1.bf16.msra.mxu0 %v5280_v17  ;;  %v3177_v17 = vld [vmem:[#allocation2 + $0x200] sm:$0xff]  ;;  %v3227_v62 = vld [vmem:[#allocation2 + $0x390] sm:$0xff] }
 0x512   : > { %8273 = vst [vmem:[#allocation30_spill] sm:$0xff] %v7413_v23  ;;  %v2893_v53 = vadd.f32 %v6114_v13, %v2846_v12  ;;  %v2848_v29 = vpop.f32.mrb[41].mxu1  ;;  %v3140_v48 = vld [vmem:[#allocation2 + $0xd8] sm:$0xff]  ;;  %v5282_v12 = vpack.c.bf16 %v3138_v22, %v3130_v55  ;;  %v5358_v55 = vpack.c.bf16 %v3188_v5, %v3180_v46  ;;  %v3194_v22 = vld [vmem:[#allocation2 + $0x288] sm:$0xff]  ;;  %v3235_v46 = vld [vmem:[#allocation2 + $0x3d0] sm:$0xff] }
 0x513   : > { %8274 = vst [vmem:[#allocation31_spill] sm:$0xff] %v7416_v45  ;;  %v2894_v41 = vadd.f32 %v6115_v42, %v2848_v29  ;;  %v2940_v52 = vadd.f32 %v7416_v45, %v7413_v23  ;;  %v5346_v13 = vpack.c.bf16 %v3140_v48, %v3132_v49  ;;  %v3137_v29 = vld [vmem:[#allocation2 + $0xc0] sm:$0xff]  ;;  %v3131_v42 = vld [vmem:[#allocation2 + $0x90] sm:$0xff]  ;;  %v3202_v49 = vld [vmem:[#allocation2 + $0x2c8] sm:$0xff] }
 0x514   : > { %v7423_v15 = vadd.f32 %v7375_v2, %v2893_v53  ;;  %v3129_v53 = vld [vmem:[#allocation2 + $0x80] sm:$0xff]  ;;  %5283 = vmatprep.subr.bf16.mxu0 %v5282_v12  ;;  %v3196_v48 = vld [vmem:[#allocation2 + $0x298] sm:$0xff]  ;;  %v3242_v5 = vld [vmem:[#allocation2 + $0x408] sm:$0xff] }
 0x515   : > { %v7426_v58 = vadd.f32 %v7378_v59, %v2894_v41  ;;  %2941 = vadd.xlane.f32.xlu0 %v2940_v52  ;;  %v2852_v28 = vpop.f32.mrb[42].mxu1  ;;  %v5284_v41 = vpack.c.bf16 %v3137_v29, %v3129_v53  ;;  %v3139_v52 = vld [vmem:[#allocation2 + $0xd0] sm:$0xff]  ;;  %v3204_v12 = vld [vmem:[#allocation2 + $0x2d8] sm:$0xff]  ;;  %v5298_v29 = vpack.c.bf16 %v3202_v49, %v3194_v22 }
 0x516   : > { %8275 = vst [vmem:[#allocation32_spill] sm:$0xff] %v7423_v15  ;;  %v2895_v51 = vadd.f32 %v6116_v57, %v2852_v28  ;;  %v2854_v31 = vpop.f32.mrb[43].mxu1  ;;  %v3146_v28 = vld [vmem:[#allocation2 + $0x108] sm:$0xff]  ;;  %v3243_v22 = vld [vmem:[#allocation2 + $0x410] sm:$0xff] }
 0x517   : > { %8276 = vst [vmem:[#allocation33_spill] sm:$0xff] %v7426_v58  ;;  %v2896_v7 = vadd.f32 %v6117_v32, %v2854_v31  ;;  %v2943_v18 = vadd.f32 %v7426_v58, %v7423_v15  ;;  %v3154_v57 = vld [vmem:[#allocation2 + $0x148] sm:$0xff]  ;;  %v3148_v32 = vld [vmem:[#allocation2 + $0x118] sm:$0xff]  ;;  %5285 = vmatpush1.bf16.msra.mxu0 %v5284_v41  ;;  %v3201_v41 = vld [vmem:[#allocation2 + $0x2c0] sm:$0xff] }
 0x518   : > { %v7433_v19 = vadd.f32 %v7375_v2, %v2895_v51  ;;  %v5348_v51 = vpack.c.bf16 %v3139_v52, %v3131_v42  ;;  %v5286_v31 = vpack.c.bf16 %v3154_v57, %v3146_v28  ;;  %v3193_v42 = vld [vmem:[#allocation2 + $0x280] sm:$0xff]  ;;  %v3195_v52 = vld [vmem:[#allocation2 + $0x290] sm:$0xff]  ;;  %v5362_v28 = vpack.c.bf16 %v3204_v12, %v3196_v48  ;;  %v3258_v12 = vld [vmem:[#allocation2 + $0x488] sm:$0xff] }
 0x519   : > { %v7436_v0 = vadd.f32 %v7378_v59, %v2896_v7  ;;  %2944 = vadd.xlane.f32.xlu0 %v2943_v18  ;;  %v2858_v21 = vpop.f32.mrb[44].mxu1  ;;  %v3156_v7 = vld [vmem:[#allocation2 + $0x158] sm:$0xff]  ;;  %v3145_v18 = vld [vmem:[#allocation2 + $0x100] sm:$0xff]  ;;  %v3203_v57 = vld [vmem:[#allocation2 + $0x2d0] sm:$0xff] }
 0x51a   : > { %8277 = vst [vmem:[#allocation34_spill] sm:$0xff] %v7433_v19  ;;  %v2897_v9 = vadd.f32 %v6118_v34, %v2858_v21  ;;  %v2860_v35 = vpop.f32.mrb[45].mxu1  ;;  %v5350_v21 = vpack.c.bf16 %v3156_v7, %v3148_v32  ;;  %v3153_v34 = vld [vmem:[#allocation2 + $0x140] sm:$0xff]  ;;  %5287 = vmatprep.subr.bf16.mxu0 %v5286_v31  ;;  %v3218_v31 = vld [vmem:[#allocation2 + $0x348] sm:$0xff]  ;;  %v3212_v32 = vld [vmem:[#allocation2 + $0x318] sm:$0xff] }
 0x51b   : > { %8278 = vst [vmem:[#allocation35_spill] sm:$0xff] %v7436_v0  ;;  %v2898_v1 = vadd.f32 %v6119_v54, %v2860_v35  ;;  %v2946_v56 = vadd.f32 %v7436_v0, %v7433_v19  ;;  %v3155_v35 = vld [vmem:[#allocation2 + $0x150] sm:$0xff]  ;;  %v5288_v54 = vpack.c.bf16 %v3153_v34, %v3145_v18  ;;  %v3220_v7 = vld [vmem:[#allocation2 + $0x358] sm:$0xff]  ;;  %v5300_v18 = vpack.c.bf16 %v3201_v41, %v3193_v42 }
 0x51c   : > { %v7443_v60 = vadd.f32 %v7375_v2, %v2897_v9  ;;  %v3147_v9 = vld [vmem:[#allocation2 + $0x110] sm:$0xff] }
 0x51d   : > { %v7446_v47 = vadd.f32 %v7378_v59, %v2898_v1  ;;  %2947 = vadd.xlane.f32.xlu1 %v2946_v56  ;;  %v2864_v24 = vpop.f32.mrb[46].mxu1  ;;  %v3162_v1 = vld [vmem:[#allocation2 + $0x188] sm:$0xff]  ;;  %5289 = vmatpush1.bf16.msra.mxu0 %v5288_v54  ;;  %v3211_v54 = vld [vmem:[#allocation2 + $0x310] sm:$0xff] }
 0x51e   : > { %8279 = vst [vmem:[#allocation36_spill] sm:$0xff] %v7443_v60  ;;  %v2899_v25 = vadd.f32 %v6120_v43, %v2864_v24  ;;  %v2866_v37 = vpop.f32.mrb[47].mxu1  ;;  %v3170_v56 = vld [vmem:[#allocation2 + $0x1c8] sm:$0xff]  ;;  %v3164_v24 = vld [vmem:[#allocation2 + $0x198] sm:$0xff]  ;;  %v5352_v43 = vpack.c.bf16 %v3155_v35, %v3147_v9  ;;  %v3209_v9 = vld [vmem:[#allocation2 + $0x300] sm:$0xff] }
 0x51f   : > { %8280 = vst [vmem:[#allocation37_spill] sm:$0xff] %v7446_v47  ;;  %v2900_v39 = vadd.f32 %v6121_v38, %v2866_v37  ;;  %v2949_v11 = vadd.f32 %v7446_v47, %v7443_v60  ;;  %v3172_v37 = vld [vmem:[#allocation2 + $0x1d8] sm:$0xff]  ;;  %v3161_v38 = vld [vmem:[#allocation2 + $0x180] sm:$0xff]  ;;  %v3251_v48 = vld [vmem:[#allocation2 + $0x450] sm:$0xff] }
 0x520   : > { %v7453_v27 = vadd.f32 %v7375_v2, %v2899_v25  ;;  %v3123_v2 = vld [vmem:[#allocation2 + $0x50] sm:$0xff]  ;;  %v5290_v25 = vpack.c.bf16 %v3170_v56, %v3162_v1  ;;  %v3217_v35 = vld [vmem:[#allocation2 + $0x340] sm:$0xff]  ;;  %v5366_v1 = vpack.c.bf16 %v3220_v7, %v3212_v32  ;;  %v5376_v41 = vpack.c.bf16 %v3251_v48, %v3243_v22  ;;  %v3274_v7 = vld [vmem:[#allocation2 + $0x508] sm:$0xff] }
 0x521   : > { %v7456_v40 = vadd.f32 %v7378_v59, %v2900_v39  ;;  %2950 = vadd.xlane.f32.xlu0 %v2949_v11  ;;  %v5344_v59 = vpack.c.bf16 %v3123_v2, %v3115_v4  ;;  %v3169_v39 = vld [vmem:[#allocation2 + $0x1c0] sm:$0xff]  ;;  %v5354_v11 = vpack.c.bf16 %v3172_v37, %v3164_v24  ;;  %v3179_v2 = vld [vmem:[#allocation2 + $0x210] sm:$0xff]  ;;  %v3226_v24 = vld [vmem:[#allocation2 + $0x388] sm:$0xff] }
 0x522   : > { %8281 = vst [vmem:[#allocation38_spill] sm:$0xff] %v7453_v27  ;;  %v5292_v6 = vpack.c.bf16 %v3169_v39, %v3161_v38  ;;  %5291 = vmatprep.subr.bf16.mxu0 %v5290_v25  ;;  %v3185_v4 = vld [vmem:[#allocation2 + $0x240] sm:$0xff]  ;;  %v3219_v56 = vld [vmem:[#allocation2 + $0x350] sm:$0xff]  ;;  %v3228_v25 = vld [vmem:[#allocation2 + $0x398] sm:$0xff]  ;;  %v5304_v38 = vpack.c.bf16 %v3217_v35, %v3209_v9 }
 0x523   : > { %8282 = vst [vmem:[#allocation39_spill] sm:$0xff] %v7456_v40  ;;  %v2952_v44 = vadd.f32 %v7456_v40, %v7453_v27  ;;  %5345 = vmatpush1.bf16.msra.mxu1 %v5344_v59  ;;  %v3187_v59 = vld [vmem:[#allocation2 + $0x250] sm:$0xff]  ;;  %v3236_v37 = vld [vmem:[#allocation2 + $0x3d8] sm:$0xff]  ;;  %v5368_v39 = vpack.c.bf16 %v3219_v56, %v3211_v54  ;;  %v3281_v56 = vld [vmem:[#allocation2 + $0x540] sm:$0xff] }
 0x524   : > { %5347 = vmatprep.subr.bf16.mxu1 %v5346_v13  ;;  %5293 = vmatpush1.bf16.msra.mxu0 %v5292_v6  ;;  %v5296_v13 = vpack.c.bf16 %v3185_v4, %v3177_v17  ;;  %v5360_v53 = vpack.c.bf16 %v3187_v59, %v3179_v2  ;;  %v5370_v63 = vpack.c.bf16 %v3236_v37, %v3228_v25  ;;  %v3250_v6 = vld [vmem:[#allocation2 + $0x448] sm:$0xff]  ;;  %v3249_v59 = vld [vmem:[#allocation2 + $0x440] sm:$0xff]  ;;  %v3267_v32 = vld [vmem:[#allocation2 + $0x4d0] sm:$0xff] }
 0x525   : > { %2953 = vadd.xlane.f32.xlu1 %v2952_v44  ;;  %v3163_v44 = vld [vmem:[#allocation2 + $0x190] sm:$0xff]  ;;  %5295 = vmatprep.subr.bf16.mxu0 %v5294_v30  ;;  %v3252_v30 = vld [vmem:[#allocation2 + $0x458] sm:$0xff]  ;;  %v5372_v4 = vpack.c.bf16 %v3235_v46, %v3227_v62  ;;  %v5310_v2 = vpack.c.bf16 %v3250_v6, %v3242_v5 }
 0x526   : > { %v5356_v3 = vpack.c.bf16 %v3171_v61, %v3163_v44  ;;  %v3225_v44 = vld [vmem:[#allocation2 + $0x380] sm:$0xff]  ;;  %v3283_v25 = vld [vmem:[#allocation2 + $0x550] sm:$0xff] }
 0x527   : > { %5349 = vmatpush1.bf16.msra.mxu1 %v5348_v51  ;;  %v3210_v51 = vld [vmem:[#allocation2 + $0x308] sm:$0xff]  ;;  %v3233_v61 = vld [vmem:[#allocation2 + $0x3c0] sm:$0xff] }
 0x528   : > { %5351 = vmatprep.subr.bf16.mxu1 %v5350_v21  ;;  %5297 = vmatpush1.bf16.msra.mxu0 %v5296_v13  ;;  %v5364_v21 = vpack.c.bf16 %v3203_v57, %v3195_v52  ;;  %v5302_v34 = vpack.c.bf16 %v3218_v31, %v3210_v51  ;;  %v5308_v17 = vpack.c.bf16 %v3233_v61, %v3225_v44  ;;  %v3266_v13 = vld [vmem:[#allocation2 + $0x4c8] sm:$0xff]  ;;  %v3265_v57 = vld [vmem:[#allocation2 + $0x4c0] sm:$0xff]  ;;  %v3259_v51 = vld [vmem:[#allocation2 + $0x490] sm:$0xff] }
 0x529   : > { %5299 = vmatprep.subr.bf16.mxu0 %v5298_v29  ;;  %v3268_v29 = vld [vmem:[#allocation2 + $0x4d8] sm:$0xff]  ;;  %v5314_v52 = vpack.c.bf16 %v3266_v13, %v3258_v12  ;;  %v5380_v35 = vpack.c.bf16 %v3267_v32, %v3259_v51 }
 0x52b   : > { %5353 = vmatpush1.bf16.msra.mxu1 %v5352_v43  ;;  %v3234_v43 = vld [vmem:[#allocation2 + $0x3c8] sm:$0xff] }
 0x52c   : > { %5355 = vmatprep.subr.bf16.mxu1 %v5354_v11  ;;  %5301 = vmatpush1.bf16.msra.mxu0 %v5300_v18  ;;  %v5306_v11 = vpack.c.bf16 %v3234_v43, %v3226_v24  ;;  %v3282_v18 = vld [vmem:[#allocation2 + $0x548] sm:$0xff]  ;;  %v3275_v43 = vld [vmem:[#allocation2 + $0x510] sm:$0xff] }
 0x52d   : > { %5303 = vmatprep.subr.bf16.mxu0 %v5302_v34  ;;  %v3284_v34 = vld [vmem:[#allocation2 + $0x558] sm:$0xff]  ;;  %v5318_v54 = vpack.c.bf16 %v3282_v18, %v3274_v7 }
 0x52f   : > { %5357 = vmatpush1.bf16.msra.mxu1 %v5356_v3  ;;  %v3244_v3 = vld [vmem:[#allocation2 + $0x418] sm:$0xff] }
 0x530   : > { %5359 = vmatprep.subr.bf16.mxu1 %v5358_v55  ;;  %5305 = vmatpush1.bf16.msra.mxu0 %v5304_v38  ;;  %v3241_v55 = vld [vmem:[#allocation2 + $0x400] sm:$0xff]  ;;  %v5374_v49 = vpack.c.bf16 %v3252_v30, %v3244_v3  ;;  %v5384_v38 = vpack.c.bf16 %v3283_v25, %v3275_v43 }
 0x531   : > { %5307 = vmatprep.subr.bf16.mxu0 %v5306_v11  ;;  %v5312_v42 = vpack.c.bf16 %v3249_v59, %v3241_v55 }
 0x533   : > { %5361 = vmatpush1.bf16.msra.mxu1 %v5360_v53  ;;  %v3260_v53 = vld [vmem:[#allocation2 + $0x498] sm:$0xff] }
 0x534   : > { %5363 = vmatprep.subr.bf16.mxu1 %v5362_v28  ;;  %5309 = vmatpush1.bf16.msra.mxu0 %v5308_v17  ;;  %v3257_v28 = vld [vmem:[#allocation2 + $0x480] sm:$0xff]  ;;  %v5378_v31 = vpack.c.bf16 %v3268_v29, %v3260_v53 }
 0x535   : > { %5311 = vmatprep.subr.bf16.mxu0 %v5310_v2  ;;  %v5316_v9 = vpack.c.bf16 %v3265_v57, %v3257_v28 }
 0x537   : > { %5365 = vmatpush1.bf16.msra.mxu1 %v5364_v21  ;;  %v3276_v21 = vld [vmem:[#allocation2 + $0x518] sm:$0xff] }
 0x538   : > { %5367 = vmatprep.subr.bf16.mxu1 %v5366_v1  ;;  %5313 = vmatpush1.bf16.msra.mxu0 %v5312_v42  ;;  %v3273_v1 = vld [vmem:[#allocation2 + $0x500] sm:$0xff]  ;;  %v5382_v24 = vpack.c.bf16 %v3284_v34, %v3276_v21 }
 0x539   : > { %5315 = vmatprep.subr.bf16.mxu0 %v5314_v52  ;;  %v5320_v37 = vpack.c.bf16 %v3281_v56, %v3273_v1  ;;  %v3292_v1 = vld [vmem:[#allocation2 + $0x598] sm:$0xff] }
 0x53b   : > { %5369 = vmatpush1.bf16.msra.mxu1 %v5368_v39 }
 0x53c   : > { %5371 = vmatprep.subr.bf16.mxu1 %v5370_v63  ;;  %5317 = vmatpush1.bf16.msra.mxu0 %v5316_v9 }
 0x53d   : > { %5319 = vmatprep.subr.bf16.mxu0 %v5318_v54  ;;  %v3298_v54 = vld [vmem:[#allocation2 + $0x5c8] sm:$0xff] }
 0x53f   : > { %5373 = vmatpush1.bf16.msra.mxu1 %v5372_v4 }
 0x540   : > { %5375 = vmatprep.subr.bf16.mxu1 %v5374_v49  ;;  %5321 = vmatpush1.bf16.msra.mxu0 %v5320_v37  ;;  %v3300_v37 = vld [vmem:[#allocation2 + $0x5d8] sm:$0xff] }
 0x543   : > { %5377 = vmatpush1.bf16.msra.mxu1 %v5376_v41 }
 0x544   : > { %5379 = vmatprep.subr.bf16.mxu1 %v5378_v31 }
 0x547   : > { %5381 = vmatpush1.bf16.msra.mxu1 %v5380_v35  ;;  %v3290_v35 = vld [vmem:[#allocation2 + $0x588] sm:$0xff] }
 0x548   : > { %5383 = vmatprep.subr.bf16.mxu1 %v5382_v24  ;;  %v5322_v25 = vpack.c.bf16 %v3298_v54, %v3290_v35 }
 0x54a   : > { %5323 = vmatprep.subr.bf16.mxu0 %v5322_v25  ;;  %v3330_v25 = vld [vmem:[#allocation2 + $0x6c8] sm:$0xff] }
 0x54b   : > { %5385 = vmatpush1.bf16.msra.mxu1 %v5384_v38  ;;  %v3289_v38 = vld [vmem:[#allocation2 + $0x580] sm:$0xff] }
 0x596   : > { %v2933_v39 = vpop.xlane.xlu0 %2932 }
 0x597   : > { %v2955_v11 = vmul.f32 0.00390625, %v2933_v39  ;;  %v3297_v39 = vld [vmem:[#allocation2 + $0x5c0] sm:$0xff] }
 0x599   : > { %v7461_v44 = vsub.f32 %v7383_v16, %v2955_v11  ;;  %v7464_v61 = vsub.f32 %v7386_v36, %v2955_v11  ;;  %v4002_v16 = vld [vmem:[#allocation5 + $0x258] sm:$0xff] }
 0x59a   : > { %v2936_v62 = vpop.xlane.xlu1 %2935 }
 0x59b   : > { %v2956_v63 = vmul.f32 0.00390625, %v2936_v62  ;;  %v2979_v46 = vmul.f32 %v7461_v44, %v7461_v44  ;;  %v2980_v5 = vmul.f32 %v7464_v61, %v7464_v61  ;;  %v5386_v62 = vpack.c.bf16 %v3300_v37, %v3292_v1  ;;  %v3324_v37 = vld [vmem:[#allocation2 + $0x698] sm:$0xff] }
 0x59d   : > { %v7471_v6 = vsub.f32 %v7393_v26, %v2956_v63  ;;  %v7474_v3 = vsub.f32 %v7396_v50, %v2956_v63  ;;  %v2995_v30 = vadd.f32 %v2980_v5, %v2979_v46  ;;  %v5324_v63 = vpack.c.bf16 %v3297_v39, %v3289_v38  ;;  %v3291_v46 = vld [vmem:[#allocation2 + $0x590] sm:$0xff]  ;;  %5387 = vmatprep.subr.bf16.mxu1 %v5386_v62  ;;  %v3995_v50 = vld [vmem:[#allocation5 + $0x220] sm:$0xff] }
 0x59e   : > { %v2939_v17 = vpop.xlane.xlu0 %2938  ;;  %v3299_v5 = vld [vmem:[#allocation2 + $0x5d0] sm:$0xff] }
 0x59f   : > { %v2957_v4 = vmul.f32 0.00390625, %v2939_v17  ;;  %2996 = vadd.xlane.f32.xlu0 %v2995_v30  ;;  %v2981_v2 = vmul.f32 %v7471_v6, %v7471_v6  ;;  %v2982_v55 = vmul.f32 %v7474_v3, %v7474_v3  ;;  %5325 = vmatpush1.bf16.msra.mxu0 %v5324_v63  ;;  %v3332_v63 = vld [vmem:[#allocation2 + $0x6d8] sm:$0xff]  ;;  %v3997_v26 = vld [vmem:[#allocation5 + $0x230] sm:$0xff] }
 0x5a1   : > { %v7481_v59 = vsub.f32 %v7403_v8, %v2957_v4  ;;  %v7484_v22 = vsub.f32 %v7406_v10, %v2957_v4  ;;  %v2998_v49 = vadd.f32 %v2982_v55, %v2981_v2  ;;  %v5388_v2 = vpack.c.bf16 %v3299_v5, %v3291_v46  ;;  %v3306_v55 = vld [vmem:[#allocation2 + $0x608] sm:$0xff]  ;;  %v3321_v46 = vld [vmem:[#allocation2 + $0x680] sm:$0xff] }
 0x5a2   : > { %v2942_v48 = vpop.xlane.xlu0 %2941  ;;  %v3329_v5 = vld [vmem:[#allocation2 + $0x6c0] sm:$0xff] }
 0x5a3   : > { %v2958_v12 = vmul.f32 0.00390625, %v2942_v48  ;;  %2999 = vadd.xlane.f32.xlu1 %v2998_v49  ;;  %v2983_v13 = vmul.f32 %v7481_v59, %v7481_v59  ;;  %v2984_v53 = vmul.f32 %v7484_v22, %v7484_v22  ;;  %v3314_v49 = vld [vmem:[#allocation2 + $0x648] sm:$0xff]  ;;  %v3308_v48 = vld [vmem:[#allocation2 + $0x618] sm:$0xff]  ;;  %5389 = vmatpush1.bf16.msra.mxu1 %v5388_v2  ;;  %v3331_v2 = vld [vmem:[#allocation2 + $0x6d0] sm:$0xff] }
 0x5a5   : > { %v7491_v29 = vsub.f32 %v7413_v23, %v2958_v12  ;;  %v7494_v42 = vsub.f32 %v7416_v45, %v2958_v12  ;;  %v3001_v41 = vadd.f32 %v2984_v53, %v2983_v13 }
 0x5a6   : > { %v2945_v52 = vpop.xlane.xlu0 %2944 }
 0x5a7   : > { %v2959_v28 = vmul.f32 0.00390625, %v2945_v52  ;;  %3002 = vadd.xlane.f32.xlu0 %v3001_v41  ;;  %v2985_v57 = vmul.f32 %v7491_v29, %v7491_v29  ;;  %v2986_v51 = vmul.f32 %v7494_v42, %v7494_v42  ;;  %v5326_v41 = vpack.c.bf16 %v3314_v49, %v3306_v55  ;;  %v3316_v52 = vld [vmem:[#allocation2 + $0x658] sm:$0xff] }
 0x5a9   : > { %v7501_v31 = vsub.f32 %v7423_v15, %v2959_v28  ;;  %v7504_v32 = vsub.f32 %v7426_v58, %v2959_v28  ;;  %v3004_v7 = vadd.f32 %v2986_v51, %v2985_v57  ;;  %v3305_v28 = vld [vmem:[#allocation2 + $0x600] sm:$0xff]  ;;  %5327 = vmatprep.subr.bf16.mxu0 %v5326_v41  ;;  %v3346_v41 = vld [vmem:[#allocation2 + $0x748] sm:$0xff] }
 0x5aa   : > { %v2948_v18 = vpop.xlane.xlu1 %2947  ;;  %v3313_v57 = vld [vmem:[#allocation2 + $0x640] sm:$0xff] }
 0x5ab   : > { %v2960_v21 = vmul.f32 0.00390625, %v2948_v18  ;;  %3005 = vadd.xlane.f32.xlu1 %v3004_v7  ;;  %v2987_v34 = vmul.f32 %v7501_v31, %v7501_v31  ;;  %v2988_v9 = vmul.f32 %v7504_v32, %v7504_v32  ;;  %v5390_v7 = vpack.c.bf16 %v3316_v52, %v3308_v48  ;;  %v3340_v52 = vld [vmem:[#allocation2 + $0x718] sm:$0xff] }
 0x5ac   : > { %v5328_v18 = vpack.c.bf16 %v3313_v57, %v3305_v28 }
 0x5ad   : > { %v7511_v56 = vsub.f32 %v7433_v19, %v2960_v21  ;;  %v7514_v24 = vsub.f32 %v7436_v0, %v2960_v21  ;;  %v3007_v43 = vadd.f32 %v2988_v9, %v2987_v34  ;;  %v3307_v21 = vld [vmem:[#allocation2 + $0x610] sm:$0xff]  ;;  %5391 = vmatprep.subr.bf16.mxu1 %v5390_v7  ;;  %v3337_v7 = vld [vmem:[#allocation2 + $0x700] sm:$0xff]  ;;  %v3166_v0 = vld [vmem:[#allocation2 + $0x1a8] sm:$0xff] }
 0x5ae   : > { %v2951_v11 = vpop.xlane.xlu0 %2950  ;;  %v3315_v34 = vld [vmem:[#allocation2 + $0x650] sm:$0xff]  ;;  %5329 = vmatpush1.bf16.msra.mxu0 %v5328_v18  ;;  %v3345_v18 = vld [vmem:[#allocation2 + $0x740] sm:$0xff]  ;;  %v3174_v19 = vld [vmem:[#allocation2 + $0x1e8] sm:$0xff] }
 0x5af   : > { %v2961_v30 = vmul.f32 0.00390625, %v2951_v11  ;;  %3008 = vadd.xlane.f32.xlu0 %v3007_v43  ;;  %v2989_v17 = vmul.f32 %v7511_v56, %v7511_v56  ;;  %v2990_v4 = vmul.f32 %v7514_v24, %v7514_v24  ;;  %v5392_v1 = vpack.c.bf16 %v3315_v34, %v3307_v21  ;;  %v3322_v43 = vld [vmem:[#allocation2 + $0x688] sm:$0xff] }
 0x5b0   : > { %v5330_v62 = vpack.c.bf16 %v3330_v25, %v3322_v43  ;;  %v5336_v34 = vpack.c.bf16 %v3345_v18, %v3337_v7  ;;  %v3362_v43 = vld [vmem:[#allocation2 + $0x7c8] sm:$0xff]  ;;  %v3356_v25 = vld [vmem:[#allocation2 + $0x798] sm:$0xff] }
 0x5b1   : > { %v7521_v12 = vsub.f32 %v7443_v60, %v2961_v30  ;;  %v7524_v13 = vsub.f32 %v7446_v47, %v2961_v30  ;;  %v3010_v53 = vadd.f32 %v2990_v4, %v2989_v17  ;;  %5393 = vmatpush1.bf16.msra.mxu1 %v5392_v1  ;;  %v5394_v30 = vpack.c.bf16 %v3332_v63, %v3324_v37  ;;  %v3323_v4 = vld [vmem:[#allocation2 + $0x690] sm:$0xff]  ;;  %v3354_v1 = vld [vmem:[#allocation2 + $0x788] sm:$0xff]  ;;  %v3361_v63 = vld [vmem:[#allocation2 + $0x7c0] sm:$0xff] }
 0x5b2   : > { %v2954_v51 = vpop.xlane.xlu1 %2953  ;;  %v5332_v17 = vpack.c.bf16 %v3329_v5, %v3321_v46  ;;  %5331 = vmatprep.subr.bf16.mxu0 %v5330_v62  ;;  %v5396_v48 = vpack.c.bf16 %v3331_v2, %v3323_v4  ;;  %v5338_v37 = vpack.c.bf16 %v3362_v43, %v3354_v1  ;;  %v3353_v62 = vld [vmem:[#allocation2 + $0x780] sm:$0xff]  ;;  %v3118_v2 = vld [vmem:[#allocation2 + $0x28] sm:$0xff] }
 0x5b3   : > { %v2962_v9 = vmul.f32 0.00390625, %v2954_v51  ;;  %3011 = vadd.xlane.f32.xlu1 %v3010_v53  ;;  %v2991_v35 = vmul.f32 %v7521_v12, %v7521_v12  ;;  %v2992_v54 = vmul.f32 %v7524_v13, %v7524_v13  ;;  %5395 = vmatprep.subr.bf16.mxu1 %v5394_v30  ;;  %v3338_v53 = vld [vmem:[#allocation2 + $0x708] sm:$0xff]  ;;  %v3348_v51 = vld [vmem:[#allocation2 + $0x758] sm:$0xff]  ;;  %v5340_v5 = vpack.c.bf16 %v3361_v63, %v3353_v62  ;;  %v3355_v30 = vld [vmem:[#allocation2 + $0x790] sm:$0xff] }
 0x5b4   : > { %5333 = vmatpush1.bf16.msra.mxu0 %v5332_v17  ;;  %v5334_v57 = vpack.c.bf16 %v3346_v41, %v3338_v53  ;;  %v5398_v21 = vpack.c.bf16 %v3348_v51, %v3340_v52  ;;  %v3363_v17 = vld [vmem:[#allocation2 + $0x7d0] sm:$0xff]  ;;  %v3128_v53 = vld [vmem:[#allocation2 + $0x78] sm:$0xff]  ;;  %v2930_v43 = vld [vmem:[%s8188_s9] sm:$0x3] }
 0x5b5   : > { %v7531_v38 = vsub.f32 %v7453_v27, %v2962_v9  ;;  %v7534_v39 = vsub.f32 %v7456_v40, %v2962_v9  ;;  %v3013_v11 = vadd.f32 %v2992_v54, %v2991_v35  ;;  %5397 = vmatpush1.bf16.msra.mxu1 %v5396_v48  ;;  %v3339_v9 = vld [vmem:[#allocation2 + $0x710] sm:$0xff]  ;;  %v5404_v4 = vpack.c.bf16 %v3363_v17, %v3355_v30  ;;  %v3117_v63 = vld [vmem:[#allocation2 + $0x20] sm:$0xff] }
 0x5b6   : > { %v3347_v35 = vld [vmem:[#allocation2 + $0x750] sm:$0xff]  ;;  %5335 = vmatprep.subr.bf16.mxu0 %v5334_v57  ;;  %5399 = vmatprep.subr.bf16.mxu1 %v5398_v21  ;;  %v7554_v30 = vrot.slane %v2930_v43, %v6860_v20 }
 0x5b7   : > { %3014 = vadd.xlane.f32.xlu0 %v3013_v11  ;;  %v2993_v55 = vmul.f32 %v7531_v38, %v7531_v38  ;;  %v2994_v49 = vmul.f32 %v7534_v39, %v7534_v39  ;;  %v5400_v54 = vpack.c.bf16 %v3347_v35, %v3339_v9  ;;  %v3364_v11 = vld [vmem:[#allocation2 + $0x7d8] sm:$0xff]  ;;  %v2929_v35 = vld [vmem:[%s8187_s8] sm:$0x3] }
 0x5b8   : > { %5337 = vmatpush1.bf16.msra.mxu0 %v5336_v34  ;;  %v5402_v46 = vpack.c.bf16 %v3364_v11, %v3356_v25  ;;  %v7547_v25 = vrot.slane %v2929_v35, %v6860_v20 }
 0x5b9   : > { %v3016_v28 = vadd.f32 %v2994_v49, %v2993_v55  ;;  %5401 = vmatpush1.bf16.msra.mxu1 %v5400_v54  ;;  %5339 = vmatprep.subr.bf16.mxu0 %v5338_v37  ;;  %v3126_v55 = vld [vmem:[#allocation2 + $0x68] sm:$0xff]  ;;  %v3120_v49 = vld [vmem:[#allocation2 + $0x38] sm:$0xff]  ;;  %v7550_v37 = vrot.slane %v2929_v35, %v6857_v33 }
 0x5ba   : > { %5403 = vmatprep.subr.bf16.mxu1 %v5402_v46  ;;  %v5406_v48 = vpack.c.bf16 %v3126_v55, %v3118_v2  ;;  %v5470_v41 = vpack.c.bf16 %v3128_v53, %v3120_v49  ;;  %v3125_v2 = vld [vmem:[#allocation2 + $0x60] sm:$0xff]  ;;  %v3119_v55 = vld [vmem:[#allocation2 + $0x30] sm:$0xff]  ;;  %v3134_v53 = vld [vmem:[#allocation2 + $0xa8] sm:$0xff] }
 0x5bb   : > { %3017 = vadd.xlane.f32.xlu1 %v3016_v28  ;;  %v3127_v49 = vld [vmem:[#allocation2 + $0x70] sm:$0xff] }
 0x5bc   : > { %5341 = vmatpush1.bf16.msra.mxu0 %v5340_v5 }
 0x5bd   : > { %5405 = vmatpush1.bf16.msra.mxu1 %v5404_v4  ;;  %5407 = vmatprep.subr.bf16.mxu0 %v5406_v48  ;;  %v7558_v4 = vrot.slane %v2930_v43, %v6857_v33 }
 0x5be   : > { %5471 = vmatprep.subr.bf16.mxu1 %v5470_v41 }
 0x62c   : > { %v2997_v52 = vpop.xlane.xlu0 %2996 }
 0x62d   : > { %v3019_v28 = vmul.f32 0.00390625, %v2997_v52 }
 0x62f   : > { %v3027_v57 = vadd.f32 1e-05, %v3019_v28  ;;  %v3142_v28 = vld [vmem:[#allocation2 + $0xe8] sm:$0xff] }
 0x630   : > { %v3000_v51 = vpop.xlane.xlu1 %2999 }
 0x631   : > { %6090 = vrsqrt.f32 %v3027_v57  ;;  %v3020_v7 = vmul.f32 0.00390625, %v3000_v51  ;;  %v3144_v57 = vld [vmem:[#allocation2 + $0xf8] sm:$0xff] }
 0x633   : > { %v3028_v18 = vadd.f32 1e-05, %v3020_v7 }
 0x634   : > { %v3003_v21 = vpop.xlane.xlu0 %3002 }
 0x635   : > { %6092 = vrsqrt.f32 %v3028_v18  ;;  %v3021_v34 = vmul.f32 0.00390625, %v3003_v21  ;;  %v5408_v18 = vpack.c.bf16 %v3125_v2, %v3117_v63  ;;  %v3133_v21 = vld [vmem:[#allocation2 + $0xa0] sm:$0xff] }
 0x637   : > { %v3029_v9 = vadd.f32 1e-05, %v3021_v34  ;;  %v3141_v34 = vld [vmem:[#allocation2 + $0xe0] sm:$0xff] }
 0x638   : > { %v3006_v54 = vpop.xlane.xlu1 %3005 }
 0x639   : > { %6094 = vrsqrt.f32 %v3029_v9  ;;  %v3022_v1 = vmul.f32 0.00390625, %v3006_v54  ;;  %v3135_v9 = vld [vmem:[#allocation2 + $0xb0] sm:$0xff] }
 0x63b   : > { %v6091_v11 = vpop.eup %6090  ;;  %v3030_v62 = vadd.f32 1e-05, %v3022_v1 }
 0x63c   : > { %v3009_v46 = vpop.xlane.xlu0 %3008  ;;  %v3044_v5 = vmul.f32 %v6091_v11, %v7464_v61  ;;  %v3043_v17 = vmul.f32 %v6091_v11, %v7461_v44  ;;  %v3136_v61 = vld [vmem:[#allocation2 + $0xb8] sm:$0xff]  ;;  %v5472_v44 = vpack.c.bf16 %v3127_v49, %v3119_v55 }
 0x63d   : > { %6096 = vrsqrt.f32 %v3030_v62  ;;  %v3023_v48 = vmul.f32 0.00390625, %v3009_v46  ;;  %v3143_v62 = vld [vmem:[#allocation2 + $0xf0] sm:$0xff]  ;;  %v3150_v46 = vld [vmem:[#allocation2 + $0x128] sm:$0xff]  ;;  %v5474_v2 = vpack.c.bf16 %v3144_v57, %v3136_v61  ;;  %v3157_v61 = vld [vmem:[#allocation2 + $0x160] sm:$0xff] }
 0x63e   : > { %v3071_v41 = vmul.f32 %v7547_v25, %v3044_v5  ;;  %v3070_v52 = vmul.f32 %v7550_v37, %v3043_v17  ;;  %v3158_v5 = vld [vmem:[#allocation2 + $0x168] sm:$0xff]  ;;  %v5410_v17 = vpack.c.bf16 %v3142_v28, %v3134_v53  ;;  %v3149_v28 = vld [vmem:[#allocation2 + $0x120] sm:$0xff]  ;;  %v3151_v57 = vld [vmem:[#allocation2 + $0x130] sm:$0xff] }
 0x63f   : > { %v6093_v51 = vpop.eup %6092  ;;  %v3031_v7 = vadd.f32 1e-05, %v3023_v48  ;;  %v3152_v48 = vld [vmem:[#allocation2 + $0x138] sm:$0xff]  ;;  %v5414_v53 = vpack.c.bf16 %v3158_v5, %v3150_v46 }
 0x640   : > { %v3012_v35 = vpop.xlane.xlu1 %3011  ;;  %v7563_v54 = vadd.f32 %v7554_v30, %v3071_v41  ;;  %v7566_v1 = vadd.f32 %v7558_v4, %v3070_v52  ;;  %v3046_v43 = vmul.f32 %v6093_v51, %v7474_v3  ;;  %v3045_v11 = vmul.f32 %v6093_v51, %v7471_v6  ;;  %v3160_v41 = vld [vmem:[#allocation2 + $0x178] sm:$0xff] }
 0x641   : > { %6098 = vrsqrt.f32 %v3031_v7  ;;  %v3024_v63 = vmul.f32 0.00390625, %v3012_v35  ;;  %v5412_v6 = vpack.c.bf16 %v3141_v34, %v3133_v21  ;;  %v5476_v51 = vpack.c.bf16 %v3143_v62, %v3135_v9  ;;  %v3168_v62 = vld [vmem:[#allocation2 + $0x1b8] sm:$0xff] }
 0x642   : > { %3475 = vmatprep.mubr.f32.mxu0 %v7563_v54  ;;  %3588 = vmatprep.mubr.f32.mxu1 %v7563_v54  ;;  %v3073_v55 = vmul.f32 %v7547_v25, %v3046_v43  ;;  %v3072_v49 = vmul.f32 %v7550_v37, %v3045_v11  ;;  %v5478_v34 = vpack.c.bf16 %v3160_v41, %v3152_v48  ;;  %v3176_v46 = vld [vmem:[#allocation2 + $0x1f8] sm:$0xff] }
 0x643   : > { %v6095_v3 = vpop.eup %6094  ;;  %v3032_v52 = vadd.f32 1e-05, %v3024_v63  ;;  %3476 = vmatmul.mubr.f32.vlgmr.msra.gmra.mrb[16].mxu0 %v7566_v1  ;;  %3589 = vmatmul.mubr.f32.vlgmr.msra.gmra.mrb[48].mxu1 %v7566_v1  ;;  %v3159_v63 = vld [vmem:[#allocation2 + $0x170] sm:$0xff]  ;;  %v5416_v9 = vpack.c.bf16 %v3157_v61, %v3149_v28 }
 0x644   : > { %5409 = vmatpush1.bf16.msra.mxu0 %v5408_v18  ;;  %5473 = vmatpush1.bf16.msra.mxu1 %v5472_v44  ;;  %v3015_v7 = vpop.xlane.xlu0 %3014  ;;  %v7577_v35 = vadd.f32 %v7554_v30, %v3073_v55  ;;  %v7580_v43 = vadd.f32 %v7558_v4, %v3072_v49  ;;  %v3048_v11 = vmul.f32 %v6095_v3, %v7484_v22  ;;  %v3167_v28 = vld [vmem:[#allocation2 + $0x1b0] sm:$0xff] }
 0x645   : > { %6100 = vrsqrt.f32 %v3032_v52  ;;  %v3025_v21 = vmul.f32 0.00390625, %v3015_v7  ;;  %5411 = vmatprep.subr.bf16.mxu0 %v5410_v17  ;;  %5475 = vmatprep.subr.bf16.mxu1 %v5474_v2  ;;  %v3047_v18 = vmul.f32 %v6095_v3, %v7481_v59  ;;  %v5480_v2 = vpack.c.bf16 %v3159_v63, %v3151_v57  ;;  %v3165_v59 = vld [vmem:[#allocation2 + $0x1a0] sm:$0xff]  ;;  %v3175_v61 = vld [vmem:[#allocation2 + $0x1f0] sm:$0xff]  ;;  %v3184_v57 = vld [vmem:[#allocation2 + $0x238] sm:$0xff] }
 0x646   : > { %3481 = vmatprep.mubr.f32.mxu0 %v7577_v35  ;;  %3594 = vmatprep.mubr.f32.mxu1 %v7577_v35  ;;  %v3075_v44 = vmul.f32 %v7547_v25, %v3048_v11  ;;  %v5418_v55 = vpack.c.bf16 %v3174_v19, %v3166_v0  ;;  %v3173_v52 = vld [vmem:[#allocation2 + $0x1e0] sm:$0xff]  ;;  %v5482_v0 = vpack.c.bf16 %v3176_v46, %v3168_v62  ;;  %v3192_v11 = vld [vmem:[#allocation2 + $0x278] sm:$0xff] }
 0x647   : > { %v6097_v22 = vpop.eup %6096  ;;  %v3033_v5 = vadd.f32 1e-05, %v3025_v21  ;;  %3482 = vmatmul.mubr.f32.gmra.mrb[18].mxu0 %v7580_v43  ;;  %3595 = vmatmul.mubr.f32.gmra.mrb[50].mxu1 %v7580_v43  ;;  %v3074_v17 = vmul.f32 %v7550_v37, %v3047_v18  ;;  %v3181_v18 = vld [vmem:[#allocation2 + $0x220] sm:$0xff] }
 0x648   : > { %5413 = vmatpush1.bf16.msra.mxu0 %v5412_v6  ;;  %5477 = vmatpush1.bf16.msra.mxu1 %v5476_v51  ;;  %v3018_v49 = vpop.xlane.xlu1 %3017  ;;  %v7591_v48 = vadd.f32 %v7554_v30, %v3075_v44  ;;  %v3050_v41 = vmul.f32 %v6097_v22, %v7494_v42  ;;  %v3049_v3 = vmul.f32 %v6097_v22, %v7491_v29  ;;  %v3182_v6 = vld [vmem:[#allocation2 + $0x228] sm:$0xff]  ;;  %v3189_v22 = vld [vmem:[#allocation2 + $0x260] sm:$0xff] }
 0x649   : > { %6102 = vrsqrt.f32 %v3033_v5  ;;  %v3026_v7 = vmul.f32 0.00390625, %v3018_v49  ;;  %5415 = vmatprep.subr.bf16.mxu0 %v5414_v53  ;;  %5479 = vmatprep.subr.bf16.mxu1 %v5478_v34  ;;  %v7596_v19 = vadd.f32 %v7558_v4, %v3074_v17  ;;  %v3190_v51 = vld [vmem:[#allocation2 + $0x268] sm:$0xff]  ;;  %v5420_v53 = vpack.c.bf16 %v3173_v52, %v3165_v59  ;;  %v3183_v5 = vld [vmem:[#allocation2 + $0x230] sm:$0xff]  ;;  %v3200_v52 = vld [vmem:[#allocation2 + $0x2b8] sm:$0xff] }
 0x64a   : > { %3487 = vmatprep.mubr.f32.mxu0 %v7591_v48  ;;  %3600 = vmatprep.mubr.f32.mxu1 %v7591_v48  ;;  %v3077_v42 = vmul.f32 %v7547_v25, %v3050_v41  ;;  %v3076_v29 = vmul.f32 %v7550_v37, %v3049_v3  ;;  %v5484_v34 = vpack.c.bf16 %v3175_v61, %v3167_v28  ;;  %v3191_v17 = vld [vmem:[#allocation2 + $0x270] sm:$0xff]  ;;  %v3206_v3 = vld [vmem:[#allocation2 + $0x2e8] sm:$0xff] }
 0x64b   : > { %v6099_v63 = vpop.eup %6098  ;;  %v3034_v21 = vadd.f32 1e-05, %v3026_v7  ;;  %3488 = vmatmul.mubr.f32.gmra.mrb[20].mxu0 %v7596_v19  ;;  %3601 = vmatmul.mubr.f32.gmra.mrb[52].mxu1 %v7596_v19  ;;  %v5422_v49 = vpack.c.bf16 %v3190_v51, %v3182_v6  ;;  %v5486_v59 = vpack.c.bf16 %v3192_v11, %v3184_v57  ;;  %v5424_v61 = vpack.c.bf16 %v3189_v22, %v3181_v18  ;;  %v3199_v51 = vld [vmem:[#allocation2 + $0x2b0] sm:$0xff]  ;;  %v3214_v18 = vld [vmem:[#allocation2 + $0x328] sm:$0xff] }
 0x64c   : > { %5417 = vmatpush1.bf16.msra.mxu0 %v5416_v9  ;;  %5481 = vmatpush1.bf16.msra.mxu1 %v5480_v2  ;;  %v7605_v44 = vadd.f32 %v7554_v30, %v3077_v42  ;;  %v7608_v62 = vadd.f32 %v7558_v4, %v3076_v29  ;;  %v3052_v46 = vmul.f32 %v6099_v63, %v7504_v32  ;;  %v3198_v9 = vld [vmem:[#allocation2 + $0x2a8] sm:$0xff]  ;;  %v3208_v32 = vld [vmem:[#allocation2 + $0x2f8] sm:$0xff]  ;;  %v3205_v29 = vld [vmem:[#allocation2 + $0x2e0] sm:$0xff] }
 0x64d   : > { %6104 = vrsqrt.f32 %v3034_v21  ;;  %5419 = vmatprep.subr.bf16.mxu0 %v5418_v55  ;;  %5483 = vmatprep.subr.bf16.mxu1 %v5482_v0  ;;  %v3051_v41 = vmul.f32 %v6099_v63, %v7501_v31  ;;  %v5488_v7 = vpack.c.bf16 %v3191_v17, %v3183_v5  ;;  %v3197_v31 = vld [vmem:[#allocation2 + $0x2a0] sm:$0xff]  ;;  %v3207_v57 = vld [vmem:[#allocation2 + $0x2f0] sm:$0xff]  ;;  %v5426_v63 = vpack.c.bf16 %v3206_v3, %v3198_v9 }
 0x64e   : > { %3493 = vmatprep.mubr.f32.mxu0 %v7605_v44  ;;  %3606 = vmatprep.mubr.f32.mxu1 %v7605_v44  ;;  %v3079_v2 = vmul.f32 %v7547_v25, %v3052_v46  ;;  %v5490_v21 = vpack.c.bf16 %v3208_v32, %v3200_v52  ;;  %v3224_v46 = vld [vmem:[#allocation2 + $0x378] sm:$0xff]  ;;  %v5428_v5 = vpack.c.bf16 %v3205_v29, %v3197_v31  ;;  %v3215_v3 = vld [vmem:[#allocation2 + $0x330] sm:$0xff]  ;;  %v3230_v31 = vld [vmem:[#allocation2 + $0x3a8] sm:$0xff] }
 0x64f   : > { %v6101_v28 = vpop.eup %6100  ;;  %3494 = vmatmul.mubr.f32.gmra.mrb[22].mxu0 %v7608_v62  ;;  %3607 = vmatmul.mubr.f32.gmra.mrb[54].mxu1 %v7608_v62  ;;  %v3078_v55 = vmul.f32 %v7550_v37, %v3051_v41  ;;  %v5492_v17 = vpack.c.bf16 %v3207_v57, %v3199_v51  ;;  %v3223_v52 = vld [vmem:[#allocation2 + $0x370] sm:$0xff] }
 0x650   : > { %5421 = vmatpush1.bf16.msra.mxu0 %v5420_v53  ;;  %5485 = vmatpush1.bf16.msra.mxu1 %v5484_v34  ;;  %v7619_v0 = vadd.f32 %v7554_v30, %v3079_v2  ;;  %v3054_v6 = vmul.f32 %v6101_v28, %v7514_v24  ;;  %v3053_v42 = vmul.f32 %v6101_v28, %v7511_v56  ;;  %v3222_v56 = vld [vmem:[#allocation2 + $0x368] sm:$0xff]  ;;  %v3216_v34 = vld [vmem:[#allocation2 + $0x338] sm:$0xff]  ;;  %v3221_v2 = vld [vmem:[#allocation2 + $0x360] sm:$0xff] }
 0x651   : > { %5423 = vmatprep.subr.bf16.mxu0 %v5422_v49  ;;  %5487 = vmatprep.subr.bf16.mxu1 %v5486_v59  ;;  %v7624_v11 = vadd.f32 %v7558_v4, %v3078_v55  ;;  %v3213_v49 = vld [vmem:[#allocation2 + $0x320] sm:$0xff]  ;;  %v5430_v32 = vpack.c.bf16 %v3222_v56, %v3214_v18  ;;  %v5494_v28 = vpack.c.bf16 %v3224_v46, %v3216_v34  ;;  %v3231_v46 = vld [vmem:[#allocation2 + $0x3b0] sm:$0xff] }
 0x652   : > { %3499 = vmatprep.mubr.f32.mxu0 %v7619_v0  ;;  %3612 = vmatprep.mubr.f32.mxu1 %v7619_v0  ;;  %v3081_v53 = vmul.f32 %v7547_v25, %v3054_v6  ;;  %v3080_v24 = vmul.f32 %v7550_v37, %v3053_v42  ;;  %v3232_v6 = vld [vmem:[#allocation2 + $0x3b8] sm:$0xff]  ;;  %v5432_v51 = vpack.c.bf16 %v3221_v2, %v3213_v49  ;;  %v3229_v18 = vld [vmem:[#allocation2 + $0x3a0] sm:$0xff]  ;;  %v3254_v49 = vld [vmem:[#allocation2 + $0x468] sm:$0xff] }
 0x653   : > { %v6103_v22 = vpop.eup %6102  ;;  %3500 = vmatmul.mubr.f32.gmra.mrb[24].mxu0 %v7624_v11  ;;  %3613 = vmatmul.mubr.f32.gmra.mrb[56].mxu1 %v7624_v11  ;;  %v3240_v42 = vld [vmem:[#allocation2 + $0x3f8] sm:$0xff]  ;;  %v5496_v57 = vpack.c.bf16 %v3223_v52, %v3215_v3 }
 0x654   : > { %5425 = vmatpush1.bf16.msra.mxu0 %v5424_v61  ;;  %5489 = vmatpush1.bf16.msra.mxu1 %v5488_v7  ;;  %v7633_v59 = vadd.f32 %v7554_v30, %v3081_v53  ;;  %v7636_v41 = vadd.f32 %v7558_v4, %v3080_v24  ;;  %v3056_v9 = vmul.f32 %v6103_v22, %v7524_v13  ;;  %v3238_v7 = vld [vmem:[#allocation2 + $0x3e8] sm:$0xff]  ;;  %v3237_v53 = vld [vmem:[#allocation2 + $0x3e0] sm:$0xff]  ;;  %v3256_v2 = vld [vmem:[#allocation2 + $0x478] sm:$0xff] }
 0x655   : > { %5427 = vmatprep.subr.bf16.mxu0 %v5426_v63  ;;  %5491 = vmatprep.subr.bf16.mxu1 %v5490_v21  ;;  %v3055_v55 = vmul.f32 %v6103_v22, %v7521_v12  ;;  %v5434_v56 = vpack.c.bf16 %v3238_v7, %v3230_v31  ;;  %v5498_v34 = vpack.c.bf16 %v3240_v42, %v3232_v6  ;;  %v3239_v22 = vld [vmem:[#allocation2 + $0x3f0] sm:$0xff]  ;;  %v3262_v31 = vld [vmem:[#allocation2 + $0x4a8] sm:$0xff]  ;;  %v3272_v42 = vld [vmem:[#allocation2 + $0x4f8] sm:$0xff] }
 0x656   : > { %3505 = vmatprep.mubr.f32.mxu0 %v7633_v59  ;;  %3618 = vmatprep.mubr.f32.mxu1 %v7633_v59  ;;  %v3083_v61 = vmul.f32 %v7547_v25, %v3056_v9  ;;  %v3248_v9 = vld [vmem:[#allocation2 + $0x438] sm:$0xff]  ;;  %v3270_v6 = vld [vmem:[#allocation2 + $0x4e8] sm:$0xff] }
 0x657   : > { %v6105_v13 = vpop.eup %6104  ;;  %3506 = vmatmul.mubr.f32.gmra.mrb[26].mxu0 %v7636_v41  ;;  %3619 = vmatmul.mubr.f32.gmra.mrb[58].mxu1 %v7636_v41  ;;  %v3082_v29 = vmul.f32 %v7550_v37, %v3055_v55  ;;  %v3255_v55 = vld [vmem:[#allocation2 + $0x470] sm:$0xff]  ;;  %v5502_v7 = vpack.c.bf16 %v3256_v2, %v3248_v9  ;;  %v3294_v2 = vld [vmem:[#allocation2 + $0x5a8] sm:$0xff] }
 0x658   : > { %5429 = vmatpush1.bf16.msra.mxu0 %v5428_v5  ;;  %5493 = vmatpush1.bf16.msra.mxu1 %v5492_v17  ;;  %v7647_v12 = vadd.f32 %v7554_v30, %v3083_v61  ;;  %v3058_v63 = vmul.f32 %v6105_v13, %v7534_v39  ;;  %v3057_v21 = vmul.f32 %v6105_v13, %v7531_v38  ;;  %v3246_v38 = vld [vmem:[#allocation2 + $0x428] sm:$0xff]  ;;  %v3287_v9 = vld [vmem:[#allocation2 + $0x570] sm:$0xff] }
 0x659   : > { %5431 = vmatprep.subr.bf16.mxu0 %v5430_v32  ;;  %5495 = vmatprep.subr.bf16.mxu1 %v5494_v28  ;;  %v7652_v24 = vadd.f32 %v7558_v4, %v3082_v29  ;;  %v5436_v17 = vpack.c.bf16 %v3237_v53, %v3229_v18  ;;  %v3245_v32 = vld [vmem:[#allocation2 + $0x420] sm:$0xff]  ;;  %v3247_v28 = vld [vmem:[#allocation2 + $0x430] sm:$0xff]  ;;  %v5438_v61 = vpack.c.bf16 %v3254_v49, %v3246_v38  ;;  %v3278_v53 = vld [vmem:[#allocation2 + $0x528] sm:$0xff] }
 0x65a   : > { %3511 = vmatprep.mubr.f32.mxu0 %v7647_v12  ;;  %3624 = vmatprep.mubr.f32.mxu1 %v7647_v12  ;;  %v3085_v5 = vmul.f32 %v7547_v25, %v3058_v63  ;;  %v3084_v39 = vmul.f32 %v7550_v37, %v3057_v21  ;;  %v5500_v25 = vpack.c.bf16 %v3239_v22, %v3231_v46  ;;  %v3253_v37 = vld [vmem:[#allocation2 + $0x460] sm:$0xff]  ;;  %v3263_v21 = vld [vmem:[#allocation2 + $0x4b0] sm:$0xff]  ;;  %v3288_v46 = vld [vmem:[#allocation2 + $0x578] sm:$0xff] }
 0x65b   : > { %3512 = vmatmul.mubr.f32.gmra.mrb[28].mxu0 %v7652_v24  ;;  %3625 = vmatmul.mubr.f32.gmra.mrb[60].mxu1 %v7652_v24  ;;  %v5504_v13 = vpack.c.bf16 %v3255_v55, %v3247_v28  ;;  %v3261_v29 = vld [vmem:[#allocation2 + $0x4a0] sm:$0xff]  ;;  %v3271_v18 = vld [vmem:[#allocation2 + $0x4f0] sm:$0xff] }
 0x65c   : > { %5433 = vmatpush1.bf16.msra.mxu0 %v5432_v51  ;;  %5497 = vmatpush1.bf16.msra.mxu1 %v5496_v57  ;;  %v7661_v3 = vadd.f32 %v7554_v30, %v3085_v5  ;;  %v7664_v52 = vadd.f32 %v7558_v4, %v3084_v39  ;;  %v3264_v30 = vld [vmem:[#allocation2 + $0x4b8] sm:$0xff]  ;;  %v5440_v4 = vpack.c.bf16 %v3253_v37, %v3245_v32  ;;  %v3269_v51 = vld [vmem:[#allocation2 + $0x4e0] sm:$0xff]  ;;  %v3279_v49 = vld [vmem:[#allocation2 + $0x530] sm:$0xff] }
 0x65d   : > { %5435 = vmatprep.subr.bf16.mxu0 %v5434_v56  ;;  %5499 = vmatprep.subr.bf16.mxu1 %v5498_v34  ;;  %v5442_v57 = vpack.c.bf16 %v3270_v6, %v3262_v31  ;;  %v5506_v63 = vpack.c.bf16 %v3272_v42, %v3264_v30  ;;  %v3286_v56 = vld [vmem:[#allocation2 + $0x568] sm:$0xff]  ;;  %v3280_v34 = vld [vmem:[#allocation2 + $0x538] sm:$0xff]  ;;  %v5444_v22 = vpack.c.bf16 %v3269_v51, %v3261_v29  ;;  %v3277_v39 = vld [vmem:[#allocation2 + $0x520] sm:$0xff] }
 0x65e   : > { %3517 = vmatprep.mubr.f32.mxu0 %v7661_v3  ;;  %3630 = vmatprep.mubr.f32.mxu1 %v7661_v3  ;;  %v5508_v5 = vpack.c.bf16 %v3271_v18, %v3263_v21  ;;  %v3285_v38 = vld [vmem:[#allocation2 + $0x560] sm:$0xff]  ;;  %v3296_v32 = vld [vmem:[#allocation2 + $0x5b8] sm:$0xff]  ;;  %v5512_v55 = vpack.c.bf16 %v3287_v9, %v3279_v49  ;;  %v3295_v30 = vld [vmem:[#allocation2 + $0x5b0] sm:$0xff] }
 0x65f   : > { %3518 = vmatmul.mubr.f32.gmra.mrb[30].mxu0 %v7664_v52  ;;  %3631 = vmatmul.mubr.f32.gmra.mrb[62].mxu1 %v7664_v52  ;;  %v3304_v37 = vld [vmem:[#allocation2 + $0x5f8] sm:$0xff]  ;;  %v5448_v28 = vpack.c.bf16 %v3285_v38, %v3277_v39  ;;  %v3293_v31 = vld [vmem:[#allocation2 + $0x5a0] sm:$0xff]  ;;  %v3303_v42 = vld [vmem:[#allocation2 + $0x5f0] sm:$0xff] }
 0x660   : > { %5437 = vmatpush1.bf16.msra.mxu0 %v5436_v17  ;;  %5501 = vmatpush1.bf16.msra.mxu1 %v5500_v25  ;;  %v5446_v17 = vpack.c.bf16 %v3286_v56, %v3278_v53  ;;  %v3302_v25 = vld [vmem:[#allocation2 + $0x5e8] sm:$0xff]  ;;  %v5514_v6 = vpack.c.bf16 %v3304_v37, %v3296_v32  ;;  %v3312_v29 = vld [vmem:[#allocation2 + $0x638] sm:$0xff]  ;;  %v3309_v21 = vld [vmem:[#allocation2 + $0x620] sm:$0xff] }
 0x661   : > { %3701 = vmatprep.mubr.f32.mxu0 %v7563_v54  ;;  %3814 = vmatprep.mubr.f32.mxu1 %v7563_v54  ;;  %v5510_v54 = vpack.c.bf16 %v3288_v46, %v3280_v34  ;;  %v3320_v51 = vld [vmem:[#allocation2 + $0x678] sm:$0xff]  ;;  %v3317_v18 = vld [vmem:[#allocation2 + $0x660] sm:$0xff]  ;;  %v3311_v34 = vld [vmem:[#allocation2 + $0x630] sm:$0xff] }
 0x662   : > { %5439 = vmatprep.subr.bf16.mxu0 %v5438_v61  ;;  %5503 = vmatprep.subr.bf16.mxu1 %v5502_v7  ;;  %v3301_v61 = vld [vmem:[#allocation2 + $0x5e0] sm:$0xff]  ;;  %v5450_v7 = vpack.c.bf16 %v3302_v25, %v3294_v2  ;;  %v5518_v56 = vpack.c.bf16 %v3320_v51, %v3312_v29  ;;  %v3319_v46 = vld [vmem:[#allocation2 + $0x670] sm:$0xff]  ;;  %v3328_v39 = vld [vmem:[#allocation2 + $0x6b8] sm:$0xff] }
 0x663   : > { %v3336_v38 = vld [vmem:[#allocation2 + $0x6f8] sm:$0xff]  ;;  %v3325_v49 = vld [vmem:[#allocation2 + $0x6a0] sm:$0xff]  ;;  %v3327_v32 = vld [vmem:[#allocation2 + $0x6b0] sm:$0xff] }
 0x664   : > { %5441 = vmatpush1.bf16.msra.mxu0 %v5440_v4  ;;  %5505 = vmatpush1.bf16.msra.mxu1 %v5504_v13  ;;  %v3310_v4 = vld [vmem:[#allocation2 + $0x628] sm:$0xff]  ;;  %v3333_v9 = vld [vmem:[#allocation2 + $0x6e0] sm:$0xff]  ;;  %v5522_v25 = vpack.c.bf16 %v3336_v38, %v3328_v39  ;;  %v3335_v37 = vld [vmem:[#allocation2 + $0x6f0] sm:$0xff] }
 0x665   : > { %5443 = vmatprep.subr.bf16.mxu0 %v5442_v57  ;;  %5507 = vmatprep.subr.bf16.mxu1 %v5506_v63  ;;  %v3318_v13 = vld [vmem:[#allocation2 + $0x668] sm:$0xff]  ;;  %v5452_v57 = vpack.c.bf16 %v3301_v61, %v3293_v31  ;;  %v5516_v63 = vpack.c.bf16 %v3303_v42, %v3295_v30  ;;  %v3344_v31 = vld [vmem:[#allocation2 + $0x738] sm:$0xff]  ;;  %v3341_v30 = vld [vmem:[#allocation2 + $0x720] sm:$0xff] }
 0x666   : > { %v5454_v53 = vpack.c.bf16 %v3318_v13, %v3310_v4  ;;  %v3352_v61 = vld [vmem:[#allocation2 + $0x778] sm:$0xff]  ;;  %v3349_v42 = vld [vmem:[#allocation2 + $0x760] sm:$0xff]  ;;  %v3343_v29 = vld [vmem:[#allocation2 + $0x730] sm:$0xff] }
 0x667   : > { %v5526_v13 = vpack.c.bf16 %v3352_v61, %v3344_v31  ;;  %v3351_v51 = vld [vmem:[#allocation2 + $0x770] sm:$0xff]  ;;  %v3931_v61 = vld [vmem:[#allocation5 + $0x20] sm:$0xff] }
 0x668   : > { %5445 = vmatpush1.bf16.msra.mxu0 %v5444_v22  ;;  %5509 = vmatpush1.bf16.msra.mxu1 %v5508_v5  ;;  %v3326_v22 = vld [vmem:[#allocation2 + $0x6a8] sm:$0xff]  ;;  %v3359_v39 = vld [vmem:[#allocation2 + $0x7b0] sm:$0xff] }
 0x669   : > { %5447 = vmatprep.subr.bf16.mxu0 %v5446_v17  ;;  %5511 = vmatprep.subr.bf16.mxu1 %v5510_v54  ;;  %v3334_v5 = vld [vmem:[#allocation2 + $0x6e8] sm:$0xff]  ;;  %v5456_v17 = vpack.c.bf16 %v3317_v18, %v3309_v21  ;;  %v5520_v54 = vpack.c.bf16 %v3319_v46, %v3311_v34  ;;  %v3360_v21 = vld [vmem:[#allocation2 + $0x7b8] sm:$0xff]  ;;  %v3357_v34 = vld [vmem:[#allocation2 + $0x7a0] sm:$0xff] }
 0x66a   : > { %v5458_v2 = vpack.c.bf16 %v3334_v5, %v3326_v22  ;;  %v3368_v18 = vld [vmem:[#allocation2 + $0x7f8] sm:$0xff]  ;;  %v3365_v5 = vld [vmem:[#allocation2 + $0x7e0] sm:$0xff]  ;;  %v3367_v38 = vld [vmem:[#allocation2 + $0x7f0] sm:$0xff] }
 0x66b   : > { %v5530_v22 = vpack.c.bf16 %v3368_v18, %v3360_v21  ;;  %v3941_v21 = vld [vmem:[#allocation5 + $0x70] sm:$0xff]  ;;  %v3944_v18 = vld [vmem:[#allocation5 + $0x88] sm:$0xff] }
 0x66c   : > { %5449 = vmatpush1.bf16.msra.mxu0 %v5448_v28  ;;  %5513 = vmatpush1.bf16.msra.mxu1 %v5512_v55  ;;  %v3342_v28 = vld [vmem:[#allocation2 + $0x728] sm:$0xff] }
 0x66d   : > { %5451 = vmatprep.subr.bf16.mxu0 %v5450_v7  ;;  %5515 = vmatprep.subr.bf16.mxu1 %v5514_v6  ;;  %v3350_v55 = vld [vmem:[#allocation2 + $0x768] sm:$0xff]  ;;  %v5460_v7 = vpack.c.bf16 %v3333_v9, %v3325_v49  ;;  %v5524_v6 = vpack.c.bf16 %v3335_v37, %v3327_v32  ;;  %v5468_v49 = vpack.c.bf16 %v3365_v5, %v3357_v34  ;;  %v3929_v32 = vld [vmem:[#allocation5 + $0x10] sm:$0xff]  ;;  %v3947_v5 = vld [vmem:[#allocation5 + $0xa0] sm:$0xff] }
 0x66e   : > { %v5462_v4 = vpack.c.bf16 %v3350_v55, %v3342_v28  ;;  %v5532_v9 = vpack.c.bf16 %v3367_v38, %v3359_v39  ;;  %v3932_v37 = vld [vmem:[#allocation5 + $0x28] sm:$0xff]  ;;  %v3934_v28 = vld [vmem:[#allocation5 + $0x38] sm:$0xff]  ;;  %v3945_v34 = vld [vmem:[#allocation5 + $0x90] sm:$0xff] }
 0x66f   : > { %v5538_v31 = vpack.c.bf16 %v3934_v28, %v3932_v37  ;;  %v3949_v39 = vld [vmem:[#allocation5 + $0xb0] sm:$0xff]  ;;  %v3952_v38 = vld [vmem:[#allocation5 + $0xc8] sm:$0xff]  ;;  %v3962_v28 = vld [vmem:[#allocation5 + $0x118] sm:$0xff] }
 0x670   : > { %5453 = vmatpush1.bf16.msra.mxu0 %v5452_v57  ;;  %5517 = vmatpush1.bf16.msra.mxu1 %v5516_v63  ;;  %v3358_v57 = vld [vmem:[#allocation2 + $0x7a8] sm:$0xff] }
 0x671   : > { %5455 = vmatprep.subr.bf16.mxu0 %v5454_v53  ;;  %5519 = vmatprep.subr.bf16.mxu1 %v5518_v56  ;;  %v3366_v63 = vld [vmem:[#allocation2 + $0x7e8] sm:$0xff]  ;;  %v5464_v53 = vpack.c.bf16 %v3349_v42, %v3341_v30  ;;  %v5528_v56 = vpack.c.bf16 %v3351_v51, %v3343_v29  ;;  %v3938_v30 = vld [vmem:[#allocation5 + $0x58] sm:$0xff]  ;;  %v3937_v29 = vld [vmem:[#allocation5 + $0x50] sm:$0xff] }
 0x672   : > { %v5466_v46 = vpack.c.bf16 %v3366_v63, %v3358_v57  ;;  %v3940_v51 = vld [vmem:[#allocation5 + $0x68] sm:$0xff]  ;;  %v3942_v57 = vld [vmem:[#allocation5 + $0x78] sm:$0xff]  ;;  %v3939_v63 = vld [vmem:[#allocation5 + $0x60] sm:$0xff] }
 0x673   : > { %v3960_v37 = vld [vmem:[#allocation5 + $0x108] sm:$0xff] }
 0x674   : > { %5457 = vmatpush1.bf16.msra.mxu0 %v5456_v17  ;;  %5521 = vmatpush1.bf16.msra.mxu1 %v5520_v54  ;;  %v3928_v17 = vld [vmem:[#allocation5 + $0x8] sm:$0xff]  ;;  %v3930_v54 = vld [vmem:[#allocation5 + $0x18] sm:$0xff] }
 0x675   : > { %5459 = vmatprep.subr.bf16.mxu0 %v5458_v2  ;;  %5523 = vmatprep.subr.bf16.mxu1 %v5522_v25  ;;  %v5534_v2 = vpack.c.bf16 %v3930_v54, %v3928_v17  ;;  %v3927_v25 = vld [vmem:[#allocation5] sm:$0xff]  ;;  %v3954_v17 = vld [vmem:[#allocation5 + $0xd8] sm:$0xff] }
 0x676   : > { %v5536_v55 = vpack.c.bf16 %v3929_v32, %v3927_v25  ;;  %v3951_v54 = vld [vmem:[#allocation5 + $0xc0] sm:$0xff]  ;;  %v3957_v32 = vld [vmem:[#allocation5 + $0xf0] sm:$0xff] }
 0x677   : > { %v3955_v25 = vld [vmem:[#allocation5 + $0xe0] sm:$0xff] }
 0x678   : > { %5461 = vmatpush1.bf16.msra.mxu0 %v5460_v7  ;;  %5525 = vmatpush1.bf16.msra.mxu1 %v5524_v6  ;;  %v3933_v7 = vld [vmem:[#allocation5 + $0x30] sm:$0xff]  ;;  %v3936_v6 = vld [vmem:[#allocation5 + $0x48] sm:$0xff] }
 0x679   : > { %5463 = vmatprep.subr.bf16.mxu0 %v5462_v4  ;;  %5527 = vmatprep.subr.bf16.mxu1 %v5526_v13  ;;  %v5540_v42 = vpack.c.bf16 %v3933_v7, %v3931_v61  ;;  %v5542_v4 = vpack.c.bf16 %v3938_v30, %v3936_v6  ;;  %v3935_v13 = vld [vmem:[#allocation5 + $0x40] sm:$0xff]  ;;  %v3964_v61 = vld [vmem:[#allocation5 + $0x128] sm:$0xff]  ;;  %v3966_v7 = vld [vmem:[#allocation5 + $0x138] sm:$0xff] }
 0x67a   : > { %v5570_v6 = vpack.c.bf16 %v3966_v7, %v3964_v61  ;;  %v3963_v30 = vld [vmem:[#allocation5 + $0x120] sm:$0xff]  ;;  %v4125_v7 = vld [vmem:[#allocation5 + $0x630] sm:$0xff] }
 0x67b   : > { %v4123_v61 = vld [vmem:[#allocation5 + $0x620] sm:$0xff] }
 0x67c   : > { %5465 = vmatpush1.bf16.msra.mxu0 %v5464_v53  ;;  %5529 = vmatpush1.bf16.msra.mxu1 %v5528_v56  ;;  %v3946_v53 = vld [vmem:[#allocation5 + $0x98] sm:$0xff]  ;;  %v3943_v56 = vld [vmem:[#allocation5 + $0x80] sm:$0xff] }
 0x67d   : > { %5467 = vmatprep.subr.bf16.mxu0 %v5466_v46  ;;  %5531 = vmatprep.subr.bf16.mxu1 %v5530_v22  ;;  %v3948_v46 = vld [vmem:[#allocation5 + $0xa8] sm:$0xff]  ;;  %v3950_v22 = vld [vmem:[#allocation5 + $0xb8] sm:$0xff] }
 0x680   : > { %5469 = vmatpush1.bf16.msra.mxu0 %v5468_v49  ;;  %5533 = vmatpush1.bf16.msra.mxu1 %v5532_v9  ;;  %v3953_v49 = vld [vmem:[#allocation5 + $0xd0] sm:$0xff]  ;;  %v3956_v9 = vld [vmem:[#allocation5 + $0xe8] sm:$0xff] }
 0x681   : > { %5535 = vmatprep.subr.bf16.mxu0 %v5534_v2  ;;  %v3958_v2 = vld [vmem:[#allocation5 + $0xf8] sm:$0xff] }
 0x683   : > { %3702 = vmatmul.mubr.f32.vlgmr.msra.gmra.mrb[32].mxu0 %v7566_v1  ;;  %3815 = vmatmul.mubr.f32.vlgmr.msra.gmra.mrb[64].mxu1 %v7566_v1  ;;  %v5544_v1 = vpack.c.bf16 %v3937_v29, %v3935_v13 }
 0x684   : > { %3707 = vmatprep.mubr.f32.mxu0 %v7577_v35  ;;  %3820 = vmatprep.mubr.f32.mxu1 %v7577_v35  ;;  %v5546_v35 = vpack.c.bf16 %v3942_v57, %v3940_v51  ;;  %v3967_v51 = vld [vmem:[#allocation5 + $0x140] sm:$0xff]  ;;  %v3969_v57 = vld [vmem:[#allocation5 + $0x150] sm:$0xff] }
 0x685   : > { %5537 = vmatpush1.bf16.msra.mxu0 %v5536_v55  ;;  %v3959_v55 = vld [vmem:[#allocation5 + $0x100] sm:$0xff] }
 0x686   : > { %5539 = vmatprep.subr.bf16.mxu0 %v5538_v31  ;;  %v3961_v31 = vld [vmem:[#allocation5 + $0x110] sm:$0xff] }
 0x687   : > { %3708 = vmatmul.mubr.f32.gmra.mrb[34].mxu0 %v7580_v43  ;;  %3821 = vmatmul.mubr.f32.gmra.mrb[66].mxu1 %v7580_v43  ;;  %v5548_v43 = vpack.c.bf16 %v3941_v21, %v3939_v63  ;;  %v3971_v21 = vld [vmem:[#allocation5 + $0x160] sm:$0xff] }
 0x688   : > { %3713 = vmatprep.mubr.f32.mxu0 %v7591_v48  ;;  %3826 = vmatprep.mubr.f32.mxu1 %v7591_v48  ;;  %v5550_v48 = vpack.c.bf16 %v3946_v53, %v3944_v18  ;;  %v3973_v18 = vld [vmem:[#allocation5 + $0x170] sm:$0xff]  ;;  %v3976_v53 = vld [vmem:[#allocation5 + $0x188] sm:$0xff] }
 0x689   : > { %5541 = vmatpush1.bf16.msra.mxu0 %v5540_v42  ;;  %v3965_v42 = vld [vmem:[#allocation5 + $0x130] sm:$0xff] }
 0x68a   : > { %5543 = vmatprep.subr.bf16.mxu0 %v5542_v4  ;;  %v3968_v4 = vld [vmem:[#allocation5 + $0x148] sm:$0xff]  ;;  %v5572_v13 = vpack.c.bf16 %v3965_v42, %v3963_v30  ;;  %v3987_v42 = vld [vmem:[#allocation5 + $0x1e0] sm:$0xff] }
 0x68b   : > { %3714 = vmatmul.mubr.f32.gmra.mrb[36].mxu0 %v7596_v19  ;;  %3827 = vmatmul.mubr.f32.gmra.mrb[68].mxu1 %v7596_v19  ;;  %v5552_v19 = vpack.c.bf16 %v3945_v34, %v3943_v56  ;;  %v3975_v34 = vld [vmem:[#allocation5 + $0x180] sm:$0xff] }
 0x68c   : > { %3719 = vmatprep.mubr.f32.mxu0 %v7605_v44  ;;  %3832 = vmatprep.mubr.f32.mxu1 %v7605_v44  ;;  %v5554_v44 = vpack.c.bf16 %v3950_v22, %v3948_v46  ;;  %v3977_v46 = vld [vmem:[#allocation5 + $0x190] sm:$0xff]  ;;  %v3980_v22 = vld [vmem:[#allocation5 + $0x1a8] sm:$0xff] }
 0x68d   : > { %5545 = vmatpush1.bf16.msra.mxu0 %v5544_v1  ;;  %v3972_v1 = vld [vmem:[#allocation5 + $0x168] sm:$0xff] }
 0x68e   : > { %5547 = vmatprep.subr.bf16.mxu0 %v5546_v35  ;;  %v3974_v35 = vld [vmem:[#allocation5 + $0x178] sm:$0xff] }
 0x68f   : > { %3720 = vmatmul.mubr.f32.gmra.mrb[38].mxu0 %v7608_v62  ;;  %3833 = vmatmul.mubr.f32.gmra.mrb[70].mxu1 %v7608_v62  ;;  %v5556_v62 = vpack.c.bf16 %v3949_v39, %v3947_v5  ;;  %v5578_v63 = vpack.c.bf16 %v3974_v35, %v3972_v1  ;;  %v3979_v39 = vld [vmem:[#allocation5 + $0x1a0] sm:$0xff]  ;;  %v4129_v35 = vld [vmem:[#allocation5 + $0x650] sm:$0xff] }
 0x690   : > { %3725 = vmatprep.mubr.f32.mxu0 %v7619_v0  ;;  %3838 = vmatprep.mubr.f32.mxu1 %v7619_v0  ;;  %v5558_v0 = vpack.c.bf16 %v3954_v17, %v3952_v38  ;;  %v3981_v38 = vld [vmem:[#allocation5 + $0x1b0] sm:$0xff]  ;;  %v4120_v17 = vld [vmem:[#allocation5 + $0x608] sm:$0xff]  ;;  %v4127_v1 = vld [vmem:[#allocation5 + $0x640] sm:$0xff] }
 0x691   : > { %5549 = vmatpush1.bf16.msra.mxu0 %v5548_v43  ;;  %v3978_v43 = vld [vmem:[#allocation5 + $0x198] sm:$0xff] }
 0x692   : > { %5551 = vmatprep.subr.bf16.mxu0 %v5550_v48  ;;  %v5580_v48 = vpack.c.bf16 %v3973_v18, %v3971_v21  ;;  %v5582_v56 = vpack.c.bf16 %v3978_v43, %v3976_v53  ;;  %v4132_v18 = vld [vmem:[#allocation5 + $0x668] sm:$0xff]  ;;  %v4134_v53 = vld [vmem:[#allocation5 + $0x678] sm:$0xff] }
 0x693   : > { %3726 = vmatmul.mubr.f32.gmra.mrb[40].mxu0 %v7624_v11  ;;  %3839 = vmatmul.mubr.f32.gmra.mrb[72].mxu1 %v7624_v11  ;;  %v5560_v11 = vpack.c.bf16 %v3953_v49, %v3951_v54  ;;  %v4122_v54 = vld [vmem:[#allocation5 + $0x618] sm:$0xff]  ;;  %v7720_v43 = vpack.c.bf16 %v4134_v53, %v4132_v18  ;;  %v4160_v53 = vld [vmem:[#allocation5 + $0x748] sm:$0xff] }
 0x694   : > { %3731 = vmatprep.mubr.f32.mxu0 %v7633_v59  ;;  %3844 = vmatprep.mubr.f32.mxu1 %v7633_v59  ;;  %v5562_v59 = vpack.c.bf16 %v3958_v2, %v3956_v9  ;;  %v7702_v49 = vpack.c.bf16 %v4122_v54, %v4120_v17  ;;  %v4119_v9 = vld [vmem:[#allocation5 + $0x600] sm:$0xff]  ;;  %v4121_v2 = vld [vmem:[#allocation5 + $0x610] sm:$0xff]  ;;  %v4142_v17 = vld [vmem:[#allocation5 + $0x6b8] sm:$0xff] }
 0x695   : > { %5553 = vmatpush1.bf16.msra.mxu0 %v5552_v19  ;;  %v3982_v19 = vld [vmem:[#allocation5 + $0x1b8] sm:$0xff]  ;;  %v4141_v54 = vld [vmem:[#allocation5 + $0x6b0] sm:$0xff] }
 0x696   : > { %5555 = vmatprep.subr.bf16.mxu0 %v5554_v44  ;;  %v5584_v44 = vpack.c.bf16 %v3977_v46, %v3975_v34  ;;  %v5586_v5 = vpack.c.bf16 %v3982_v19, %v3980_v22  ;;  %5790 = vmatprep.subr.bf16.mxu1 %v7702_v49  ;;  %v4136_v46 = vld [vmem:[#allocation5 + $0x688] sm:$0xff]  ;;  %v4138_v22 = vld [vmem:[#allocation5 + $0x698] sm:$0xff] }
 0x697   : > { %3732 = vmatmul.mubr.f32.gmra.mrb[42].mxu0 %v7636_v41  ;;  %3845 = vmatmul.mubr.f32.gmra.mrb[74].mxu1 %v7636_v41  ;;  %v5564_v41 = vpack.c.bf16 %v3957_v32, %v3955_v25  ;;  %v3983_v32 = vld [vmem:[#allocation5 + $0x1c0] sm:$0xff]  ;;  %v7726_v19 = vpack.c.bf16 %v4138_v22, %v4136_v46  ;;  %v4161_v22 = vld [vmem:[#allocation5 + $0x750] sm:$0xff] }
 0x698   : > { %3737 = vmatprep.mubr.f32.mxu0 %v7647_v12  ;;  %3850 = vmatprep.mubr.f32.mxu1 %v7647_v12  ;;  %v5566_v12 = vpack.c.bf16 %v3962_v28, %v3960_v37  ;;  %v3985_v37 = vld [vmem:[#allocation5 + $0x1d0] sm:$0xff]  ;;  %v4124_v28 = vld [vmem:[#allocation5 + $0x628] sm:$0xff]  ;;  %v4159_v46 = vld [vmem:[#allocation5 + $0x740] sm:$0xff] }
 0x699   : > { %5557 = vmatpush1.bf16.msra.mxu0 %v5556_v62  ;;  %v3984_v62 = vld [vmem:[#allocation5 + $0x1c8] sm:$0xff] }
 0x69a   : > { %5559 = vmatprep.subr.bf16.mxu0 %v5558_v0  ;;  %v3986_v0 = vld [vmem:[#allocation5 + $0x1d8] sm:$0xff] }
 0x69b   : > { %3738 = vmatmul.mubr.f32.gmra.mrb[44].mxu0 %v7652_v24  ;;  %3851 = vmatmul.mubr.f32.gmra.mrb[76].mxu1 %v7652_v24  ;;  %v5568_v24 = vpack.c.bf16 %v3961_v31, %v3959_v55  ;;  %v5590_v25 = vpack.c.bf16 %v3986_v0, %v3984_v62  ;;  %v4126_v55 = vld [vmem:[#allocation5 + $0x638] sm:$0xff]  ;;  %v4139_v0 = vld [vmem:[#allocation5 + $0x6a0] sm:$0xff] }
 0x69c   : > { %3743 = vmatprep.mubr.f32.mxu0 %v7661_v3  ;;  %3856 = vmatprep.mubr.f32.mxu1 %v7661_v3  ;;  %v3970_v3 = vld [vmem:[#allocation5 + $0x158] sm:$0xff]  ;;  %v7708_v31 = vpack.c.bf16 %v4126_v55, %v4124_v28 }
 0x69d   : > { %5561 = vmatpush1.bf16.msra.mxu0 %v5560_v11  ;;  %v5574_v29 = vpack.c.bf16 %v3970_v3, %v3968_v4  ;;  %v5588_v11 = vpack.c.bf16 %v3981_v38, %v3979_v39  ;;  %v3989_v4 = vld [vmem:[#allocation5 + $0x1f0] sm:$0xff]  ;;  %v4128_v3 = vld [vmem:[#allocation5 + $0x648] sm:$0xff] }
 0x69e   : > { %5563 = vmatprep.subr.bf16.mxu0 %v5562_v59  ;;  %v7704_v59 = vpack.c.bf16 %v4121_v2, %v4119_v9  ;;  %v4140_v38 = vld [vmem:[#allocation5 + $0x6a8] sm:$0xff]  ;;  %v7734_v9 = vpack.c.bf16 %v4141_v54, %v4139_v0  ;;  %v4163_v0 = vld [vmem:[#allocation5 + $0x760] sm:$0xff]  ;;  %v4165_v54 = vld [vmem:[#allocation5 + $0x770] sm:$0xff] }
 0x69f   : > { %3744 = vmatmul.mubr.f32.gmra.mrb[46].mxu0 %v7664_v52  ;;  %3857 = vmatmul.mubr.f32.gmra.mrb[78].mxu1 %v7664_v52  ;;  %v5576_v52 = vpack.c.bf16 %v3969_v57, %v3967_v51  ;;  %v4130_v51 = vld [vmem:[#allocation5 + $0x658] sm:$0xff]  ;;  %v7732_v62 = vpack.c.bf16 %v4142_v17, %v4140_v38  ;;  %v4144_v2 = vld [vmem:[#allocation5 + $0x6c8] sm:$0xff] }
 0x6a0   : > { %5806 = vmatpush1.bf16.msra.mxu1 %v7704_v59  ;;  %v7714_v57 = vpack.c.bf16 %v4130_v51, %v4128_v3  ;;  %v4151_v3 = vld [vmem:[#allocation5 + $0x700] sm:$0xff]  ;;  %v4156_v51 = vld [vmem:[#allocation5 + $0x728] sm:$0xff]  ;;  %v4166_v38 = vld [vmem:[#allocation5 + $0x778] sm:$0xff] }
 0x6a1   : > { %5565 = vmatpush1.bf16.msra.mxu0 %v5564_v41  ;;  %v3988_v41 = vld [vmem:[#allocation5 + $0x1e8] sm:$0xff]  ;;  %5791 = vmatprep.subr.bf16.mxu1 %v7708_v31 }
 0x6a2   : > { %5567 = vmatprep.subr.bf16.mxu0 %v5566_v12  ;;  %v3990_v12 = vld [vmem:[#allocation5 + $0x1f8] sm:$0xff] }
 0x6a3   : > { %v5594_v30 = vpack.c.bf16 %v3990_v12, %v3988_v41  ;;  %v4148_v41 = vld [vmem:[#allocation5 + $0x6e8] sm:$0xff]  ;;  %v4150_v12 = vld [vmem:[#allocation5 + $0x6f8] sm:$0xff] }
 0x6a4   : > { %v7744_v55 = vpack.c.bf16 %v4150_v12, %v4148_v41  ;;  %v4167_v41 = vld [vmem:[#allocation5 + $0x780] sm:$0xff]  ;;  %v4169_v12 = vld [vmem:[#allocation5 + $0x790] sm:$0xff] }
 0x6a5   : > { %5569 = vmatpush1.bf16.msra.mxu0 %v5568_v24  ;;  %v5592_v24 = vpack.c.bf16 %v3985_v37, %v3983_v32  ;;  %v4143_v32 = vld [vmem:[#allocation5 + $0x6c0] sm:$0xff]  ;;  %v4145_v37 = vld [vmem:[#allocation5 + $0x6d0] sm:$0xff] }
 0x6a6   : > { %5571 = vmatprep.subr.bf16.mxu0 %v5570_v6  ;;  %v7710_v6 = vpack.c.bf16 %v4125_v7, %v4123_v61  ;;  %v7740_v28 = vpack.c.bf16 %v4145_v37, %v4143_v32  ;;  %v4147_v61 = vld [vmem:[#allocation5 + $0x6e0] sm:$0xff]  ;;  %v4149_v7 = vld [vmem:[#allocation5 + $0x6f0] sm:$0xff]  ;;  %v4170_v32 = vld [vmem:[#allocation5 + $0x798] sm:$0xff] }
 0x6a8   : > { %5807 = vmatpush1.bf16.msra.mxu1 %v7710_v6 }
 0x6a9   : > { %5573 = vmatpush1.bf16.msra.mxu0 %v5572_v13  ;;  %v3992_v13 = vld [vmem:[#allocation5 + $0x208] sm:$0xff]  ;;  %5792 = vmatprep.subr.bf16.mxu1 %v7714_v57 }
 0x6aa   : > { %5575 = vmatprep.subr.bf16.mxu0 %v5574_v29  ;;  %v3994_v29 = vld [vmem:[#allocation5 + $0x218] sm:$0xff] }
 0x6ab   : > { %v5598_v21 = vpack.c.bf16 %v3994_v29, %v3992_v13  ;;  %v4153_v13 = vld [vmem:[#allocation5 + $0x710] sm:$0xff] }
 0x6ac   : > { %v7752_v29 = vpack.c.bf16 %v4153_v13, %v4151_v3  ;;  %v4171_v3 = vld [vmem:[#allocation5 + $0x7a0] sm:$0xff]  ;;  %v4173_v13 = vld [vmem:[#allocation5 + $0x7b0] sm:$0xff] }
 0x6ad   : > { %5577 = vmatpush1.bf16.msra.mxu0 %v5576_v52  ;;  %v5596_v52 = vpack.c.bf16 %v3989_v4, %v3987_v42  ;;  %v4154_v42 = vld [vmem:[#allocation5 + $0x718] sm:$0xff] }
 0x6ae   : > { %5579 = vmatprep.subr.bf16.mxu0 %v5578_v63  ;;  %v7716_v63 = vpack.c.bf16 %v4129_v35, %v4127_v1  ;;  %v4158_v1 = vld [vmem:[#allocation5 + $0x738] sm:$0xff] }
 0x6af   : > { %v7756_v35 = vpack.c.bf16 %v4158_v1, %v4156_v51  ;;  %v7782_v51 = vpack.c.bf16 %v4173_v13, %v4171_v3  ;;  %v4176_v1 = vld [vmem:[#allocation5 + $0x7c8] sm:$0xff] }
 0x6b0   : > { %5808 = vmatpush1.bf16.msra.mxu1 %v7716_v63 }
 0x6b1   : > { %5581 = vmatpush1.bf16.msra.mxu0 %v5580_v48  ;;  %v4131_v48 = vld [vmem:[#allocation5 + $0x660] sm:$0xff]  ;;  %5793 = vmatprep.subr.bf16.mxu1 %v7720_v43  ;;  %8283 = vst [vmem:[#allocation40_spill] sm:$0xff] %v7756_v35  ;;  %8292 = vst [vmem:[#allocation49_spill] sm:$0xff] %v7782_v51 }
 0x6b2   : > { %5583 = vmatprep.subr.bf16.mxu0 %v5582_v56  ;;  %v4133_v56 = vld [vmem:[#allocation5 + $0x670] sm:$0xff] }
 0x6b3   : > { %v7722_v34 = vpack.c.bf16 %v4133_v56, %v4131_v48  ;;  %v4162_v48 = vld [vmem:[#allocation5 + $0x758] sm:$0xff] }
 0x6b4   : > { %v7762_v56 = vpack.c.bf16 %v4162_v48, %v4160_v53  ;;  %v4175_v53 = vld [vmem:[#allocation5 + $0x7c0] sm:$0xff]  ;;  %v4177_v48 = vld [vmem:[#allocation5 + $0x7d0] sm:$0xff] }
 0x6b5   : > { %5585 = vmatpush1.bf16.msra.mxu0 %v5584_v44  ;;  %5809 = vmatpush1.bf16.msra.mxu1 %v7722_v34  ;;  %v4135_v44 = vld [vmem:[#allocation5 + $0x680] sm:$0xff] }
 0x6b6   : > { %5587 = vmatprep.subr.bf16.mxu0 %v5586_v5  ;;  %v4137_v5 = vld [vmem:[#allocation5 + $0x690] sm:$0xff]  ;;  %5794 = vmatprep.subr.bf16.mxu1 %v7726_v19  ;;  %8285 = vst [vmem:[#allocation42_spill] sm:$0xff] %v7762_v56 }
 0x6b7   : > { %v7728_v39 = vpack.c.bf16 %v4137_v5, %v4135_v44  ;;  %v7764_v44 = vpack.c.bf16 %v4161_v22, %v4159_v46  ;;  %v4164_v5 = vld [vmem:[#allocation5 + $0x768] sm:$0xff]  ;;  %v7788_v46 = vpack.c.bf16 %v4177_v48, %v4175_v53  ;;  %v3993_v53 = vld [vmem:[#allocation5 + $0x210] sm:$0xff] }
 0x6b8   : > { %v7768_v17 = vpack.c.bf16 %v4166_v38, %v4164_v5  ;;  %v4180_v22 = vld [vmem:[#allocation5 + $0x7e8] sm:$0xff]  ;;  %v4182_v5 = vld [vmem:[#allocation5 + $0x7f8] sm:$0xff] }
 0x6b9   : > { %5589 = vmatpush1.bf16.msra.mxu0 %v5588_v11  ;;  %5810 = vmatpush1.bf16.msra.mxu1 %v7728_v39  ;;  %v4146_v11 = vld [vmem:[#allocation5 + $0x6d8] sm:$0xff]  ;;  %8286 = vst [vmem:[#allocation43_spill] sm:$0xff] %v7764_v44  ;;  %8294 = vst [vmem:[#allocation51_spill] sm:$0xff] %v7788_v46  ;;  %v7792_v38 = vpack.c.bf16 %v4182_v5, %v4180_v22  ;;  %v3996_v22 = vld [vmem:[#allocation5 + $0x228] sm:$0xff] }
 0x6ba   : > { %5591 = vmatprep.subr.bf16.mxu0 %v5590_v25  ;;  %5795 = vmatprep.subr.bf16.mxu1 %v7732_v62  ;;  %v7738_v25 = vpack.c.bf16 %v4146_v11, %v4144_v2  ;;  %8287 = vst [vmem:[#allocation44_spill] sm:$0xff] %v7768_v17  ;;  %v7770_v2 = vpack.c.bf16 %v4165_v54, %v4163_v0  ;;  %v4168_v11 = vld [vmem:[#allocation5 + $0x788] sm:$0xff]  ;;  %v4179_v0 = vld [vmem:[#allocation5 + $0x7e0] sm:$0xff]  ;;  %v4181_v54 = vld [vmem:[#allocation5 + $0x7f0] sm:$0xff] }
 0x6bb   : > { %v7774_v37 = vpack.c.bf16 %v4170_v32, %v4168_v11  ;;  %8295 = vst [vmem:[#allocation52_spill] sm:$0xff] %v7792_v38  ;;  %v7794_v11 = vpack.c.bf16 %v4181_v54, %v4179_v0  ;;  %v7801_v32 = vld [vmem:[%s8297_s19] sm:$0xff]  ;;  %v3998_v5 = vld [vmem:[#allocation5 + $0x238] sm:$0xff]  ;;  %s8127_s19 = scalar_lea.sflag [#allocation4], %s530_s18 }
 0x6bc   : > { %8288 = vst [vmem:[#allocation45_spill] sm:$0xff] %v7770_v2 }
 0x6bd   : > { %5593 = vmatpush1.bf16.msra.mxu0 %v5592_v24  ;;  %5811 = vmatpush1.bf16.msra.mxu1 %v7734_v9  ;;  %v7746_v24 = vpack.c.bf16 %v4149_v7, %v4147_v61  ;;  %8289 = vst [vmem:[#allocation46_spill] sm:$0xff] %v7774_v37  ;;  %v7776_v61 = vpack.c.bf16 %v4169_v12, %v4167_v41  ;;  %v4172_v7 = vld [vmem:[#allocation5 + $0x7a8] sm:$0xff]  ;;  %8296 = vst [vmem:[#allocation53_spill] sm:$0xff] %v7794_v11 }
 0x6be   : > { %5595 = vmatprep.subr.bf16.mxu0 %v5594_v30  ;;  %5796 = vmatprep.subr.bf16.mxu1 %v7738_v25  ;;  %v4152_v30 = vld [vmem:[#allocation5 + $0x708] sm:$0xff]  ;;  %v7805_v41 = vrot.slane %v7801_v32, %v6857_v33  ;;  %v7809_v12 = vrot.slane %v7801_v32, %v6860_v20 }
 0x6bf   : > { %v7750_v4 = vpack.c.bf16 %v4154_v42, %v4152_v30  ;;  %8290 = vst [vmem:[#allocation47_spill] sm:$0xff] %v7776_v61  ;;  %v4174_v30 = vld [vmem:[#allocation5 + $0x7b8] sm:$0xff] }
 0x6c0   : > { %v7780_v42 = vpack.c.bf16 %v4174_v30, %v4172_v7 }
 0x6c1   : > { %5597 = vmatpush1.bf16.msra.mxu0 %v5596_v52  ;;  %5812 = vmatpush1.bf16.msra.mxu1 %v7740_v28  ;;  %v4155_v52 = vld [vmem:[#allocation5 + $0x720] sm:$0xff] }
 0x6c2   : > { %5599 = vmatprep.subr.bf16.mxu0 %v5598_v21  ;;  %5797 = vmatprep.subr.bf16.mxu1 %v7744_v55  ;;  %v4157_v21 = vld [vmem:[#allocation5 + $0x730] sm:$0xff]  ;;  %8291 = vst [vmem:[#allocation48_spill] sm:$0xff] %v7780_v42 }
 0x6c3   : > { %v7758_v18 = vpack.c.bf16 %v4157_v21, %v4155_v52  ;;  %v4178_v52 = vld [vmem:[#allocation5 + $0x7d8] sm:$0xff] }
 0x6c4   : > { %v7786_v21 = vpack.c.bf16 %v4178_v52, %v4176_v1  ;;  %v3991_v52 = vld [vmem:[#allocation5 + $0x200] sm:$0xff] }
 0x6c5   : > { %5813 = vmatpush1.bf16.msra.mxu1 %v7746_v24  ;;  %8284 = vst [vmem:[#allocation41_spill] sm:$0xff] %v7758_v18  ;;  %v5600_v15 = vpack.c.bf16 %v3993_v53, %v3991_v52 }
 0x6c6   : > { %5798 = vmatprep.subr.bf16.mxu1 %v7750_v4  ;;  %8293 = vst [vmem:[#allocation50_spill] sm:$0xff] %v7786_v21 }
 0x6c9   : > { %5814 = vmatpush1.bf16.msra.mxu1 %v7752_v29 }
 0x6ca   : > { %5799 = vmatprep.subr.bf16.mxu1 %v7756_v35 }
 0x6cd   : > { %5815 = vmatpush1.bf16.msra.mxu1 %v7758_v18  ;;  %v4086_v18 = vld [vmem:[#allocation5 + $0x4f8] sm:$0xff] }
 0x6ce   : > { %5800 = vmatprep.subr.bf16.mxu1 %v7762_v56  ;;  %v4081_v56 = vld [vmem:[#allocation5 + $0x4d0] sm:$0xff] }
 0x6d1   : > { %5816 = vmatpush1.bf16.msra.mxu1 %v7764_v44 }
 0x6d2   : > { %5801 = vmatprep.subr.bf16.mxu1 %v7768_v17 }
 0x6d5   : > { %5817 = vmatpush1.bf16.msra.mxu1 %v7770_v2  ;;  %v4030_v2 = vld [vmem:[#allocation5 + $0x338] sm:$0xff] }
 0x6d6   : > { %5802 = vmatprep.subr.bf16.mxu1 %v7774_v37  ;;  %v4019_v37 = vld [vmem:[#allocation5 + $0x2e0] sm:$0xff] }
 0x6d9   : > { %5818 = vmatpush1.bf16.msra.mxu1 %v7776_v61 }
 0x6da   : > { %5803 = vmatprep.subr.bf16.mxu1 %v7780_v42  ;;  %v4015_v42 = vld [vmem:[#allocation5 + $0x2c0] sm:$0xff] }
 0x6dd   : > { %5819 = vmatpush1.bf16.msra.mxu1 %v7782_v51 }
 0x6de   : > { %5804 = vmatprep.subr.bf16.mxu1 %v7786_v21 }
 0x6e1   : > { %5820 = vmatpush1.bf16.msra.mxu1 %v7788_v46 }
 0x6e2   : > { %5805 = vmatprep.subr.bf16.mxu1 %v7792_v38 }
 0x6e5   : > { %5821 = vmatpush1.bf16.msra.mxu1 %v7794_v11 }
 0x716   : > { %v3477_v7 = vpop.f32.mrb[16].mxu0  ;;  %v7811_v30 = vpop.f32.mrb[48].mxu1 }
 0x717   : > { %v3478_v3 = vadd.f32 %v3477_v7, %v7805_v41  ;;  %v3479_v13 = vpop.f32.mrb[17].mxu0  ;;  %v7814_v1 = vpop.f32.mrb[49].mxu1  ;;  %v5602_v7 = vpack.c.bf16 %v3998_v5, %v3996_v22  ;;  %v3999_v5 = vld [vmem:[#allocation5 + $0x240] sm:$0xff] }
 0x718   : > { %v3480_v48 = vadd.f32 %v3479_v13, %v7809_v12  ;;  %v4000_v13 = vld [vmem:[#allocation5 + $0x248] sm:$0xff] }
 0x719   : > { %v3863_v45 = vmax.f32 %v3478_v3, 0.0  ;;  %v5604_v3 = vpack.c.bf16 %v3997_v26, %v3995_v50  ;;  %v5606_v22 = vpack.c.bf16 %v4002_v16, %v4000_v13  ;;  %v4003_v13 = vld [vmem:[#allocation5 + $0x260] sm:$0xff] }
 0x71a   : > { %v3864_v0 = vmax.f32 %v3480_v48, 0.0  ;;  %v3483_v54 = vpop.f32.mrb[18].mxu0  ;;  %v7817_v58 = vpop.f32.mrb[50].mxu1 }
 0x71b   : > { %v3484_v23 = vadd.f32 %v3483_v54, %v7805_v41  ;;  %v3485_v10 = vpop.f32.mrb[19].mxu0  ;;  %v7820_v8 = vpop.f32.mrb[51].mxu1 }
 0x71c   : > { %v3486_v36 = vadd.f32 %v3485_v10, %v7809_v12  ;;  %4259 = vmatprep.mubr.f32.mxu0 %v3864_v0  ;;  %v4001_v10 = vld [vmem:[#allocation5 + $0x250] sm:$0xff] }
 0x71d   : > { %4260 = vmatmul.mubr.f32.vlgmr.msra.gmra.mrb[48].mxu0 %v3863_v45  ;;  %v3871_v52 = vmax.f32 %v3484_v23, 0.0  ;;  %v4004_v45 = vld [vmem:[#allocation5 + $0x268] sm:$0xff]  ;;  %v5608_v50 = vpack.c.bf16 %v4001_v10, %v3999_v5 }
 0x71e   : > { %v3872_v48 = vmax.f32 %v3486_v36, 0.0  ;;  %5601 = vmatpush1.bf16.msra.mxu0 %v5600_v15  ;;  %v3489_v40 = vpop.f32.mrb[20].mxu0  ;;  %v7823_v27 = vpop.f32.mrb[52].mxu1  ;;  %v4006_v36 = vld [vmem:[#allocation5 + $0x278] sm:$0xff] }
 0x71f   : > { %v3490_v53 = vadd.f32 %v3489_v40, %v7805_v41  ;;  %v3491_v54 = vpop.f32.mrb[21].mxu0  ;;  %v7826_v47 = vpop.f32.mrb[53].mxu1  ;;  %5603 = vmatprep.subr.bf16.mxu0 %v5602_v7  ;;  %v5610_v16 = vpack.c.bf16 %v4006_v36, %v4004_v45  ;;  %v4007_v36 = vld [vmem:[#allocation5 + $0x280] sm:$0xff] }
 0x720   : > { %v3492_v0 = vadd.f32 %v3491_v54, %v7809_v12  ;;  %4265 = vmatprep.mubr.f32.mxu0 %v3872_v48  ;;  %v4005_v54 = vld [vmem:[#allocation5 + $0x270] sm:$0xff] }
 0x721   : > { %4266 = vmatmul.mubr.f32.gmra.mrb[50].mxu0 %v3871_v52  ;;  %v3879_v23 = vmax.f32 %v3490_v53, 0.0  ;;  %v4008_v52 = vld [vmem:[#allocation5 + $0x288] sm:$0xff]  ;;  %v5612_v53 = vpack.c.bf16 %v4005_v54, %v4003_v13 }
 0x722   : > { %v3880_v15 = vmax.f32 %v3492_v0, 0.0  ;;  %5605 = vmatpush1.bf16.msra.mxu0 %v5604_v3  ;;  %v3495_v60 = vpop.f32.mrb[22].mxu0  ;;  %v7829_v26 = vpop.f32.mrb[54].mxu1  ;;  %v4010_v0 = vld [vmem:[#allocation5 + $0x298] sm:$0xff] }
 0x723   : > { %v3496_v40 = vadd.f32 %v3495_v60, %v7805_v41  ;;  %v3497_v20 = vpop.f32.mrb[23].mxu0  ;;  %v7832_v7 = vpop.f32.mrb[55].mxu1  ;;  %5607 = vmatprep.subr.bf16.mxu0 %v5606_v22  ;;  %v5614_v45 = vpack.c.bf16 %v4010_v0, %v4008_v52  ;;  %v4011_v0 = vld [vmem:[#allocation5 + $0x2a0] sm:$0xff] }
 0x724   : > { %v3498_v48 = vadd.f32 %v3497_v20, %v7809_v12  ;;  %4271 = vmatprep.mubr.f32.mxu0 %v3880_v15  ;;  %v4009_v20 = vld [vmem:[#allocation5 + $0x290] sm:$0xff] }
 0x725   : > { %4272 = vmatmul.mubr.f32.gmra.mrb[52].mxu0 %v3879_v23  ;;  %v3887_v60 = vmax.f32 %v3496_v40, 0.0  ;;  %v4012_v23 = vld [vmem:[#allocation5 + $0x2a8] sm:$0xff]  ;;  %v5616_v40 = vpack.c.bf16 %v4009_v20, %v4007_v36 }
 0x726   : > { %v3888_v3 = vmax.f32 %v3498_v48, 0.0  ;;  %5609 = vmatpush1.bf16.msra.mxu0 %v5608_v50  ;;  %v3501_v33 = vpop.f32.mrb[24].mxu0  ;;  %v7835_v5 = vpop.f32.mrb[56].mxu1  ;;  %v4014_v48 = vld [vmem:[#allocation5 + $0x2b8] sm:$0xff] }
 0x727   : > { %v3502_v10 = vadd.f32 %v3501_v33, %v7805_v41  ;;  %v3503_v11 = vpop.f32.mrb[25].mxu0  ;;  %v7838_v22 = vpop.f32.mrb[57].mxu1  ;;  %5611 = vmatprep.subr.bf16.mxu0 %v5610_v16  ;;  %v5618_v52 = vpack.c.bf16 %v4014_v48, %v4012_v23 }
 0x728   : > { %v3504_v15 = vadd.f32 %v3503_v11, %v7809_v12  ;;  %4277 = vmatprep.mubr.f32.mxu0 %v3888_v3  ;;  %v4013_v11 = vld [vmem:[#allocation5 + $0x2b0] sm:$0xff]  ;;  %v3385_v3 = vsub.s32 3, %v6854_v14 }
 0x729   : > { %4278 = vmatmul.mubr.f32.gmra.mrb[54].mxu0 %v3887_v60  ;;  %v3895_v33 = vmax.f32 %v3502_v10, 0.0 }
 0x72a   : > { %v3896_v50 = vmax.f32 %v3504_v15, 0.0  ;;  %5613 = vmatpush1.bf16.msra.mxu0 %v5612_v53  ;;  %v3507_v38 = vpop.f32.mrb[26].mxu0  ;;  %v7841_v13 = vpop.f32.mrb[58].mxu1  ;;  %v4016_v53 = vld [vmem:[#allocation5 + $0x2c8] sm:$0xff]  ;;  %v4018_v15 = vld [vmem:[#allocation5 + $0x2d8] sm:$0xff] }
 0x72b   : > { %v3508_v54 = vadd.f32 %v3507_v38, %v7805_v41  ;;  %v3509_v46 = vpop.f32.mrb[27].mxu0  ;;  %v7844_v16 = vpop.f32.mrb[59].mxu1  ;;  %5615 = vmatprep.subr.bf16.mxu0 %v5614_v45  ;;  %v5620_v38 = vpack.c.bf16 %v4013_v11, %v4011_v0  ;;  %v5622_v51 = vpack.c.bf16 %v4018_v15, %v4016_v53 }
 0x72c   : > { %v3510_v60 = vadd.f32 %v3509_v46, %v7809_v12  ;;  %4283 = vmatprep.mubr.f32.mxu0 %v3896_v50  ;;  %v4017_v46 = vld [vmem:[#allocation5 + $0x2d0] sm:$0xff]  ;;  %v7854_v50 = vrot.slane %v7801_v32, %v3385_v3 }
 0x72d   : > { %4284 = vmatmul.mubr.f32.gmra.mrb[56].mxu0 %v3895_v33  ;;  %v3903_v20 = vmax.f32 %v3508_v54, 0.0 }
 0x72e   : > { %v3904_v21 = vmax.f32 %v3510_v60, 0.0  ;;  %5617 = vmatpush1.bf16.msra.mxu0 %v5616_v40  ;;  %v3513_v10 = vpop.f32.mrb[28].mxu0  ;;  %v7848_v36 = vpop.f32.mrb[60].mxu1  ;;  %v4020_v40 = vld [vmem:[#allocation5 + $0x2e8] sm:$0xff]  ;;  %v4022_v60 = vld [vmem:[#allocation5 + $0x2f8] sm:$0xff]  ;;  %v3605_v44 = vadd.f32 %v7826_v47, %v7854_v50 }
 0x72f   : > { %v3514_v45 = vadd.f32 %v3513_v10, %v7805_v41  ;;  %v3515_v23 = vpop.f32.mrb[29].mxu0  ;;  %v7851_v48 = vpop.f32.mrb[61].mxu1  ;;  %5619 = vmatprep.subr.bf16.mxu0 %v5618_v52  ;;  %v5624_v10 = vpack.c.bf16 %v4017_v46, %v4015_v42  ;;  %v5626_v3 = vpack.c.bf16 %v4022_v60, %v4020_v40  ;;  %v4028_v60 = vld [vmem:[#allocation5 + $0x328] sm:$0xff] }
 0x730   : > { %v3516_v33 = vadd.f32 %v3515_v23, %v7809_v12  ;;  %4289 = vmatprep.mubr.f32.mxu0 %v3904_v21  ;;  %v4021_v23 = vld [vmem:[#allocation5 + $0x2f0] sm:$0xff]  ;;  %v3593_v21 = vadd.f32 %v7814_v1, %v7854_v50  ;;  %v5634_v1 = vpack.c.bf16 %v4030_v2, %v4028_v60  ;;  %v4042_v2 = vld [vmem:[#allocation5 + $0x398] sm:$0xff]  ;;  %v4044_v60 = vld [vmem:[#allocation5 + $0x3a8] sm:$0xff] }
 0x731   : > { %4290 = vmatmul.mubr.f32.gmra.mrb[58].mxu0 %v3903_v20  ;;  %v3911_v61 = vmax.f32 %v3514_v45, 0.0  ;;  %v5628_v45 = vpack.c.bf16 %v4021_v23, %v4019_v37  ;;  %v4033_v23 = vld [vmem:[#allocation5 + $0x350] sm:$0xff] }
 0x732   : > { %v3912_v0 = vmax.f32 %v3516_v33, 0.0  ;;  %5621 = vmatpush1.bf16.msra.mxu0 %v5620_v38  ;;  %v3519_v54 = vpop.f32.mrb[30].mxu0  ;;  %v7857_v11 = vpop.f32.mrb[62].mxu1  ;;  %v4024_v38 = vld [vmem:[#allocation5 + $0x308] sm:$0xff]  ;;  %v4026_v33 = vld [vmem:[#allocation5 + $0x318] sm:$0xff]  ;;  %v3866_v40 = vmax.f32 %v3593_v21, 0.0 }
 0x733   : > { %v3520_v52 = vadd.f32 %v3519_v54, %v7805_v41  ;;  %v3521_v53 = vpop.f32.mrb[31].mxu0  ;;  %v7860_v15 = vpop.f32.mrb[63].mxu1  ;;  %5623 = vmatprep.subr.bf16.mxu0 %v5622_v51  ;;  %v5630_v46 = vpack.c.bf16 %v4026_v33, %v4024_v38  ;;  %v4023_v54 = vld [vmem:[#allocation5 + $0x300] sm:$0xff]  ;;  %v4025_v51 = vld [vmem:[#allocation5 + $0x310] sm:$0xff]  ;;  %v4036_v21 = vld [vmem:[#allocation5 + $0x368] sm:$0xff] }
 0x734   : > { %v3522_v20 = vadd.f32 %v3521_v53, %v7809_v12  ;;  %4295 = vmatprep.mubr.f32.mxu0 %v3912_v0  ;;  %v5632_v12 = vpack.c.bf16 %v4025_v51, %v4023_v54  ;;  %v4027_v0 = vld [vmem:[#allocation5 + $0x320] sm:$0xff]  ;;  %v4032_v53 = vld [vmem:[#allocation5 + $0x348] sm:$0xff] }
 0x735   : > { %4296 = vmatmul.mubr.f32.gmra.mrb[60].mxu0 %v3911_v61  ;;  %v3919_v41 = vmax.f32 %v3520_v52, 0.0  ;;  %v4029_v61 = vld [vmem:[#allocation5 + $0x330] sm:$0xff]  ;;  %v4039_v51 = vld [vmem:[#allocation5 + $0x380] sm:$0xff] }
 0x736   : > { %v3920_v42 = vmax.f32 %v3522_v20, 0.0  ;;  %5625 = vmatpush1.bf16.msra.mxu0 %v5624_v10  ;;  %v4034_v10 = vld [vmem:[#allocation5 + $0x358] sm:$0xff]  ;;  %v5636_v37 = vpack.c.bf16 %v4029_v61, %v4027_v0  ;;  %v4043_v61 = vld [vmem:[#allocation5 + $0x3a0] sm:$0xff] }
 0x737   : > { %5627 = vmatprep.subr.bf16.mxu0 %v5626_v3  ;;  %v5638_v52 = vpack.c.bf16 %v4034_v10, %v4032_v53  ;;  %v4031_v3 = vld [vmem:[#allocation5 + $0x340] sm:$0xff]  ;;  %v4038_v20 = vld [vmem:[#allocation5 + $0x378] sm:$0xff]  ;;  %v4045_v53 = vld [vmem:[#allocation5 + $0x3b0] sm:$0xff] }
 0x738   : > { %4301 = vmatprep.mubr.f32.mxu0 %v3920_v42  ;;  %v5640_v38 = vpack.c.bf16 %v4033_v23, %v4031_v3  ;;  %v5642_v33 = vpack.c.bf16 %v4038_v20, %v4036_v21  ;;  %v4035_v42 = vld [vmem:[#allocation5 + $0x360] sm:$0xff]  ;;  %v4048_v10 = vld [vmem:[#allocation5 + $0x3c8] sm:$0xff]  ;;  %v3381_v3 = vsub.s32 2, %v6854_v14  ;;  %v3397_v21 = vsub.s32 6, %v6854_v14 }
 0x739   : > { %4302 = vmatmul.mubr.f32.gmra.mrb[62].mxu0 %v3919_v41  ;;  %v4040_v41 = vld [vmem:[#allocation5 + $0x388] sm:$0xff]  ;;  %v4047_v20 = vld [vmem:[#allocation5 + $0x3c0] sm:$0xff] }
 0x73a   : > { %5629 = vmatpush1.bf16.msra.mxu0 %v5628_v45  ;;  %4372 = vmatprep.mubr.f32.mxu0 %v3866_v40  ;;  %v4037_v45 = vld [vmem:[#allocation5 + $0x370] sm:$0xff]  ;;  %v5646_v54 = vpack.c.bf16 %v4042_v2, %v4040_v41  ;;  %v7869_v2 = vrot.slane %v7801_v32, %v3381_v3 }
 0x73b   : > { %5631 = vmatprep.subr.bf16.mxu0 %v5630_v46  ;;  %v5644_v46 = vpack.c.bf16 %v4037_v45, %v4035_v42  ;;  %v4041_v40 = vld [vmem:[#allocation5 + $0x390] sm:$0xff]  ;;  %v4052_v42 = vld [vmem:[#allocation5 + $0x3e8] sm:$0xff]  ;;  %v4054_v45 = vld [vmem:[#allocation5 + $0x3f8] sm:$0xff] }
 0x73e   : > { %5633 = vmatpush1.bf16.msra.mxu0 %v5632_v12  ;;  %v4046_v12 = vld [vmem:[#allocation5 + $0x3b8] sm:$0xff] }
 0x73f   : > { %5635 = vmatprep.subr.bf16.mxu0 %v5634_v1  ;;  %v5648_v1 = vpack.c.bf16 %v4041_v40, %v4039_v51  ;;  %v5650_v0 = vpack.c.bf16 %v4046_v12, %v4044_v60  ;;  %v4051_v51 = vld [vmem:[#allocation5 + $0x3e0] sm:$0xff]  ;;  %v4053_v40 = vld [vmem:[#allocation5 + $0x3f0] sm:$0xff]  ;;  %v4056_v12 = vld [vmem:[#allocation5 + $0x408] sm:$0xff] }
 0x742   : > { %5637 = vmatpush1.bf16.msra.mxu0 %v5636_v37  ;;  %v4050_v37 = vld [vmem:[#allocation5 + $0x3d8] sm:$0xff] }
 0x743   : > { %5639 = vmatprep.subr.bf16.mxu0 %v5638_v52  ;;  %v5652_v52 = vpack.c.bf16 %v4045_v53, %v4043_v61  ;;  %v5654_v23 = vpack.c.bf16 %v4050_v37, %v4048_v10  ;;  %v5660_v53 = vpack.c.bf16 %v4053_v40, %v4051_v51  ;;  %v3591_v10 = vadd.f32 %v7811_v30, %v7869_v2 }
 0x745   : > { %v3865_v40 = vmax.f32 %v3591_v10, 0.0  ;;  %v4064_v10 = vld [vmem:[#allocation5 + $0x448] sm:$0xff] }
 0x746   : > { %5641 = vmatpush1.bf16.msra.mxu0 %v5640_v38  ;;  %v4049_v38 = vld [vmem:[#allocation5 + $0x3d0] sm:$0xff] }
 0x747   : > { %5643 = vmatprep.subr.bf16.mxu0 %v5642_v33  ;;  %v3401_v33 = vsub.s32 7, %v6854_v14  ;;  %v5656_v41 = vpack.c.bf16 %v4049_v38, %v4047_v20  ;;  %v4057_v20 = vld [vmem:[#allocation5 + $0x410] sm:$0xff]  ;;  %v3599_v38 = vadd.f32 %v7820_v8, %v7854_v50 }
 0x749   : > { %v7875_v60 = vrot.slane %v7801_v32, %v3401_v33  ;;  %v3874_v17 = vmax.f32 %v3599_v38, 0.0 }
 0x74a   : > { %5645 = vmatpush1.bf16.msra.mxu0 %v5644_v46  ;;  %v7872_v46 = vrot.slane %v7801_v32, %v3397_v21  ;;  %v4055_v21 = vld [vmem:[#allocation5 + $0x400] sm:$0xff] }
 0x74b   : > { %5647 = vmatprep.subr.bf16.mxu0 %v5646_v54  ;;  %v5658_v54 = vpack.c.bf16 %v4054_v45, %v4052_v42  ;;  %v4060_v42 = vld [vmem:[#allocation5 + $0x428] sm:$0xff]  ;;  %v4062_v45 = vld [vmem:[#allocation5 + $0x438] sm:$0xff]  ;;  %v5664_v51 = vpack.c.bf16 %v4057_v20, %v4055_v21 }
 0x74c   : > { %v4066_v21 = vld [vmem:[#allocation5 + $0x458] sm:$0xff] }
 0x74e   : > { %5649 = vmatpush1.bf16.msra.mxu0 %v5648_v1  ;;  %v4058_v1 = vld [vmem:[#allocation5 + $0x418] sm:$0xff] }
 0x74f   : > { %5651 = vmatprep.subr.bf16.mxu0 %v5650_v0 }
 0x752   : > { %5653 = vmatpush1.bf16.msra.mxu0 %v5652_v52 }
 0x753   : > { %5655 = vmatprep.subr.bf16.mxu0 %v5654_v23  ;;  %v5662_v23 = vpack.c.bf16 %v4058_v1, %v4056_v12 }
 0x756   : > { %v7877_v0 = vpop.f32.mrb[32].mxu0  ;;  %v3816_v61 = vpop.f32.mrb[64].mxu1  ;;  %5657 = vmatpush1.bf16.msra.mxu0 %v5656_v41 }
 0x757   : > { %v7882_v37 = vadd.f32 %v3816_v61, %v7872_v46  ;;  %v7884_v52 = vpop.f32.mrb[33].mxu0  ;;  %v3818_v3 = vpop.f32.mrb[65].mxu1  ;;  %5659 = vmatprep.subr.bf16.mxu0 %v5658_v54  ;;  %v3597_v54 = vadd.f32 %v7817_v58, %v7869_v2  ;;  %v5666_v61 = vpack.c.bf16 %v4062_v45, %v4060_v42  ;;  %v3603_v42 = vadd.f32 %v7823_v27, %v7869_v2 }
 0x758   : > { %v7889_v33 = vadd.f32 %v3818_v3, %v7875_v60  ;;  %v4059_v3 = vld [vmem:[#allocation5 + $0x420] sm:$0xff] }
 0x759   : > { %8298 = vst [vmem:[#allocation54_spill] sm:$0xff] %v7882_v37  ;;  %v4061_v37 = vld [vmem:[#allocation5 + $0x430] sm:$0xff] }
 0x75a   : > { %v7891_v41 = vpop.f32.mrb[34].mxu0  ;;  %v3822_v30 = vpop.f32.mrb[66].mxu1  ;;  %5661 = vmatpush1.bf16.msra.mxu0 %v5660_v53 }
 0x75b   : > { %v7896_v12 = vadd.f32 %v3822_v30, %v7872_v46  ;;  %v7898_v1 = vpop.f32.mrb[35].mxu0  ;;  %v3824_v8 = vpop.f32.mrb[67].mxu1  ;;  %5663 = vmatprep.subr.bf16.mxu0 %v5662_v23  ;;  %v5668_v30 = vpack.c.bf16 %v4061_v37, %v4059_v3  ;;  %v3873_v23 = vmax.f32 %v3597_v54, 0.0  ;;  %v4070_v54 = vld [vmem:[#allocation5 + $0x478] sm:$0xff] }
 0x75c   : > { %v7903_v53 = vadd.f32 %v3824_v8, %v7875_v60  ;;  %v5670_v8 = vpack.c.bf16 %v4066_v21, %v4064_v10  ;;  %v3609_v10 = vadd.f32 %v7829_v26, %v7869_v2 }
 0x75d   : > { %8299 = vst [vmem:[#allocation55_spill] sm:$0xff] %v7896_v12  ;;  %4373 = vmatmul.mubr.f32.vlgmr.msra.gmra.mrb[48].mxu0 %v3865_v40  ;;  %v4063_v12 = vld [vmem:[#allocation5 + $0x440] sm:$0xff]  ;;  %v4065_v40 = vld [vmem:[#allocation5 + $0x450] sm:$0xff] }
 0x75e   : > { %8300 = vst [vmem:[#allocation56_spill] sm:$0xff] %v7903_v53  ;;  %v7905_v58 = vpop.f32.mrb[36].mxu0  ;;  %v3828_v20 = vpop.f32.mrb[68].mxu1  ;;  %4378 = vmatprep.mubr.f32.mxu0 %v3874_v17  ;;  %5665 = vmatpush1.bf16.msra.mxu0 %v5664_v51  ;;  %v3882_v53 = vmax.f32 %v3605_v44, 0.0  ;;  %v3611_v17 = vadd.f32 %v7832_v7, %v7854_v50  ;;  %v4068_v51 = vld [vmem:[#allocation5 + $0x468] sm:$0xff] }
 0x75f   : > { %v7910_v38 = vadd.f32 %v3828_v20, %v7872_v46  ;;  %v7912_v47 = vpop.f32.mrb[37].mxu0  ;;  %v3830_v45 = vpop.f32.mrb[69].mxu1  ;;  %5667 = vmatprep.subr.bf16.mxu0 %v5666_v61  ;;  %v5672_v20 = vpack.c.bf16 %v4065_v40, %v4063_v12  ;;  %v3881_v61 = vmax.f32 %v3603_v42, 0.0  ;;  %v4074_v42 = vld [vmem:[#allocation5 + $0x498] sm:$0xff] }
 0x760   : > { %v7917_v37 = vadd.f32 %v3830_v45, %v7875_v60  ;;  %v5674_v45 = vpack.c.bf16 %v4070_v54, %v4068_v51  ;;  %v3615_v51 = vadd.f32 %v7835_v5, %v7869_v2 }
 0x761   : > { %8301 = vst [vmem:[#allocation57_spill] sm:$0xff] %v7910_v38  ;;  %4379 = vmatmul.mubr.f32.gmra.mrb[50].mxu0 %v3873_v23  ;;  %v4067_v38 = vld [vmem:[#allocation5 + $0x460] sm:$0xff]  ;;  %v4069_v23 = vld [vmem:[#allocation5 + $0x470] sm:$0xff] }
 0x762   : > { %8302 = vst [vmem:[#allocation58_spill] sm:$0xff] %v7917_v37  ;;  %v7919_v27 = vpop.f32.mrb[38].mxu0  ;;  %v3834_v3 = vpop.f32.mrb[70].mxu1  ;;  %4384 = vmatprep.mubr.f32.mxu0 %v3882_v53  ;;  %5669 = vmatpush1.bf16.msra.mxu0 %v5668_v30  ;;  %v3890_v37 = vmax.f32 %v3611_v17, 0.0  ;;  %v3617_v53 = vadd.f32 %v7838_v22, %v7854_v50  ;;  %v4072_v30 = vld [vmem:[#allocation5 + $0x488] sm:$0xff] }
 0x763   : > { %v7924_v44 = vadd.f32 %v3834_v3, %v7872_v46  ;;  %v7926_v7 = vpop.f32.mrb[39].mxu0  ;;  %v3836_v21 = vpop.f32.mrb[71].mxu1  ;;  %5671 = vmatprep.subr.bf16.mxu0 %v5670_v8  ;;  %v5676_v3 = vpack.c.bf16 %v4069_v23, %v4067_v38  ;;  %v3889_v8 = vmax.f32 %v3609_v10, 0.0  ;;  %v4078_v10 = vld [vmem:[#allocation5 + $0x4b8] sm:$0xff] }
 0x764   : > { %v7931_v12 = vadd.f32 %v3836_v21, %v7875_v60  ;;  %v5678_v21 = vpack.c.bf16 %v4074_v42, %v4072_v30  ;;  %v3621_v30 = vadd.f32 %v7841_v13, %v7869_v2  ;;  %v4080_v13 = vld [vmem:[#allocation5 + $0x4c8] sm:$0xff] }
 0x765   : > { %8303 = vst [vmem:[#allocation59_spill] sm:$0xff] %v7924_v44  ;;  %4385 = vmatmul.mubr.f32.gmra.mrb[52].mxu0 %v3881_v61  ;;  %v4071_v44 = vld [vmem:[#allocation5 + $0x480] sm:$0xff]  ;;  %v4073_v61 = vld [vmem:[#allocation5 + $0x490] sm:$0xff] }
 0x766   : > { %8304 = vst [vmem:[#allocation60_spill] sm:$0xff] %v7931_v12  ;;  %v7933_v26 = vpop.f32.mrb[40].mxu0  ;;  %v3840_v40 = vpop.f32.mrb[72].mxu1  ;;  %4390 = vmatprep.mubr.f32.mxu0 %v3890_v37  ;;  %5673 = vmatpush1.bf16.msra.mxu0 %v5672_v20  ;;  %v3898_v12 = vmax.f32 %v3617_v53, 0.0  ;;  %v3623_v37 = vadd.f32 %v7844_v16, %v7854_v50  ;;  %v4076_v20 = vld [vmem:[#allocation5 + $0x4a8] sm:$0xff] }
 0x767   : > { %v7938_v17 = vadd.f32 %v3840_v40, %v7872_v46  ;;  %v7940_v22 = vpop.f32.mrb[41].mxu0  ;;  %v3842_v54 = vpop.f32.mrb[73].mxu1  ;;  %5675 = vmatprep.subr.bf16.mxu0 %v5674_v45  ;;  %v5680_v40 = vpack.c.bf16 %v4073_v61, %v4071_v44  ;;  %v3897_v45 = vmax.f32 %v3615_v51, 0.0  ;;  %v3393_v44 = vsub.s32 5, %v6854_v14  ;;  %v4082_v51 = vld [vmem:[#allocation5 + $0x4d8] sm:$0xff] }
 0x768   : > { %v7945_v38 = vadd.f32 %v3842_v54, %v7875_v60  ;;  %v5682_v54 = vpack.c.bf16 %v4078_v10, %v4076_v20  ;;  %v4079_v20 = vld [vmem:[#allocation5 + $0x4c0] sm:$0xff]  ;;  %v3905_v10 = vmax.f32 %v3621_v30, 0.0 }
 0x769   : > { %8305 = vst [vmem:[#allocation61_spill] sm:$0xff] %v7938_v17  ;;  %4391 = vmatmul.mubr.f32.gmra.mrb[54].mxu0 %v3889_v8  ;;  %v4075_v17 = vld [vmem:[#allocation5 + $0x4a0] sm:$0xff]  ;;  %v4077_v8 = vld [vmem:[#allocation5 + $0x4b0] sm:$0xff] }
 0x76a   : > { %8306 = vst [vmem:[#allocation62_spill] sm:$0xff] %v7945_v38  ;;  %v7947_v5 = vpop.f32.mrb[42].mxu0  ;;  %v3846_v23 = vpop.f32.mrb[74].mxu1  ;;  %4396 = vmatprep.mubr.f32.mxu0 %v3898_v12  ;;  %5677 = vmatpush1.bf16.msra.mxu0 %v5676_v3  ;;  %v3906_v38 = vmax.f32 %v3623_v37, 0.0  ;;  %v3629_v12 = vadd.f32 %v7851_v48, %v7854_v50  ;;  %v3627_v37 = vadd.f32 %v7848_v36, %v7869_v2 }
 0x76b   : > { %v7952_v53 = vadd.f32 %v3846_v23, %v7872_v46  ;;  %v7954_v16 = vpop.f32.mrb[43].mxu0  ;;  %v3848_v42 = vpop.f32.mrb[75].mxu1  ;;  %5679 = vmatprep.subr.bf16.mxu0 %v5678_v21  ;;  %v5684_v21 = vpack.c.bf16 %v4077_v8, %v4075_v17  ;;  %v7972_v17 = vrot.slane %v7801_v32, %v3393_v44 }
 0x76c   : > { %v7960_v3 = vadd.f32 %v3848_v42, %v7875_v60  ;;  %v3914_v35 = vmax.f32 %v3629_v12, 0.0  ;;  %v3633_v12 = vadd.f32 %v7857_v11, %v7869_v2 }
 0x76d   : > { %8307 = vst [vmem:[#allocation63_spill] sm:$0xff] %v7952_v53  ;;  %4397 = vmatmul.mubr.f32.gmra.mrb[56].mxu0 %v3897_v45  ;;  %v4084_v45 = vld [vmem:[#allocation5 + $0x4e8] sm:$0xff] }
 0x76e   : > { %8308 = vst [vmem:[#allocation64_spill] sm:$0xff] %v7960_v3  ;;  %v7962_v61 = vpop.f32.mrb[44].mxu0  ;;  %v3852_v23 = vpop.f32.mrb[76].mxu1  ;;  %4402 = vmatprep.mubr.f32.mxu0 %v3906_v38  ;;  %5681 = vmatpush1.bf16.msra.mxu0 %v5680_v40  ;;  %v5686_v3 = vpack.c.bf16 %v4082_v51, %v4080_v13  ;;  %v3635_v38 = vadd.f32 %v7860_v15, %v7854_v50  ;;  %v3913_v51 = vmax.f32 %v3627_v37, 0.0  ;;  %v4087_v37 = vld [vmem:[#allocation5 + $0x500] sm:$0xff] }
 0x76f   : > { %v3853_v48 = vadd.f32 %v3852_v23, %v7872_v46  ;;  %v7967_v53 = vpop.f32.mrb[45].mxu0  ;;  %v3854_v42 = vpop.f32.mrb[77].mxu1  ;;  %5683 = vmatprep.subr.bf16.mxu0 %v5682_v54  ;;  %v5688_v54 = vpack.c.bf16 %v4081_v56, %v4079_v20  ;;  %v5690_v13 = vpack.c.bf16 %v4086_v18, %v4084_v45  ;;  %v4088_v18 = vld [vmem:[#allocation5 + $0x508] sm:$0xff] }
 0x770   : > { %v3855_v40 = vadd.f32 %v3854_v42, %v7875_v60  ;;  %v4085_v42 = vld [vmem:[#allocation5 + $0x4f0] sm:$0xff] }
 0x771   : > { %4403 = vmatmul.mubr.f32.gmra.mrb[58].mxu0 %v3905_v10  ;;  %v3917_v23 = vmax.f32 %v3853_v48, 0.0  ;;  %v4083_v10 = vld [vmem:[#allocation5 + $0x4e0] sm:$0xff]  ;;  %v4089_v48 = vld [vmem:[#allocation5 + $0x510] sm:$0xff] }
 0x772   : > { %v3918_v36 = vmax.f32 %v3855_v40, 0.0  ;;  %v7975_v30 = vpop.f32.mrb[46].mxu0  ;;  %v3858_v8 = vpop.f32.mrb[78].mxu1  ;;  %4408 = vmatprep.mubr.f32.mxu0 %v3914_v35  ;;  %5685 = vmatpush1.bf16.msra.mxu0 %v5684_v21  ;;  %v3922_v40 = vmax.f32 %v3635_v38, 0.0  ;;  %v3706_v35 = vadd.f32 %v7884_v52, %v7972_v17  ;;  %v4090_v21 = vld [vmem:[#allocation5 + $0x518] sm:$0xff]  ;;  %v5692_v2 = vpack.c.bf16 %v4085_v42, %v4083_v10  ;;  %v4092_v52 = vld [vmem:[#allocation5 + $0x528] sm:$0xff] }
 0x773   : > { %v3859_v50 = vadd.f32 %v3858_v8, %v7872_v46  ;;  %v7980_v15 = vpop.f32.mrb[47].mxu0  ;;  %v3860_v44 = vpop.f32.mrb[79].mxu1  ;;  %5687 = vmatprep.subr.bf16.mxu0 %v5686_v3  ;;  %v3921_v46 = vmax.f32 %v3633_v12, 0.0  ;;  %v5694_v3 = vpack.c.bf16 %v4090_v21, %v4088_v18  ;;  %v4094_v38 = vld [vmem:[#allocation5 + $0x538] sm:$0xff]  ;;  %v4091_v8 = vld [vmem:[#allocation5 + $0x520] sm:$0xff]  ;;  %v4100_v10 = vld [vmem:[#allocation5 + $0x568] sm:$0xff] }
 0x774   : > { %v3861_v56 = vadd.f32 %v3860_v44, %v7875_v60  ;;  %4634 = vmatprep.mubr.f32.mxu1 %v3918_v36  ;;  %v3868_v45 = vmax.f32 %v3706_v35, 0.0  ;;  %v5696_v60 = vpack.c.bf16 %v4089_v48, %v4087_v37  ;;  %v5698_v36 = vpack.c.bf16 %v4094_v38, %v4092_v52  ;;  %v4098_v12 = vld [vmem:[#allocation5 + $0x558] sm:$0xff]  ;;  %v4097_v44 = vld [vmem:[#allocation5 + $0x550] sm:$0xff]  ;;  %v4104_v21 = vld [vmem:[#allocation5 + $0x588] sm:$0xff] }
 0x775   : > { %4409 = vmatmul.mubr.f32.gmra.mrb[60].mxu0 %v3913_v51  ;;  %4635 = vmatmul.mubr.f32.vlgmr.msra.gmra.mrb[80].mxu1 %v3917_v23  ;;  %v3925_v20 = vmax.f32 %v3859_v50, 0.0  ;;  %v4096_v51 = vld [vmem:[#allocation5 + $0x548] sm:$0xff]  ;;  %v4095_v50 = vld [vmem:[#allocation5 + $0x540] sm:$0xff]  ;;  %v4102_v42 = vld [vmem:[#allocation5 + $0x578] sm:$0xff] }
 0x776   : > { %v3926_v11 = vmax.f32 %v3861_v56, 0.0  ;;  %4414 = vmatprep.mubr.f32.mxu0 %v3922_v40  ;;  %5689 = vmatpush1.bf16.msra.mxu0 %v5688_v54  ;;  %v4093_v54 = vld [vmem:[#allocation5 + $0x530] sm:$0xff]  ;;  %v5702_v23 = vpack.c.bf16 %v4098_v12, %v4096_v51  ;;  %v5704_v40 = vpack.c.bf16 %v4097_v44, %v4095_v50  ;;  %v5706_v35 = vpack.c.bf16 %v4102_v42, %v4100_v10  ;;  %v4099_v56 = vld [vmem:[#allocation5 + $0x560] sm:$0xff]  ;;  %v4108_v37 = vld [vmem:[#allocation5 + $0x5a8] sm:$0xff] }
 0x777   : > { %5691 = vmatprep.subr.bf16.mxu0 %v5690_v13  ;;  %v5700_v13 = vpack.c.bf16 %v4093_v54, %v4091_v8  ;;  %v4101_v18 = vld [vmem:[#allocation5 + $0x570] sm:$0xff]  ;;  %v4110_v48 = vld [vmem:[#allocation5 + $0x5b8] sm:$0xff]  ;;  %v4107_v38 = vld [vmem:[#allocation5 + $0x5a0] sm:$0xff]  ;;  %v3389_v51 = vsub.s32 4, %v6854_v14  ;;  %v3712_v14 = vadd.f32 %v7898_v1, %v7972_v17 }
 0x778   : > { %4640 = vmatprep.mubr.f32.mxu1 %v3926_v11  ;;  %v4106_v11 = vld [vmem:[#allocation5 + $0x598] sm:$0xff]  ;;  %v5714_v52 = vpack.c.bf16 %v4110_v48, %v4108_v37  ;;  %v4116_v50 = vld [vmem:[#allocation5 + $0x5e8] sm:$0xff]  ;;  %v8321_v37 = vld [vmem:[#allocation52_spill] sm:$0xff] }
 0x779   : > { %4415 = vmatmul.mubr.f32.gmra.mrb[62].mxu0 %v3921_v46  ;;  %4641 = vmatmul.mubr.f32.gmra.mrb[82].mxu1 %v3925_v20  ;;  %v5710_v46 = vpack.c.bf16 %v4106_v11, %v4104_v21  ;;  %v4103_v20 = vld [vmem:[#allocation5 + $0x580] sm:$0xff]  ;;  %v4114_v8 = vld [vmem:[#allocation5 + $0x5d8] sm:$0xff]  ;;  %v3390_v42 = vrot.slane %v7801_v32, %v3389_v51  ;;  %v3718_v32 = vadd.f32 %v7912_v47, %v7972_v17 }
 0x77a   : > { %5693 = vmatpush1.bf16.msra.mxu0 %v5692_v2  ;;  %4485 = vmatprep.mubr.f32.mxu0 %v3868_v45  ;;  %v5708_v2 = vpack.c.bf16 %v4101_v18, %v4099_v56  ;;  %v4118_v44 = vld [vmem:[#allocation5 + $0x5f8] sm:$0xff]  ;;  %v4117_v56 = vld [vmem:[#allocation5 + $0x5f0] sm:$0xff] }
 0x77b   : > { %5695 = vmatprep.subr.bf16.mxu0 %v5694_v3  ;;  %v4105_v3 = vld [vmem:[#allocation5 + $0x590] sm:$0xff]  ;;  %v3704_v21 = vadd.f32 %v7877_v0, %v3390_v42  ;;  %v3716_v0 = vadd.f32 %v7905_v58, %v3390_v42  ;;  %v3884_v1 = vmax.f32 %v3718_v32, 0.0  ;;  %v3728_v58 = vadd.f32 %v7933_v26, %v3390_v42  ;;  %v8322_v48 = vld [vmem:[#allocation53_spill] sm:$0xff] }
 0x77c   : > { %v5712_v45 = vpack.c.bf16 %v4105_v3, %v4103_v20  ;;  %v3724_v3 = vadd.f32 %v7926_v7, %v7972_v17  ;;  %v3740_v26 = vadd.f32 %v7962_v61, %v3390_v42  ;;  %v8311_v61 = vld [vmem:[#allocation42_spill] sm:$0xff] }
 0x77d   : > { %v3867_v11 = vmax.f32 %v3704_v21, 0.0 }
 0x77e   : > { %5697 = vmatpush1.bf16.msra.mxu0 %v5696_v60  ;;  %v4109_v60 = vld [vmem:[#allocation5 + $0x5b0] sm:$0xff]  ;;  %v3892_v47 = vmax.f32 %v3724_v3, 0.0 }
 0x77f   : > { %5699 = vmatprep.subr.bf16.mxu0 %v5698_v36  ;;  %v4112_v36 = vld [vmem:[#allocation5 + $0x5c8] sm:$0xff]  ;;  %v5716_v54 = vpack.c.bf16 %v4109_v60, %v4107_v38  ;;  %v8324_v38 = vld [vmem:[#allocation56_spill] sm:$0xff] }
 0x780   : > { %v5718_v12 = vpack.c.bf16 %v4114_v8, %v4112_v36  ;;  %v3878_v60 = vmax.f32 %v8324_v38, 0.0  ;;  %v8325_v36 = vld [vmem:[#allocation55_spill] sm:$0xff] }
 0x781   : > { %v3877_v8 = vmax.f32 %v8325_v36, 0.0 }
 0x782   : > { %5701 = vmatpush1.bf16.msra.mxu0 %v5700_v13  ;;  %v4111_v13 = vld [vmem:[#allocation5 + $0x5c0] sm:$0xff] }
 0x783   : > { %5703 = vmatprep.subr.bf16.mxu0 %v5702_v23  ;;  %v4113_v23 = vld [vmem:[#allocation5 + $0x5d0] sm:$0xff] }
 0x784   : > { %v5720_v10 = vpack.c.bf16 %v4113_v23, %v4111_v13  ;;  %v8328_v23 = vld [vmem:[#allocation60_spill] sm:$0xff] }
 0x786   : > { %5705 = vmatpush1.bf16.msra.mxu0 %v5704_v40  ;;  %v5722_v40 = vpack.c.bf16 %v4118_v44, %v4116_v50  ;;  %v3894_v50 = vmax.f32 %v8328_v23, 0.0  ;;  %v8329_v44 = vld [vmem:[#allocation59_spill] sm:$0xff] }
 0x787   : > { %5707 = vmatprep.subr.bf16.mxu0 %v5706_v35  ;;  %v4115_v35 = vld [vmem:[#allocation5 + $0x5e0] sm:$0xff] }
 0x788   : > { %v5724_v18 = vpack.c.bf16 %v4117_v56, %v4115_v35  ;;  %v8332_v35 = vld [vmem:[#allocation61_spill] sm:$0xff] }
 0x789   : > { %v3901_v56 = vmax.f32 %v8332_v35, 0.0 }
 0x78a   : > { %5709 = vmatpush1.bf16.msra.mxu0 %v5708_v2  ;;  %v3710_v2 = vadd.f32 %v7891_v41, %v3390_v42  ;;  %v3722_v41 = vadd.f32 %v7919_v27, %v3390_v42  ;;  %v3734_v27 = vadd.f32 %v7947_v5, %v3390_v42  ;;  %v3746_v5 = vadd.f32 %v7975_v30, %v3390_v42  ;;  %v8317_v30 = vld [vmem:[#allocation48_spill] sm:$0xff]  ;;  %v8330_v42 = vld [vmem:[#allocation62_spill] sm:$0xff] }
 0x78b   : > { %5711 = vmatprep.subr.bf16.mxu0 %v5710_v46  ;;  %v3876_v46 = vmax.f32 %v3712_v14, 0.0  ;;  %v8334_v14 = vld [vmem:[#allocation63_spill] sm:$0xff] }
 0x78c   : > { %v3875_v20 = vmax.f32 %v3710_v2, 0.0 }
 0x78e   : > { %5713 = vmatpush1.bf16.msra.mxu0 %v5712_v45  ;;  %v8323_v45 = vld [vmem:[#allocation54_spill] sm:$0xff] }
 0x78f   : > { %5715 = vmatprep.subr.bf16.mxu0 %v5714_v52  ;;  %v3869_v52 = vmax.f32 %v8323_v45, 0.0 }
 0x792   : > { %5717 = vmatpush1.bf16.msra.mxu0 %v5716_v54  ;;  %v8326_v54 = vld [vmem:[#allocation58_spill] sm:$0xff] }
 0x793   : > { %5719 = vmatprep.subr.bf16.mxu0 %v5718_v12  ;;  %v3886_v51 = vmax.f32 %v8326_v54, 0.0  ;;  %v8327_v12 = vld [vmem:[#allocation57_spill] sm:$0xff] }
 0x794   : > { %v3885_v13 = vmax.f32 %v8327_v12, 0.0 }
 0x796   : > { %5721 = vmatpush1.bf16.msra.mxu0 %v5720_v10  ;;  %v3893_v10 = vmax.f32 %v8329_v44, 0.0 }
 0x797   : > { %5723 = vmatprep.subr.bf16.mxu0 %v5722_v40  ;;  %v3902_v40 = vmax.f32 %v8330_v42, 0.0 }
 0x79a   : > { %5725 = vmatpush1.bf16.msra.mxu0 %v5724_v18  ;;  %v8333_v18 = vld [vmem:[#allocation64_spill] sm:$0xff] }
 0x79b   : > { %5727 = vmatprep.subr.bf16.mxu0 %v7702_v49  ;;  %v3883_v49 = vmax.f32 %v3716_v0, 0.0  ;;  %v3910_v21 = vmax.f32 %v8333_v18, 0.0  ;;  %v4183_v0 = vld [vmem:[%s8335_s26] sm:$0x3]  ;;  %s6182_s26 = sshll.u32 %s6290_s21, 4  ;;  %s6183_s26 = int_to_ptr.vmem [resolvable:$false] %s6182_s26 }
 0x79c   : > { %s6184_s25 = scalar_lea.vmem %s6183_s26, 4096  ;;  %p6185_p5 = scmp.lt.s32.totalorder %s8120_s29, %s6183_s26 }
 0x79d   : > { %4486 = vmatmul.mubr.f32.vlgmr.msra.gmra.mrb[48].mxu0 %v3867_v11  ;;  %v3909_v11 = vmax.f32 %v8334_v14, 0.0  ;;  %p6186_p6 = scmp.lt.s32.totalorder %s6184_s25, %s6178_s13 }
 0x79e   : > { %4491 = vmatprep.mubr.f32.mxu0 %v3876_v46  ;;  %5729 = vmatpush1.bf16.msra.mxu0 %v7704_v59  ;;  %v3730_v59 = vadd.f32 %v7940_v22, %v7972_v17 }
 0x79f   : > { %5731 = vmatprep.subr.bf16.mxu0 %v7708_v31  ;;  %v3891_v31 = vmax.f32 %v3722_v41, 0.0  ;;  %p6187_p7 = por %p6186_p6, %p6185_p5 }
 0x7a0   : > { %v3900_v7 = vmax.f32 %v3730_v59, 0.0 }
 0x7a1   : > { %4492 = vmatmul.mubr.f32.gmra.mrb[50].mxu0 %v3875_v20  ;;  %p6188_p9 = pnand %p6187_p7, %p6181_p4 }
 0x7a2   : > { %4497 = vmatprep.mubr.f32.mxu0 %v3884_v1  ;;  %5733 = vmatpush1.bf16.msra.mxu0 %v7710_v6  ;;  %v3736_v6 = vadd.f32 %v7954_v16, %v7972_v17  ;;  %v8336_v1 = vld [vmem:[#allocation22_spill] sm:$0xff] }
 0x7a3   : > { %5735 = vmatprep.subr.bf16.mxu0 %v7714_v57  ;;  %v3899_v57 = vmax.f32 %v3728_v58, 0.0  ;;  %v8057_v3 = vrot.slane %v4183_v0, %v8336_v1 }
 0x7a4   : > { %v3908_v22 = vmax.f32 %v3736_v6, 0.0 }
 0x7a5   : > { %4498 = vmatmul.mubr.f32.gmra.mrb[52].mxu0 %v3883_v49  ;;  %v8337_v49 = vld [vmem:[#allocation23_spill] sm:$0xff] }
 0x7a6   : > { %4503 = vmatprep.mubr.f32.mxu0 %v3892_v47  ;;  %5737 = vmatpush1.bf16.msra.mxu0 %v7716_v63  ;;  %v3742_v63 = vadd.f32 %v7967_v53, %v7972_v17  ;;  %v8061_v41 = vrot.slane %v4183_v0, %v8337_v49 }
 0x7a7   : > { %5739 = vmatprep.subr.bf16.mxu0 %v7720_v43  ;;  %v3907_v43 = vmax.f32 %v3734_v27, 0.0  ;;  %v8338_v27 = vld [vmem:[#allocation36_spill] sm:$0xff] }
 0x7a8   : > { %v3916_v16 = vmax.f32 %v3742_v63, 0.0 }
 0x7a9   : > { %4504 = vmatmul.mubr.f32.gmra.mrb[54].mxu0 %v3891_v31 }
 0x7aa   : > { %4509 = vmatprep.mubr.f32.mxu0 %v3900_v7  ;;  %5741 = vmatpush1.bf16.msra.mxu0 %v7722_v34  ;;  %v3748_v34 = vadd.f32 %v7980_v15, %v7972_v17  ;;  %v8313_v17 = vld [vmem:[#allocation44_spill] sm:$0xff]  ;;  %v8320_v15 = vld [vmem:[#allocation51_spill] sm:$0xff] }
 0x7ab   : > { %5743 = vmatprep.subr.bf16.mxu0 %v7726_v19  ;;  %v3915_v19 = vmax.f32 %v3740_v26, 0.0  ;;  %v8339_v26 = vld [vmem:[#allocation37_spill] sm:$0xff] }
 0x7ac   : > { %v3924_v53 = vmax.f32 %v3748_v34, 0.0 }
 0x7ad   : > { %4510 = vmatmul.mubr.f32.gmra.mrb[56].mxu0 %v3899_v57 }
 0x7ae   : > { %4515 = vmatprep.mubr.f32.mxu0 %v3908_v22  ;;  %5745 = vmatpush1.bf16.msra.mxu0 %v7728_v39  ;;  %v3923_v39 = vmax.f32 %v3746_v5, 0.0 }
 0x7af   : > { %5747 = vmatprep.subr.bf16.mxu0 %v7732_v62  ;;  %v3870_v62 = vmax.f32 %v7889_v33, 0.0  ;;  %v8315_v33 = vld [vmem:[#allocation46_spill] sm:$0xff] }
 0x7b1   : > { %4516 = vmatmul.mubr.f32.gmra.mrb[58].mxu0 %v3907_v43 }
 0x7b2   : > { %4521 = vmatprep.mubr.f32.mxu0 %v3916_v16  ;;  %5749 = vmatpush1.bf16.msra.mxu0 %v7734_v9  ;;  %v8309_v9 = vld [vmem:[#allocation40_spill] sm:$0xff] }
 0x7b3   : > { %5751 = vmatprep.subr.bf16.mxu0 %v7738_v25  ;;  %v8310_v25 = vld [vmem:[#allocation41_spill] sm:$0xff] }
 0x7b5   : > { %4522 = vmatmul.mubr.f32.gmra.mrb[60].mxu0 %v3915_v19 }
 0x7b6   : > { %4527 = vmatprep.mubr.f32.mxu0 %v3924_v53  ;;  %5753 = vmatpush1.bf16.msra.mxu0 %v7740_v28  ;;  %v8312_v28 = vld [vmem:[#allocation43_spill] sm:$0xff]  ;;  %v8340_v53 = vld [vmem:[#allocation38_spill] sm:$0xff] }
 0x7b7   : > { %5755 = vmatprep.subr.bf16.mxu0 %v7744_v55  ;;  %v8314_v55 = vld [vmem:[#allocation45_spill] sm:$0xff] }
 0x7b9   : > { %4528 = vmatmul.mubr.f32.gmra.mrb[62].mxu0 %v3923_v39 }
 0x7ba   : > { %5757 = vmatpush1.bf16.msra.mxu0 %v7746_v24  ;;  %4598 = vmatprep.mubr.f32.mxu0 %v3870_v62  ;;  %v8316_v24 = vld [vmem:[#allocation47_spill] sm:$0xff] }
 0x7bb   : > { %5759 = vmatprep.subr.bf16.mxu0 %v7750_v4  ;;  %v8318_v4 = vld [vmem:[#allocation49_spill] sm:$0xff]  ;;  %v8341_v62 = vld [vmem:[#allocation39_spill] sm:$0xff] }
 0x7be   : > { %5761 = vmatpush1.bf16.msra.mxu0 %v7752_v29  ;;  %v8319_v29 = vld [vmem:[#allocation50_spill] sm:$0xff] }
 0x7bf   : > { %5763 = vmatprep.subr.bf16.mxu0 %v8309_v9 }
 0x7c2   : > { %5765 = vmatpush1.bf16.msra.mxu0 %v8310_v25 }
 0x7c3   : > { %5767 = vmatprep.subr.bf16.mxu0 %v8311_v61 }
 0x7c6   : > { %5769 = vmatpush1.bf16.msra.mxu0 %v8312_v28 }
 0x7c7   : > { %5771 = vmatprep.subr.bf16.mxu0 %v8313_v17 }
 0x7ca   : > { %5773 = vmatpush1.bf16.msra.mxu0 %v8314_v55  ;;  %v8342_v55 = vld [vmem:[#allocation24_spill] sm:$0xff] }
 0x7cb   : > { %5775 = vmatprep.subr.bf16.mxu0 %v8315_v33 }
 0x7ce   : > { %5777 = vmatpush1.bf16.msra.mxu0 %v8316_v24  ;;  %v8343_v24 = vld [vmem:[#allocation25_spill] sm:$0xff] }
 0x7cf   : > { %5779 = vmatprep.subr.bf16.mxu0 %v8317_v30 }
 0x7d2   : > { %5781 = vmatpush1.bf16.msra.mxu0 %v8318_v4 }
 0x7d3   : > { %5783 = vmatprep.subr.bf16.mxu0 %v8319_v29 }
 0x7d6   : > { %5785 = vmatpush1.bf16.msra.mxu0 %v8320_v15 }
 0x7d7   : > { %5787 = vmatprep.subr.bf16.mxu0 %v8321_v37 }
 0x7da   : > { %5789 = vmatpush1.bf16.msra.mxu0 %v8322_v48  ;;  %v8344_v48 = vld [vmem:[#allocation26_spill] sm:$0xff] }
 0x7dd   : > { %4599 = vmatmul.mubr.f32.vlgmr.msra.gmra.mrb[48].mxu0 %v3869_v52  ;;  %v8345_v52 = vld [vmem:[#allocation27_spill] sm:$0xff] }
 0x7de   : > { %4604 = vmatprep.mubr.f32.mxu0 %v3878_v60 }
 0x7e1   : > { %4605 = vmatmul.mubr.f32.gmra.mrb[50].mxu0 %v3877_v8 }
 0x7e2   : > { %4610 = vmatprep.mubr.f32.mxu0 %v3886_v51  ;;  %v8346_v51 = vld [vmem:[#allocation28_spill] sm:$0xff] }
 0x7e5   : > { %4611 = vmatmul.mubr.f32.gmra.mrb[52].mxu0 %v3885_v13  ;;  %v8347_v13 = vld [vmem:[#allocation29_spill] sm:$0xff] }
 0x7e6   : > { %4616 = vmatprep.mubr.f32.mxu0 %v3894_v50 }
 0x7e9   : > { %4617 = vmatmul.mubr.f32.gmra.mrb[54].mxu0 %v3893_v10 }
 0x7ea   : > { %4622 = vmatprep.mubr.f32.mxu0 %v3902_v40  ;;  %v8348_v40 = vld [vmem:[#allocation30_spill] sm:$0xff] }
 0x7ed   : > { %4623 = vmatmul.mubr.f32.gmra.mrb[56].mxu0 %v3901_v56  ;;  %v8349_v56 = vld [vmem:[#allocation31_spill] sm:$0xff] }
 0x7ee   : > { %4628 = vmatprep.mubr.f32.mxu0 %v3910_v21 }
 0x7f1   : > { %4629 = vmatmul.mubr.f32.gmra.mrb[58].mxu0 %v3909_v11 }
 0x848   : > { %v4636_v2 = vpop.f32.mrb[80].mxu1 }
 0x849   : > { %v4638_v46 = vpop.f32.mrb[81].mxu1 }
 0x84c   : > { %v4642_v32 = vpop.f32.mrb[82].mxu1 }
 0x84d   : > { %v4644_v20 = vpop.f32.mrb[83].mxu1 }
 0x888   : > { %v4523_v47 = vpop.f32.mrb[60].mxu0 }
 0x889   : > { %v5834_v59 = vadd.f32 %v4523_v47, %v8057_v3  ;;  %v4525_v31 = vpop.f32.mrb[61].mxu0 }
 0x88a   : > { %v5836_v58 = vadd.f32 %v4525_v31, %v8061_v41  ;;  %v8353_v31 = vld [vmem:[#allocation34_spill] sm:$0xff] }
 0x88b   : > { %v5835_v7 = vadd.f32 %v5834_v59, %v4636_v2 }
 0x88c   : > { %v5837_v6 = vadd.f32 %v5836_v58, %v4638_v46  ;;  %v4529_v57 = vpop.f32.mrb[62].mxu0  ;;  %v8350_v46 = vld [vmem:[#allocation32_spill] sm:$0xff] }
 0x88d   : > { %v4659_v22 = vadd.f32 %v5835_v7, %v8338_v27  ;;  %v5838_v63 = vadd.f32 %v4529_v57, %v8057_v3  ;;  %v4531_v43 = vpop.f32.mrb[63].mxu0  ;;  %v8356_v7 = vld [vmem:[#allocation35_spill] sm:$0xff] }
 0x88e   : > { %v4660_v16 = vadd.f32 %v5837_v6, %v8339_v26  ;;  %v5840_v34 = vadd.f32 %v4531_v43, %v8061_v41 }
 0x88f   : > { %4675 = vst [vmem:[%s8071_s23 + $0x60] sm:$0xff] %v4659_v22  ;;  %v5839_v19 = vadd.f32 %v5838_v63, %v4642_v32 }
 0x890   : > { %4676 = vst [vmem:[%s8071_s23 + $0x68] sm:$0xff] %v4660_v16  ;;  %v5841_v5 = vadd.f32 %v5840_v34, %v4644_v20  ;;  %v8351_v20 = vld [vmem:[#allocation33_spill] sm:$0xff] }
 0x891   : > { %v4661_v39 = vadd.f32 %v5839_v19, %v8340_v53 }
 0x892   : > { %v4662_v9 = vadd.f32 %v5841_v5, %v8341_v62 }
 0x893   : > { %4677 = vst [vmem:[%s8071_s23 + $0x70] sm:$0xff] %v4661_v39 }
 0x894   : > { %4678 = vst [vmem:[%s8071_s23 + $0x78] sm:$0xff] %v4662_v9 }
 0x8b0   : > { %v4600_v25 = vpop.f32.mrb[48].mxu0 }
 0x8b1   : > { %v5822_v61 = vadd.f32 %v4600_v25, %v8057_v3  ;;  %v4602_v28 = vpop.f32.mrb[49].mxu0 }
 0x8b2   : > { %v5823_v17 = vadd.f32 %v4602_v28, %v8061_v41 }
 0x8b3   : > { %v4647_v33 = vadd.f32 %v5822_v61, %v8342_v55 }
 0x8b4   : > { %v4648_v30 = vadd.f32 %v5823_v17, %v8343_v24  ;;  %v4606_v4 = vpop.f32.mrb[50].mxu0 }
 0x8b5   : > { %4663 = vst [vmem:[%s8071_s23] sm:$0xff] %v4647_v33  ;;  %v5824_v29 = vadd.f32 %v4606_v4, %v8057_v3  ;;  %v4608_v15 = vpop.f32.mrb[51].mxu0 }
 0x8b6   : > { %4664 = vst [vmem:[%s8071_s23 + $0x8] sm:$0xff] %v4648_v30  ;;  %v5825_v37 = vadd.f32 %v4608_v15, %v8061_v41 }
 0x8b7   : > { %v4649_v45 = vadd.f32 %v5824_v29, %v8344_v48 }
 0x8b8   : > { %v4650_v38 = vadd.f32 %v5825_v37, %v8345_v52  ;;  %v4612_v60 = vpop.f32.mrb[52].mxu0 }
 0x8b9   : > { %4665 = vst [vmem:[%s8071_s23 + $0x10] sm:$0xff] %v4649_v45  ;;  %v5826_v36 = vadd.f32 %v4612_v60, %v8057_v3  ;;  %v4614_v8 = vpop.f32.mrb[53].mxu0 }
 0x8ba   : > { %4666 = vst [vmem:[%s8071_s23 + $0x18] sm:$0xff] %v4650_v38  ;;  %v5827_v54 = vadd.f32 %v4614_v8, %v8061_v41 }
 0x8bb   : > { %v4651_v12 = vadd.f32 %v5826_v36, %v8346_v51 }
 0x8bc   : > { %v4652_v23 = vadd.f32 %v5827_v54, %v8347_v13  ;;  %v4618_v50 = vpop.f32.mrb[54].mxu0 }
 0x8bd   : > { %4667 = vst [vmem:[%s8071_s23 + $0x20] sm:$0xff] %v4651_v12  ;;  %v5828_v44 = vadd.f32 %v4618_v50, %v8057_v3  ;;  %v4620_v10 = vpop.f32.mrb[55].mxu0 }
 0x8be   : > { %4668 = vst [vmem:[%s8071_s23 + $0x28] sm:$0xff] %v4652_v23  ;;  %v5829_v42 = vadd.f32 %v4620_v10, %v8061_v41 }
 0x8bf   : > { %v4653_v35 = vadd.f32 %v5828_v44, %v8348_v40 }
 0x8c0   : > { %v4654_v18 = vadd.f32 %v5829_v42, %v8349_v56  ;;  %v4624_v21 = vpop.f32.mrb[56].mxu0 }
 0x8c1   : > { %4669 = vst [vmem:[%s8071_s23 + $0x30] sm:$0xff] %v4653_v35  ;;  %v5830_v14 = vadd.f32 %v4624_v21, %v8057_v3  ;;  %v4626_v11 = vpop.f32.mrb[57].mxu0 }
 0x8c2   : > { %4670 = vst [vmem:[%s8071_s23 + $0x38] sm:$0xff] %v4654_v18  ;;  %v5831_v2 = vadd.f32 %v4626_v11, %v8061_v41 }
 0x8c3   : > { %v4655_v32 = vadd.f32 %v5830_v14, %v8350_v46 }
 0x8c4   : > { %v4656_v0 = vadd.f32 %v5831_v2, %v8351_v20  ;;  %v4630_v1 = vpop.f32.mrb[58].mxu0 }
 0x8c5   : > { %4671 = vst [vmem:[%s8071_s23 + $0x40] sm:$0xff] %v4655_v32  ;;  %v5832_v49 = vadd.f32 %v4630_v1, %v8057_v3  ;;  %v4632_v47 = vpop.f32.mrb[59].mxu0 }
 0x8c6   : > { %4672 = vst [vmem:[%s8071_s23 + $0x48] sm:$0xff] %v4656_v0  ;;  %v5833_v59 = vadd.f32 %v4632_v47, %v8061_v41 }
 0x8c7   : > { %v4657_v58 = vadd.f32 %v5832_v49, %v8353_v31 }
 0x8c8   : > { %v4658_v6 = vadd.f32 %v5833_v59, %v8356_v7 }
 0x8c9   : > { %4673 = vst [vmem:[%s8071_s23 + $0x50] sm:$0xff] %v4657_v58 }
 0x8ca   : > { %4674 = vst [vmem:[%s8071_s23 + $0x58] sm:$0xff] %v4658_v6 }
 0x8cb   : > { %6191 = shalt.err (!%p6188_p9)
}
 0x8cc   : > { %s6192_s24 = scalar_lea.hbm %s8118_s20, 2048  ;;  %s6196_s22 = scalar_lea.hbm %s8355_s14, 8192 }
 0x8cd   : > { %p6193_p11 = scmp.ne.s32.totalorder %s8118_s20, %s6192_s24  ;;  %p6197_p8 = scmp.lt.u32.totalorder %s8118_s20, %s8355_s14 }
 0x8ce   : > { %p6198_p2 = scmp.lt.u32.totalorder %s6196_s22, %s6192_s24  ;;  %p6200_p10 = scmp.lt.u32.totalorder %s6192_s24, %s8118_s20 }
 0x8cf   : > { %p6194_p13 = pnand %p6193_p11, %p8357_p12 }
 0x8d0   : > { %p6199_p0 = por %p6198_p2, %p6197_p8 }
 0x8d1   : > { %p6195_p3 = pneg %p6194_p13 }
 0x8d2   : > { %p6201_p1 = por %p6200_p10, %p6199_p0 }
 0x8d4   : > { %p6202_p4 = pnand %p6201_p1, %p6195_p3 }
 0x8d6   : > { %6205 = shalt.err (!%p6202_p4)
}
 0x8d7   : > { %s6291_s16 = smov 256   ;;  %s6292_s27 = smov 16  }
 0x8d8   : > { %5942 = dma.vmem_to_hbm [thread:$0]  (%p8357_p12), %s8120_s29, 2048, %s8118_s20, %s8127_s19, %s6291_s16, %s6291_s16, %s6292_s27  }
 0x8d9 PF: > { %s8358_s11 = sld [smem:[#allocation16_spill]]  ;;  %s8359_s30 = sld [smem:[#allocation11_spill]] }
 0x8da   : > { %s8360_s13 = sld [smem:[#allocation20_spill]] }
 0x8df   : > { %p5959_p5 = scmp.ge.s32.totalorder %s8358_s11, 2  ;;  %s4711_s21 = sand.u32 1, %s8359_s30  }
 0x8e0   : > { %p8361_p6 = scmp.ne.s32.totalorder %s8360_s13, 0  ;;  %s4712_s26 = scalar_lea.sflag [#allocation4], %s4711_s21 }
 0x8e2   : > { %p5952_p7 = pnand %p5959_p5, %p8361_p6 }
 0x8e4   : > { %6247 = dma.done.wait (!%p5952_p7), %s4712_s26, 2048  }
 0x8e5   : > { %6249 = vsyncadd (!%p5952_p7), %s4712_s26, 4294965248  ;;  %s29_s20 = sadd.s32 1, %s8358_s11   ;;  %s8362_s29 = sld [smem:[#allocation12_spill]] }
 0x8e6   : > { %p26_p9 = scmp.ge.s32.totalorder %s29_s20, 6   ;;  %s8363_s30 = sld [smem:[#allocation13_spill]] }
 0x8e7   : > { %s8364_s15 = sld [smem:[#allocation21_spill]]  ;;  %s8365_s16 = sld [smem:[#allocation14_spill]] }
 0x8e8   : > { %s8366_s17 = sld [smem:[#allocation15_spill]]  ;;  %s8367_s18 = sld [smem:[#allocation17_spill]] }
 0x8e9   : > { %s8368_s19 = sld [smem:[#allocation19_spill]]  ;;  %28 = sbr.rel (!%p26_p9) target bundleno = 11 (0xb), region = 126 }
 0x8f0   :  { %4717 = vsyncpa [#allocation3], 1 }
 0x8f1   :  { %4719 = vsyncpa [#allocation3 + $0x1], 1 }
 0x8f2   :  { %4720 = vsyncpa [#allocation6], 1 }
 0x8f3   :  { %4721 = vsyncpa [#allocation4], 1 }
 0x8f4   :  { %4723 = vsyncpa [#allocation4 + $0x1], 1 }

</bundles_post_ra>
